<compile_context>
chip_gen: v7x
topology: tpu7x:2x2x1
jax: 0.10.0
libtpu: 0.0.40
codegen_flags: <defaults>
</compile_context>

<pallas_src>
import functools

import jax
import jax.numpy as jnp
from jax.experimental import pallas as pl
from jax.experimental.pallas import tpu as pltpu

GN_EPS = 1e-5      # torch.nn.GroupNorm default eps
_OFF = 128         # lane offset of the image inside the padded scratch


def _silu(x):
    return x * (1.0 / (1.0 + jnp.exp(-x)))


def _group_norm(x, gamma, beta, gmask_ref):
    """x: (C, HW); gamma/beta: (C, 1); gmask_ref: (G, C, 1) one-hot group masks.

    Two full-array reduction passes (sum, sum of squares); the per-group
    mean/var combine happens on (C, 1) columns only.  Affine is fused into a
    single x*scale + shift pass.
    """
    C, HW = x.shape
    G = gmask_ref.shape[0]
    inv_n = 1.0 / float((C // G) * HW)

    s1 = jnp.sum(x, axis=1, keepdims=True)          # (C, 1) per-channel sum
    s2 = jnp.sum(x * x, axis=1, keepdims=True)      # (C, 1) per-channel sum sq

    mean = jnp.zeros((C, 1), jnp.float32)
    ex2 = jnp.zeros((C, 1), jnp.float32)
    for g in range(G):
        m = gmask_ref[g]                                            # (C, 1)
        gs1 = jnp.sum(m * s1, axis=0, keepdims=True)                # (1, 1)
        gs2 = jnp.sum(m * s2, axis=0, keepdims=True)                # (1, 1)
        mean = mean + (gs1 * inv_n) * m
        ex2 = ex2 + (gs2 * inv_n) * m

    var = ex2 - mean * mean                                         # biased, like PyTorch
    inv = jax.lax.rsqrt(var + GN_EPS)
    scale = inv * gamma                                             # (C, 1)
    shift = beta - mean * scale                                     # (C, 1)
    return x * scale + shift


def _conv3x3(x, xp_ref, w_ref, wmask_ref, W):
    """3x3 conv, stride 1, padding 1, on the flattened (C, H*W) layout.

    x        : (Ci, HW) activation value
    xp_ref   : VMEM scratch (Cmax, 2*_OFF + HW); borders already zero
    w_ref    : (9*Ci, Co, 1); row (kh*3 + kw)*Ci + ci == torch_w[:, ci, kh, kw]
    wmask_ref: (2, 1, HW); [0] kills w==0 for the dw=-1 taps, [1] kills w==W-1
    returns  : (Co, HW)
    """
    Ci, HW = x.shape
    Co = w_ref.shape[1]

    # Aligned store of the image at lane offset _OFF; the zero border around it
    # provides the row (H-edge) padding for the flattened tap slices.
    xp_ref[0:Ci, _OFF:_OFF + HW] = x

    acc = jnp.zeros((Co, HW), jnp.float32)
    for kh in range(3):
        for kw in range(3):
            s = (kh - 1) * W + (kw - 1)
            tap = xp_ref[0:Ci, _OFF + s:_OFF + s + HW]              # (Ci, HW)
            if kw == 0:                                             # dw = -1
                tap = tap * wmask_ref[0]
            elif kw == 2:                                           # dw = +1
                tap = tap * wmask_ref[1]
            t = kh * 3 + kw
            for ci in range(Ci):
                wcol = w_ref[t * Ci + ci]                           # (Co, 1)
                acc = acc + wcol * tap[ci:ci + 1, :]                # (Co,1)*(1,HW)
    return acc


def rblock_kernel(img_ref, ts_ref,
                  gn1_g_ref, gn1_b_ref, gm1_ref,
                  w1_ref, b1_ref, tw_ref, tb_ref,
                  gn2_g_ref, gn2_b_ref, gm2_ref,
                  w2_ref, b2_ref, scw_ref, scb_ref, wmask_ref,
                  out_ref,
                  xp_ref,
                  *, W, use_shortcut):
    # Zero the padded scratch (4 vregs): the flattened H-edge taps then read
    # zeros from the border; per-step zeroing is safe under "parallel" splits.
    xp_ref[...] = jnp.zeros_like(xp_ref)

    img = img_ref[0]                                                # (Cin, HW)

    # GroupNorm1 + SiLU
    h = _silu(_group_norm(img, gn1_g_ref[...], gn1_b_ref[...], gm1_ref))

    # time embedding: Linear(T -> Cout) as a lane reduction -> (Cout, 1)
    t = jnp.sum(tw_ref[...] * ts_ref[0], axis=1, keepdims=True) + tb_ref[...]

    # Conv1 (3x3, pad 1) + bias + time broadcast
    fm = _conv3x3(h, xp_ref, w1_ref, wmask_ref, W) + (b1_ref[...] + t)

    # GroupNorm2 + SiLU
    fm = _silu(_group_norm(fm, gn2_g_ref[...], gn2_b_ref[...], gm2_ref))

    # Conv2 (3x3, pad 1) + bias
    fm = _conv3x3(fm, xp_ref, w2_ref, wmask_ref, W) + b2_ref[...]

    # Shortcut: 1x1 conv when in_channels != out_channels, else identity
    if use_shortcut:
        Cin = img.shape[0]
        sc = jnp.zeros(fm.shape, jnp.float32)
        for ci in range(Cin):
            sc = sc + scw_ref[ci] * img[ci:ci + 1, :]               # (Cout,1)*(1,HW)
        shortcut = sc + scb_ref[...]
    else:
        shortcut = img

    out_ref[0] = (shortcut + fm).astype(out_ref.dtype)


def rblock_pallas(image, ts, params, *, num_groups=4):
    B, Cin, H, W = image.shape
    Cout = params["w1"].shape[0]
    Tdim = params["tw"].shape[1]
    HW = H * W
    use_shortcut = (Cin != Cout)
    f32 = jnp.float32
    assert W + 1 <= _OFF, "pad region too small for this W"

    # --- glue: reshape parameters into broadcast-friendly kernel layouts ----
    def col(v, C):
        return v.reshape(C, 1).astype(f32)

    def conv_w(w):  # torch (Co, Ci, 3, 3) -> (9*Ci, Co, 1); row = (kh*3+kw)*Ci + ci
        Co, Ci = w.shape[0], w.shape[1]
        return jnp.transpose(w, (2, 3, 1, 0)).reshape(9 * Ci, Co)[:, :, None].astype(f32)

    def gmasks(C):  # (G, C, 1) one-hot channel masks per group
        cg = C // num_groups
        gid = jnp.arange(C, dtype=jnp.int32) // cg
        m = (gid[None, :] == jnp.arange(num_groups, dtype=jnp.int32)[:, None])
        return m.astype(f32)[:, :, None]

    # lane masks killing the column wrap of the dw = -1 / +1 taps
    wpos = jnp.arange(HW, dtype=jnp.int32) % W
    wmask = jnp.stack([(wpos != 0), (wpos != W - 1)]).astype(f32).reshape(2, 1, HW)

    gn1_g, gn1_b = col(params["gn1_g"], Cin), col(params["gn1_b"], Cin)
    gn2_g, gn2_b = col(params["gn2_g"], Cout), col(params["gn2_b"], Cout)
    w1, b1 = conv_w(params["w1"]), col(params["b1"], Cout)
    w2, b2 = conv_w(params["w2"]), col(params["b2"], Cout)
    tw, tb = params["tw"].astype(f32), col(params["tb"], Cout)
    if use_shortcut:
        scw = jnp.transpose(params["scw"].reshape(Cout, Cin), (1, 0))[:, :, None].astype(f32)
        scb = col(params["scb"], Cout)
    else:
        scw = jnp.zeros((Cin, Cout, 1), f32)                        # unused in kernel
        scb = jnp.zeros((Cout, 1), f32)
    gm1, gm2 = gmasks(Cin), gmasks(Cout)

    img_flat = image.reshape(B, Cin, HW).astype(f32)                # lane-dense
    ts3 = ts.reshape(B, 1, Tdim).astype(f32)

    operands = (img_flat, ts3, gn1_g, gn1_b, gm1, w1, b1, tw, tb,
                gn2_g, gn2_b, gm2, w2, b2, scw, scb, wmask)

    def full_spec(a):
        nd = a.ndim
        return pl.BlockSpec(a.shape, lambda b, _nd=nd: (0,) * _nd)

    in_specs = [pl.BlockSpec((1, Cin, HW), lambda b: (b, 0, 0)),
                pl.BlockSpec((1, 1, Tdim), lambda b: (b, 0, 0))]
    in_specs += [full_spec(a) for a in operands[2:]]

    kernel = functools.partial(rblock_kernel, W=W, use_shortcut=use_shortcut)
    out = pl.pallas_call(
        kernel,
        out_shape=jax.ShapeDtypeStruct((B, Cout, HW), f32),
        grid=(B,),
        in_specs=in_specs,
        out_specs=pl.BlockSpec((1, Cout, HW), lambda b: (b, 0, 0)),
        scratch_shapes=[pltpu.VMEM((max(Cin, Cout), HW + 2 * _OFF), f32)],
        compiler_params=pltpu.CompilerParams(
            dimension_semantics=("parallel",)),
    )(*operands)
    return out.reshape(B, Cout, H, W)


# ------------------------- pure-JAX reference ------------------------------
def rblock_reference(image, ts, params, *, num_groups=4):
    hp = jax.lax.Precision.HIGHEST

    def gn(x, g, b):
        B, C, H, W = x.shape
        xg = x.reshape(B, num_groups, C // num_groups, H, W)
        m = jnp.mean(xg, axis=(2, 3, 4), keepdims=True)
        v = jnp.mean((xg - m) ** 2, axis=(2, 3, 4), keepdims=True)
        xn = ((xg - m) * jax.lax.rsqrt(v + GN_EPS)).reshape(B, C, H, W)
        return xn * g.reshape(1, C, 1, 1) + b.reshape(1, C, 1, 1)

    def conv(x, w, b, pad):
        y = jax.lax.conv_general_dilated(
            x, w, window_strides=(1, 1), padding=[(pad, pad), (pad, pad)],
            dimension_numbers=("NCHW", "OIHW", "NCHW"), precision=hp)
        return y + b.reshape(1, -1, 1, 1)

    Cin, Cout = image.shape[1], params["w1"].shape[0]
    h = _silu(gn(image, params["gn1_g"], params["gn1_b"]))
    h = conv(h, params["w1"], params["b1"], 1)
    t = jnp.einsum("bt,ot->bo", ts, params["tw"], precision=hp) + params["tb"]
    h = h + t[:, :, None, None]
    h = _silu(gn(h, params["gn2_g"], params["gn2_b"]))
    h = conv(h, params["w2"], params["b2"], 1)
    if Cin != Cout:
        image = conv(image, params["scw"], params["scb"], 0)
    return image + h


if __name__ == "__main__":
    B, Cin, Cout, H, W, Tdim, G = 2, 4, 8, 16, 16, 32, 4

    key = jax.random.PRNGKey(0)
    ks = jax.random.split(key, 14)

    def n(k, shp, s=0.2):
        return (s * jax.random.normal(k, shp)).astype(jnp.float32)

    # deterministic synthetic parameters (shapes follow RBlock.__init__)
    params = {
        "gn1_g": 1.0 + n(ks[0], (Cin,), 0.1),
        "gn1_b": n(ks[1], (Cin,), 0.1),
        "w1":   n(ks[2], (Cout, Cin, 3, 3)),
        "b1":   n(ks[3], (Cout,), 0.1),
        "tw":   n(ks[4], (Cout, Tdim)),          # nn.Linear weight (out, in)
        "tb":   n(ks[5], (Cout,), 0.1),
        "gn2_g": 1.0 + n(ks[6], (Cout,), 0.1),
        "gn2_b": n(ks[7], (Cout,), 0.1),
        "w2":   n(ks[8], (Cout, Cout, 3, 3)),
        "b2":   n(ks[9], (Cout,), 0.1),
        "scw":  n(ks[10], (Cout, Cin, 1, 1)),    # 1x1 shortcut conv
        "scb":  n(ks[11], (Cout,), 0.1),
    }

    image = n(ks[12], (B, Cin, H, W), 1.0)
    ts = n(ks[13], (B, Tdim), 1.0)

    out = rblock_pallas(image, ts, params, num_groups=G)
    out = jax.block_until_ready(out)

    ref = rblock_reference(image, ts, params, num_groups=G)
    assert out.shape == (B, Cout, H, W) and out.dtype == jnp.float32
    err = float(jnp.max(jnp.abs(out - ref)))
    if err > 1e-3:
        raise AssertionError(f"Pallas RBlock mismatch vs reference: max |err| = {err}")
    print("KERNEL_OK")
</pallas_src>

<mosaic_0001>
module attributes {stable_mosaic.version = 11 : i64} {
  func.func @rblock_kernel(%arg0: i32, %arg1: memref<1x4x256xf32, #tpu.memory_space<vmem>>, %arg2: memref<1x1x32xf32, #tpu.memory_space<vmem>>, %arg3: memref<4x1xf32, #tpu.memory_space<vmem>>, %arg4: memref<4x1xf32, #tpu.memory_space<vmem>>, %arg5: memref<4x4x1xf32, #tpu.memory_space<vmem>>, %arg6: memref<36x8x1xf32, #tpu.memory_space<vmem>>, %arg7: memref<8x1xf32, #tpu.memory_space<vmem>>, %arg8: memref<8x32xf32, #tpu.memory_space<vmem>>, %arg9: memref<8x1xf32, #tpu.memory_space<vmem>>, %arg10: memref<8x1xf32, #tpu.memory_space<vmem>>, %arg11: memref<8x1xf32, #tpu.memory_space<vmem>>, %arg12: memref<4x8x1xf32, #tpu.memory_space<vmem>>, %arg13: memref<72x8x1xf32, #tpu.memory_space<vmem>>, %arg14: memref<8x1xf32, #tpu.memory_space<vmem>>, %arg15: memref<4x8x1xf32, #tpu.memory_space<vmem>>, %arg16: memref<8x1xf32, #tpu.memory_space<vmem>>, %arg17: memref<2x1x256xf32, #tpu.memory_space<vmem>>, %arg18: memref<1x8x256xf32, #tpu.memory_space<vmem>>, %arg19: memref<8x512xf32, #tpu.memory_space<vmem>>) attributes {dimension_semantics = [#tpu.dimension_semantics<parallel>], iteration_bounds = array<i64: 2>, scalar_prefetch = 0 : i64, scratch_operands = 1 : i64, tpu.core_type = #tpu.core_type<tc>, window_params = [{transform_indices = @transform_0, window_bounds = array<i64: 1, 4, 256>}, {transform_indices = @transform_1, window_bounds = array<i64: 1, 1, 32>}, {pipeline_mode = #tpu.pipeline_mode<synchronous>, transform_indices = @transform_2, window_bounds = array<i64: 4, 1>}, {pipeline_mode = #tpu.pipeline_mode<synchronous>, transform_indices = @transform_3, window_bounds = array<i64: 4, 1>}, {pipeline_mode = #tpu.pipeline_mode<synchronous>, transform_indices = @transform_4, window_bounds = array<i64: 4, 4, 1>}, {pipeline_mode = #tpu.pipeline_mode<synchronous>, transform_indices = @transform_5, window_bounds = array<i64: 36, 8, 1>}, {pipeline_mode = #tpu.pipeline_mode<synchronous>, transform_indices = @transform_6, window_bounds = array<i64: 8, 1>}, {pipeline_mode = #tpu.pipeline_mode<synchronous>, transform_indices = @transform_7, window_bounds = array<i64: 8, 32>}, {pipeline_mode = #tpu.pipeline_mode<synchronous>, transform_indices = @transform_8, window_bounds = array<i64: 8, 1>}, {pipeline_mode = #tpu.pipeline_mode<synchronous>, transform_indices = @transform_9, window_bounds = array<i64: 8, 1>}, {pipeline_mode = #tpu.pipeline_mode<synchronous>, transform_indices = @transform_10, window_bounds = array<i64: 8, 1>}, {pipeline_mode = #tpu.pipeline_mode<synchronous>, transform_indices = @transform_11, window_bounds = array<i64: 4, 8, 1>}, {pipeline_mode = #tpu.pipeline_mode<synchronous>, transform_indices = @transform_12, window_bounds = array<i64: 72, 8, 1>}, {pipeline_mode = #tpu.pipeline_mode<synchronous>, transform_indices = @transform_13, window_bounds = array<i64: 8, 1>}, {pipeline_mode = #tpu.pipeline_mode<synchronous>, transform_indices = @transform_14, window_bounds = array<i64: 4, 8, 1>}, {pipeline_mode = #tpu.pipeline_mode<synchronous>, transform_indices = @transform_15, window_bounds = array<i64: 8, 1>}, {pipeline_mode = #tpu.pipeline_mode<synchronous>, transform_indices = @transform_16, window_bounds = array<i64: 2, 1, 256>}, {transform_indices = @transform_17, window_bounds = array<i64: 1, 8, 256>}]} {
    %cst = arith.constant 0.000000e+00 : f32
    %0 = vector.broadcast %cst : f32 to vector<8x512xf32>
    %c0 = arith.constant 0 : index
    %c0_0 = arith.constant 0 : index
    %1 = vector.load %arg19[%c0, %c0_0] : memref<8x512xf32, #tpu.memory_space<vmem>>, vector<8x512xf32>
    tpu.vector_store %arg19[%c0, %c0_0], %0 {strides = array<i32>} : memref<8x512xf32, #tpu.memory_space<vmem>>, vector<8x512xf32>,
    %c0_1 = arith.constant 0 : index
    %c0_2 = arith.constant 0 : index
    %c0_3 = arith.constant 0 : index
    %2 = vector.load %arg1[%c0_1, %c0_2, %c0_3] : memref<1x4x256xf32, #tpu.memory_space<vmem>>, vector<1x4x256xf32>
    %3 = vector.shape_cast %2 : vector<1x4x256xf32> to vector<4x256xf32>
    %c0_4 = arith.constant 0 : index
    %c0_5 = arith.constant 0 : index
    %4 = vector.load %arg3[%c0_4, %c0_5] : memref<4x1xf32, #tpu.memory_space<vmem>>, vector<4x1xf32>
    %c0_6 = arith.constant 0 : index
    %c0_7 = arith.constant 0 : index
    %5 = vector.load %arg4[%c0_6, %c0_7] : memref<4x1xf32, #tpu.memory_space<vmem>>, vector<4x1xf32>
    %cst_8 = arith.constant dense<0.000000e+00> : vector<4xf32>
    %6 = vector.multi_reduction <add>, %3, %cst_8 [1] : vector<4x256xf32> to vector<4xf32>
    %7 = vector.shape_cast %6 : vector<4xf32> to vector<4x1xf32>
    %8 = arith.mulf %3, %3 : vector<4x256xf32>
    %cst_9 = arith.constant dense<0.000000e+00> : vector<4xf32>
    %9 = vector.multi_reduction <add>, %8, %cst_9 [1] : vector<4x256xf32> to vector<4xf32>
    %10 = vector.shape_cast %9 : vector<4xf32> to vector<4x1xf32>
    %cst_10 = arith.constant 0.000000e+00 : f32
    %11 = vector.broadcast %cst_10 : f32 to vector<4x1xf32>
    %cst_11 = arith.constant 0.000000e+00 : f32
    %12 = vector.broadcast %cst_11 : f32 to vector<4x1xf32>
    %c0_12 = arith.constant 0 : index
    %c0_13 = arith.constant 0 : index
    %c0_14 = arith.constant 0 : index
    %13 = vector.load %arg5[%c0_12, %c0_13, %c0_14] : memref<4x4x1xf32, #tpu.memory_space<vmem>>, vector<1x4x1xf32>
    %14 = vector.shape_cast %13 : vector<1x4x1xf32> to vector<4x1xf32>
    %15 = arith.mulf %14, %7 : vector<4x1xf32>
    %cst_15 = arith.constant dense<0.000000e+00> : vector<1xf32>
    %16 = vector.multi_reduction <add>, %15, %cst_15 [0] : vector<4x1xf32> to vector<1xf32>
    %17 = vector.shape_cast %16 : vector<1xf32> to vector<1x1xf32>
    %18 = arith.mulf %14, %10 : vector<4x1xf32>
    %cst_16 = arith.constant dense<0.000000e+00> : vector<1xf32>
    %19 = vector.multi_reduction <add>, %18, %cst_16 [0] : vector<4x1xf32> to vector<1xf32>
    %20 = vector.shape_cast %19 : vector<1xf32> to vector<1x1xf32>
    %cst_17 = arith.constant 3.906250e-03 : f32
    %21 = vector.broadcast %cst_17 : f32 to vector<1x1xf32>
    %22 = arith.mulf %17, %21 : vector<1x1xf32>
    %23 = vector.broadcast %22 : vector<1x1xf32> to vector<4x1xf32>
    %24 = arith.mulf %23, %14 : vector<4x1xf32>
    %25 = arith.addf %11, %24 : vector<4x1xf32>
    %cst_18 = arith.constant 3.906250e-03 : f32
    %26 = vector.broadcast %cst_18 : f32 to vector<1x1xf32>
    %27 = arith.mulf %20, %26 : vector<1x1xf32>
    %28 = vector.broadcast %27 : vector<1x1xf32> to vector<4x1xf32>
    %29 = arith.mulf %28, %14 : vector<4x1xf32>
    %30 = arith.addf %12, %29 : vector<4x1xf32>
    %c1 = arith.constant 1 : index
    %c0_19 = arith.constant 0 : index
    %c0_20 = arith.constant 0 : index
    %31 = vector.load %arg5[%c1, %c0_19, %c0_20] : memref<4x4x1xf32, #tpu.memory_space<vmem>>, vector<1x4x1xf32>
    %32 = vector.shape_cast %31 : vector<1x4x1xf32> to vector<4x1xf32>
    %33 = arith.mulf %32, %7 : vector<4x1xf32>
    %cst_21 = arith.constant dense<0.000000e+00> : vector<1xf32>
    %34 = vector.multi_reduction <add>, %33, %cst_21 [0] : vector<4x1xf32> to vector<1xf32>
    %35 = vector.shape_cast %34 : vector<1xf32> to vector<1x1xf32>
    %36 = arith.mulf %32, %10 : vector<4x1xf32>
    %cst_22 = arith.constant dense<0.000000e+00> : vector<1xf32>
    %37 = vector.multi_reduction <add>, %36, %cst_22 [0] : vector<4x1xf32> to vector<1xf32>
    %38 = vector.shape_cast %37 : vector<1xf32> to vector<1x1xf32>
    %cst_23 = arith.constant 3.906250e-03 : f32
    %39 = vector.broadcast %cst_23 : f32 to vector<1x1xf32>
    %40 = arith.mulf %35, %39 : vector<1x1xf32>
    %41 = vector.broadcast %40 : vector<1x1xf32> to vector<4x1xf32>
    %42 = arith.mulf %41, %32 : vector<4x1xf32>
    %43 = arith.addf %25, %42 : vector<4x1xf32>
    %cst_24 = arith.constant 3.906250e-03 : f32
    %44 = vector.broadcast %cst_24 : f32 to vector<1x1xf32>
    %45 = arith.mulf %38, %44 : vector<1x1xf32>
    %46 = vector.broadcast %45 : vector<1x1xf32> to vector<4x1xf32>
    %47 = arith.mulf %46, %32 : vector<4x1xf32>
    %48 = arith.addf %30, %47 : vector<4x1xf32>
    %c2 = arith.constant 2 : index
    %c0_25 = arith.constant 0 : index
    %c0_26 = arith.constant 0 : index
    %49 = vector.load %arg5[%c2, %c0_25, %c0_26] : memref<4x4x1xf32, #tpu.memory_space<vmem>>, vector<1x4x1xf32>
    %50 = vector.shape_cast %49 : vector<1x4x1xf32> to vector<4x1xf32>
    %51 = arith.mulf %50, %7 : vector<4x1xf32>
    %cst_27 = arith.constant dense<0.000000e+00> : vector<1xf32>
    %52 = vector.multi_reduction <add>, %51, %cst_27 [0] : vector<4x1xf32> to vector<1xf32>
    %53 = vector.shape_cast %52 : vector<1xf32> to vector<1x1xf32>
    %54 = arith.mulf %50, %10 : vector<4x1xf32>
    %cst_28 = arith.constant dense<0.000000e+00> : vector<1xf32>
    %55 = vector.multi_reduction <add>, %54, %cst_28 [0] : vector<4x1xf32> to vector<1xf32>
    %56 = vector.shape_cast %55 : vector<1xf32> to vector<1x1xf32>
    %cst_29 = arith.constant 3.906250e-03 : f32
    %57 = vector.broadcast %cst_29 : f32 to vector<1x1xf32>
    %58 = arith.mulf %53, %57 : vector<1x1xf32>
    %59 = vector.broadcast %58 : vector<1x1xf32> to vector<4x1xf32>
    %60 = arith.mulf %59, %50 : vector<4x1xf32>
    %61 = arith.addf %43, %60 : vector<4x1xf32>
    %cst_30 = arith.constant 3.906250e-03 : f32
    %62 = vector.broadcast %cst_30 : f32 to vector<1x1xf32>
    %63 = arith.mulf %56, %62 : vector<1x1xf32>
    %64 = vector.broadcast %63 : vector<1x1xf32> to vector<4x1xf32>
    %65 = arith.mulf %64, %50 : vector<4x1xf32>
    %66 = arith.addf %48, %65 : vector<4x1xf32>
    %c3 = arith.constant 3 : index
    %c0_31 = arith.constant 0 : index
    %c0_32 = arith.constant 0 : index
    %67 = vector.load %arg5[%c3, %c0_31, %c0_32] : memref<4x4x1xf32, #tpu.memory_space<vmem>>, vector<1x4x1xf32>
    %68 = vector.shape_cast %67 : vector<1x4x1xf32> to vector<4x1xf32>
    %69 = arith.mulf %68, %7 : vector<4x1xf32>
    %cst_33 = arith.constant dense<0.000000e+00> : vector<1xf32>
    %70 = vector.multi_reduction <add>, %69, %cst_33 [0] : vector<4x1xf32> to vector<1xf32>
    %71 = vector.shape_cast %70 : vector<1xf32> to vector<1x1xf32>
    %72 = arith.mulf %68, %10 : vector<4x1xf32>
    %cst_34 = arith.constant dense<0.000000e+00> : vector<1xf32>
    %73 = vector.multi_reduction <add>, %72, %cst_34 [0] : vector<4x1xf32> to vector<1xf32>
    %74 = vector.shape_cast %73 : vector<1xf32> to vector<1x1xf32>
    %cst_35 = arith.constant 3.906250e-03 : f32
    %75 = vector.broadcast %cst_35 : f32 to vector<1x1xf32>
    %76 = arith.mulf %71, %75 : vector<1x1xf32>
    %77 = vector.broadcast %76 : vector<1x1xf32> to vector<4x1xf32>
    %78 = arith.mulf %77, %68 : vector<4x1xf32>
    %79 = arith.addf %61, %78 : vector<4x1xf32>
    %cst_36 = arith.constant 3.906250e-03 : f32
    %80 = vector.broadcast %cst_36 : f32 to vector<1x1xf32>
    %81 = arith.mulf %74, %80 : vector<1x1xf32>
    %82 = vector.broadcast %81 : vector<1x1xf32> to vector<4x1xf32>
    %83 = arith.mulf %82, %68 : vector<4x1xf32>
    %84 = arith.addf %66, %83 : vector<4x1xf32>
    %85 = arith.mulf %79, %79 : vector<4x1xf32>
    %86 = arith.subf %84, %85 : vector<4x1xf32>
    %cst_37 = arith.constant 9.99999974E-6 : f32
    %87 = vector.broadcast %cst_37 : f32 to vector<4x1xf32>
    %88 = arith.addf %86, %87 : vector<4x1xf32>
    %89 = math.rsqrt %88 : vector<4x1xf32>
    %90 = arith.mulf %89, %4 : vector<4x1xf32>
    %91 = arith.mulf %79, %90 : vector<4x1xf32>
    %92 = arith.subf %5, %91 : vector<4x1xf32>
    %93 = vector.broadcast %90 : vector<4x1xf32> to vector<4x256xf32>
    %94 = arith.mulf %3, %93 : vector<4x256xf32>
    %95 = vector.broadcast %92 : vector<4x1xf32> to vector<4x256xf32>
    %96 = arith.addf %94, %95 : vector<4x256xf32>
    %cst_38 = arith.constant 0.000000e+00 : f32
    %97 = vector.broadcast %cst_38 : f32 to vector<4x256xf32>
    %98 = arith.subf %97, %96 : vector<4x256xf32>
    %99 = math.exp %98 : vector<4x256xf32>
    %cst_39 = arith.constant 1.000000e+00 : f32
    %100 = vector.broadcast %cst_39 : f32 to vector<4x256xf32>
    %101 = arith.addf %100, %99 : vector<4x256xf32>
    %cst_40 = arith.constant 1.000000e+00 : f32
    %102 = vector.broadcast %cst_40 : f32 to vector<4x256xf32>
    %103 = arith.divf %102, %101 : vector<4x256xf32>
    %104 = arith.mulf %96, %103 : vector<4x256xf32>
    %c0_41 = arith.constant 0 : index
    %c0_42 = arith.constant 0 : index
    %105 = vector.load %arg8[%c0_41, %c0_42] : memref<8x32xf32, #tpu.memory_space<vmem>>, vector<8x32xf32>
    %c0_43 = arith.constant 0 : index
    %c0_44 = arith.constant 0 : index
    %c0_45 = arith.constant 0 : index
    %106 = vector.load %arg2[%c0_43, %c0_44, %c0_45] : memref<1x1x32xf32, #tpu.memory_space<vmem>>, vector<1x1x32xf32>
    %107 = vector.shape_cast %106 : vector<1x1x32xf32> to vector<1x32xf32>
    %108 = vector.broadcast %107 : vector<1x32xf32> to vector<8x32xf32>
    %109 = arith.mulf %105, %108 : vector<8x32xf32>
    %cst_46 = arith.constant dense<0.000000e+00> : vector<8xf32>
    %110 = vector.multi_reduction <add>, %109, %cst_46 [1] : vector<8x32xf32> to vector<8xf32>
    %111 = vector.shape_cast %110 : vector<8xf32> to vector<8x1xf32>
    %c0_47 = arith.constant 0 : index
    %c0_48 = arith.constant 0 : index
    %112 = vector.load %arg9[%c0_47, %c0_48] : memref<8x1xf32, #tpu.memory_space<vmem>>, vector<8x1xf32>
    %113 = arith.addf %111, %112 : vector<8x1xf32>
    %c0_49 = arith.constant 0 : index
    %c128 = arith.constant 128 : index
    %114 = vector.load %arg19[%c0_49, %c128] : memref<8x512xf32, #tpu.memory_space<vmem>>, vector<4x256xf32>
    tpu.vector_store %arg19[%c0_49, %c128], %104 {strides = array<i32>} : memref<8x512xf32, #tpu.memory_space<vmem>>, vector<4x256xf32>,
    %cst_50 = arith.constant 0.000000e+00 : f32
    %115 = vector.broadcast %cst_50 : f32 to vector<8x256xf32>
    %c0_51 = arith.constant 0 : index
    %c111 = arith.constant 111 : index
    %116 = vector.load %arg19[%c0_51, %c111] : memref<8x512xf32, #tpu.memory_space<vmem>>, vector<4x256xf32>
    %c0_52 = arith.constant 0 : index
    %c0_53 = arith.constant 0 : index
    %c0_54 = arith.constant 0 : index
    %117 = vector.load %arg17[%c0_52, %c0_53, %c0_54] : memref<2x1x256xf32, #tpu.memory_space<vmem>>, vector<1x1x256xf32>
    %118 = vector.shape_cast %117 : vector<1x1x256xf32> to vector<1x256xf32>
    %119 = vector.broadcast %118 : vector<1x256xf32> to vector<4x256xf32>
    %120 = arith.mulf %116, %119 : vector<4x256xf32>
    %c0_55 = arith.constant 0 : index
    %c0_56 = arith.constant 0 : index
    %c0_57 = arith.constant 0 : index
    %121 = vector.load %arg6[%c0_55, %c0_56, %c0_57] : memref<36x8x1xf32, #tpu.memory_space<vmem>>, vector<1x8x1xf32>
    %122 = vector.shape_cast %121 : vector<1x8x1xf32> to vector<8x1xf32>
    %123 = vector.extract_strided_slice %120 {offsets = [0, 0], sizes = [1, 256], strides = [1, 1]} : vector<4x256xf32> to vector<1x256xf32>
    %124 = vector.broadcast %122 : vector<8x1xf32> to vector<8x256xf32>
    %125 = vector.broadcast %123 : vector<1x256xf32> to vector<8x256xf32>
    %126 = arith.mulf %124, %125 : vector<8x256xf32>
    %127 = arith.addf %115, %126 : vector<8x256xf32>
    %c1_58 = arith.constant 1 : index
    %c0_59 = arith.constant 0 : index
    %c0_60 = arith.constant 0 : index
    %128 = vector.load %arg6[%c1_58, %c0_59, %c0_60] : memref<36x8x1xf32, #tpu.memory_space<vmem>>, vector<1x8x1xf32>
    %129 = vector.shape_cast %128 : vector<1x8x1xf32> to vector<8x1xf32>
    %130 = vector.extract_strided_slice %120 {offsets = [1, 0], sizes = [1, 256], strides = [1, 1]} : vector<4x256xf32> to vector<1x256xf32>
    %131 = vector.broadcast %129 : vector<8x1xf32> to vector<8x256xf32>
    %132 = vector.broadcast %130 : vector<1x256xf32> to vector<8x256xf32>
    %133 = arith.mulf %131, %132 : vector<8x256xf32>
    %134 = arith.addf %127, %133 : vector<8x256xf32>
    %c2_61 = arith.constant 2 : index
    %c0_62 = arith.constant 0 : index
    %c0_63 = arith.constant 0 : index
    %135 = vector.load %arg6[%c2_61, %c0_62, %c0_63] : memref<36x8x1xf32, #tpu.memory_space<vmem>>, vector<1x8x1xf32>
    %136 = vector.shape_cast %135 : vector<1x8x1xf32> to vector<8x1xf32>
    %137 = vector.extract_strided_slice %120 {offsets = [2, 0], sizes = [1, 256], strides = [1, 1]} : vector<4x256xf32> to vector<1x256xf32>
    %138 = vector.broadcast %136 : vector<8x1xf32> to vector<8x256xf32>
    %139 = vector.broadcast %137 : vector<1x256xf32> to vector<8x256xf32>
    %140 = arith.mulf %138, %139 : vector<8x256xf32>
    %141 = arith.addf %134, %140 : vector<8x256xf32>
    %c3_64 = arith.constant 3 : index
    %c0_65 = arith.constant 0 : index
    %c0_66 = arith.constant 0 : index
    %142 = vector.load %arg6[%c3_64, %c0_65, %c0_66] : memref<36x8x1xf32, #tpu.memory_space<vmem>>, vector<1x8x1xf32>
    %143 = vector.shape_cast %142 : vector<1x8x1xf32> to vector<8x1xf32>
    %144 = vector.extract_strided_slice %120 {offsets = [3, 0], sizes = [1, 256], strides = [1, 1]} : vector<4x256xf32> to vector<1x256xf32>
    %145 = vector.broadcast %143 : vector<8x1xf32> to vector<8x256xf32>
    %146 = vector.broadcast %144 : vector<1x256xf32> to vector<8x256xf32>
    %147 = arith.mulf %145, %146 : vector<8x256xf32>
    %148 = arith.addf %141, %147 : vector<8x256xf32>
    %c0_67 = arith.constant 0 : index
    %c112 = arith.constant 112 : index
    %149 = vector.load %arg19[%c0_67, %c112] : memref<8x512xf32, #tpu.memory_space<vmem>>, vector<4x256xf32>
    %c4 = arith.constant 4 : index
    %c0_68 = arith.constant 0 : index
    %c0_69 = arith.constant 0 : index
    %150 = vector.load %arg6[%c4, %c0_68, %c0_69] : memref<36x8x1xf32, #tpu.memory_space<vmem>>, vector<1x8x1xf32>
    %151 = vector.shape_cast %150 : vector<1x8x1xf32> to vector<8x1xf32>
    %152 = vector.extract_strided_slice %149 {offsets = [0, 0], sizes = [1, 256], strides = [1, 1]} : vector<4x256xf32> to vector<1x256xf32>
    %153 = vector.broadcast %151 : vector<8x1xf32> to vector<8x256xf32>
    %154 = vector.broadcast %152 : vector<1x256xf32> to vector<8x256xf32>
    %155 = arith.mulf %153, %154 : vector<8x256xf32>
    %156 = arith.addf %148, %155 : vector<8x256xf32>
    %c5 = arith.constant 5 : index
    %c0_70 = arith.constant 0 : index
    %c0_71 = arith.constant 0 : index
    %157 = vector.load %arg6[%c5, %c0_70, %c0_71] : memref<36x8x1xf32, #tpu.memory_space<vmem>>, vector<1x8x1xf32>
    %158 = vector.shape_cast %157 : vector<1x8x1xf32> to vector<8x1xf32>
    %159 = vector.extract_strided_slice %149 {offsets = [1, 0], sizes = [1, 256], strides = [1, 1]} : vector<4x256xf32> to vector<1x256xf32>
    %160 = vector.broadcast %158 : vector<8x1xf32> to vector<8x256xf32>
    %161 = vector.broadcast %159 : vector<1x256xf32> to vector<8x256xf32>
    %162 = arith.mulf %160, %161 : vector<8x256xf32>
    %163 = arith.addf %156, %162 : vector<8x256xf32>
    %c6 = arith.constant 6 : index
    %c0_72 = arith.constant 0 : index
    %c0_73 = arith.constant 0 : index
    %164 = vector.load %arg6[%c6, %c0_72, %c0_73] : memref<36x8x1xf32, #tpu.memory_space<vmem>>, vector<1x8x1xf32>
    %165 = vector.shape_cast %164 : vector<1x8x1xf32> to vector<8x1xf32>
    %166 = vector.extract_strided_slice %149 {offsets = [2, 0], sizes = [1, 256], strides = [1, 1]} : vector<4x256xf32> to vector<1x256xf32>
    %167 = vector.broadcast %165 : vector<8x1xf32> to vector<8x256xf32>
    %168 = vector.broadcast %166 : vector<1x256xf32> to vector<8x256xf32>
    %169 = arith.mulf %167, %168 : vector<8x256xf32>
    %170 = arith.addf %163, %169 : vector<8x256xf32>
    %c7 = arith.constant 7 : index
    %c0_74 = arith.constant 0 : index
    %c0_75 = arith.constant 0 : index
    %171 = vector.load %arg6[%c7, %c0_74, %c0_75] : memref<36x8x1xf32, #tpu.memory_space<vmem>>, vector<1x8x1xf32>
    %172 = vector.shape_cast %171 : vector<1x8x1xf32> to vector<8x1xf32>
    %173 = vector.extract_strided_slice %149 {offsets = [3, 0], sizes = [1, 256], strides = [1, 1]} : vector<4x256xf32> to vector<1x256xf32>
    %174 = vector.broadcast %172 : vector<8x1xf32> to vector<8x256xf32>
    %175 = vector.broadcast %173 : vector<1x256xf32> to vector<8x256xf32>
    %176 = arith.mulf %174, %175 : vector<8x256xf32>
    %177 = arith.addf %170, %176 : vector<8x256xf32>
    %c0_76 = arith.constant 0 : index
    %c113 = arith.constant 113 : index
    %178 = vector.load %arg19[%c0_76, %c113] : memref<8x512xf32, #tpu.memory_space<vmem>>, vector<4x256xf32>
    %c1_77 = arith.constant 1 : index
    %c0_78 = arith.constant 0 : index
    %c0_79 = arith.constant 0 : index
    %179 = vector.load %arg17[%c1_77, %c0_78, %c0_79] : memref<2x1x256xf32, #tpu.memory_space<vmem>>, vector<1x1x256xf32>
    %180 = vector.shape_cast %179 : vector<1x1x256xf32> to vector<1x256xf32>
    %181 = vector.broadcast %180 : vector<1x256xf32> to vector<4x256xf32>
    %182 = arith.mulf %178, %181 : vector<4x256xf32>
    %c8 = arith.constant 8 : index
    %c0_80 = arith.constant 0 : index
    %c0_81 = arith.constant 0 : index
    %183 = vector.load %arg6[%c8, %c0_80, %c0_81] : memref<36x8x1xf32, #tpu.memory_space<vmem>>, vector<1x8x1xf32>
    %184 = vector.shape_cast %183 : vector<1x8x1xf32> to vector<8x1xf32>
    %185 = vector.extract_strided_slice %182 {offsets = [0, 0], sizes = [1, 256], strides = [1, 1]} : vector<4x256xf32> to vector<1x256xf32>
    %186 = vector.broadcast %184 : vector<8x1xf32> to vector<8x256xf32>
    %187 = vector.broadcast %185 : vector<1x256xf32> to vector<8x256xf32>
    %188 = arith.mulf %186, %187 : vector<8x256xf32>
    %189 = arith.addf %177, %188 : vector<8x256xf32>
    %c9 = arith.constant 9 : index
    %c0_82 = arith.constant 0 : index
    %c0_83 = arith.constant 0 : index
    %190 = vector.load %arg6[%c9, %c0_82, %c0_83] : memref<36x8x1xf32, #tpu.memory_space<vmem>>, vector<1x8x1xf32>
    %191 = vector.shape_cast %190 : vector<1x8x1xf32> to vector<8x1xf32>
    %192 = vector.extract_strided_slice %182 {offsets = [1, 0], sizes = [1, 256], strides = [1, 1]} : vector<4x256xf32> to vector<1x256xf32>
    %193 = vector.broadcast %191 : vector<8x1xf32> to vector<8x256xf32>
    %194 = vector.broadcast %192 : vector<1x256xf32> to vector<8x256xf32>
    %195 = arith.mulf %193, %194 : vector<8x256xf32>
    %196 = arith.addf %189, %195 : vector<8x256xf32>
    %c10 = arith.constant 10 : index
    %c0_84 = arith.constant 0 : index
    %c0_85 = arith.constant 0 : index
    %197 = vector.load %arg6[%c10, %c0_84, %c0_85] : memref<36x8x1xf32, #tpu.memory_space<vmem>>, vector<1x8x1xf32>
    %198 = vector.shape_cast %197 : vector<1x8x1xf32> to vector<8x1xf32>
    %199 = vector.extract_strided_slice %182 {offsets = [2, 0], sizes = [1, 256], strides = [1, 1]} : vector<4x256xf32> to vector<1x256xf32>
    %200 = vector.broadcast %198 : vector<8x1xf32> to vector<8x256xf32>
    %201 = vector.broadcast %199 : vector<1x256xf32> to vector<8x256xf32>
    %202 = arith.mulf %200, %201 : vector<8x256xf32>
    %203 = arith.addf %196, %202 : vector<8x256xf32>
    %c11 = arith.constant 11 : index
    %c0_86 = arith.constant 0 : index
    %c0_87 = arith.constant 0 : index
    %204 = vector.load %arg6[%c11, %c0_86, %c0_87] : memref<36x8x1xf32, #tpu.memory_space<vmem>>, vector<1x8x1xf32>
    %205 = vector.shape_cast %204 : vector<1x8x1xf32> to vector<8x1xf32>
    %206 = vector.extract_strided_slice %182 {offsets = [3, 0], sizes = [1, 256], strides = [1, 1]} : vector<4x256xf32> to vector<1x256xf32>
    %207 = vector.broadcast %205 : vector<8x1xf32> to vector<8x256xf32>
    %208 = vector.broadcast %206 : vector<1x256xf32> to vector<8x256xf32>
    %209 = arith.mulf %207, %208 : vector<8x256xf32>
    %210 = arith.addf %203, %209 : vector<8x256xf32>
    %c0_88 = arith.constant 0 : index
    %c127 = arith.constant 127 : index
    %211 = vector.load %arg19[%c0_88, %c127] : memref<8x512xf32, #tpu.memory_space<vmem>>, vector<4x256xf32>
    %c0_89 = arith.constant 0 : index
    %c0_90 = arith.constant 0 : index
    %c0_91 = arith.constant 0 : index
    %212 = vector.load %arg17[%c0_89, %c0_90, %c0_91] : memref<2x1x256xf32, #tpu.memory_space<vmem>>, vector<1x1x256xf32>
    %213 = vector.shape_cast %212 : vector<1x1x256xf32> to vector<1x256xf32>
    %214 = vector.broadcast %213 : vector<1x256xf32> to vector<4x256xf32>
    %215 = arith.mulf %211, %214 : vector<4x256xf32>
    %c12 = arith.constant 12 : index
    %c0_92 = arith.constant 0 : index
    %c0_93 = arith.constant 0 : index
    %216 = vector.load %arg6[%c12, %c0_92, %c0_93] : memref<36x8x1xf32, #tpu.memory_space<vmem>>, vector<1x8x1xf32>
    %217 = vector.shape_cast %216 : vector<1x8x1xf32> to vector<8x1xf32>
    %218 = vector.extract_strided_slice %215 {offsets = [0, 0], sizes = [1, 256], strides = [1, 1]} : vector<4x256xf32> to vector<1x256xf32>
    %219 = vector.broadcast %217 : vector<8x1xf32> to vector<8x256xf32>
    %220 = vector.broadcast %218 : vector<1x256xf32> to vector<8x256xf32>
    %221 = arith.mulf %219, %220 : vector<8x256xf32>
    %222 = arith.addf %210, %221 : vector<8x256xf32>
    %c13 = arith.constant 13 : index
    %c0_94 = arith.constant 0 : index
    %c0_95 = arith.constant 0 : index
    %223 = vector.load %arg6[%c13, %c0_94, %c0_95] : memref<36x8x1xf32, #tpu.memory_space<vmem>>, vector<1x8x1xf32>
    %224 = vector.shape_cast %223 : vector<1x8x1xf32> to vector<8x1xf32>
    %225 = vector.extract_strided_slice %215 {offsets = [1, 0], sizes = [1, 256], strides = [1, 1]} : vector<4x256xf32> to vector<1x256xf32>
    %226 = vector.broadcast %224 : vector<8x1xf32> to vector<8x256xf32>
    %227 = vector.broadcast %225 : vector<1x256xf32> to vector<8x256xf32>
    %228 = arith.mulf %226, %227 : vector<8x256xf32>
    %229 = arith.addf %222, %228 : vector<8x256xf32>
    %c14 = arith.constant 14 : index
    %c0_96 = arith.constant 0 : index
    %c0_97 = arith.constant 0 : index
    %230 = vector.load %arg6[%c14, %c0_96, %c0_97] : memref<36x8x1xf32, #tpu.memory_space<vmem>>, vector<1x8x1xf32>
    %231 = vector.shape_cast %230 : vector<1x8x1xf32> to vector<8x1xf32>
    %232 = vector.extract_strided_slice %215 {offsets = [2, 0], sizes = [1, 256], strides = [1, 1]} : vector<4x256xf32> to vector<1x256xf32>
    %233 = vector.broadcast %231 : vector<8x1xf32> to vector<8x256xf32>
    %234 = vector.broadcast %232 : vector<1x256xf32> to vector<8x256xf32>
    %235 = arith.mulf %233, %234 : vector<8x256xf32>
    %236 = arith.addf %229, %235 : vector<8x256xf32>
    %c15 = arith.constant 15 : index
    %c0_98 = arith.constant 0 : index
    %c0_99 = arith.constant 0 : index
    %237 = vector.load %arg6[%c15, %c0_98, %c0_99] : memref<36x8x1xf32, #tpu.memory_space<vmem>>, vector<1x8x1xf32>
    %238 = vector.shape_cast %237 : vector<1x8x1xf32> to vector<8x1xf32>
    %239 = vector.extract_strided_slice %215 {offsets = [3, 0], sizes = [1, 256], strides = [1, 1]} : vector<4x256xf32> to vector<1x256xf32>
    %240 = vector.broadcast %238 : vector<8x1xf32> to vector<8x256xf32>
    %241 = vector.broadcast %239 : vector<1x256xf32> to vector<8x256xf32>
    %242 = arith.mulf %240, %241 : vector<8x256xf32>
    %243 = arith.addf %236, %242 : vector<8x256xf32>
    %c0_100 = arith.constant 0 : index
    %c128_101 = arith.constant 128 : index
    %244 = vector.load %arg19[%c0_100, %c128_101] : memref<8x512xf32, #tpu.memory_space<vmem>>, vector<4x256xf32>
    %c16 = arith.constant 16 : index
    %c0_102 = arith.constant 0 : index
    %c0_103 = arith.constant 0 : index
    %245 = vector.load %arg6[%c16, %c0_102, %c0_103] : memref<36x8x1xf32, #tpu.memory_space<vmem>>, vector<1x8x1xf32>
    %246 = vector.shape_cast %245 : vector<1x8x1xf32> to vector<8x1xf32>
    %247 = vector.extract_strided_slice %244 {offsets = [0, 0], sizes = [1, 256], strides = [1, 1]} : vector<4x256xf32> to vector<1x256xf32>
    %248 = vector.broadcast %246 : vector<8x1xf32> to vector<8x256xf32>
    %249 = vector.broadcast %247 : vector<1x256xf32> to vector<8x256xf32>
    %250 = arith.mulf %248, %249 : vector<8x256xf32>
    %251 = arith.addf %243, %250 : vector<8x256xf32>
    %c17 = arith.constant 17 : index
    %c0_104 = arith.constant 0 : index
    %c0_105 = arith.constant 0 : index
    %252 = vector.load %arg6[%c17, %c0_104, %c0_105] : memref<36x8x1xf32, #tpu.memory_space<vmem>>, vector<1x8x1xf32>
    %253 = vector.shape_cast %252 : vector<1x8x1xf32> to vector<8x1xf32>
    %254 = vector.extract_strided_slice %244 {offsets = [1, 0], sizes = [1, 256], strides = [1, 1]} : vector<4x256xf32> to vector<1x256xf32>
    %255 = vector.broadcast %253 : vector<8x1xf32> to vector<8x256xf32>
    %256 = vector.broadcast %254 : vector<1x256xf32> to vector<8x256xf32>
    %257 = arith.mulf %255, %256 : vector<8x256xf32>
    %258 = arith.addf %251, %257 : vector<8x256xf32>
    %c18 = arith.constant 18 : index
    %c0_106 = arith.constant 0 : index
    %c0_107 = arith.constant 0 : index
    %259 = vector.load %arg6[%c18, %c0_106, %c0_107] : memref<36x8x1xf32, #tpu.memory_space<vmem>>, vector<1x8x1xf32>
    %260 = vector.shape_cast %259 : vector<1x8x1xf32> to vector<8x1xf32>
    %261 = vector.extract_strided_slice %244 {offsets = [2, 0], sizes = [1, 256], strides = [1, 1]} : vector<4x256xf32> to vector<1x256xf32>
    %262 = vector.broadcast %260 : vector<8x1xf32> to vector<8x256xf32>
    %263 = vector.broadcast %261 : vector<1x256xf32> to vector<8x256xf32>
    %264 = arith.mulf %262, %263 : vector<8x256xf32>
    %265 = arith.addf %258, %264 : vector<8x256xf32>
    %c19 = arith.constant 19 : index
    %c0_108 = arith.constant 0 : index
    %c0_109 = arith.constant 0 : index
    %266 = vector.load %arg6[%c19, %c0_108, %c0_109] : memref<36x8x1xf32, #tpu.memory_space<vmem>>, vector<1x8x1xf32>
    %267 = vector.shape_cast %266 : vector<1x8x1xf32> to vector<8x1xf32>
    %268 = vector.extract_strided_slice %244 {offsets = [3, 0], sizes = [1, 256], strides = [1, 1]} : vector<4x256xf32> to vector<1x256xf32>
    %269 = vector.broadcast %267 : vector<8x1xf32> to vector<8x256xf32>
    %270 = vector.broadcast %268 : vector<1x256xf32> to vector<8x256xf32>
    %271 = arith.mulf %269, %270 : vector<8x256xf32>
    %272 = arith.addf %265, %271 : vector<8x256xf32>
    %c0_110 = arith.constant 0 : index
    %c129 = arith.constant 129 : index
    %273 = vector.load %arg19[%c0_110, %c129] : memref<8x512xf32, #tpu.memory_space<vmem>>, vector<4x256xf32>
    %c1_111 = arith.constant 1 : index
    %c0_112 = arith.constant 0 : index
    %c0_113 = arith.constant 0 : index
    %274 = vector.load %arg17[%c1_111, %c0_112, %c0_113] : memref<2x1x256xf32, #tpu.memory_space<vmem>>, vector<1x1x256xf32>
    %275 = vector.shape_cast %274 : vector<1x1x256xf32> to vector<1x256xf32>
    %276 = vector.broadcast %275 : vector<1x256xf32> to vector<4x256xf32>
    %277 = arith.mulf %273, %276 : vector<4x256xf32>
    %c20 = arith.constant 20 : index
    %c0_114 = arith.constant 0 : index
    %c0_115 = arith.constant 0 : index
    %278 = vector.load %arg6[%c20, %c0_114, %c0_115] : memref<36x8x1xf32, #tpu.memory_space<vmem>>, vector<1x8x1xf32>
    %279 = vector.shape_cast %278 : vector<1x8x1xf32> to vector<8x1xf32>
    %280 = vector.extract_strided_slice %277 {offsets = [0, 0], sizes = [1, 256], strides = [1, 1]} : vector<4x256xf32> to vector<1x256xf32>
    %281 = vector.broadcast %279 : vector<8x1xf32> to vector<8x256xf32>
    %282 = vector.broadcast %280 : vector<1x256xf32> to vector<8x256xf32>
    %283 = arith.mulf %281, %282 : vector<8x256xf32>
    %284 = arith.addf %272, %283 : vector<8x256xf32>
    %c21 = arith.constant 21 : index
    %c0_116 = arith.constant 0 : index
    %c0_117 = arith.constant 0 : index
    %285 = vector.load %arg6[%c21, %c0_116, %c0_117] : memref<36x8x1xf32, #tpu.memory_space<vmem>>, vector<1x8x1xf32>
    %286 = vector.shape_cast %285 : vector<1x8x1xf32> to vector<8x1xf32>
    %287 = vector.extract_strided_slice %277 {offsets = [1, 0], sizes = [1, 256], strides = [1, 1]} : vector<4x256xf32> to vector<1x256xf32>
    %288 = vector.broadcast %286 : vector<8x1xf32> to vector<8x256xf32>
    %289 = vector.broadcast %287 : vector<1x256xf32> to vector<8x256xf32>
    %290 = arith.mulf %288, %289 : vector<8x256xf32>
    %291 = arith.addf %284, %290 : vector<8x256xf32>
    %c22 = arith.constant 22 : index
    %c0_118 = arith.constant 0 : index
    %c0_119 = arith.constant 0 : index
    %292 = vector.load %arg6[%c22, %c0_118, %c0_119] : memref<36x8x1xf32, #tpu.memory_space<vmem>>, vector<1x8x1xf32>
    %293 = vector.shape_cast %292 : vector<1x8x1xf32> to vector<8x1xf32>
    %294 = vector.extract_strided_slice %277 {offsets = [2, 0], sizes = [1, 256], strides = [1, 1]} : vector<4x256xf32> to vector<1x256xf32>
    %295 = vector.broadcast %293 : vector<8x1xf32> to vector<8x256xf32>
    %296 = vector.broadcast %294 : vector<1x256xf32> to vector<8x256xf32>
    %297 = arith.mulf %295, %296 : vector<8x256xf32>
    %298 = arith.addf %291, %297 : vector<8x256xf32>
    %c23 = arith.constant 23 : index
    %c0_120 = arith.constant 0 : index
    %c0_121 = arith.constant 0 : index
    %299 = vector.load %arg6[%c23, %c0_120, %c0_121] : memref<36x8x1xf32, #tpu.memory_space<vmem>>, vector<1x8x1xf32>
    %300 = vector.shape_cast %299 : vector<1x8x1xf32> to vector<8x1xf32>
    %301 = vector.extract_strided_slice %277 {offsets = [3, 0], sizes = [1, 256], strides = [1, 1]} : vector<4x256xf32> to vector<1x256xf32>
    %302 = vector.broadcast %300 : vector<8x1xf32> to vector<8x256xf32>
    %303 = vector.broadcast %301 : vector<1x256xf32> to vector<8x256xf32>
    %304 = arith.mulf %302, %303 : vector<8x256xf32>
    %305 = arith.addf %298, %304 : vector<8x256xf32>
    %c0_122 = arith.constant 0 : index
    %c143 = arith.constant 143 : index
    %306 = vector.load %arg19[%c0_122, %c143] : memref<8x512xf32, #tpu.memory_space<vmem>>, vector<4x256xf32>
    %c0_123 = arith.constant 0 : index
    %c0_124 = arith.constant 0 : index
    %c0_125 = arith.constant 0 : index
    %307 = vector.load %arg17[%c0_123, %c0_124, %c0_125] : memref<2x1x256xf32, #tpu.memory_space<vmem>>, vector<1x1x256xf32>
    %308 = vector.shape_cast %307 : vector<1x1x256xf32> to vector<1x256xf32>
    %309 = vector.broadcast %308 : vector<1x256xf32> to vector<4x256xf32>
    %310 = arith.mulf %306, %309 : vector<4x256xf32>
    %c24 = arith.constant 24 : index
    %c0_126 = arith.constant 0 : index
    %c0_127 = arith.constant 0 : index
    %311 = vector.load %arg6[%c24, %c0_126, %c0_127] : memref<36x8x1xf32, #tpu.memory_space<vmem>>, vector<1x8x1xf32>
    %312 = vector.shape_cast %311 : vector<1x8x1xf32> to vector<8x1xf32>
    %313 = vector.extract_strided_slice %310 {offsets = [0, 0], sizes = [1, 256], strides = [1, 1]} : vector<4x256xf32> to vector<1x256xf32>
    %314 = vector.broadcast %312 : vector<8x1xf32> to vector<8x256xf32>
    %315 = vector.broadcast %313 : vector<1x256xf32> to vector<8x256xf32>
    %316 = arith.mulf %314, %315 : vector<8x256xf32>
    %317 = arith.addf %305, %316 : vector<8x256xf32>
    %c25 = arith.constant 25 : index
    %c0_128 = arith.constant 0 : index
    %c0_129 = arith.constant 0 : index
    %318 = vector.load %arg6[%c25, %c0_128, %c0_129] : memref<36x8x1xf32, #tpu.memory_space<vmem>>, vector<1x8x1xf32>
    %319 = vector.shape_cast %318 : vector<1x8x1xf32> to vector<8x1xf32>
    %320 = vector.extract_strided_slice %310 {offsets = [1, 0], sizes = [1, 256], strides = [1, 1]} : vector<4x256xf32> to vector<1x256xf32>
    %321 = vector.broadcast %319 : vector<8x1xf32> to vector<8x256xf32>
    %322 = vector.broadcast %320 : vector<1x256xf32> to vector<8x256xf32>
    %323 = arith.mulf %321, %322 : vector<8x256xf32>
    %324 = arith.addf %317, %323 : vector<8x256xf32>
    %c26 = arith.constant 26 : index
    %c0_130 = arith.constant 0 : index
    %c0_131 = arith.constant 0 : index
    %325 = vector.load %arg6[%c26, %c0_130, %c0_131] : memref<36x8x1xf32, #tpu.memory_space<vmem>>, vector<1x8x1xf32>
    %326 = vector.shape_cast %325 : vector<1x8x1xf32> to vector<8x1xf32>
    %327 = vector.extract_strided_slice %310 {offsets = [2, 0], sizes = [1, 256], strides = [1, 1]} : vector<4x256xf32> to vector<1x256xf32>
    %328 = vector.broadcast %326 : vector<8x1xf32> to vector<8x256xf32>
    %329 = vector.broadcast %327 : vector<1x256xf32> to vector<8x256xf32>
    %330 = arith.mulf %328, %329 : vector<8x256xf32>
    %331 = arith.addf %324, %330 : vector<8x256xf32>
    %c27 = arith.constant 27 : index
    %c0_132 = arith.constant 0 : index
    %c0_133 = arith.constant 0 : index
    %332 = vector.load %arg6[%c27, %c0_132, %c0_133] : memref<36x8x1xf32, #tpu.memory_space<vmem>>, vector<1x8x1xf32>
    %333 = vector.shape_cast %332 : vector<1x8x1xf32> to vector<8x1xf32>
    %334 = vector.extract_strided_slice %310 {offsets = [3, 0], sizes = [1, 256], strides = [1, 1]} : vector<4x256xf32> to vector<1x256xf32>
    %335 = vector.broadcast %333 : vector<8x1xf32> to vector<8x256xf32>
    %336 = vector.broadcast %334 : vector<1x256xf32> to vector<8x256xf32>
    %337 = arith.mulf %335, %336 : vector<8x256xf32>
    %338 = arith.addf %331, %337 : vector<8x256xf32>
    %c0_134 = arith.constant 0 : index
    %c144 = arith.constant 144 : index
    %339 = vector.load %arg19[%c0_134, %c144] : memref<8x512xf32, #tpu.memory_space<vmem>>, vector<4x256xf32>
    %c28 = arith.constant 28 : index
    %c0_135 = arith.constant 0 : index
    %c0_136 = arith.constant 0 : index
    %340 = vector.load %arg6[%c28, %c0_135, %c0_136] : memref<36x8x1xf32, #tpu.memory_space<vmem>>, vector<1x8x1xf32>
    %341 = vector.shape_cast %340 : vector<1x8x1xf32> to vector<8x1xf32>
    %342 = vector.extract_strided_slice %339 {offsets = [0, 0], sizes = [1, 256], strides = [1, 1]} : vector<4x256xf32> to vector<1x256xf32>
    %343 = vector.broadcast %341 : vector<8x1xf32> to vector<8x256xf32>
    %344 = vector.broadcast %342 : vector<1x256xf32> to vector<8x256xf32>
    %345 = arith.mulf %343, %344 : vector<8x256xf32>
    %346 = arith.addf %338, %345 : vector<8x256xf32>
    %c29 = arith.constant 29 : index
    %c0_137 = arith.constant 0 : index
    %c0_138 = arith.constant 0 : index
    %347 = vector.load %arg6[%c29, %c0_137, %c0_138] : memref<36x8x1xf32, #tpu.memory_space<vmem>>, vector<1x8x1xf32>
    %348 = vector.shape_cast %347 : vector<1x8x1xf32> to vector<8x1xf32>
    %349 = vector.extract_strided_slice %339 {offsets = [1, 0], sizes = [1, 256], strides = [1, 1]} : vector<4x256xf32> to vector<1x256xf32>
    %350 = vector.broadcast %348 : vector<8x1xf32> to vector<8x256xf32>
    %351 = vector.broadcast %349 : vector<1x256xf32> to vector<8x256xf32>
    %352 = arith.mulf %350, %351 : vector<8x256xf32>
    %353 = arith.addf %346, %352 : vector<8x256xf32>
    %c30 = arith.constant 30 : index
    %c0_139 = arith.constant 0 : index
    %c0_140 = arith.constant 0 : index
    %354 = vector.load %arg6[%c30, %c0_139, %c0_140] : memref<36x8x1xf32, #tpu.memory_space<vmem>>, vector<1x8x1xf32>
    %355 = vector.shape_cast %354 : vector<1x8x1xf32> to vector<8x1xf32>
    %356 = vector.extract_strided_slice %339 {offsets = [2, 0], sizes = [1, 256], strides = [1, 1]} : vector<4x256xf32> to vector<1x256xf32>
    %357 = vector.broadcast %355 : vector<8x1xf32> to vector<8x256xf32>
    %358 = vector.broadcast %356 : vector<1x256xf32> to vector<8x256xf32>
    %359 = arith.mulf %357, %358 : vector<8x256xf32>
    %360 = arith.addf %353, %359 : vector<8x256xf32>
    %c31 = arith.constant 31 : index
    %c0_141 = arith.constant 0 : index
    %c0_142 = arith.constant 0 : index
    %361 = vector.load %arg6[%c31, %c0_141, %c0_142] : memref<36x8x1xf32, #tpu.memory_space<vmem>>, vector<1x8x1xf32>
    %362 = vector.shape_cast %361 : vector<1x8x1xf32> to vector<8x1xf32>
    %363 = vector.extract_strided_slice %339 {offsets = [3, 0], sizes = [1, 256], strides = [1, 1]} : vector<4x256xf32> to vector<1x256xf32>
    %364 = vector.broadcast %362 : vector<8x1xf32> to vector<8x256xf32>
    %365 = vector.broadcast %363 : vector<1x256xf32> to vector<8x256xf32>
    %366 = arith.mulf %364, %365 : vector<8x256xf32>
    %367 = arith.addf %360, %366 : vector<8x256xf32>
    %c0_143 = arith.constant 0 : index
    %c145 = arith.constant 145 : index
    %368 = vector.load %arg19[%c0_143, %c145] : memref<8x512xf32, #tpu.memory_space<vmem>>, vector<4x256xf32>
    %c1_144 = arith.constant 1 : index
    %c0_145 = arith.constant 0 : index
    %c0_146 = arith.constant 0 : index
    %369 = vector.load %arg17[%c1_144, %c0_145, %c0_146] : memref<2x1x256xf32, #tpu.memory_space<vmem>>, vector<1x1x256xf32>
    %370 = vector.shape_cast %369 : vector<1x1x256xf32> to vector<1x256xf32>
    %371 = vector.broadcast %370 : vector<1x256xf32> to vector<4x256xf32>
    %372 = arith.mulf %368, %371 : vector<4x256xf32>
    %c32 = arith.constant 32 : index
    %c0_147 = arith.constant 0 : index
    %c0_148 = arith.constant 0 : index
    %373 = vector.load %arg6[%c32, %c0_147, %c0_148] : memref<36x8x1xf32, #tpu.memory_space<vmem>>, vector<1x8x1xf32>
    %374 = vector.shape_cast %373 : vector<1x8x1xf32> to vector<8x1xf32>
    %375 = vector.extract_strided_slice %372 {offsets = [0, 0], sizes = [1, 256], strides = [1, 1]} : vector<4x256xf32> to vector<1x256xf32>
    %376 = vector.broadcast %374 : vector<8x1xf32> to vector<8x256xf32>
    %377 = vector.broadcast %375 : vector<1x256xf32> to vector<8x256xf32>
    %378 = arith.mulf %376, %377 : vector<8x256xf32>
    %379 = arith.addf %367, %378 : vector<8x256xf32>
    %c33 = arith.constant 33 : index
    %c0_149 = arith.constant 0 : index
    %c0_150 = arith.constant 0 : index
    %380 = vector.load %arg6[%c33, %c0_149, %c0_150] : memref<36x8x1xf32, #tpu.memory_space<vmem>>, vector<1x8x1xf32>
    %381 = vector.shape_cast %380 : vector<1x8x1xf32> to vector<8x1xf32>
    %382 = vector.extract_strided_slice %372 {offsets = [1, 0], sizes = [1, 256], strides = [1, 1]} : vector<4x256xf32> to vector<1x256xf32>
    %383 = vector.broadcast %381 : vector<8x1xf32> to vector<8x256xf32>
    %384 = vector.broadcast %382 : vector<1x256xf32> to vector<8x256xf32>
    %385 = arith.mulf %383, %384 : vector<8x256xf32>
    %386 = arith.addf %379, %385 : vector<8x256xf32>
    %c34 = arith.constant 34 : index
    %c0_151 = arith.constant 0 : index
    %c0_152 = arith.constant 0 : index
    %387 = vector.load %arg6[%c34, %c0_151, %c0_152] : memref<36x8x1xf32, #tpu.memory_space<vmem>>, vector<1x8x1xf32>
    %388 = vector.shape_cast %387 : vector<1x8x1xf32> to vector<8x1xf32>
    %389 = vector.extract_strided_slice %372 {offsets = [2, 0], sizes = [1, 256], strides = [1, 1]} : vector<4x256xf32> to vector<1x256xf32>
    %390 = vector.broadcast %388 : vector<8x1xf32> to vector<8x256xf32>
    %391 = vector.broadcast %389 : vector<1x256xf32> to vector<8x256xf32>
    %392 = arith.mulf %390, %391 : vector<8x256xf32>
    %393 = arith.addf %386, %392 : vector<8x256xf32>
    %c35 = arith.constant 35 : index
    %c0_153 = arith.constant 0 : index
    %c0_154 = arith.constant 0 : index
    %394 = vector.load %arg6[%c35, %c0_153, %c0_154] : memref<36x8x1xf32, #tpu.memory_space<vmem>>, vector<1x8x1xf32>
    %395 = vector.shape_cast %394 : vector<1x8x1xf32> to vector<8x1xf32>
    %396 = vector.extract_strided_slice %372 {offsets = [3, 0], sizes = [1, 256], strides = [1, 1]} : vector<4x256xf32> to vector<1x256xf32>
    %397 = vector.broadcast %395 : vector<8x1xf32> to vector<8x256xf32>
    %398 = vector.broadcast %396 : vector<1x256xf32> to vector<8x256xf32>
    %399 = arith.mulf %397, %398 : vector<8x256xf32>
    %400 = arith.addf %393, %399 : vector<8x256xf32>
    %c0_155 = arith.constant 0 : index
    %c0_156 = arith.constant 0 : index
    %401 = vector.load %arg7[%c0_155, %c0_156] : memref<8x1xf32, #tpu.memory_space<vmem>>, vector<8x1xf32>
    %402 = arith.addf %401, %113 : vector<8x1xf32>
    %403 = vector.broadcast %402 : vector<8x1xf32> to vector<8x256xf32>
    %404 = arith.addf %400, %403 : vector<8x256xf32>
    %c0_157 = arith.constant 0 : index
    %c0_158 = arith.constant 0 : index
    %405 = vector.load %arg10[%c0_157, %c0_158] : memref<8x1xf32, #tpu.memory_space<vmem>>, vector<8x1xf32>
    %c0_159 = arith.constant 0 : index
    %c0_160 = arith.constant 0 : index
    %406 = vector.load %arg11[%c0_159, %c0_160] : memref<8x1xf32, #tpu.memory_space<vmem>>, vector<8x1xf32>
    %cst_161 = arith.constant dense<0.000000e+00> : vector<8xf32>
    %407 = vector.multi_reduction <add>, %404, %cst_161 [1] : vector<8x256xf32> to vector<8xf32>
    %408 = vector.shape_cast %407 : vector<8xf32> to vector<8x1xf32>
    %409 = arith.mulf %404, %404 : vector<8x256xf32>
    %cst_162 = arith.constant dense<0.000000e+00> : vector<8xf32>
    %410 = vector.multi_reduction <add>, %409, %cst_162 [1] : vector<8x256xf32> to vector<8xf32>
    %411 = vector.shape_cast %410 : vector<8xf32> to vector<8x1xf32>
    %cst_163 = arith.constant 0.000000e+00 : f32
    %412 = vector.broadcast %cst_163 : f32 to vector<8x1xf32>
    %cst_164 = arith.constant 0.000000e+00 : f32
    %413 = vector.broadcast %cst_164 : f32 to vector<8x1xf32>
    %c0_165 = arith.constant 0 : index
    %c0_166 = arith.constant 0 : index
    %c0_167 = arith.constant 0 : index
    %414 = vector.load %arg12[%c0_165, %c0_166, %c0_167] : memref<4x8x1xf32, #tpu.memory_space<vmem>>, vector<1x8x1xf32>
    %415 = vector.shape_cast %414 : vector<1x8x1xf32> to vector<8x1xf32>
    %416 = arith.mulf %415, %408 : vector<8x1xf32>
    %cst_168 = arith.constant dense<0.000000e+00> : vector<1xf32>
    %417 = vector.multi_reduction <add>, %416, %cst_168 [0] : vector<8x1xf32> to vector<1xf32>
    %418 = vector.shape_cast %417 : vector<1xf32> to vector<1x1xf32>
    %419 = arith.mulf %415, %411 : vector<8x1xf32>
    %cst_169 = arith.constant dense<0.000000e+00> : vector<1xf32>
    %420 = vector.multi_reduction <add>, %419, %cst_169 [0] : vector<8x1xf32> to vector<1xf32>
    %421 = vector.shape_cast %420 : vector<1xf32> to vector<1x1xf32>
    %cst_170 = arith.constant 0.001953125 : f32
    %422 = vector.broadcast %cst_170 : f32 to vector<1x1xf32>
    %423 = arith.mulf %418, %422 : vector<1x1xf32>
    %424 = vector.broadcast %423 : vector<1x1xf32> to vector<8x1xf32>
    %425 = arith.mulf %424, %415 : vector<8x1xf32>
    %426 = arith.addf %412, %425 : vector<8x1xf32>
    %cst_171 = arith.constant 0.001953125 : f32
    %427 = vector.broadcast %cst_171 : f32 to vector<1x1xf32>
    %428 = arith.mulf %421, %427 : vector<1x1xf32>
    %429 = vector.broadcast %428 : vector<1x1xf32> to vector<8x1xf32>
    %430 = arith.mulf %429, %415 : vector<8x1xf32>
    %431 = arith.addf %413, %430 : vector<8x1xf32>
    %c1_172 = arith.constant 1 : index
    %c0_173 = arith.constant 0 : index
    %c0_174 = arith.constant 0 : index
    %432 = vector.load %arg12[%c1_172, %c0_173, %c0_174] : memref<4x8x1xf32, #tpu.memory_space<vmem>>, vector<1x8x1xf32>
    %433 = vector.shape_cast %432 : vector<1x8x1xf32> to vector<8x1xf32>
    %434 = arith.mulf %433, %408 : vector<8x1xf32>
    %cst_175 = arith.constant dense<0.000000e+00> : vector<1xf32>
    %435 = vector.multi_reduction <add>, %434, %cst_175 [0] : vector<8x1xf32> to vector<1xf32>
    %436 = vector.shape_cast %435 : vector<1xf32> to vector<1x1xf32>
    %437 = arith.mulf %433, %411 : vector<8x1xf32>
    %cst_176 = arith.constant dense<0.000000e+00> : vector<1xf32>
    %438 = vector.multi_reduction <add>, %437, %cst_176 [0] : vector<8x1xf32> to vector<1xf32>
    %439 = vector.shape_cast %438 : vector<1xf32> to vector<1x1xf32>
    %cst_177 = arith.constant 0.001953125 : f32
    %440 = vector.broadcast %cst_177 : f32 to vector<1x1xf32>
    %441 = arith.mulf %436, %440 : vector<1x1xf32>
    %442 = vector.broadcast %441 : vector<1x1xf32> to vector<8x1xf32>
    %443 = arith.mulf %442, %433 : vector<8x1xf32>
    %444 = arith.addf %426, %443 : vector<8x1xf32>
    %cst_178 = arith.constant 0.001953125 : f32
    %445 = vector.broadcast %cst_178 : f32 to vector<1x1xf32>
    %446 = arith.mulf %439, %445 : vector<1x1xf32>
    %447 = vector.broadcast %446 : vector<1x1xf32> to vector<8x1xf32>
    %448 = arith.mulf %447, %433 : vector<8x1xf32>
    %449 = arith.addf %431, %448 : vector<8x1xf32>
    %c2_179 = arith.constant 2 : index
    %c0_180 = arith.constant 0 : index
    %c0_181 = arith.constant 0 : index
    %450 = vector.load %arg12[%c2_179, %c0_180, %c0_181] : memref<4x8x1xf32, #tpu.memory_space<vmem>>, vector<1x8x1xf32>
    %451 = vector.shape_cast %450 : vector<1x8x1xf32> to vector<8x1xf32>
    %452 = arith.mulf %451, %408 : vector<8x1xf32>
    %cst_182 = arith.constant dense<0.000000e+00> : vector<1xf32>
    %453 = vector.multi_reduction <add>, %452, %cst_182 [0] : vector<8x1xf32> to vector<1xf32>
    %454 = vector.shape_cast %453 : vector<1xf32> to vector<1x1xf32>
    %455 = arith.mulf %451, %411 : vector<8x1xf32>
    %cst_183 = arith.constant dense<0.000000e+00> : vector<1xf32>
    %456 = vector.multi_reduction <add>, %455, %cst_183 [0] : vector<8x1xf32> to vector<1xf32>
    %457 = vector.shape_cast %456 : vector<1xf32> to vector<1x1xf32>
    %cst_184 = arith.constant 0.001953125 : f32
    %458 = vector.broadcast %cst_184 : f32 to vector<1x1xf32>
    %459 = arith.mulf %454, %458 : vector<1x1xf32>
    %460 = vector.broadcast %459 : vector<1x1xf32> to vector<8x1xf32>
    %461 = arith.mulf %460, %451 : vector<8x1xf32>
    %462 = arith.addf %444, %461 : vector<8x1xf32>
    %cst_185 = arith.constant 0.001953125 : f32
    %463 = vector.broadcast %cst_185 : f32 to vector<1x1xf32>
    %464 = arith.mulf %457, %463 : vector<1x1xf32>
    %465 = vector.broadcast %464 : vector<1x1xf32> to vector<8x1xf32>
    %466 = arith.mulf %465, %451 : vector<8x1xf32>
    %467 = arith.addf %449, %466 : vector<8x1xf32>
    %c3_186 = arith.constant 3 : index
    %c0_187 = arith.constant 0 : index
    %c0_188 = arith.constant 0 : index
    %468 = vector.load %arg12[%c3_186, %c0_187, %c0_188] : memref<4x8x1xf32, #tpu.memory_space<vmem>>, vector<1x8x1xf32>
    %469 = vector.shape_cast %468 : vector<1x8x1xf32> to vector<8x1xf32>
    %470 = arith.mulf %469, %408 : vector<8x1xf32>
    %cst_189 = arith.constant dense<0.000000e+00> : vector<1xf32>
    %471 = vector.multi_reduction <add>, %470, %cst_189 [0] : vector<8x1xf32> to vector<1xf32>
    %472 = vector.shape_cast %471 : vector<1xf32> to vector<1x1xf32>
    %473 = arith.mulf %469, %411 : vector<8x1xf32>
    %cst_190 = arith.constant dense<0.000000e+00> : vector<1xf32>
    %474 = vector.multi_reduction <add>, %473, %cst_190 [0] : vector<8x1xf32> to vector<1xf32>
    %475 = vector.shape_cast %474 : vector<1xf32> to vector<1x1xf32>
    %cst_191 = arith.constant 0.001953125 : f32
    %476 = vector.broadcast %cst_191 : f32 to vector<1x1xf32>
    %477 = arith.mulf %472, %476 : vector<1x1xf32>
    %478 = vector.broadcast %477 : vector<1x1xf32> to vector<8x1xf32>
    %479 = arith.mulf %478, %469 : vector<8x1xf32>
    %480 = arith.addf %462, %479 : vector<8x1xf32>
    %cst_192 = arith.constant 0.001953125 : f32
    %481 = vector.broadcast %cst_192 : f32 to vector<1x1xf32>
    %482 = arith.mulf %475, %481 : vector<1x1xf32>
    %483 = vector.broadcast %482 : vector<1x1xf32> to vector<8x1xf32>
    %484 = arith.mulf %483, %469 : vector<8x1xf32>
    %485 = arith.addf %467, %484 : vector<8x1xf32>
    %486 = arith.mulf %480, %480 : vector<8x1xf32>
    %487 = arith.subf %485, %486 : vector<8x1xf32>
    %cst_193 = arith.constant 9.99999974E-6 : f32
    %488 = vector.broadcast %cst_193 : f32 to vector<8x1xf32>
    %489 = arith.addf %487, %488 : vector<8x1xf32>
    %490 = math.rsqrt %489 : vector<8x1xf32>
    %491 = arith.mulf %490, %405 : vector<8x1xf32>
    %492 = arith.mulf %480, %491 : vector<8x1xf32>
    %493 = arith.subf %406, %492 : vector<8x1xf32>
    %494 = vector.broadcast %491 : vector<8x1xf32> to vector<8x256xf32>
    %495 = arith.mulf %404, %494 : vector<8x256xf32>
    %496 = vector.broadcast %493 : vector<8x1xf32> to vector<8x256xf32>
    %497 = arith.addf %495, %496 : vector<8x256xf32>
    %cst_194 = arith.constant 0.000000e+00 : f32
    %498 = vector.broadcast %cst_194 : f32 to vector<8x256xf32>
    %499 = arith.subf %498, %497 : vector<8x256xf32>
    %500 = math.exp %499 : vector<8x256xf32>
    %cst_195 = arith.constant 1.000000e+00 : f32
    %501 = vector.broadcast %cst_195 : f32 to vector<8x256xf32>
    %502 = arith.addf %501, %500 : vector<8x256xf32>
    %cst_196 = arith.constant 1.000000e+00 : f32
    %503 = vector.broadcast %cst_196 : f32 to vector<8x256xf32>
    %504 = arith.divf %503, %502 : vector<8x256xf32>
    %505 = arith.mulf %497, %504 : vector<8x256xf32>
    %c0_197 = arith.constant 0 : index
    %c128_198 = arith.constant 128 : index
    %506 = vector.load %arg19[%c0_197, %c128_198] : memref<8x512xf32, #tpu.memory_space<vmem>>, vector<8x256xf32>
    tpu.vector_store %arg19[%c0_197, %c128_198], %505 {strides = array<i32>} : memref<8x512xf32, #tpu.memory_space<vmem>>, vector<8x256xf32>,
    %cst_199 = arith.constant 0.000000e+00 : f32
    %507 = vector.broadcast %cst_199 : f32 to vector<8x256xf32>
    %c0_200 = arith.constant 0 : index
    %c111_201 = arith.constant 111 : index
    %508 = vector.load %arg19[%c0_200, %c111_201] : memref<8x512xf32, #tpu.memory_space<vmem>>, vector<8x256xf32>
    %c0_202 = arith.constant 0 : index
    %c0_203 = arith.constant 0 : index
    %c0_204 = arith.constant 0 : index
    %509 = vector.load %arg17[%c0_202, %c0_203, %c0_204] : memref<2x1x256xf32, #tpu.memory_space<vmem>>, vector<1x1x256xf32>
    %510 = vector.shape_cast %509 : vector<1x1x256xf32> to vector<1x256xf32>
    %511 = vector.broadcast %510 : vector<1x256xf32> to vector<8x256xf32>
    %512 = arith.mulf %508, %511 : vector<8x256xf32>
    %c0_205 = arith.constant 0 : index
    %c0_206 = arith.constant 0 : index
    %c0_207 = arith.constant 0 : index
    %513 = vector.load %arg13[%c0_205, %c0_206, %c0_207] : memref<72x8x1xf32, #tpu.memory_space<vmem>>, vector<1x8x1xf32>
    %514 = vector.shape_cast %513 : vector<1x8x1xf32> to vector<8x1xf32>
    %515 = vector.extract_strided_slice %512 {offsets = [0, 0], sizes = [1, 256], strides = [1, 1]} : vector<8x256xf32> to vector<1x256xf32>
    %516 = vector.broadcast %514 : vector<8x1xf32> to vector<8x256xf32>
    %517 = vector.broadcast %515 : vector<1x256xf32> to vector<8x256xf32>
    %518 = arith.mulf %516, %517 : vector<8x256xf32>
    %519 = arith.addf %507, %518 : vector<8x256xf32>
    %c1_208 = arith.constant 1 : index
    %c0_209 = arith.constant 0 : index
    %c0_210 = arith.constant 0 : index
    %520 = vector.load %arg13[%c1_208, %c0_209, %c0_210] : memref<72x8x1xf32, #tpu.memory_space<vmem>>, vector<1x8x1xf32>
    %521 = vector.shape_cast %520 : vector<1x8x1xf32> to vector<8x1xf32>
    %522 = vector.extract_strided_slice %512 {offsets = [1, 0], sizes = [1, 256], strides = [1, 1]} : vector<8x256xf32> to vector<1x256xf32>
    %523 = vector.broadcast %521 : vector<8x1xf32> to vector<8x256xf32>
    %524 = vector.broadcast %522 : vector<1x256xf32> to vector<8x256xf32>
    %525 = arith.mulf %523, %524 : vector<8x256xf32>
    %526 = arith.addf %519, %525 : vector<8x256xf32>
    %c2_211 = arith.constant 2 : index
    %c0_212 = arith.constant 0 : index
    %c0_213 = arith.constant 0 : index
    %527 = vector.load %arg13[%c2_211, %c0_212, %c0_213] : memref<72x8x1xf32, #tpu.memory_space<vmem>>, vector<1x8x1xf32>
    %528 = vector.shape_cast %527 : vector<1x8x1xf32> to vector<8x1xf32>
    %529 = vector.extract_strided_slice %512 {offsets = [2, 0], sizes = [1, 256], strides = [1, 1]} : vector<8x256xf32> to vector<1x256xf32>
    %530 = vector.broadcast %528 : vector<8x1xf32> to vector<8x256xf32>
    %531 = vector.broadcast %529 : vector<1x256xf32> to vector<8x256xf32>
    %532 = arith.mulf %530, %531 : vector<8x256xf32>
    %533 = arith.addf %526, %532 : vector<8x256xf32>
    %c3_214 = arith.constant 3 : index
    %c0_215 = arith.constant 0 : index
    %c0_216 = arith.constant 0 : index
    %534 = vector.load %arg13[%c3_214, %c0_215, %c0_216] : memref<72x8x1xf32, #tpu.memory_space<vmem>>, vector<1x8x1xf32>
    %535 = vector.shape_cast %534 : vector<1x8x1xf32> to vector<8x1xf32>
    %536 = vector.extract_strided_slice %512 {offsets = [3, 0], sizes = [1, 256], strides = [1, 1]} : vector<8x256xf32> to vector<1x256xf32>
    %537 = vector.broadcast %535 : vector<8x1xf32> to vector<8x256xf32>
    %538 = vector.broadcast %536 : vector<1x256xf32> to vector<8x256xf32>
    %539 = arith.mulf %537, %538 : vector<8x256xf32>
    %540 = arith.addf %533, %539 : vector<8x256xf32>
    %c4_217 = arith.constant 4 : index
    %c0_218 = arith.constant 0 : index
    %c0_219 = arith.constant 0 : index
    %541 = vector.load %arg13[%c4_217, %c0_218, %c0_219] : memref<72x8x1xf32, #tpu.memory_space<vmem>>, vector<1x8x1xf32>
    %542 = vector.shape_cast %541 : vector<1x8x1xf32> to vector<8x1xf32>
    %543 = vector.extract_strided_slice %512 {offsets = [4, 0], sizes = [1, 256], strides = [1, 1]} : vector<8x256xf32> to vector<1x256xf32>
    %544 = vector.broadcast %542 : vector<8x1xf32> to vector<8x256xf32>
    %545 = vector.broadcast %543 : vector<1x256xf32> to vector<8x256xf32>
    %546 = arith.mulf %544, %545 : vector<8x256xf32>
    %547 = arith.addf %540, %546 : vector<8x256xf32>
    %c5_220 = arith.constant 5 : index
    %c0_221 = arith.constant 0 : index
    %c0_222 = arith.constant 0 : index
    %548 = vector.load %arg13[%c5_220, %c0_221, %c0_222] : memref<72x8x1xf32, #tpu.memory_space<vmem>>, vector<1x8x1xf32>
    %549 = vector.shape_cast %548 : vector<1x8x1xf32> to vector<8x1xf32>
    %550 = vector.extract_strided_slice %512 {offsets = [5, 0], sizes = [1, 256], strides = [1, 1]} : vector<8x256xf32> to vector<1x256xf32>
    %551 = vector.broadcast %549 : vector<8x1xf32> to vector<8x256xf32>
    %552 = vector.broadcast %550 : vector<1x256xf32> to vector<8x256xf32>
    %553 = arith.mulf %551, %552 : vector<8x256xf32>
    %554 = arith.addf %547, %553 : vector<8x256xf32>
    %c6_223 = arith.constant 6 : index
    %c0_224 = arith.constant 0 : index
    %c0_225 = arith.constant 0 : index
    %555 = vector.load %arg13[%c6_223, %c0_224, %c0_225] : memref<72x8x1xf32, #tpu.memory_space<vmem>>, vector<1x8x1xf32>
    %556 = vector.shape_cast %555 : vector<1x8x1xf32> to vector<8x1xf32>
    %557 = vector.extract_strided_slice %512 {offsets = [6, 0], sizes = [1, 256], strides = [1, 1]} : vector<8x256xf32> to vector<1x256xf32>
    %558 = vector.broadcast %556 : vector<8x1xf32> to vector<8x256xf32>
    %559 = vector.broadcast %557 : vector<1x256xf32> to vector<8x256xf32>
    %560 = arith.mulf %558, %559 : vector<8x256xf32>
    %561 = arith.addf %554, %560 : vector<8x256xf32>
    %c7_226 = arith.constant 7 : index
    %c0_227 = arith.constant 0 : index
    %c0_228 = arith.constant 0 : index
    %562 = vector.load %arg13[%c7_226, %c0_227, %c0_228] : memref<72x8x1xf32, #tpu.memory_space<vmem>>, vector<1x8x1xf32>
    %563 = vector.shape_cast %562 : vector<1x8x1xf32> to vector<8x1xf32>
    %564 = vector.extract_strided_slice %512 {offsets = [7, 0], sizes = [1, 256], strides = [1, 1]} : vector<8x256xf32> to vector<1x256xf32>
    %565 = vector.broadcast %563 : vector<8x1xf32> to vector<8x256xf32>
    %566 = vector.broadcast %564 : vector<1x256xf32> to vector<8x256xf32>
    %567 = arith.mulf %565, %566 : vector<8x256xf32>
    %568 = arith.addf %561, %567 : vector<8x256xf32>
    %c0_229 = arith.constant 0 : index
    %c112_230 = arith.constant 112 : index
    %569 = vector.load %arg19[%c0_229, %c112_230] : memref<8x512xf32, #tpu.memory_space<vmem>>, vector<8x256xf32>
    %c8_231 = arith.constant 8 : index
    %c0_232 = arith.constant 0 : index
    %c0_233 = arith.constant 0 : index
    %570 = vector.load %arg13[%c8_231, %c0_232, %c0_233] : memref<72x8x1xf32, #tpu.memory_space<vmem>>, vector<1x8x1xf32>
    %571 = vector.shape_cast %570 : vector<1x8x1xf32> to vector<8x1xf32>
    %572 = vector.extract_strided_slice %569 {offsets = [0, 0], sizes = [1, 256], strides = [1, 1]} : vector<8x256xf32> to vector<1x256xf32>
    %573 = vector.broadcast %571 : vector<8x1xf32> to vector<8x256xf32>
    %574 = vector.broadcast %572 : vector<1x256xf32> to vector<8x256xf32>
    %575 = arith.mulf %573, %574 : vector<8x256xf32>
    %576 = arith.addf %568, %575 : vector<8x256xf32>
    %c9_234 = arith.constant 9 : index
    %c0_235 = arith.constant 0 : index
    %c0_236 = arith.constant 0 : index
    %577 = vector.load %arg13[%c9_234, %c0_235, %c0_236] : memref<72x8x1xf32, #tpu.memory_space<vmem>>, vector<1x8x1xf32>
    %578 = vector.shape_cast %577 : vector<1x8x1xf32> to vector<8x1xf32>
    %579 = vector.extract_strided_slice %569 {offsets = [1, 0], sizes = [1, 256], strides = [1, 1]} : vector<8x256xf32> to vector<1x256xf32>
    %580 = vector.broadcast %578 : vector<8x1xf32> to vector<8x256xf32>
    %581 = vector.broadcast %579 : vector<1x256xf32> to vector<8x256xf32>
    %582 = arith.mulf %580, %581 : vector<8x256xf32>
    %583 = arith.addf %576, %582 : vector<8x256xf32>
    %c10_237 = arith.constant 10 : index
    %c0_238 = arith.constant 0 : index
    %c0_239 = arith.constant 0 : index
    %584 = vector.load %arg13[%c10_237, %c0_238, %c0_239] : memref<72x8x1xf32, #tpu.memory_space<vmem>>, vector<1x8x1xf32>
    %585 = vector.shape_cast %584 : vector<1x8x1xf32> to vector<8x1xf32>
    %586 = vector.extract_strided_slice %569 {offsets = [2, 0], sizes = [1, 256], strides = [1, 1]} : vector<8x256xf32> to vector<1x256xf32>
    %587 = vector.broadcast %585 : vector<8x1xf32> to vector<8x256xf32>
    %588 = vector.broadcast %586 : vector<1x256xf32> to vector<8x256xf32>
    %589 = arith.mulf %587, %588 : vector<8x256xf32>
    %590 = arith.addf %583, %589 : vector<8x256xf32>
    %c11_240 = arith.constant 11 : index
    %c0_241 = arith.constant 0 : index
    %c0_242 = arith.constant 0 : index
    %591 = vector.load %arg13[%c11_240, %c0_241, %c0_242] : memref<72x8x1xf32, #tpu.memory_space<vmem>>, vector<1x8x1xf32>
    %592 = vector.shape_cast %591 : vector<1x8x1xf32> to vector<8x1xf32>
    %593 = vector.extract_strided_slice %569 {offsets = [3, 0], sizes = [1, 256], strides = [1, 1]} : vector<8x256xf32> to vector<1x256xf32>
    %594 = vector.broadcast %592 : vector<8x1xf32> to vector<8x256xf32>
    %595 = vector.broadcast %593 : vector<1x256xf32> to vector<8x256xf32>
    %596 = arith.mulf %594, %595 : vector<8x256xf32>
    %597 = arith.addf %590, %596 : vector<8x256xf32>
    %c12_243 = arith.constant 12 : index
    %c0_244 = arith.constant 0 : index
    %c0_245 = arith.constant 0 : index
    %598 = vector.load %arg13[%c12_243, %c0_244, %c0_245] : memref<72x8x1xf32, #tpu.memory_space<vmem>>, vector<1x8x1xf32>
    %599 = vector.shape_cast %598 : vector<1x8x1xf32> to vector<8x1xf32>
    %600 = vector.extract_strided_slice %569 {offsets = [4, 0], sizes = [1, 256], strides = [1, 1]} : vector<8x256xf32> to vector<1x256xf32>
    %601 = vector.broadcast %599 : vector<8x1xf32> to vector<8x256xf32>
    %602 = vector.broadcast %600 : vector<1x256xf32> to vector<8x256xf32>
    %603 = arith.mulf %601, %602 : vector<8x256xf32>
    %604 = arith.addf %597, %603 : vector<8x256xf32>
    %c13_246 = arith.constant 13 : index
    %c0_247 = arith.constant 0 : index
    %c0_248 = arith.constant 0 : index
    %605 = vector.load %arg13[%c13_246, %c0_247, %c0_248] : memref<72x8x1xf32, #tpu.memory_space<vmem>>, vector<1x8x1xf32>
    %606 = vector.shape_cast %605 : vector<1x8x1xf32> to vector<8x1xf32>
    %607 = vector.extract_strided_slice %569 {offsets = [5, 0], sizes = [1, 256], strides = [1, 1]} : vector<8x256xf32> to vector<1x256xf32>
    %608 = vector.broadcast %606 : vector<8x1xf32> to vector<8x256xf32>
    %609 = vector.broadcast %607 : vector<1x256xf32> to vector<8x256xf32>
    %610 = arith.mulf %608, %609 : vector<8x256xf32>
    %611 = arith.addf %604, %610 : vector<8x256xf32>
    %c14_249 = arith.constant 14 : index
    %c0_250 = arith.constant 0 : index
    %c0_251 = arith.constant 0 : index
    %612 = vector.load %arg13[%c14_249, %c0_250, %c0_251] : memref<72x8x1xf32, #tpu.memory_space<vmem>>, vector<1x8x1xf32>
    %613 = vector.shape_cast %612 : vector<1x8x1xf32> to vector<8x1xf32>
    %614 = vector.extract_strided_slice %569 {offsets = [6, 0], sizes = [1, 256], strides = [1, 1]} : vector<8x256xf32> to vector<1x256xf32>
    %615 = vector.broadcast %613 : vector<8x1xf32> to vector<8x256xf32>
    %616 = vector.broadcast %614 : vector<1x256xf32> to vector<8x256xf32>
    %617 = arith.mulf %615, %616 : vector<8x256xf32>
    %618 = arith.addf %611, %617 : vector<8x256xf32>
    %c15_252 = arith.constant 15 : index
    %c0_253 = arith.constant 0 : index
    %c0_254 = arith.constant 0 : index
    %619 = vector.load %arg13[%c15_252, %c0_253, %c0_254] : memref<72x8x1xf32, #tpu.memory_space<vmem>>, vector<1x8x1xf32>
    %620 = vector.shape_cast %619 : vector<1x8x1xf32> to vector<8x1xf32>
    %621 = vector.extract_strided_slice %569 {offsets = [7, 0], sizes = [1, 256], strides = [1, 1]} : vector<8x256xf32> to vector<1x256xf32>
    %622 = vector.broadcast %620 : vector<8x1xf32> to vector<8x256xf32>
    %623 = vector.broadcast %621 : vector<1x256xf32> to vector<8x256xf32>
    %624 = arith.mulf %622, %623 : vector<8x256xf32>
    %625 = arith.addf %618, %624 : vector<8x256xf32>
    %c0_255 = arith.constant 0 : index
    %c113_256 = arith.constant 113 : index
    %626 = vector.load %arg19[%c0_255, %c113_256] : memref<8x512xf32, #tpu.memory_space<vmem>>, vector<8x256xf32>
    %c1_257 = arith.constant 1 : index
    %c0_258 = arith.constant 0 : index
    %c0_259 = arith.constant 0 : index
    %627 = vector.load %arg17[%c1_257, %c0_258, %c0_259] : memref<2x1x256xf32, #tpu.memory_space<vmem>>, vector<1x1x256xf32>
    %628 = vector.shape_cast %627 : vector<1x1x256xf32> to vector<1x256xf32>
    %629 = vector.broadcast %628 : vector<1x256xf32> to vector<8x256xf32>
    %630 = arith.mulf %626, %629 : vector<8x256xf32>
    %c16_260 = arith.constant 16 : index
    %c0_261 = arith.constant 0 : index
    %c0_262 = arith.constant 0 : index
    %631 = vector.load %arg13[%c16_260, %c0_261, %c0_262] : memref<72x8x1xf32, #tpu.memory_space<vmem>>, vector<1x8x1xf32>
    %632 = vector.shape_cast %631 : vector<1x8x1xf32> to vector<8x1xf32>
    %633 = vector.extract_strided_slice %630 {offsets = [0, 0], sizes = [1, 256], strides = [1, 1]} : vector<8x256xf32> to vector<1x256xf32>
    %634 = vector.broadcast %632 : vector<8x1xf32> to vector<8x256xf32>
    %635 = vector.broadcast %633 : vector<1x256xf32> to vector<8x256xf32>
    %636 = arith.mulf %634, %635 : vector<8x256xf32>
    %637 = arith.addf %625, %636 : vector<8x256xf32>
    %c17_263 = arith.constant 17 : index
    %c0_264 = arith.constant 0 : index
    %c0_265 = arith.constant 0 : index
    %638 = vector.load %arg13[%c17_263, %c0_264, %c0_265] : memref<72x8x1xf32, #tpu.memory_space<vmem>>, vector<1x8x1xf32>
    %639 = vector.shape_cast %638 : vector<1x8x1xf32> to vector<8x1xf32>
    %640 = vector.extract_strided_slice %630 {offsets = [1, 0], sizes = [1, 256], strides = [1, 1]} : vector<8x256xf32> to vector<1x256xf32>
    %641 = vector.broadcast %639 : vector<8x1xf32> to vector<8x256xf32>
    %642 = vector.broadcast %640 : vector<1x256xf32> to vector<8x256xf32>
    %643 = arith.mulf %641, %642 : vector<8x256xf32>
    %644 = arith.addf %637, %643 : vector<8x256xf32>
    %c18_266 = arith.constant 18 : index
    %c0_267 = arith.constant 0 : index
    %c0_268 = arith.constant 0 : index
    %645 = vector.load %arg13[%c18_266, %c0_267, %c0_268] : memref<72x8x1xf32, #tpu.memory_space<vmem>>, vector<1x8x1xf32>
    %646 = vector.shape_cast %645 : vector<1x8x1xf32> to vector<8x1xf32>
    %647 = vector.extract_strided_slice %630 {offsets = [2, 0], sizes = [1, 256], strides = [1, 1]} : vector<8x256xf32> to vector<1x256xf32>
    %648 = vector.broadcast %646 : vector<8x1xf32> to vector<8x256xf32>
    %649 = vector.broadcast %647 : vector<1x256xf32> to vector<8x256xf32>
    %650 = arith.mulf %648, %649 : vector<8x256xf32>
    %651 = arith.addf %644, %650 : vector<8x256xf32>
    %c19_269 = arith.constant 19 : index
    %c0_270 = arith.constant 0 : index
    %c0_271 = arith.constant 0 : index
    %652 = vector.load %arg13[%c19_269, %c0_270, %c0_271] : memref<72x8x1xf32, #tpu.memory_space<vmem>>, vector<1x8x1xf32>
    %653 = vector.shape_cast %652 : vector<1x8x1xf32> to vector<8x1xf32>
    %654 = vector.extract_strided_slice %630 {offsets = [3, 0], sizes = [1, 256], strides = [1, 1]} : vector<8x256xf32> to vector<1x256xf32>
    %655 = vector.broadcast %653 : vector<8x1xf32> to vector<8x256xf32>
    %656 = vector.broadcast %654 : vector<1x256xf32> to vector<8x256xf32>
    %657 = arith.mulf %655, %656 : vector<8x256xf32>
    %658 = arith.addf %651, %657 : vector<8x256xf32>
    %c20_272 = arith.constant 20 : index
    %c0_273 = arith.constant 0 : index
    %c0_274 = arith.constant 0 : index
    %659 = vector.load %arg13[%c20_272, %c0_273, %c0_274] : memref<72x8x1xf32, #tpu.memory_space<vmem>>, vector<1x8x1xf32>
    %660 = vector.shape_cast %659 : vector<1x8x1xf32> to vector<8x1xf32>
    %661 = vector.extract_strided_slice %630 {offsets = [4, 0], sizes = [1, 256], strides = [1, 1]} : vector<8x256xf32> to vector<1x256xf32>
    %662 = vector.broadcast %660 : vector<8x1xf32> to vector<8x256xf32>
    %663 = vector.broadcast %661 : vector<1x256xf32> to vector<8x256xf32>
    %664 = arith.mulf %662, %663 : vector<8x256xf32>
    %665 = arith.addf %658, %664 : vector<8x256xf32>
    %c21_275 = arith.constant 21 : index
    %c0_276 = arith.constant 0 : index
    %c0_277 = arith.constant 0 : index
    %666 = vector.load %arg13[%c21_275, %c0_276, %c0_277] : memref<72x8x1xf32, #tpu.memory_space<vmem>>, vector<1x8x1xf32>
    %667 = vector.shape_cast %666 : vector<1x8x1xf32> to vector<8x1xf32>
    %668 = vector.extract_strided_slice %630 {offsets = [5, 0], sizes = [1, 256], strides = [1, 1]} : vector<8x256xf32> to vector<1x256xf32>
    %669 = vector.broadcast %667 : vector<8x1xf32> to vector<8x256xf32>
    %670 = vector.broadcast %668 : vector<1x256xf32> to vector<8x256xf32>
    %671 = arith.mulf %669, %670 : vector<8x256xf32>
    %672 = arith.addf %665, %671 : vector<8x256xf32>
    %c22_278 = arith.constant 22 : index
    %c0_279 = arith.constant 0 : index
    %c0_280 = arith.constant 0 : index
    %673 = vector.load %arg13[%c22_278, %c0_279, %c0_280] : memref<72x8x1xf32, #tpu.memory_space<vmem>>, vector<1x8x1xf32>
    %674 = vector.shape_cast %673 : vector<1x8x1xf32> to vector<8x1xf32>
    %675 = vector.extract_strided_slice %630 {offsets = [6, 0], sizes = [1, 256], strides = [1, 1]} : vector<8x256xf32> to vector<1x256xf32>
    %676 = vector.broadcast %674 : vector<8x1xf32> to vector<8x256xf32>
    %677 = vector.broadcast %675 : vector<1x256xf32> to vector<8x256xf32>
    %678 = arith.mulf %676, %677 : vector<8x256xf32>
    %679 = arith.addf %672, %678 : vector<8x256xf32>
    %c23_281 = arith.constant 23 : index
    %c0_282 = arith.constant 0 : index
    %c0_283 = arith.constant 0 : index
    %680 = vector.load %arg13[%c23_281, %c0_282, %c0_283] : memref<72x8x1xf32, #tpu.memory_space<vmem>>, vector<1x8x1xf32>
    %681 = vector.shape_cast %680 : vector<1x8x1xf32> to vector<8x1xf32>
    %682 = vector.extract_strided_slice %630 {offsets = [7, 0], sizes = [1, 256], strides = [1, 1]} : vector<8x256xf32> to vector<1x256xf32>
    %683 = vector.broadcast %681 : vector<8x1xf32> to vector<8x256xf32>
    %684 = vector.broadcast %682 : vector<1x256xf32> to vector<8x256xf32>
    %685 = arith.mulf %683, %684 : vector<8x256xf32>
    %686 = arith.addf %679, %685 : vector<8x256xf32>
    %c0_284 = arith.constant 0 : index
    %c127_285 = arith.constant 127 : index
    %687 = vector.load %arg19[%c0_284, %c127_285] : memref<8x512xf32, #tpu.memory_space<vmem>>, vector<8x256xf32>
    %c0_286 = arith.constant 0 : index
    %c0_287 = arith.constant 0 : index
    %c0_288 = arith.constant 0 : index
    %688 = vector.load %arg17[%c0_286, %c0_287, %c0_288] : memref<2x1x256xf32, #tpu.memory_space<vmem>>, vector<1x1x256xf32>
    %689 = vector.shape_cast %688 : vector<1x1x256xf32> to vector<1x256xf32>
    %690 = vector.broadcast %689 : vector<1x256xf32> to vector<8x256xf32>
    %691 = arith.mulf %687, %690 : vector<8x256xf32>
    %c24_289 = arith.constant 24 : index
    %c0_290 = arith.constant 0 : index
    %c0_291 = arith.constant 0 : index
    %692 = vector.load %arg13[%c24_289, %c0_290, %c0_291] : memref<72x8x1xf32, #tpu.memory_space<vmem>>, vector<1x8x1xf32>
    %693 = vector.shape_cast %692 : vector<1x8x1xf32> to vector<8x1xf32>
    %694 = vector.extract_strided_slice %691 {offsets = [0, 0], sizes = [1, 256], strides = [1, 1]} : vector<8x256xf32> to vector<1x256xf32>
    %695 = vector.broadcast %693 : vector<8x1xf32> to vector<8x256xf32>
    %696 = vector.broadcast %694 : vector<1x256xf32> to vector<8x256xf32>
    %697 = arith.mulf %695, %696 : vector<8x256xf32>
    %698 = arith.addf %686, %697 : vector<8x256xf32>
    %c25_292 = arith.constant 25 : index
    %c0_293 = arith.constant 0 : index
    %c0_294 = arith.constant 0 : index
    %699 = vector.load %arg13[%c25_292, %c0_293, %c0_294] : memref<72x8x1xf32, #tpu.memory_space<vmem>>, vector<1x8x1xf32>
    %700 = vector.shape_cast %699 : vector<1x8x1xf32> to vector<8x1xf32>
    %701 = vector.extract_strided_slice %691 {offsets = [1, 0], sizes = [1, 256], strides = [1, 1]} : vector<8x256xf32> to vector<1x256xf32>
    %702 = vector.broadcast %700 : vector<8x1xf32> to vector<8x256xf32>
    %703 = vector.broadcast %701 : vector<1x256xf32> to vector<8x256xf32>
    %704 = arith.mulf %702, %703 : vector<8x256xf32>
    %705 = arith.addf %698, %704 : vector<8x256xf32>
    %c26_295 = arith.constant 26 : index
    %c0_296 = arith.constant 0 : index
    %c0_297 = arith.constant 0 : index
    %706 = vector.load %arg13[%c26_295, %c0_296, %c0_297] : memref<72x8x1xf32, #tpu.memory_space<vmem>>, vector<1x8x1xf32>
    %707 = vector.shape_cast %706 : vector<1x8x1xf32> to vector<8x1xf32>
    %708 = vector.extract_strided_slice %691 {offsets = [2, 0], sizes = [1, 256], strides = [1, 1]} : vector<8x256xf32> to vector<1x256xf32>
    %709 = vector.broadcast %707 : vector<8x1xf32> to vector<8x256xf32>
    %710 = vector.broadcast %708 : vector<1x256xf32> to vector<8x256xf32>
    %711 = arith.mulf %709, %710 : vector<8x256xf32>
    %712 = arith.addf %705, %711 : vector<8x256xf32>
    %c27_298 = arith.constant 27 : index
    %c0_299 = arith.constant 0 : index
    %c0_300 = arith.constant 0 : index
    %713 = vector.load %arg13[%c27_298, %c0_299, %c0_300] : memref<72x8x1xf32, #tpu.memory_space<vmem>>, vector<1x8x1xf32>
    %714 = vector.shape_cast %713 : vector<1x8x1xf32> to vector<8x1xf32>
    %715 = vector.extract_strided_slice %691 {offsets = [3, 0], sizes = [1, 256], strides = [1, 1]} : vector<8x256xf32> to vector<1x256xf32>
    %716 = vector.broadcast %714 : vector<8x1xf32> to vector<8x256xf32>
    %717 = vector.broadcast %715 : vector<1x256xf32> to vector<8x256xf32>
    %718 = arith.mulf %716, %717 : vector<8x256xf32>
    %719 = arith.addf %712, %718 : vector<8x256xf32>
    %c28_301 = arith.constant 28 : index
    %c0_302 = arith.constant 0 : index
    %c0_303 = arith.constant 0 : index
    %720 = vector.load %arg13[%c28_301, %c0_302, %c0_303] : memref<72x8x1xf32, #tpu.memory_space<vmem>>, vector<1x8x1xf32>
    %721 = vector.shape_cast %720 : vector<1x8x1xf32> to vector<8x1xf32>
    %722 = vector.extract_strided_slice %691 {offsets = [4, 0], sizes = [1, 256], strides = [1, 1]} : vector<8x256xf32> to vector<1x256xf32>
    %723 = vector.broadcast %721 : vector<8x1xf32> to vector<8x256xf32>
    %724 = vector.broadcast %722 : vector<1x256xf32> to vector<8x256xf32>
    %725 = arith.mulf %723, %724 : vector<8x256xf32>
    %726 = arith.addf %719, %725 : vector<8x256xf32>
    %c29_304 = arith.constant 29 : index
    %c0_305 = arith.constant 0 : index
    %c0_306 = arith.constant 0 : index
    %727 = vector.load %arg13[%c29_304, %c0_305, %c0_306] : memref<72x8x1xf32, #tpu.memory_space<vmem>>, vector<1x8x1xf32>
    %728 = vector.shape_cast %727 : vector<1x8x1xf32> to vector<8x1xf32>
    %729 = vector.extract_strided_slice %691 {offsets = [5, 0], sizes = [1, 256], strides = [1, 1]} : vector<8x256xf32> to vector<1x256xf32>
    %730 = vector.broadcast %728 : vector<8x1xf32> to vector<8x256xf32>
    %731 = vector.broadcast %729 : vector<1x256xf32> to vector<8x256xf32>
    %732 = arith.mulf %730, %731 : vector<8x256xf32>
    %733 = arith.addf %726, %732 : vector<8x256xf32>
    %c30_307 = arith.constant 30 : index
    %c0_308 = arith.constant 0 : index
    %c0_309 = arith.constant 0 : index
    %734 = vector.load %arg13[%c30_307, %c0_308, %c0_309] : memref<72x8x1xf32, #tpu.memory_space<vmem>>, vector<1x8x1xf32>
    %735 = vector.shape_cast %734 : vector<1x8x1xf32> to vector<8x1xf32>
    %736 = vector.extract_strided_slice %691 {offsets = [6, 0], sizes = [1, 256], strides = [1, 1]} : vector<8x256xf32> to vector<1x256xf32>
    %737 = vector.broadcast %735 : vector<8x1xf32> to vector<8x256xf32>
    %738 = vector.broadcast %736 : vector<1x256xf32> to vector<8x256xf32>
    %739 = arith.mulf %737, %738 : vector<8x256xf32>
    %740 = arith.addf %733, %739 : vector<8x256xf32>
    %c31_310 = arith.constant 31 : index
    %c0_311 = arith.constant 0 : index
    %c0_312 = arith.constant 0 : index
    %741 = vector.load %arg13[%c31_310, %c0_311, %c0_312] : memref<72x8x1xf32, #tpu.memory_space<vmem>>, vector<1x8x1xf32>
    %742 = vector.shape_cast %741 : vector<1x8x1xf32> to vector<8x1xf32>
    %743 = vector.extract_strided_slice %691 {offsets = [7, 0], sizes = [1, 256], strides = [1, 1]} : vector<8x256xf32> to vector<1x256xf32>
    %744 = vector.broadcast %742 : vector<8x1xf32> to vector<8x256xf32>
    %745 = vector.broadcast %743 : vector<1x256xf32> to vector<8x256xf32>
    %746 = arith.mulf %744, %745 : vector<8x256xf32>
    %747 = arith.addf %740, %746 : vector<8x256xf32>
    %c0_313 = arith.constant 0 : index
    %c128_314 = arith.constant 128 : index
    %748 = vector.load %arg19[%c0_313, %c128_314] : memref<8x512xf32, #tpu.memory_space<vmem>>, vector<8x256xf32>
    %c32_315 = arith.constant 32 : index
    %c0_316 = arith.constant 0 : index
    %c0_317 = arith.constant 0 : index
    %749 = vector.load %arg13[%c32_315, %c0_316, %c0_317] : memref<72x8x1xf32, #tpu.memory_space<vmem>>, vector<1x8x1xf32>
    %750 = vector.shape_cast %749 : vector<1x8x1xf32> to vector<8x1xf32>
    %751 = vector.extract_strided_slice %748 {offsets = [0, 0], sizes = [1, 256], strides = [1, 1]} : vector<8x256xf32> to vector<1x256xf32>
    %752 = vector.broadcast %750 : vector<8x1xf32> to vector<8x256xf32>
    %753 = vector.broadcast %751 : vector<1x256xf32> to vector<8x256xf32>
    %754 = arith.mulf %752, %753 : vector<8x256xf32>
    %755 = arith.addf %747, %754 : vector<8x256xf32>
    %c33_318 = arith.constant 33 : index
    %c0_319 = arith.constant 0 : index
    %c0_320 = arith.constant 0 : index
    %756 = vector.load %arg13[%c33_318, %c0_319, %c0_320] : memref<72x8x1xf32, #tpu.memory_space<vmem>>, vector<1x8x1xf32>
    %757 = vector.shape_cast %756 : vector<1x8x1xf32> to vector<8x1xf32>
    %758 = vector.extract_strided_slice %748 {offsets = [1, 0], sizes = [1, 256], strides = [1, 1]} : vector<8x256xf32> to vector<1x256xf32>
    %759 = vector.broadcast %757 : vector<8x1xf32> to vector<8x256xf32>
    %760 = vector.broadcast %758 : vector<1x256xf32> to vector<8x256xf32>
    %761 = arith.mulf %759, %760 : vector<8x256xf32>
    %762 = arith.addf %755, %761 : vector<8x256xf32>
    %c34_321 = arith.constant 34 : index
    %c0_322 = arith.constant 0 : index
    %c0_323 = arith.constant 0 : index
    %763 = vector.load %arg13[%c34_321, %c0_322, %c0_323] : memref<72x8x1xf32, #tpu.memory_space<vmem>>, vector<1x8x1xf32>
    %764 = vector.shape_cast %763 : vector<1x8x1xf32> to vector<8x1xf32>
    %765 = vector.extract_strided_slice %748 {offsets = [2, 0], sizes = [1, 256], strides = [1, 1]} : vector<8x256xf32> to vector<1x256xf32>
    %766 = vector.broadcast %764 : vector<8x1xf32> to vector<8x256xf32>
    %767 = vector.broadcast %765 : vector<1x256xf32> to vector<8x256xf32>
    %768 = arith.mulf %766, %767 : vector<8x256xf32>
    %769 = arith.addf %762, %768 : vector<8x256xf32>
    %c35_324 = arith.constant 35 : index
    %c0_325 = arith.constant 0 : index
    %c0_326 = arith.constant 0 : index
    %770 = vector.load %arg13[%c35_324, %c0_325, %c0_326] : memref<72x8x1xf32, #tpu.memory_space<vmem>>, vector<1x8x1xf32>
    %771 = vector.shape_cast %770 : vector<1x8x1xf32> to vector<8x1xf32>
    %772 = vector.extract_strided_slice %748 {offsets = [3, 0], sizes = [1, 256], strides = [1, 1]} : vector<8x256xf32> to vector<1x256xf32>
    %773 = vector.broadcast %771 : vector<8x1xf32> to vector<8x256xf32>
    %774 = vector.broadcast %772 : vector<1x256xf32> to vector<8x256xf32>
    %775 = arith.mulf %773, %774 : vector<8x256xf32>
    %776 = arith.addf %769, %775 : vector<8x256xf32>
    %c36 = arith.constant 36 : index
    %c0_327 = arith.constant 0 : index
    %c0_328 = arith.constant 0 : index
    %777 = vector.load %arg13[%c36, %c0_327, %c0_328] : memref<72x8x1xf32, #tpu.memory_space<vmem>>, vector<1x8x1xf32>
    %778 = vector.shape_cast %777 : vector<1x8x1xf32> to vector<8x1xf32>
    %779 = vector.extract_strided_slice %748 {offsets = [4, 0], sizes = [1, 256], strides = [1, 1]} : vector<8x256xf32> to vector<1x256xf32>
    %780 = vector.broadcast %778 : vector<8x1xf32> to vector<8x256xf32>
    %781 = vector.broadcast %779 : vector<1x256xf32> to vector<8x256xf32>
    %782 = arith.mulf %780, %781 : vector<8x256xf32>
    %783 = arith.addf %776, %782 : vector<8x256xf32>
    %c37 = arith.constant 37 : index
    %c0_329 = arith.constant 0 : index
    %c0_330 = arith.constant 0 : index
    %784 = vector.load %arg13[%c37, %c0_329, %c0_330] : memref<72x8x1xf32, #tpu.memory_space<vmem>>, vector<1x8x1xf32>
    %785 = vector.shape_cast %784 : vector<1x8x1xf32> to vector<8x1xf32>
    %786 = vector.extract_strided_slice %748 {offsets = [5, 0], sizes = [1, 256], strides = [1, 1]} : vector<8x256xf32> to vector<1x256xf32>
    %787 = vector.broadcast %785 : vector<8x1xf32> to vector<8x256xf32>
    %788 = vector.broadcast %786 : vector<1x256xf32> to vector<8x256xf32>
    %789 = arith.mulf %787, %788 : vector<8x256xf32>
    %790 = arith.addf %783, %789 : vector<8x256xf32>
    %c38 = arith.constant 38 : index
    %c0_331 = arith.constant 0 : index
    %c0_332 = arith.constant 0 : index
    %791 = vector.load %arg13[%c38, %c0_331, %c0_332] : memref<72x8x1xf32, #tpu.memory_space<vmem>>, vector<1x8x1xf32>
    %792 = vector.shape_cast %791 : vector<1x8x1xf32> to vector<8x1xf32>
    %793 = vector.extract_strided_slice %748 {offsets = [6, 0], sizes = [1, 256], strides = [1, 1]} : vector<8x256xf32> to vector<1x256xf32>
    %794 = vector.broadcast %792 : vector<8x1xf32> to vector<8x256xf32>
    %795 = vector.broadcast %793 : vector<1x256xf32> to vector<8x256xf32>
    %796 = arith.mulf %794, %795 : vector<8x256xf32>
    %797 = arith.addf %790, %796 : vector<8x256xf32>
    %c39 = arith.constant 39 : index
    %c0_333 = arith.constant 0 : index
    %c0_334 = arith.constant 0 : index
    %798 = vector.load %arg13[%c39, %c0_333, %c0_334] : memref<72x8x1xf32, #tpu.memory_space<vmem>>, vector<1x8x1xf32>
    %799 = vector.shape_cast %798 : vector<1x8x1xf32> to vector<8x1xf32>
    %800 = vector.extract_strided_slice %748 {offsets = [7, 0], sizes = [1, 256], strides = [1, 1]} : vector<8x256xf32> to vector<1x256xf32>
    %801 = vector.broadcast %799 : vector<8x1xf32> to vector<8x256xf32>
    %802 = vector.broadcast %800 : vector<1x256xf32> to vector<8x256xf32>
    %803 = arith.mulf %801, %802 : vector<8x256xf32>
    %804 = arith.addf %797, %803 : vector<8x256xf32>
    %c0_335 = arith.constant 0 : index
    %c129_336 = arith.constant 129 : index
    %805 = vector.load %arg19[%c0_335, %c129_336] : memref<8x512xf32, #tpu.memory_space<vmem>>, vector<8x256xf32>
    %c1_337 = arith.constant 1 : index
    %c0_338 = arith.constant 0 : index
    %c0_339 = arith.constant 0 : index
    %806 = vector.load %arg17[%c1_337, %c0_338, %c0_339] : memref<2x1x256xf32, #tpu.memory_space<vmem>>, vector<1x1x256xf32>
    %807 = vector.shape_cast %806 : vector<1x1x256xf32> to vector<1x256xf32>
    %808 = vector.broadcast %807 : vector<1x256xf32> to vector<8x256xf32>
    %809 = arith.mulf %805, %808 : vector<8x256xf32>
    %c40 = arith.constant 40 : index
    %c0_340 = arith.constant 0 : index
    %c0_341 = arith.constant 0 : index
    %810 = vector.load %arg13[%c40, %c0_340, %c0_341] : memref<72x8x1xf32, #tpu.memory_space<vmem>>, vector<1x8x1xf32>
    %811 = vector.shape_cast %810 : vector<1x8x1xf32> to vector<8x1xf32>
    %812 = vector.extract_strided_slice %809 {offsets = [0, 0], sizes = [1, 256], strides = [1, 1]} : vector<8x256xf32> to vector<1x256xf32>
    %813 = vector.broadcast %811 : vector<8x1xf32> to vector<8x256xf32>
    %814 = vector.broadcast %812 : vector<1x256xf32> to vector<8x256xf32>
    %815 = arith.mulf %813, %814 : vector<8x256xf32>
    %816 = arith.addf %804, %815 : vector<8x256xf32>
    %c41 = arith.constant 41 : index
    %c0_342 = arith.constant 0 : index
    %c0_343 = arith.constant 0 : index
    %817 = vector.load %arg13[%c41, %c0_342, %c0_343] : memref<72x8x1xf32, #tpu.memory_space<vmem>>, vector<1x8x1xf32>
    %818 = vector.shape_cast %817 : vector<1x8x1xf32> to vector<8x1xf32>
    %819 = vector.extract_strided_slice %809 {offsets = [1, 0], sizes = [1, 256], strides = [1, 1]} : vector<8x256xf32> to vector<1x256xf32>
    %820 = vector.broadcast %818 : vector<8x1xf32> to vector<8x256xf32>
    %821 = vector.broadcast %819 : vector<1x256xf32> to vector<8x256xf32>
    %822 = arith.mulf %820, %821 : vector<8x256xf32>
    %823 = arith.addf %816, %822 : vector<8x256xf32>
    %c42 = arith.constant 42 : index
    %c0_344 = arith.constant 0 : index
    %c0_345 = arith.constant 0 : index
    %824 = vector.load %arg13[%c42, %c0_344, %c0_345] : memref<72x8x1xf32, #tpu.memory_space<vmem>>, vector<1x8x1xf32>
    %825 = vector.shape_cast %824 : vector<1x8x1xf32> to vector<8x1xf32>
    %826 = vector.extract_strided_slice %809 {offsets = [2, 0], sizes = [1, 256], strides = [1, 1]} : vector<8x256xf32> to vector<1x256xf32>
    %827 = vector.broadcast %825 : vector<8x1xf32> to vector<8x256xf32>
    %828 = vector.broadcast %826 : vector<1x256xf32> to vector<8x256xf32>
    %829 = arith.mulf %827, %828 : vector<8x256xf32>
    %830 = arith.addf %823, %829 : vector<8x256xf32>
    %c43 = arith.constant 43 : index
    %c0_346 = arith.constant 0 : index
    %c0_347 = arith.constant 0 : index
    %831 = vector.load %arg13[%c43, %c0_346, %c0_347] : memref<72x8x1xf32, #tpu.memory_space<vmem>>, vector<1x8x1xf32>
    %832 = vector.shape_cast %831 : vector<1x8x1xf32> to vector<8x1xf32>
    %833 = vector.extract_strided_slice %809 {offsets = [3, 0], sizes = [1, 256], strides = [1, 1]} : vector<8x256xf32> to vector<1x256xf32>
    %834 = vector.broadcast %832 : vector<8x1xf32> to vector<8x256xf32>
    %835 = vector.broadcast %833 : vector<1x256xf32> to vector<8x256xf32>
    %836 = arith.mulf %834, %835 : vector<8x256xf32>
    %837 = arith.addf %830, %836 : vector<8x256xf32>
    %c44 = arith.constant 44 : index
    %c0_348 = arith.constant 0 : index
    %c0_349 = arith.constant 0 : index
    %838 = vector.load %arg13[%c44, %c0_348, %c0_349] : memref<72x8x1xf32, #tpu.memory_space<vmem>>, vector<1x8x1xf32>
    %839 = vector.shape_cast %838 : vector<1x8x1xf32> to vector<8x1xf32>
    %840 = vector.extract_strided_slice %809 {offsets = [4, 0], sizes = [1, 256], strides = [1, 1]} : vector<8x256xf32> to vector<1x256xf32>
    %841 = vector.broadcast %839 : vector<8x1xf32> to vector<8x256xf32>
    %842 = vector.broadcast %840 : vector<1x256xf32> to vector<8x256xf32>
    %843 = arith.mulf %841, %842 : vector<8x256xf32>
    %844 = arith.addf %837, %843 : vector<8x256xf32>
    %c45 = arith.constant 45 : index
    %c0_350 = arith.constant 0 : index
    %c0_351 = arith.constant 0 : index
    %845 = vector.load %arg13[%c45, %c0_350, %c0_351] : memref<72x8x1xf32, #tpu.memory_space<vmem>>, vector<1x8x1xf32>
    %846 = vector.shape_cast %845 : vector<1x8x1xf32> to vector<8x1xf32>
    %847 = vector.extract_strided_slice %809 {offsets = [5, 0], sizes = [1, 256], strides = [1, 1]} : vector<8x256xf32> to vector<1x256xf32>
    %848 = vector.broadcast %846 : vector<8x1xf32> to vector<8x256xf32>
    %849 = vector.broadcast %847 : vector<1x256xf32> to vector<8x256xf32>
    %850 = arith.mulf %848, %849 : vector<8x256xf32>
    %851 = arith.addf %844, %850 : vector<8x256xf32>
    %c46 = arith.constant 46 : index
    %c0_352 = arith.constant 0 : index
    %c0_353 = arith.constant 0 : index
    %852 = vector.load %arg13[%c46, %c0_352, %c0_353] : memref<72x8x1xf32, #tpu.memory_space<vmem>>, vector<1x8x1xf32>
    %853 = vector.shape_cast %852 : vector<1x8x1xf32> to vector<8x1xf32>
    %854 = vector.extract_strided_slice %809 {offsets = [6, 0], sizes = [1, 256], strides = [1, 1]} : vector<8x256xf32> to vector<1x256xf32>
    %855 = vector.broadcast %853 : vector<8x1xf32> to vector<8x256xf32>
    %856 = vector.broadcast %854 : vector<1x256xf32> to vector<8x256xf32>
    %857 = arith.mulf %855, %856 : vector<8x256xf32>
    %858 = arith.addf %851, %857 : vector<8x256xf32>
    %c47 = arith.constant 47 : index
    %c0_354 = arith.constant 0 : index
    %c0_355 = arith.constant 0 : index
    %859 = vector.load %arg13[%c47, %c0_354, %c0_355] : memref<72x8x1xf32, #tpu.memory_space<vmem>>, vector<1x8x1xf32>
    %860 = vector.shape_cast %859 : vector<1x8x1xf32> to vector<8x1xf32>
    %861 = vector.extract_strided_slice %809 {offsets = [7, 0], sizes = [1, 256], strides = [1, 1]} : vector<8x256xf32> to vector<1x256xf32>
    %862 = vector.broadcast %860 : vector<8x1xf32> to vector<8x256xf32>
    %863 = vector.broadcast %861 : vector<1x256xf32> to vector<8x256xf32>
    %864 = arith.mulf %862, %863 : vector<8x256xf32>
    %865 = arith.addf %858, %864 : vector<8x256xf32>
    %c0_356 = arith.constant 0 : index
    %c143_357 = arith.constant 143 : index
    %866 = vector.load %arg19[%c0_356, %c143_357] : memref<8x512xf32, #tpu.memory_space<vmem>>, vector<8x256xf32>
    %c0_358 = arith.constant 0 : index
    %c0_359 = arith.constant 0 : index
    %c0_360 = arith.constant 0 : index
    %867 = vector.load %arg17[%c0_358, %c0_359, %c0_360] : memref<2x1x256xf32, #tpu.memory_space<vmem>>, vector<1x1x256xf32>
    %868 = vector.shape_cast %867 : vector<1x1x256xf32> to vector<1x256xf32>
    %869 = vector.broadcast %868 : vector<1x256xf32> to vector<8x256xf32>
    %870 = arith.mulf %866, %869 : vector<8x256xf32>
    %c48 = arith.constant 48 : index
    %c0_361 = arith.constant 0 : index
    %c0_362 = arith.constant 0 : index
    %871 = vector.load %arg13[%c48, %c0_361, %c0_362] : memref<72x8x1xf32, #tpu.memory_space<vmem>>, vector<1x8x1xf32>
    %872 = vector.shape_cast %871 : vector<1x8x1xf32> to vector<8x1xf32>
    %873 = vector.extract_strided_slice %870 {offsets = [0, 0], sizes = [1, 256], strides = [1, 1]} : vector<8x256xf32> to vector<1x256xf32>
    %874 = vector.broadcast %872 : vector<8x1xf32> to vector<8x256xf32>
    %875 = vector.broadcast %873 : vector<1x256xf32> to vector<8x256xf32>
    %876 = arith.mulf %874, %875 : vector<8x256xf32>
    %877 = arith.addf %865, %876 : vector<8x256xf32>
    %c49 = arith.constant 49 : index
    %c0_363 = arith.constant 0 : index
    %c0_364 = arith.constant 0 : index
    %878 = vector.load %arg13[%c49, %c0_363, %c0_364] : memref<72x8x1xf32, #tpu.memory_space<vmem>>, vector<1x8x1xf32>
    %879 = vector.shape_cast %878 : vector<1x8x1xf32> to vector<8x1xf32>
    %880 = vector.extract_strided_slice %870 {offsets = [1, 0], sizes = [1, 256], strides = [1, 1]} : vector<8x256xf32> to vector<1x256xf32>
    %881 = vector.broadcast %879 : vector<8x1xf32> to vector<8x256xf32>
    %882 = vector.broadcast %880 : vector<1x256xf32> to vector<8x256xf32>
    %883 = arith.mulf %881, %882 : vector<8x256xf32>
    %884 = arith.addf %877, %883 : vector<8x256xf32>
    %c50 = arith.constant 50 : index
    %c0_365 = arith.constant 0 : index
    %c0_366 = arith.constant 0 : index
    %885 = vector.load %arg13[%c50, %c0_365, %c0_366] : memref<72x8x1xf32, #tpu.memory_space<vmem>>, vector<1x8x1xf32>
    %886 = vector.shape_cast %885 : vector<1x8x1xf32> to vector<8x1xf32>
    %887 = vector.extract_strided_slice %870 {offsets = [2, 0], sizes = [1, 256], strides = [1, 1]} : vector<8x256xf32> to vector<1x256xf32>
    %888 = vector.broadcast %886 : vector<8x1xf32> to vector<8x256xf32>
    %889 = vector.broadcast %887 : vector<1x256xf32> to vector<8x256xf32>
    %890 = arith.mulf %888, %889 : vector<8x256xf32>
    %891 = arith.addf %884, %890 : vector<8x256xf32>
    %c51 = arith.constant 51 : index
    %c0_367 = arith.constant 0 : index
    %c0_368 = arith.constant 0 : index
    %892 = vector.load %arg13[%c51, %c0_367, %c0_368] : memref<72x8x1xf32, #tpu.memory_space<vmem>>, vector<1x8x1xf32>
    %893 = vector.shape_cast %892 : vector<1x8x1xf32> to vector<8x1xf32>
    %894 = vector.extract_strided_slice %870 {offsets = [3, 0], sizes = [1, 256], strides = [1, 1]} : vector<8x256xf32> to vector<1x256xf32>
    %895 = vector.broadcast %893 : vector<8x1xf32> to vector<8x256xf32>
    %896 = vector.broadcast %894 : vector<1x256xf32> to vector<8x256xf32>
    %897 = arith.mulf %895, %896 : vector<8x256xf32>
    %898 = arith.addf %891, %897 : vector<8x256xf32>
    %c52 = arith.constant 52 : index
    %c0_369 = arith.constant 0 : index
    %c0_370 = arith.constant 0 : index
    %899 = vector.load %arg13[%c52, %c0_369, %c0_370] : memref<72x8x1xf32, #tpu.memory_space<vmem>>, vector<1x8x1xf32>
    %900 = vector.shape_cast %899 : vector<1x8x1xf32> to vector<8x1xf32>
    %901 = vector.extract_strided_slice %870 {offsets = [4, 0], sizes = [1, 256], strides = [1, 1]} : vector<8x256xf32> to vector<1x256xf32>
    %902 = vector.broadcast %900 : vector<8x1xf32> to vector<8x256xf32>
    %903 = vector.broadcast %901 : vector<1x256xf32> to vector<8x256xf32>
    %904 = arith.mulf %902, %903 : vector<8x256xf32>
    %905 = arith.addf %898, %904 : vector<8x256xf32>
    %c53 = arith.constant 53 : index
    %c0_371 = arith.constant 0 : index
    %c0_372 = arith.constant 0 : index
    %906 = vector.load %arg13[%c53, %c0_371, %c0_372] : memref<72x8x1xf32, #tpu.memory_space<vmem>>, vector<1x8x1xf32>
    %907 = vector.shape_cast %906 : vector<1x8x1xf32> to vector<8x1xf32>
    %908 = vector.extract_strided_slice %870 {offsets = [5, 0], sizes = [1, 256], strides = [1, 1]} : vector<8x256xf32> to vector<1x256xf32>
    %909 = vector.broadcast %907 : vector<8x1xf32> to vector<8x256xf32>
    %910 = vector.broadcast %908 : vector<1x256xf32> to vector<8x256xf32>
    %911 = arith.mulf %909, %910 : vector<8x256xf32>
    %912 = arith.addf %905, %911 : vector<8x256xf32>
    %c54 = arith.constant 54 : index
    %c0_373 = arith.constant 0 : index
    %c0_374 = arith.constant 0 : index
    %913 = vector.load %arg13[%c54, %c0_373, %c0_374] : memref<72x8x1xf32, #tpu.memory_space<vmem>>, vector<1x8x1xf32>
    %914 = vector.shape_cast %913 : vector<1x8x1xf32> to vector<8x1xf32>
    %915 = vector.extract_strided_slice %870 {offsets = [6, 0], sizes = [1, 256], strides = [1, 1]} : vector<8x256xf32> to vector<1x256xf32>
    %916 = vector.broadcast %914 : vector<8x1xf32> to vector<8x256xf32>
    %917 = vector.broadcast %915 : vector<1x256xf32> to vector<8x256xf32>
    %918 = arith.mulf %916, %917 : vector<8x256xf32>
    %919 = arith.addf %912, %918 : vector<8x256xf32>
    %c55 = arith.constant 55 : index
    %c0_375 = arith.constant 0 : index
    %c0_376 = arith.constant 0 : index
    %920 = vector.load %arg13[%c55, %c0_375, %c0_376] : memref<72x8x1xf32, #tpu.memory_space<vmem>>, vector<1x8x1xf32>
    %921 = vector.shape_cast %920 : vector<1x8x1xf32> to vector<8x1xf32>
    %922 = vector.extract_strided_slice %870 {offsets = [7, 0], sizes = [1, 256], strides = [1, 1]} : vector<8x256xf32> to vector<1x256xf32>
    %923 = vector.broadcast %921 : vector<8x1xf32> to vector<8x256xf32>
    %924 = vector.broadcast %922 : vector<1x256xf32> to vector<8x256xf32>
    %925 = arith.mulf %923, %924 : vector<8x256xf32>
    %926 = arith.addf %919, %925 : vector<8x256xf32>
    %c0_377 = arith.constant 0 : index
    %c144_378 = arith.constant 144 : index
    %927 = vector.load %arg19[%c0_377, %c144_378] : memref<8x512xf32, #tpu.memory_space<vmem>>, vector<8x256xf32>
    %c56 = arith.constant 56 : index
    %c0_379 = arith.constant 0 : index
    %c0_380 = arith.constant 0 : index
    %928 = vector.load %arg13[%c56, %c0_379, %c0_380] : memref<72x8x1xf32, #tpu.memory_space<vmem>>, vector<1x8x1xf32>
    %929 = vector.shape_cast %928 : vector<1x8x1xf32> to vector<8x1xf32>
    %930 = vector.extract_strided_slice %927 {offsets = [0, 0], sizes = [1, 256], strides = [1, 1]} : vector<8x256xf32> to vector<1x256xf32>
    %931 = vector.broadcast %929 : vector<8x1xf32> to vector<8x256xf32>
    %932 = vector.broadcast %930 : vector<1x256xf32> to vector<8x256xf32>
    %933 = arith.mulf %931, %932 : vector<8x256xf32>
    %934 = arith.addf %926, %933 : vector<8x256xf32>
    %c57 = arith.constant 57 : index
    %c0_381 = arith.constant 0 : index
    %c0_382 = arith.constant 0 : index
    %935 = vector.load %arg13[%c57, %c0_381, %c0_382] : memref<72x8x1xf32, #tpu.memory_space<vmem>>, vector<1x8x1xf32>
    %936 = vector.shape_cast %935 : vector<1x8x1xf32> to vector<8x1xf32>
    %937 = vector.extract_strided_slice %927 {offsets = [1, 0], sizes = [1, 256], strides = [1, 1]} : vector<8x256xf32> to vector<1x256xf32>
    %938 = vector.broadcast %936 : vector<8x1xf32> to vector<8x256xf32>
    %939 = vector.broadcast %937 : vector<1x256xf32> to vector<8x256xf32>
    %940 = arith.mulf %938, %939 : vector<8x256xf32>
    %941 = arith.addf %934, %940 : vector<8x256xf32>
    %c58 = arith.constant 58 : index
    %c0_383 = arith.constant 0 : index
    %c0_384 = arith.constant 0 : index
    %942 = vector.load %arg13[%c58, %c0_383, %c0_384] : memref<72x8x1xf32, #tpu.memory_space<vmem>>, vector<1x8x1xf32>
    %943 = vector.shape_cast %942 : vector<1x8x1xf32> to vector<8x1xf32>
    %944 = vector.extract_strided_slice %927 {offsets = [2, 0], sizes = [1, 256], strides = [1, 1]} : vector<8x256xf32> to vector<1x256xf32>
    %945 = vector.broadcast %943 : vector<8x1xf32> to vector<8x256xf32>
    %946 = vector.broadcast %944 : vector<1x256xf32> to vector<8x256xf32>
    %947 = arith.mulf %945, %946 : vector<8x256xf32>
    %948 = arith.addf %941, %947 : vector<8x256xf32>
    %c59 = arith.constant 59 : index
    %c0_385 = arith.constant 0 : index
    %c0_386 = arith.constant 0 : index
    %949 = vector.load %arg13[%c59, %c0_385, %c0_386] : memref<72x8x1xf32, #tpu.memory_space<vmem>>, vector<1x8x1xf32>
    %950 = vector.shape_cast %949 : vector<1x8x1xf32> to vector<8x1xf32>
    %951 = vector.extract_strided_slice %927 {offsets = [3, 0], sizes = [1, 256], strides = [1, 1]} : vector<8x256xf32> to vector<1x256xf32>
    %952 = vector.broadcast %950 : vector<8x1xf32> to vector<8x256xf32>
    %953 = vector.broadcast %951 : vector<1x256xf32> to vector<8x256xf32>
    %954 = arith.mulf %952, %953 : vector<8x256xf32>
    %955 = arith.addf %948, %954 : vector<8x256xf32>
    %c60 = arith.constant 60 : index
    %c0_387 = arith.constant 0 : index
    %c0_388 = arith.constant 0 : index
    %956 = vector.load %arg13[%c60, %c0_387, %c0_388] : memref<72x8x1xf32, #tpu.memory_space<vmem>>, vector<1x8x1xf32>
    %957 = vector.shape_cast %956 : vector<1x8x1xf32> to vector<8x1xf32>
    %958 = vector.extract_strided_slice %927 {offsets = [4, 0], sizes = [1, 256], strides = [1, 1]} : vector<8x256xf32> to vector<1x256xf32>
    %959 = vector.broadcast %957 : vector<8x1xf32> to vector<8x256xf32>
    %960 = vector.broadcast %958 : vector<1x256xf32> to vector<8x256xf32>
    %961 = arith.mulf %959, %960 : vector<8x256xf32>
    %962 = arith.addf %955, %961 : vector<8x256xf32>
    %c61 = arith.constant 61 : index
    %c0_389 = arith.constant 0 : index
    %c0_390 = arith.constant 0 : index
    %963 = vector.load %arg13[%c61, %c0_389, %c0_390] : memref<72x8x1xf32, #tpu.memory_space<vmem>>, vector<1x8x1xf32>
    %964 = vector.shape_cast %963 : vector<1x8x1xf32> to vector<8x1xf32>
    %965 = vector.extract_strided_slice %927 {offsets = [5, 0], sizes = [1, 256], strides = [1, 1]} : vector<8x256xf32> to vector<1x256xf32>
    %966 = vector.broadcast %964 : vector<8x1xf32> to vector<8x256xf32>
    %967 = vector.broadcast %965 : vector<1x256xf32> to vector<8x256xf32>
    %968 = arith.mulf %966, %967 : vector<8x256xf32>
    %969 = arith.addf %962, %968 : vector<8x256xf32>
    %c62 = arith.constant 62 : index
    %c0_391 = arith.constant 0 : index
    %c0_392 = arith.constant 0 : index
    %970 = vector.load %arg13[%c62, %c0_391, %c0_392] : memref<72x8x1xf32, #tpu.memory_space<vmem>>, vector<1x8x1xf32>
    %971 = vector.shape_cast %970 : vector<1x8x1xf32> to vector<8x1xf32>
    %972 = vector.extract_strided_slice %927 {offsets = [6, 0], sizes = [1, 256], strides = [1, 1]} : vector<8x256xf32> to vector<1x256xf32>
    %973 = vector.broadcast %971 : vector<8x1xf32> to vector<8x256xf32>
    %974 = vector.broadcast %972 : vector<1x256xf32> to vector<8x256xf32>
    %975 = arith.mulf %973, %974 : vector<8x256xf32>
    %976 = arith.addf %969, %975 : vector<8x256xf32>
    %c63 = arith.constant 63 : index
    %c0_393 = arith.constant 0 : index
    %c0_394 = arith.constant 0 : index
    %977 = vector.load %arg13[%c63, %c0_393, %c0_394] : memref<72x8x1xf32, #tpu.memory_space<vmem>>, vector<1x8x1xf32>
    %978 = vector.shape_cast %977 : vector<1x8x1xf32> to vector<8x1xf32>
    %979 = vector.extract_strided_slice %927 {offsets = [7, 0], sizes = [1, 256], strides = [1, 1]} : vector<8x256xf32> to vector<1x256xf32>
    %980 = vector.broadcast %978 : vector<8x1xf32> to vector<8x256xf32>
    %981 = vector.broadcast %979 : vector<1x256xf32> to vector<8x256xf32>
    %982 = arith.mulf %980, %981 : vector<8x256xf32>
    %983 = arith.addf %976, %982 : vector<8x256xf32>
    %c0_395 = arith.constant 0 : index
    %c145_396 = arith.constant 145 : index
    %984 = vector.load %arg19[%c0_395, %c145_396] : memref<8x512xf32, #tpu.memory_space<vmem>>, vector<8x256xf32>
    %c1_397 = arith.constant 1 : index
    %c0_398 = arith.constant 0 : index
    %c0_399 = arith.constant 0 : index
    %985 = vector.load %arg17[%c1_397, %c0_398, %c0_399] : memref<2x1x256xf32, #tpu.memory_space<vmem>>, vector<1x1x256xf32>
    %986 = vector.shape_cast %985 : vector<1x1x256xf32> to vector<1x256xf32>
    %987 = vector.broadcast %986 : vector<1x256xf32> to vector<8x256xf32>
    %988 = arith.mulf %984, %987 : vector<8x256xf32>
    %c64 = arith.constant 64 : index
    %c0_400 = arith.constant 0 : index
    %c0_401 = arith.constant 0 : index
    %989 = vector.load %arg13[%c64, %c0_400, %c0_401] : memref<72x8x1xf32, #tpu.memory_space<vmem>>, vector<1x8x1xf32>
    %990 = vector.shape_cast %989 : vector<1x8x1xf32> to vector<8x1xf32>
    %991 = vector.extract_strided_slice %988 {offsets = [0, 0], sizes = [1, 256], strides = [1, 1]} : vector<8x256xf32> to vector<1x256xf32>
    %992 = vector.broadcast %990 : vector<8x1xf32> to vector<8x256xf32>
    %993 = vector.broadcast %991 : vector<1x256xf32> to vector<8x256xf32>
    %994 = arith.mulf %992, %993 : vector<8x256xf32>
    %995 = arith.addf %983, %994 : vector<8x256xf32>
    %c65 = arith.constant 65 : index
    %c0_402 = arith.constant 0 : index
    %c0_403 = arith.constant 0 : index
    %996 = vector.load %arg13[%c65, %c0_402, %c0_403] : memref<72x8x1xf32, #tpu.memory_space<vmem>>, vector<1x8x1xf32>
    %997 = vector.shape_cast %996 : vector<1x8x1xf32> to vector<8x1xf32>
    %998 = vector.extract_strided_slice %988 {offsets = [1, 0], sizes = [1, 256], strides = [1, 1]} : vector<8x256xf32> to vector<1x256xf32>
    %999 = vector.broadcast %997 : vector<8x1xf32> to vector<8x256xf32>
    %1000 = vector.broadcast %998 : vector<1x256xf32> to vector<8x256xf32>
    %1001 = arith.mulf %999, %1000 : vector<8x256xf32>
    %1002 = arith.addf %995, %1001 : vector<8x256xf32>
    %c66 = arith.constant 66 : index
    %c0_404 = arith.constant 0 : index
    %c0_405 = arith.constant 0 : index
    %1003 = vector.load %arg13[%c66, %c0_404, %c0_405] : memref<72x8x1xf32, #tpu.memory_space<vmem>>, vector<1x8x1xf32>
    %1004 = vector.shape_cast %1003 : vector<1x8x1xf32> to vector<8x1xf32>
    %1005 = vector.extract_strided_slice %988 {offsets = [2, 0], sizes = [1, 256], strides = [1, 1]} : vector<8x256xf32> to vector<1x256xf32>
    %1006 = vector.broadcast %1004 : vector<8x1xf32> to vector<8x256xf32>
    %1007 = vector.broadcast %1005 : vector<1x256xf32> to vector<8x256xf32>
    %1008 = arith.mulf %1006, %1007 : vector<8x256xf32>
    %1009 = arith.addf %1002, %1008 : vector<8x256xf32>
    %c67 = arith.constant 67 : index
    %c0_406 = arith.constant 0 : index
    %c0_407 = arith.constant 0 : index
    %1010 = vector.load %arg13[%c67, %c0_406, %c0_407] : memref<72x8x1xf32, #tpu.memory_space<vmem>>, vector<1x8x1xf32>
    %1011 = vector.shape_cast %1010 : vector<1x8x1xf32> to vector<8x1xf32>
    %1012 = vector.extract_strided_slice %988 {offsets = [3, 0], sizes = [1, 256], strides = [1, 1]} : vector<8x256xf32> to vector<1x256xf32>
    %1013 = vector.broadcast %1011 : vector<8x1xf32> to vector<8x256xf32>
    %1014 = vector.broadcast %1012 : vector<1x256xf32> to vector<8x256xf32>
    %1015 = arith.mulf %1013, %1014 : vector<8x256xf32>
    %1016 = arith.addf %1009, %1015 : vector<8x256xf32>
    %c68 = arith.constant 68 : index
    %c0_408 = arith.constant 0 : index
    %c0_409 = arith.constant 0 : index
    %1017 = vector.load %arg13[%c68, %c0_408, %c0_409] : memref<72x8x1xf32, #tpu.memory_space<vmem>>, vector<1x8x1xf32>
    %1018 = vector.shape_cast %1017 : vector<1x8x1xf32> to vector<8x1xf32>
    %1019 = vector.extract_strided_slice %988 {offsets = [4, 0], sizes = [1, 256], strides = [1, 1]} : vector<8x256xf32> to vector<1x256xf32>
    %1020 = vector.broadcast %1018 : vector<8x1xf32> to vector<8x256xf32>
    %1021 = vector.broadcast %1019 : vector<1x256xf32> to vector<8x256xf32>
    %1022 = arith.mulf %1020, %1021 : vector<8x256xf32>
    %1023 = arith.addf %1016, %1022 : vector<8x256xf32>
    %c69 = arith.constant 69 : index
    %c0_410 = arith.constant 0 : index
    %c0_411 = arith.constant 0 : index
    %1024 = vector.load %arg13[%c69, %c0_410, %c0_411] : memref<72x8x1xf32, #tpu.memory_space<vmem>>, vector<1x8x1xf32>
    %1025 = vector.shape_cast %1024 : vector<1x8x1xf32> to vector<8x1xf32>
    %1026 = vector.extract_strided_slice %988 {offsets = [5, 0], sizes = [1, 256], strides = [1, 1]} : vector<8x256xf32> to vector<1x256xf32>
    %1027 = vector.broadcast %1025 : vector<8x1xf32> to vector<8x256xf32>
    %1028 = vector.broadcast %1026 : vector<1x256xf32> to vector<8x256xf32>
    %1029 = arith.mulf %1027, %1028 : vector<8x256xf32>
    %1030 = arith.addf %1023, %1029 : vector<8x256xf32>
    %c70 = arith.constant 70 : index
    %c0_412 = arith.constant 0 : index
    %c0_413 = arith.constant 0 : index
    %1031 = vector.load %arg13[%c70, %c0_412, %c0_413] : memref<72x8x1xf32, #tpu.memory_space<vmem>>, vector<1x8x1xf32>
    %1032 = vector.shape_cast %1031 : vector<1x8x1xf32> to vector<8x1xf32>
    %1033 = vector.extract_strided_slice %988 {offsets = [6, 0], sizes = [1, 256], strides = [1, 1]} : vector<8x256xf32> to vector<1x256xf32>
    %1034 = vector.broadcast %1032 : vector<8x1xf32> to vector<8x256xf32>
    %1035 = vector.broadcast %1033 : vector<1x256xf32> to vector<8x256xf32>
    %1036 = arith.mulf %1034, %1035 : vector<8x256xf32>
    %1037 = arith.addf %1030, %1036 : vector<8x256xf32>
    %c71 = arith.constant 71 : index
    %c0_414 = arith.constant 0 : index
    %c0_415 = arith.constant 0 : index
    %1038 = vector.load %arg13[%c71, %c0_414, %c0_415] : memref<72x8x1xf32, #tpu.memory_space<vmem>>, vector<1x8x1xf32>
    %1039 = vector.shape_cast %1038 : vector<1x8x1xf32> to vector<8x1xf32>
    %1040 = vector.extract_strided_slice %988 {offsets = [7, 0], sizes = [1, 256], strides = [1, 1]} : vector<8x256xf32> to vector<1x256xf32>
    %1041 = vector.broadcast %1039 : vector<8x1xf32> to vector<8x256xf32>
    %1042 = vector.broadcast %1040 : vector<1x256xf32> to vector<8x256xf32>
    %1043 = arith.mulf %1041, %1042 : vector<8x256xf32>
    %1044 = arith.addf %1037, %1043 : vector<8x256xf32>
    %c0_416 = arith.constant 0 : index
    %c0_417 = arith.constant 0 : index
    %1045 = vector.load %arg14[%c0_416, %c0_417] : memref<8x1xf32, #tpu.memory_space<vmem>>, vector<8x1xf32>
    %1046 = vector.broadcast %1045 : vector<8x1xf32> to vector<8x256xf32>
    %1047 = arith.addf %1044, %1046 : vector<8x256xf32>
    %cst_418 = arith.constant 0.000000e+00 : f32
    %1048 = vector.broadcast %cst_418 : f32 to vector<8x256xf32>
    %c0_419 = arith.constant 0 : index
    %c0_420 = arith.constant 0 : index
    %c0_421 = arith.constant 0 : index
    %1049 = vector.load %arg15[%c0_419, %c0_420, %c0_421] : memref<4x8x1xf32, #tpu.memory_space<vmem>>, vector<1x8x1xf32>
    %1050 = vector.shape_cast %1049 : vector<1x8x1xf32> to vector<8x1xf32>
    %1051 = vector.extract_strided_slice %3 {offsets = [0, 0], sizes = [1, 256], strides = [1, 1]} : vector<4x256xf32> to vector<1x256xf32>
    %1052 = vector.broadcast %1050 : vector<8x1xf32> to vector<8x256xf32>
    %1053 = vector.broadcast %1051 : vector<1x256xf32> to vector<8x256xf32>
    %1054 = arith.mulf %1052, %1053 : vector<8x256xf32>
    %1055 = arith.addf %1048, %1054 : vector<8x256xf32>
    %c1_422 = arith.constant 1 : index
    %c0_423 = arith.constant 0 : index
    %c0_424 = arith.constant 0 : index
    %1056 = vector.load %arg15[%c1_422, %c0_423, %c0_424] : memref<4x8x1xf32, #tpu.memory_space<vmem>>, vector<1x8x1xf32>
    %1057 = vector.shape_cast %1056 : vector<1x8x1xf32> to vector<8x1xf32>
    %1058 = vector.extract_strided_slice %3 {offsets = [1, 0], sizes = [1, 256], strides = [1, 1]} : vector<4x256xf32> to vector<1x256xf32>
    %1059 = vector.broadcast %1057 : vector<8x1xf32> to vector<8x256xf32>
    %1060 = vector.broadcast %1058 : vector<1x256xf32> to vector<8x256xf32>
    %1061 = arith.mulf %1059, %1060 : vector<8x256xf32>
    %1062 = arith.addf %1055, %1061 : vector<8x256xf32>
    %c2_425 = arith.constant 2 : index
    %c0_426 = arith.constant 0 : index
    %c0_427 = arith.constant 0 : index
    %1063 = vector.load %arg15[%c2_425, %c0_426, %c0_427] : memref<4x8x1xf32, #tpu.memory_space<vmem>>, vector<1x8x1xf32>
    %1064 = vector.shape_cast %1063 : vector<1x8x1xf32> to vector<8x1xf32>
    %1065 = vector.extract_strided_slice %3 {offsets = [2, 0], sizes = [1, 256], strides = [1, 1]} : vector<4x256xf32> to vector<1x256xf32>
    %1066 = vector.broadcast %1064 : vector<8x1xf32> to vector<8x256xf32>
    %1067 = vector.broadcast %1065 : vector<1x256xf32> to vector<8x256xf32>
    %1068 = arith.mulf %1066, %1067 : vector<8x256xf32>
    %1069 = arith.addf %1062, %1068 : vector<8x256xf32>
    %c3_428 = arith.constant 3 : index
    %c0_429 = arith.constant 0 : index
    %c0_430 = arith.constant 0 : index
    %1070 = vector.load %arg15[%c3_428, %c0_429, %c0_430] : memref<4x8x1xf32, #tpu.memory_space<vmem>>, vector<1x8x1xf32>
    %1071 = vector.shape_cast %1070 : vector<1x8x1xf32> to vector<8x1xf32>
    %1072 = vector.extract_strided_slice %3 {offsets = [3, 0], sizes = [1, 256], strides = [1, 1]} : vector<4x256xf32> to vector<1x256xf32>
    %1073 = vector.broadcast %1071 : vector<8x1xf32> to vector<8x256xf32>
    %1074 = vector.broadcast %1072 : vector<1x256xf32> to vector<8x256xf32>
    %1075 = arith.mulf %1073, %1074 : vector<8x256xf32>
    %1076 = arith.addf %1069, %1075 : vector<8x256xf32>
    %c0_431 = arith.constant 0 : index
    %c0_432 = arith.constant 0 : index
    %1077 = vector.load %arg16[%c0_431, %c0_432] : memref<8x1xf32, #tpu.memory_space<vmem>>, vector<8x1xf32>
    %1078 = vector.broadcast %1077 : vector<8x1xf32> to vector<8x256xf32>
    %1079 = arith.addf %1076, %1078 : vector<8x256xf32>
    %1080 = arith.addf %1079, %1047 : vector<8x256xf32>
    %c0_433 = arith.constant 0 : index
    %c0_434 = arith.constant 0 : index
    %c0_435 = arith.constant 0 : index
    %1081 = vector.load %arg18[%c0_433, %c0_434, %c0_435] : memref<1x8x256xf32, #tpu.memory_space<vmem>>, vector<1x8x256xf32>
    %1082 = vector.shape_cast %1081 : vector<1x8x256xf32> to vector<8x256xf32>
    %1083 = vector.shape_cast %1080 : vector<8x256xf32> to vector<1x8x256xf32>
    tpu.vector_store %arg18[%c0_433, %c0_434, %c0_435], %1083 {strides = array<i32>} : memref<1x8x256xf32, #tpu.memory_space<vmem>>, vector<1x8x256xf32>,
    return
  }
  func.func @transform_0(%arg0: i32) -> (i32, i32, i32) {
    %c0_i32 = arith.constant 0 : i32
    %c0_i32_0 = arith.constant 0 : i32
    %c0_i32_1 = arith.constant 0 : i32
    return %arg0, %c0_i32, %c0_i32_0 : i32, i32, i32
  }
  func.func @transform_1(%arg0: i32) -> (i32, i32, i32) {
    %c0_i32 = arith.constant 0 : i32
    %c0_i32_0 = arith.constant 0 : i32
    %c0_i32_1 = arith.constant 0 : i32
    return %arg0, %c0_i32, %c0_i32_0 : i32, i32, i32
  }
  func.func @transform_2(%arg0: i32) -> (i32, i32) {
    %c0_i32 = arith.constant 0 : i32
    %c0_i32_0 = arith.constant 0 : i32
    %c0_i32_1 = arith.constant 0 : i32
    return %c0_i32, %c0_i32_0 : i32, i32
  }
  func.func @transform_3(%arg0: i32) -> (i32, i32) {
    %c0_i32 = arith.constant 0 : i32
    %c0_i32_0 = arith.constant 0 : i32
    %c0_i32_1 = arith.constant 0 : i32
    return %c0_i32, %c0_i32_0 : i32, i32
  }
  func.func @transform_4(%arg0: i32) -> (i32, i32, i32) {
    %c0_i32 = arith.constant 0 : i32
    %c0_i32_0 = arith.constant 0 : i32
    %c0_i32_1 = arith.constant 0 : i32
    %c0_i32_2 = arith.constant 0 : i32
    return %c0_i32, %c0_i32_0, %c0_i32_1 : i32, i32, i32
  }
  func.func @transform_5(%arg0: i32) -> (i32, i32, i32) {
    %c0_i32 = arith.constant 0 : i32
    %c0_i32_0 = arith.constant 0 : i32
    %c0_i32_1 = arith.constant 0 : i32
    %c0_i32_2 = arith.constant 0 : i32
    return %c0_i32, %c0_i32_0, %c0_i32_1 : i32, i32, i32
  }
  func.func @transform_6(%arg0: i32) -> (i32, i32) {
    %c0_i32 = arith.constant 0 : i32
    %c0_i32_0 = arith.constant 0 : i32
    %c0_i32_1 = arith.constant 0 : i32
    return %c0_i32, %c0_i32_0 : i32, i32
  }
  func.func @transform_7(%arg0: i32) -> (i32, i32) {
    %c0_i32 = arith.constant 0 : i32
    %c0_i32_0 = arith.constant 0 : i32
    %c0_i32_1 = arith.constant 0 : i32
    return %c0_i32, %c0_i32_0 : i32, i32
  }
  func.func @transform_8(%arg0: i32) -> (i32, i32) {
    %c0_i32 = arith.constant 0 : i32
    %c0_i32_0 = arith.constant 0 : i32
    %c0_i32_1 = arith.constant 0 : i32
    return %c0_i32, %c0_i32_0 : i32, i32
  }
  func.func @transform_9(%arg0: i32) -> (i32, i32) {
    %c0_i32 = arith.constant 0 : i32
    %c0_i32_0 = arith.constant 0 : i32
    %c0_i32_1 = arith.constant 0 : i32
    return %c0_i32, %c0_i32_0 : i32, i32
  }
  func.func @transform_10(%arg0: i32) -> (i32, i32) {
    %c0_i32 = arith.constant 0 : i32
    %c0_i32_0 = arith.constant 0 : i32
    %c0_i32_1 = arith.constant 0 : i32
    return %c0_i32, %c0_i32_0 : i32, i32
  }
  func.func @transform_11(%arg0: i32) -> (i32, i32, i32) {
    %c0_i32 = arith.constant 0 : i32
    %c0_i32_0 = arith.constant 0 : i32
    %c0_i32_1 = arith.constant 0 : i32
    %c0_i32_2 = arith.constant 0 : i32
    return %c0_i32, %c0_i32_0, %c0_i32_1 : i32, i32, i32
  }
  func.func @transform_12(%arg0: i32) -> (i32, i32, i32) {
    %c0_i32 = arith.constant 0 : i32
    %c0_i32_0 = arith.constant 0 : i32
    %c0_i32_1 = arith.constant 0 : i32
    %c0_i32_2 = arith.constant 0 : i32
    return %c0_i32, %c0_i32_0, %c0_i32_1 : i32, i32, i32
  }
  func.func @transform_13(%arg0: i32) -> (i32, i32) {
    %c0_i32 = arith.constant 0 : i32
    %c0_i32_0 = arith.constant 0 : i32
    %c0_i32_1 = arith.constant 0 : i32
    return %c0_i32, %c0_i32_0 : i32, i32
  }
  func.func @transform_14(%arg0: i32) -> (i32, i32, i32) {
    %c0_i32 = arith.constant 0 : i32
    %c0_i32_0 = arith.constant 0 : i32
    %c0_i32_1 = arith.constant 0 : i32
    %c0_i32_2 = arith.constant 0 : i32
    return %c0_i32, %c0_i32_0, %c0_i32_1 : i32, i32, i32
  }
  func.func @transform_15(%arg0: i32) -> (i32, i32) {
    %c0_i32 = arith.constant 0 : i32
    %c0_i32_0 = arith.constant 0 : i32
    %c0_i32_1 = arith.constant 0 : i32
    return %c0_i32, %c0_i32_0 : i32, i32
  }
  func.func @transform_16(%arg0: i32) -> (i32, i32, i32) {
    %c0_i32 = arith.constant 0 : i32
    %c0_i32_0 = arith.constant 0 : i32
    %c0_i32_1 = arith.constant 0 : i32
    %c0_i32_2 = arith.constant 0 : i32
    return %c0_i32, %c0_i32_0, %c0_i32_1 : i32, i32, i32
  }
  func.func @transform_17(%arg0: i32) -> (i32, i32, i32) {
    %c0_i32 = arith.constant 0 : i32
    %c0_i32_0 = arith.constant 0 : i32
    %c0_i32_1 = arith.constant 0 : i32
    return %arg0, %c0_i32, %c0_i32_0 : i32, i32, i32
  }
}

</mosaic_0001>

<bundles_post_ra>
// kernel: tpu_custom_call.1
= control target key start
LH: loop header
LB: loop body
LE: loop exit
PB: predicated region body
PF: predicated region fallthrough
CT: control target
= control target key end

     0   :  { %s8820_s0 = inlined_call_operand.vmem [shape: f32[2,4,256], index: 0, kind: input, shape index: {}]   ;;  %s8821_s1 = inlined_call_operand.vmem [shape: f32[2,1,32], index: 1, kind: input, shape index: {}]   ;;  %s8822_s2 = inlined_call_operand.vmem [shape: f32[4,1], index: 2, kind: input, shape index: {}]   ;;  %s8823_s3 = inlined_call_operand.vmem [shape: f32[4,1], index: 3, kind: input, shape index: {}]   ;;  %s8824_s4 = inlined_call_operand.vmem [shape: f32[4,4,1], index: 4, kind: input, shape index: {}]   ;;  %s8825_s5 = inlined_call_operand.vmem [shape: f32[36,8,1], index: 5, kind: input, shape index: {}]   ;;  %s8826_s6 = inlined_call_operand.vmem [shape: f32[8,1], index: 6, kind: input, shape index: {}]   ;;  %s8827_s7 = inlined_call_operand.vmem [shape: f32[8,32], index: 7, kind: input, shape index: {}]   ;;  %s8828_s8 = inlined_call_operand.vmem [shape: f32[8,1], index: 8, kind: input, shape index: {}]   ;;  %s8829_s9 = inlined_call_operand.vmem [shape: f32[8,1], index: 9, kind: input, shape index: {}]   ;;  %s8830_s10 = inlined_call_operand.vmem [shape: f32[8,1], index: 10, kind: input, shape index: {}]   ;;  %s8831_s11 = inlined_call_operand.vmem [shape: f32[4,8,1], index: 11, kind: input, shape index: {}]   ;;  %s8832_s12 = inlined_call_operand.vmem [shape: f32[72,8,1], index: 12, kind: input, shape index: {}]   ;;  %s8833_s13 = inlined_call_operand.vmem [shape: f32[8,1], index: 13, kind: input, shape index: {}]   ;;  %s8834_s14 = inlined_call_operand.vmem [shape: f32[4,8,1], index: 14, kind: input, shape index: {}]   ;;  %s8835_s15 = inlined_call_operand.vmem [shape: f32[8,1], index: 15, kind: input, shape index: {}]   ;;  %s8836_s16 = inlined_call_operand.vmem [shape: f32[2,1,256], index: 16, kind: input, shape index: {}]   ;;  %s8837_s17 = inlined_call_operand.hbm [shape: f32[2,8,256], index: 17, kind: output, shape index: {}]  }
   0x1   :  { %9041 = sst [smem:[#allocation113_spill]] %s8820_s0 }
   0x2   :  { %9042 = sst [smem:[#allocation114_spill]] %s8821_s1 }
   0x3   :  { %9043 = sst [smem:[#allocation115_spill]] %s8822_s2 }
   0x4   :  { %9044 = sst [smem:[#allocation116_spill]] %s8823_s3 }
   0x5   :  { %9045 = sst [smem:[#allocation117_spill]] %s8824_s4 }
   0x6   :  { %9046 = sst [smem:[#allocation118_spill]] %s8825_s5 }
   0x7   :  { %9047 = sst [smem:[#allocation119_spill]] %s8826_s6 }
   0x8   :  { %9048 = sst [smem:[#allocation120_spill]] %s8827_s7 }
   0x9   :  { %9049 = sst [smem:[#allocation121_spill]] %s8828_s8 }
   0xa   :  { %9050 = sst [smem:[#allocation122_spill]] %s8836_s16 }
   0xb   :  { %9051 = sst [smem:[#allocation123_spill]] %s8837_s17 }
   0xc   :  { %22 = vsyncpa [#allocation4], 0 }
   0xd   :  { %24 = vsyncpa [#allocation4 + $0x1], 0  ;;  %s5594_s24 = smov 0   ;;  %s5596_s25 = smov 0  }
   0xe   :  { %s5598_s26 = smov 0   ;;  %s5600_s27 = smov 0  }
   0xf LB: > { %9052 = sst [smem:[#allocation6_spill]] %s5474_s24  ;;  %s5615_s28 = sadd.s32 4294967295, %s5486_s27   ;;  %s5486_s27 = sphi %s5600_s27, %s9512_s27   ;;  %s5482_s26 = sphi %s5598_s26, %s9514_s26   ;;  %s5478_s25 = sphi %s5596_s25, %s9516_s25   ;;  %s5474_s24 = sphi %s5594_s24, %s9515_s24  }
  0x10   : > { %9053 = sst [smem:[#allocation7_spill]] %s5482_s26  ;;  %s5210_s29 = sadd.s32 4294967294, %s5486_s27  }
  0x11   : > { %9054 = sst [smem:[#allocation8_spill]] %s5486_s27  ;;  %s5619_s0 = sadd.s32 1, %s5486_s27  }
  0x12   : > { %9055 = sst [smem:[#allocation9_spill]] %s5619_s0  ;;  %s404_s30 = sadd.s32 1, %s5482_s26 }
  0x13   : > { %s401_s18 = ssub.s32 %s5486_s27, %s5619_s0  ;;  %p414_p0 = scmp.ne.s32.totalorder %s5482_s26, %s5478_s25 }
  0x14   : > { %p402_p1 = scmp.eq.s32.totalorder %s401_s18, 0  ;;  %p415_p2 = scmp.eq.s32.totalorder %s5615_s28, 1 }
  0x15   : > { %p420_p3 = scmp.ne.s32.totalorder %s5478_s25, %s5474_s24  ;;  %p421_p4 = scmp.eq.s32.totalorder %s5210_s29, 1 }
  0x16   : > { %s5630_s19 = scalar_select %p402_p1, %s5482_s26, %s404_s30  }
  0x17   : > { %p5632_p5 = por %p415_p2, %p414_p0  ;;  %p5636_p6 = por %p421_p4, %p420_p3 }
  0x18   : > { %9056 = sst [smem:[#allocation10_spill]] %s5630_s19  ;;  %p5213_p7 = scmp.ge.s32.totalorder %s5486_s27, 1 }
  0x19   : > { %s9058_s20 = scalar_select %p5636_p6, 1, 0 }
  0x1a   : > { %p498_p8 = scmp.lt.s32.totalorder %s5486_s27, 3 }
  0x1b   : > { %9059 = sst [smem:[#allocation11_spill]] %s9058_s20 }
  0x1c   : > { %p499_p9 = pnand %p5213_p7, %p498_p8 }
  0x1e   : > { %502 = sbr.rel (%p499_p9) target bundleno = 2279 (0x8e7), region = 88 }
  0x25   : > { %v696_v0 = vlaneseq  ;;  %p553_p10 = scmp.lt.s32.totalorder %s5615_s28, 1  ;;  %v5488_v2 = vmov 0   ;;  %s9061_s16 = sld [smem:[#allocation122_spill]]  ;;  %v8856_v5 = vmov 0.0   ;;  %vm571_vm0 = vcmask 1043456  }
  0x26   : > { %5396 = vset.pattern.permute.xlu1 %v5488_v2  ;;  %5397 = vset.pattern.permute.xlu0 %v5488_v2  ;;  %s9062_s7 = sld [smem:[#allocation120_spill]]  ;;  %561 = vst [vmem:[#allocation2] sm:$0xff] %v8856_v5  ;;  %562 = vst [vmem:[#allocation2 + $0x8] sm:$0xff] %v8856_v5  ;;  %s9063_s22 = sld [smem:[#allocation114_spill]]  ;;  %vm731_vm1 = vcmask 261120   ;;  %vm588_vm2 = vcmask 3072  }
  0x27   : > { %v5643_v1 = vshrl.u32 %v696_v0, 7  ;;  %s554_s21 = scalar_select %p553_p10, %s5615_s28, 1  ;;  %563 = vst [vmem:[#allocation2 + $0x10] sm:$0xff] %v8856_v5  ;;  %564 = vst [vmem:[#allocation2 + $0x18] sm:$0xff] %v8856_v5  ;;  %vm1038_vm3 = vcmask 924672   ;;  %vm897_vm4 = vcmask 1039360  }
  0x28   : > { %s8841_s19 = smov 111   ;;  %s9065_s5 = sld [smem:[#allocation118_spill]]  ;;  %vm1466_vm5 = vcmask 7168   ;;  %vm1635_vm6 = vcmask 121856   ;;  %vm1961_vm7 = vcmask 138240   ;;  %vm1077_vm8 = vcmask 1031168  }
  0x29   : > { %9060 = vst [vmem:[#allocation12_spill] sm:$0xff] %v5643_v1  ;;  %v5657_v6 = vsub.s32 0, %v5643_v1  ;;  %s5340_s26 = sshll.u32 %s554_s21, 3  ;;  %v5703_v27 = vsub.s32 1, %v5643_v1  ;;  %s8850_s18 = smov 1   ;;  %vm1245_vm9 = vcmask 916480  }
  0x2a   : > { %s9072_s4 = sld [smem:[#allocation117_spill]]  ;;  %s8852_s20 = smov 112   ;;  %vm759_vm10 = vcmask 908288   ;;  %vm1505_vm11 = vcmask 900096   ;;  %vm1674_vm12 = vcmask 785408   ;;  %vm1831_vm13 = vcmask 777216  }
  0x2b   : > { %v745_v3 = vld [vmem:[%s9061_s16] sm:$0x3]  ;;  %v5228_v29 = vld [vmem:[%s9061_s16 + $0x2] sm:$0x3]  ;;  %s9074_s8 = sld [smem:[#allocation121_spill]]  ;;  %s9075_s6 = sld [smem:[#allocation119_spill]] }
  0x2c   : > { %v722_v4 = vld [vmem:[%s9062_s7] sm:$0xff]  ;;  %s560_s23 = scalar_lea.vmem %s9063_s22, %s554_s21  ;;  %s9064_s7 = sld [smem:[#allocation113_spill]]  ;;  %v5668_v8 = vrot.slane %v745_v3, %v5657_v6  ;;  %v754_v30 = vrot.slane %v745_v3, %v5703_v27  ;;  %v5713_v31 = vrot.slane %v5228_v29, %v5657_v6  ;;  %v5725_v34 = vrot.slane %v5228_v29, %v5703_v27 }
  0x2d   : > { %v5220_v7 = vld [vmem:[%s560_s23] ss:$0 sm:$0xff]  ;;  %s8846_s21 = smov 127   ;;  %s8848_s22 = smov 15   ;;  %vm2000_vm14 = vcmask 769024  }
  0x2e   : > { %v730_v9 = vmul.f32 %v5220_v7, %v722_v4  ;;  %755 = vrot.lane.b32.xlu1 %v5668_v8, %s8841_s19  ;;  %v767_v15 = vld [vmem:[%s9065_s5] sm:$0xff]  ;;  %v5221_v21 = vld [vmem:[%s9065_s5 + $0x8] sm:$0xff]  ;;  %v5222_v23 = vld [vmem:[%s9065_s5 + $0x10] sm:$0xff]  ;;  %s9071_s23 = smov 127   ;;  %v5829_v7 = vsub.s32 2, %v5643_v1  ;;  %s9077_s30 = smov 111  }
  0x2f   : > { %v5223_v24 = vld [vmem:[%s9065_s5 + $0x18] sm:$0xff]  ;;  %v5224_v25 = vld [vmem:[%s9065_s5 + $0x20] sm:$0xff]  ;;  %v5226_v26 = vld [vmem:[%s9065_s5 + $0x30] sm:$0xff]  ;;  %s8881_s29 = smov 110   ;;  %s9078_s2 = sld [smem:[#allocation115_spill]] }
  0x30   : > { %v732_v14 = vsel %vm731_vm1, %v730_v9, 0.0  ;;  %v5227_v28 = vld [vmem:[%s9065_s5 + $0x38] sm:$0xff]  ;;  %v5225_v32 = vld [vmem:[%s9065_s5 + $0x28] sm:$0xff]  ;;  %v5229_v33 = vld [vmem:[%s9065_s5 + $0x40] sm:$0xff]  ;;  %v5832_v9 = vsub.s32 3, %v5643_v1  ;;  %s9079_s3 = sld [smem:[#allocation116_spill]] }
  0x31   : > { %733 = vadd.xlane.f32.xlu0 %v732_v14  ;;  %v5230_v35 = vld [vmem:[%s9065_s5 + $0x48] sm:$0xff]  ;;  %v5231_v36 = vld [vmem:[%s9065_s5 + $0x50] sm:$0xff]  ;;  %v5232_v38 = vld [vmem:[%s9065_s5 + $0x58] sm:$0xff]  ;;  %s9273_s17 = smov 15  }
  0x32   : > { %s5665_s0 = scalar_lea.vmem %s9064_s7, %s5340_s26  ;;  %770 = vperm.xlu1 %5396, %v767_v15   ;;  %s8844_s7 = smov 113   ;;  %v5238_v37 = vld [vmem:[%s9065_s5 + $0x88] sm:$0xff]  ;;  %v5240_v39 = vld [vmem:[%s9065_s5 + $0x98] sm:$0xff]  ;;  %v5233_v40 = vld [vmem:[%s9065_s5 + $0x60] sm:$0xff] }
  0x33   : > { %v5671_v10 = vld [vmem:[%s5665_s0] sm:$0xff]  ;;  %v5234_v41 = vld [vmem:[%s9065_s5 + $0x68] sm:$0xff]  ;;  %v5235_v42 = vld [vmem:[%s9065_s5 + $0x70] sm:$0xff]  ;;  %s8879_s26 = smov 96  }
  0x34   : > { %v569_v11 = vcombine.high %v5671_v10, %v5671_v10  ;;  %v572_v12 = vsel %vm571_vm0, %v5671_v10, 0.0  ;;  %v577_v13 = vmul.f32 %v5671_v10, %v5671_v10  ;;  %v5236_v43 = vld [vmem:[%s9065_s5 + $0x78] sm:$0xff]  ;;  %v5237_v44 = vld [vmem:[%s9065_s5 + $0x80] sm:$0xff]  ;;  %v5239_v45 = vld [vmem:[%s9065_s5 + $0x90] sm:$0xff] }
  0x35   : > { %v5241_v46 = vld [vmem:[%s9065_s5 + $0xa0] sm:$0xff]  ;;  %v5242_v47 = vld [vmem:[%s9065_s5 + $0xa8] sm:$0xff]  ;;  %v5243_v48 = vld [vmem:[%s9065_s5 + $0xb0] sm:$0xff] }
  0x36   : > { %v573_v16 = vsel %vm571_vm0, %v569_v11, 0.0  ;;  %v579_v17 = vcombine.high %v577_v13, %v577_v13  ;;  %v581_v19 = vsel %vm571_vm0, %v577_v13, 0.0  ;;  %795 = vperm.xlu1 %5396, %v5221_v21   ;;  %v5244_v49 = vld [vmem:[%s9065_s5 + $0xb8] sm:$0xff]  ;;  %v5245_v50 = vld [vmem:[%s9065_s5 + $0xc0] sm:$0xff]  ;;  %v5246_v51 = vld [vmem:[%s9065_s5 + $0xc8] sm:$0xff] }
  0x37   : > { %v574_v18 = vadd.f32 %v573_v16, %v572_v12  ;;  %v5247_v52 = vld [vmem:[%s9065_s5 + $0xd0] sm:$0xff]  ;;  %v5248_v53 = vld [vmem:[%s9065_s5 + $0xd8] sm:$0xff]  ;;  %v5806_v59 = vld [vmem:[#allocation2] sm:$0xf] }
  0x38   : > { %v582_v20 = vsel %vm571_vm0, %v579_v17, 0.0  ;;  %v876_v61 = vrot.slane %v5806_v59, %v5657_v6  ;;  %v5819_v2 = vld [vmem:[%s9072_s4] sm:$0xf]  ;;  %v5824_v3 = vld [vmem:[%s9072_s4 + $0x4] sm:$0xf]  ;;  %v955_v13 = vrot.slane %v5806_v59, %v5829_v7  ;;  %v994_v17 = vrot.slane %v5806_v59, %v5832_v9 }
  0x39   : > { %575 = vadd.xlane.f32.xlu0 %v574_v18  ;;  %v583_v22 = vadd.f32 %v582_v20, %v581_v19  ;;  %v5847_v18 = vld [vmem:[%s9072_s4 + $0x8] sm:$0xf] }
  0x3a   : > { %820 = vperm.xlu1 %5396, %v5222_v23  }
  0x3d   : > { %584 = vadd.xlane.f32.xlu0 %v583_v22 }
  0x3e   : > { %845 = vperm.xlu1 %5396, %v5223_v24   ;;  %v916_v24 = vrot.slane %v5806_v59, %v5703_v27 }
  0x42   : > { %870 = vperm.xlu1 %5396, %v5224_v25   ;;  %v5861_v25 = vld [vmem:[%s9072_s4 + $0xc] sm:$0xf] }
  0x46   : > { %949 = vperm.xlu1 %5396, %v5226_v26  }
  0x4a   : > { %988 = vperm.xlu1 %5396, %v5227_v28  }
  0x4e   : > { %1034 = vrot.lane.b32.xlu1 %v5713_v31, %s8844_s7 }
  0x52   : > { %1050 = vperm.xlu1 %5396, %v5229_v33  }
  0x53   : > { %757 = vrot.lane.b32.xlu0 %v754_v30, %s8841_s19  ;;  %s9113_s19 = smov 112  }
  0x56   : > { %1090 = vperm.xlu1 %5396, %v5230_v35  }
  0x57   : > { %910 = vperm.xlu0 %5397, %v5225_v32  }
  0x5a   : > { %1129 = vperm.xlu1 %5396, %v5231_v36  }
  0x5b   : > { %1036 = vrot.lane.b32.xlu0 %v5725_v34, %s8844_s7  ;;  %s8854_s7 = smov 126  }
  0x5e   : > { %1168 = vperm.xlu1 %5396, %v5232_v38  }
  0x5f   : > { %1205 = vrot.lane.b32.xlu0 %v754_v30, %s8846_s21 }
  0x62   : > { %1203 = vrot.lane.b32.xlu1 %v5668_v8, %s8846_s21  ;;  %s8875_s21 = smov 17  }
  0x63   : > { %1397 = vperm.xlu0 %5397, %v5238_v37  }
  0x66   : > { %1218 = vperm.xlu1 %5396, %v5233_v40  }
  0x67   : > { %1441 = vperm.xlu0 %5397, %v5240_v39  }
  0x6a   : > { %1258 = vperm.xlu1 %5396, %v5234_v41  }
  0x6b   : > { %1464 = vrot.lane.b32.xlu0 %v5725_v34, %s8850_s18 }
  0x6e   : > { %1297 = vperm.xlu1 %5396, %v5235_v42  }
  0x6f   : > { %1633 = vrot.lane.b32.xlu0 %v754_v30, %s8848_s22 }
  0x72   : > { %1336 = vperm.xlu1 %5396, %v5236_v43  }
  0x76   : > { %1375 = vperm.xlu1 %5396, %v5237_v44  }
  0x7a   : > { %1419 = vperm.xlu1 %5396, %v5239_v45  }
  0x7e   : > { %1462 = vrot.lane.b32.xlu1 %v5713_v31, %s8850_s18  ;;  %s9126_s18 = smov 94  }
  0x82   : > { %1478 = vperm.xlu1 %5396, %v5241_v46  }
  0x86   : > { %1518 = vperm.xlu1 %5396, %v5242_v47  }
  0x8a   : > { %1557 = vperm.xlu1 %5396, %v5243_v48  }
  0x8e   : > { %1596 = vperm.xlu1 %5396, %v5244_v49  }
  0x92   : > { %1631 = vrot.lane.b32.xlu1 %v5668_v8, %s8848_s22  ;;  %s8883_s22 = smov 95  }
  0x96   : > { %1647 = vperm.xlu1 %5396, %v5245_v50  }
  0x9a   : > { %1687 = vperm.xlu1 %5396, %v5246_v51  }
  0x9e   : > { %1726 = vperm.xlu1 %5396, %v5247_v52  }
  0xa0   : > { %v5796_v54 = vpop.permute.xlu1 %755 }
  0xa1   : > { %9066 = vst [vmem:[#allocation13_spill] sm:$0xff] %v5796_v54 }
  0xa2   : > { %1765 = vperm.xlu1 %5396, %v5248_v53  }
  0xb1   : > { %v5798_v55 = vpop.permute.xlu1 %770 }
  0xb2   : > { %9067 = vst [vmem:[#allocation14_spill] sm:$0xff] %v5798_v55 }
  0xb5   : > { %v5800_v56 = vpop.permute.xlu1 %795 }
  0xb6   : > { %9068 = vst [vmem:[#allocation15_spill] sm:$0xff] %v5800_v56 }
  0xb9   : > { %v5802_v57 = vpop.permute.xlu1 %820 }
  0xba   : > { %9069 = vst [vmem:[#allocation16_spill] sm:$0xff] %v5802_v57 }
  0xbd   : > { %v5808_v60 = vpop.permute.xlu1 %845 }
  0xbe   : > { %v5804_v58 = vpop.xlane.xlu0 %733  ;;  %9070 = vst [vmem:[#allocation17_spill] sm:$0xff] %v5808_v60 }
  0xc1   : > { %v5812_v63 = vpop.permute.xlu1 %870 }
  0xc2   : > { %v885_v0 = vmul.f32 %v876_v61, %v5812_v63 }
  0xc4   : > { %891 = vrot.lane.b32.xlu1 %v885_v0, %s9071_s23 }
  0xc5   : > { %v5826_v4 = vpop.permute.xlu1 %949 }
  0xc6   : > { %v576_v62 = vpop.xlane.xlu0 %575  ;;  %v964_v21 = vmul.f32 %v955_v13, %v5826_v4 }
  0xc7   : > { %v587_v11 = vmul.f32 %v5819_v2, %v576_v62  ;;  %v612_v12 = vmul.f32 %v5824_v3, %v576_v62  ;;  %v636_v26 = vmul.f32 %v5847_v18, %v576_v62  ;;  %v660_v38 = vmul.f32 %v5861_v25, %v576_v62  ;;  %v5249_v62 = vld [vmem:[%s9065_s5 + $0xe0] sm:$0xff] }
  0xc8   : > { %970 = vrot.lane.b32.xlu0 %v964_v21, %s9071_s23 }
  0xc9   : > { %v5838_v14 = vpop.permute.xlu1 %988  ;;  %v589_v19 = vsel %vm588_vm2, %v587_v11, 0.0  ;;  %v613_v20 = vsel %vm588_vm2, %v612_v12, 0.0  ;;  %v637_v42 = vsel %vm588_vm2, %v636_v26, 0.0  ;;  %v661_v0 = vsel %vm588_vm2, %v660_v38, 0.0  ;;  %v5250_v26 = vld [vmem:[%s9065_s5 + $0xe8] sm:$0xff] }
  0xca   : > { %v585_v8 = vpop.xlane.xlu0 %584  ;;  %v1003_v30 = vmul.f32 %v994_v17, %v5838_v14  ;;  %v590_v32 = vrot.slane %v589_v19, 4  ;;  %v614_v33 = vrot.slane %v613_v20, 4  ;;  %v638_v51 = vrot.slane %v637_v42, 4 }
  0xcb   : > { %v596_v15 = vmul.f32 %v5819_v2, %v585_v8  ;;  %v620_v16 = vmul.f32 %v5824_v3, %v585_v8  ;;  %v644_v35 = vmul.f32 %v5847_v18, %v585_v8  ;;  %v668_v49 = vmul.f32 %v5861_v25, %v585_v8 }
  0xcc   : > { %1009 = vrot.lane.b32.xlu0 %v1003_v30, %s9071_s23  ;;  %v591_v46 = vadd.f32 %v590_v32, %v589_v19  ;;  %v615_v47 = vadd.f32 %v614_v33, %v613_v20  ;;  %v639_v17 = vadd.f32 %v638_v51, %v637_v42  ;;  %v662_v19 = vrot.slane %v661_v0, 4 }
  0xcd   : > { %v5854_v23 = vpop.permute.xlu1 %1034  ;;  %v597_v28 = vsel %vm588_vm2, %v596_v15, 0.0  ;;  %v621_v29 = vsel %vm588_vm2, %v620_v16, 0.0  ;;  %v645_v48 = vsel %vm588_vm2, %v644_v35, 0.0  ;;  %v669_v16 = vsel %vm588_vm2, %v668_v49, 0.0 }
  0xce   : > { %v5852_v22 = vpop.permute.xlu0 %757  ;;  %v1043_v36 = vmul.f32 %v5854_v23, %v5806_v59  ;;  %v598_v39 = vrot.slane %v597_v28, 4  ;;  %v622_v40 = vrot.slane %v621_v29, 4  ;;  %v592_v12 = vrot.slane %v591_v46, 2 }
  0xcf   : > { %9073 = vst [vmem:[#allocation18_spill] sm:$0xff] %v5852_v22  ;;  %v616_v13 = vrot.slane %v615_v47, 2  ;;  %v646_v15 = vrot.slane %v645_v48, 4  ;;  %v670_v35 = vrot.slane %v669_v16, 4  ;;  %v640_v38 = vrot.slane %v639_v17, 2 }
  0xd0   : > { %v1056_v44 = vrot.slane %v1043_v36, %v5657_v6  ;;  %v1096_v45 = vrot.slane %v1043_v36, %v5703_v27  ;;  %v599_v52 = vadd.f32 %v598_v39, %v597_v28  ;;  %v623_v53 = vadd.f32 %v622_v40, %v621_v29 }
  0xd1   : > { %v5874_v41 = vpop.permute.xlu1 %1050  ;;  %v1135_v11 = vrot.slane %v1043_v36, %v5829_v7  ;;  %v1174_v29 = vrot.slane %v1043_v36, %v5832_v9  ;;  %v593_v30 = vadd.f32 %v592_v12, %v591_v46  ;;  %v617_v32 = vadd.f32 %v616_v13, %v615_v47 }
  0xd2   : > { %v1065_v50 = vmul.f32 %v1056_v44, %v5874_v41  ;;  %v600_v20 = vrot.slane %v599_v52, 2  ;;  %v624_v21 = vrot.slane %v623_v53, 2  ;;  %v647_v33 = vadd.f32 %v646_v15, %v645_v48  ;;  %v5251_v44 = vld [vmem:[%s9065_s5 + $0xf0] sm:$0xff] }
  0xd3   : > { %v663_v39 = vadd.f32 %v662_v19, %v661_v0  ;;  %v594_v36 = vrot.slane %v593_v30, 1  ;;  %v618_v46 = vrot.slane %v617_v32, 1  ;;  %v671_v48 = vadd.f32 %v670_v35, %v669_v16  ;;  %v5252_v0 = vld [vmem:[%s9065_s5 + $0xf8] sm:$0xff] }
  0xd4   : > { %1071 = vrot.lane.b32.xlu0 %v1065_v50, %s8854_s7  ;;  %v601_v40 = vadd.f32 %v600_v20, %v599_v52  ;;  %v625_v42 = vadd.f32 %v624_v21, %v623_v53  ;;  %v648_v47 = vrot.slane %v647_v33, 2  ;;  %v641_v49 = vadd.f32 %v640_v38, %v639_v17 }
  0xd5   : > { %v5885_v61 = vpop.permute.xlu1 %1090  ;;  %v664_v50 = vrot.slane %v663_v39, 2  ;;  %v619_v12 = vadd.f32 %v618_v46, %v617_v32  ;;  %v672_v15 = vrot.slane %v671_v48, 2 }
  0xd6   : > { %v5871_v37 = vpop.permute.xlu0 %910  ;;  %v1105_v8 = vmul.f32 %v1096_v45, %v5885_v61  ;;  %v602_v51 = vrot.slane %v601_v40, 1  ;;  %v626_v52 = vrot.slane %v625_v42, 1  ;;  %v649_v13 = vadd.f32 %v648_v47, %v647_v33 }
  0xd7   : > { %v925_v43 = vmul.f32 %v916_v24, %v5871_v37  ;;  %v642_v17 = vrot.slane %v641_v49, 1  ;;  %v665_v19 = vadd.f32 %v664_v50, %v663_v39  ;;  %v673_v38 = vadd.f32 %v672_v15, %v671_v48 }
  0xd8   : > { %1111 = vrot.lane.b32.xlu0 %v1105_v8, %s8854_s7  ;;  %v603_v20 = vadd.f32 %v602_v51, %v601_v40  ;;  %v627_v21 = vadd.f32 %v626_v52, %v625_v42  ;;  %v650_v35 = vrot.slane %v649_v13, 1  ;;  %v628_v32 = vmul.f32 0.00390625, %v619_v12  ;;  %v5253_v42 = vld [vmem:[%s9065_s5 + $0x100] sm:$0xff] }
  0xd9   : > { %931 = vrot.lane.b32.xlu1 %v925_v43, %s9071_s23  ;;  %v5895_v24 = vpop.permute.xlu1 %1129  ;;  %v674_v48 = vrot.slane %v673_v38, 1 }
  0xda   : > { %v1144_v28 = vmul.f32 %v1135_v11, %v5895_v24  ;;  %v5910_v53 = vpop.permute.xlu0 %1036  ;;  %v595_v11 = vadd.f32 %v594_v36, %v593_v30  ;;  %v607_v33 = vmul.f32 0.00390625, %v603_v20  ;;  %v631_v39 = vmul.f32 0.00390625, %v627_v21 }
  0xdb   : > { %v651_v47 = vadd.f32 %v650_v35, %v649_v13  ;;  %v629_v50 = vmul.f32 %v5824_v3, %v628_v32  ;;  %v675_v20 = vadd.f32 %v674_v48, %v673_v38 }
  0xdc   : > { %1150 = vrot.lane.b32.xlu0 %v1144_v28, %s8854_s7  ;;  %v604_v30 = vmul.f32 0.00390625, %v595_v11  ;;  %v608_v51 = vmul.f32 %v607_v33, %v5819_v2  ;;  %v632_v52 = vmul.f32 %v5824_v3, %v631_v39  ;;  %v5254_v11 = vld [vmem:[%s9065_s5 + $0x108] sm:$0xff]  ;;  %v5255_v3 = vld [vmem:[%s9065_s5 + $0x110] sm:$0xff] }
  0xdd   : > { %1804 = vperm.xlu1 %5396, %v5249_v62   ;;  %v5903_v43 = vpop.permute.xlu1 %1168  ;;  %v679_v38 = vmul.f32 0.00390625, %v675_v20  ;;  %v2351_v20 = vld [vmem:[%s8832_s12] sm:$0xff] }
  0xde   : > { %v1183_v45 = vmul.f32 %v1174_v29, %v5903_v43 }
  0xe0   : > { %1189 = vrot.lane.b32.xlu0 %v1183_v45, %s8854_s7  ;;  %v666_v45 = vrot.slane %v665_v19, 1  ;;  %s9112_s7 = smov 126  }
  0xe1   : > { %1844 = vperm.xlu1 %5396, %v5250_v26   ;;  %v5912_v62 = vpop.permute.xlu1 %1203 }
  0xe2   : > { %v1211_v8 = vmul.f32 %v5912_v62, %v5806_v59  ;;  %v5925_v59 = vpop.permute.xlu0 %1205  ;;  %v667_v13 = vadd.f32 %v666_v45, %v665_v19 }
  0xe4   : > { %v1224_v16 = vrot.slane %v1211_v8, %v5657_v6  ;;  %v1264_v29 = vrot.slane %v1211_v8, %v5703_v27  ;;  %v1303_v46 = vrot.slane %v1211_v8, %v5829_v7  ;;  %v676_v19 = vmul.f32 0.00390625, %v667_v13 }
  0xe5   : > { %1883 = vperm.xlu1 %5396, %v5251_v44   ;;  %v5921_v26 = vpop.permute.xlu1 %1218  ;;  %v643_v44 = vadd.f32 %v642_v17, %v641_v49  ;;  %v655_v17 = vmul.f32 0.00390625, %v651_v47  ;;  %v5976_v47 = vld [vmem:[#allocation2 + $0x18] sm:$0xf] }
  0xe6   : > { %v1233_v28 = vmul.f32 %v1224_v16, %v5921_v26  ;;  %v1342_v16 = vrot.slane %v1211_v8, %v5832_v9  ;;  %v735_v8 = vld [vmem:[%s9074_s8] sm:$0xff]  ;;  %v677_v45 = vmul.f32 %v5861_v25, %v676_v19  ;;  %v5261_v19 = vld [vmem:[%s8832_s12 + $0x10] sm:$0xff]  ;;  %s5341_s8 = sshll.u32 %s5615_s28, 8 }
  0xe7   : > { %v652_v12 = vmul.f32 0.00390625, %v643_v44  ;;  %v656_v33 = vmul.f32 %v5847_v18, %v655_v17 }
  0xe8   : > { %1239 = vrot.lane.b32.xlu0 %v1233_v28, %s8852_s20  ;;  %v633_v28 = vadd.f32 %v632_v52, %v608_v51  ;;  %v5986_v51 = vld [vmem:[%s9061_s16] sm:$0x3] }
  0xe9   : > { %1922 = vperm.xlu1 %5396, %v5252_v0   ;;  %v5930_v40 = vpop.permute.xlu1 %1258  ;;  %v5942_v0 = vpop.permute.xlu0 %1397  ;;  %v5992_v13 = vrot.slane %v5986_v51, %v5657_v6 }
  0xea   : > { %v1273_v36 = vmul.f32 %v1264_v29, %v5930_v40  ;;  %v653_v29 = vmul.f32 %v5847_v18, %v652_v12  ;;  %v657_v44 = vadd.f32 %v656_v33, %v633_v28 }
  0xeb   : > { %9076 = vst [vmem:[#allocation19_spill] sm:$0xff] %v5992_v13 }
  0xec   : > { %1279 = vrot.lane.b32.xlu0 %v1273_v36, %s8852_s20  ;;  %v736_v36 = vadd.f32 %v735_v8, %v5804_v58 }
  0xed   : > { %1957 = vrot.lane.b32.xlu1 %v5713_v31, %s8875_s21  ;;  %v605_v31 = vmul.f32 %v604_v30, %v5819_v2  ;;  %v5944_v49 = vpop.permute.xlu1 %1297  ;;  %v5962_v30 = vpop.permute.xlu0 %1441 }
  0xee   : > { %v1312_v15 = vmul.f32 %v1303_v46, %v5944_v49  ;;  %v2126_v46 = vld [vmem:[%s9075_s6] sm:$0xff] }
  0xef   : > { %v630_v21 = vadd.f32 %v629_v50, %v605_v31  ;;  %v680_v31 = vmul.f32 %v5861_v25, %v679_v38  ;;  %v2127_v52 = vadd.f32 %v2126_v46, %v736_v36  ;;  %v5265_v36 = vld [vmem:[%s8832_s12 + $0x30] sm:$0xff] }
  0xf0   : > { %1318 = vrot.lane.b32.xlu0 %v1312_v15, %s8852_s20 }
  0xf1   : > { %1973 = vperm.xlu1 %5396, %v5253_v42   ;;  %v5952_v2 = vpop.permute.xlu1 %1336  ;;  %v654_v32 = vadd.f32 %v653_v29, %v630_v21  ;;  %v5256_v42 = vld [vmem:[%s9065_s5 + $0x118] sm:$0xff]  ;;  %v5978_v18 = vpop.permute.xlu0 %1464  ;;  %v681_v58 = vadd.f32 %v680_v31, %v657_v44  ;;  %s9255_s5 = smov 1  }
  0xf2   : > { %v1351_v35 = vmul.f32 %v1342_v16, %v5952_v2 }
  0xf3   : > { %v678_v48 = vadd.f32 %v677_v45, %v654_v32  ;;  %v5263_v32 = vld [vmem:[%s8832_s12 + $0x20] sm:$0xff] }
  0xf4   : > { %1357 = vrot.lane.b32.xlu0 %v1351_v35, %s8852_s20  ;;  %s8877_s20 = smov 94  }
  0xf5   : > { %2013 = vperm.xlu1 %5396, %v5254_v11   ;;  %v5966_v39 = vpop.permute.xlu1 %1375  ;;  %v1473_v11 = vmul.f32 %v5978_v18, %v5976_v47  ;;  %v682_v12 = vmul.f32 %v678_v48, %v678_v48  ;;  %v6022_v44 = vpop.permute.xlu0 %1633 }
  0xf6   : > { %v1642_v31 = vmul.f32 %v6022_v44, %v5976_v47 }
  0xf7   : > { %v683_v15 = vsub.f32 %v681_v58, %v682_v12  ;;  %v1492_v16 = vrot.slane %v1473_v11, %v5657_v6  ;;  %v1532_v28 = vrot.slane %v1473_v11, %v5703_v27  ;;  %v1571_v8 = vrot.slane %v1473_v11, %v5829_v7  ;;  %v5267_v12 = vld [vmem:[%s8832_s12 + $0x40] sm:$0xff] }
  0xf9   : > { %2052 = vperm.xlu1 %5396, %v5255_v3   ;;  %v5981_v50 = vpop.permute.xlu1 %1419  ;;  %v684_v21 = vadd.f32 1e-05, %v683_v15 }
  0xfb   : > { %5399 = vrsqrt.f32 %v684_v21 }
  0xfd   : > { %2091 = vperm.xlu1 %5396, %v5256_v42   ;;  %v5994_v25 = vpop.permute.xlu1 %1462  ;;  %v1610_v42 = vrot.slane %v1473_v11, %v5832_v9 }
 0x101   : > { %2130 = vperm.xlu1 %5396, %v2127_v52   ;;  %v5999_v17 = vpop.permute.xlu1 %1478  ;;  %v566_v52 = vld [vmem:[%s9078_s2] sm:$0xf] }
 0x102   : > { %v1495_v3 = vmul.f32 %v1492_v16, %v5999_v17  ;;  %v1661_v16 = vrot.slane %v1642_v31, %v5657_v6 }
 0x104   : > { %1503 = vrot.lane.b32.xlu0 %v1495_v3, %s8881_s29 }
 0x105   : > { %2340 = vrot.lane.b32.xlu1 %v5992_v13, %s9077_s30  ;;  %v6007_v29 = vpop.permute.xlu1 %1518  ;;  %v5400_v58 = vpop.eup %5399 }
 0x106   : > { %v1535_v35 = vmul.f32 %v1532_v28, %v6007_v29  ;;  %v686_v15 = vmul.f32 %v5400_v58, %v566_v52  ;;  %v1701_v28 = vrot.slane %v1642_v31, %v5703_v27  ;;  %v5269_v52 = vld [vmem:[%s8832_s12 + $0x50] sm:$0xff] }
 0x108   : > { %1543 = vrot.lane.b32.xlu0 %v1535_v35, %s8881_s29  ;;  %v687_v21 = vmul.f32 %v686_v15, %v678_v48 }
 0x109   : > { %2354 = vperm.xlu1 %5396, %v2351_v20   ;;  %v6015_v38 = vpop.permute.xlu1 %1557 }
 0x10a   : > { %v1574_v33 = vmul.f32 %v1571_v8, %v6015_v38 }
 0x10c   : > { %1582 = vrot.lane.b32.xlu0 %v1574_v33, %s8881_s29  ;;  %v1740_v33 = vrot.slane %v1642_v31, %v5829_v7 }
 0x10d   : > { %2404 = vperm.xlu1 %5396, %v5261_v19   ;;  %v6025_v45 = vpop.permute.xlu1 %1596  ;;  %v567_v19 = vld [vmem:[%s9079_s3] sm:$0xf]  ;;  %s9508_s3 = sld [smem:[#allocation123_spill]] }
 0x10e   : > { %v1613_v46 = vmul.f32 %v1610_v42, %v6025_v45  ;;  %v688_v8 = vsub.f32 %v567_v19, %v687_v21  ;;  %v5268_v42 = vld [vmem:[%s8832_s12 + $0x48] sm:$0xff] }
 0x110   : > { %1621 = vrot.lane.b32.xlu0 %v1613_v46, %s8881_s29  ;;  %v1779_v46 = vrot.slane %v1642_v31, %v5832_v9  ;;  %v1818_v31 = vrot.slane %v5976_v47, %v5657_v6  ;;  %s9116_s29 = smov 95  }
 0x111   : > { %2454 = vperm.xlu1 %5396, %v5263_v32   ;;  %v6037_v11 = vpop.permute.xlu1 %1631 }
 0x113   : > { %s8778_s4 = scalar_lea.hbm %s9508_s3, %s5341_s8 }
 0x115   : > { %2504 = vperm.xlu1 %5396, %v5265_v36   ;;  %v6043_v20 = vpop.permute.xlu1 %1647 }
 0x116   : > { %v1664_v3 = vmul.f32 %v1661_v16, %v6043_v20 }
 0x118   : > { %1672 = vrot.lane.b32.xlu0 %v1664_v3, %s8879_s26 }
 0x119   : > { %2554 = vperm.xlu1 %5396, %v5267_v12   ;;  %v6051_v35 = vpop.permute.xlu1 %1687 }
 0x11a   : > { %v1704_v32 = vmul.f32 %v1701_v28, %v6051_v35  ;;  %v1858_v28 = vrot.slane %v5976_v47, %v5703_v27 }
 0x11c   : > { %1712 = vrot.lane.b32.xlu0 %v1704_v32, %s8879_s26  ;;  %v1897_v32 = vrot.slane %v5976_v47, %v5829_v7 }
 0x11d   : > { %691 = vperm.xlu1 %5396, %v686_v15   ;;  %v6056_v48 = vpop.permute.xlu1 %1726 }
 0x11e   : > { %v1743_v36 = vmul.f32 %v1740_v33, %v6056_v48 }
 0x120   : > { %1751 = vrot.lane.b32.xlu0 %v1743_v36, %s8879_s26  ;;  %v1936_v36 = vrot.slane %v5976_v47, %v5832_v9 }
 0x121   : > { %704 = vperm.xlu1 %5396, %v688_v8   ;;  %v6064_v58 = vpop.permute.xlu1 %1765 }
 0x122   : > { %9080 = vst [vmem:[#allocation20_spill] sm:$0xff] %v6064_v58  ;;  %v1782_v12 = vmul.f32 %v1779_v46, %v6064_v58 }
 0x124   : > { %1790 = vrot.lane.b32.xlu0 %v1782_v12, %s8879_s26 }
 0x125   : > { %2593 = vperm.xlu1 %5396, %v5268_v42  }
 0x129   : > { %2632 = vperm.xlu1 %5396, %v5269_v52  }
 0x136   : > { %v6071_v15 = vpop.permute.xlu1 %891 }
 0x137   : > { %9081 = vst [vmem:[#allocation21_spill] sm:$0xff] %v6071_v15 }
 0x14b   : > { %v6073_v16 = vpop.permute.xlu1 %931 }
 0x14c   : > { %9082 = vst [vmem:[#allocation22_spill] sm:$0xff] %v6073_v16 }
 0x15c   : > { %v6077_v21 = vpop.permute.xlu1 %1804 }
 0x15d   : > { %v1821_v3 = vmul.f32 %v1818_v31, %v6077_v21  ;;  %v6101_v31 = vpop.permute.xlu0 %970 }
 0x15e   : > { %9083 = vst [vmem:[#allocation23_spill] sm:$0xff] %v6101_v31 }
 0x15f   : > { %1829 = vrot.lane.b32.xlu0 %v1821_v3, %s8883_s22 }
 0x160   : > { %v6083_v19 = vpop.permute.xlu1 %1844 }
 0x161   : > { %v1861_v8 = vmul.f32 %v1858_v28, %v6083_v19 }
 0x163   : > { %1869 = vrot.lane.b32.xlu0 %v1861_v8, %s8883_s22  ;;  %v6109_v8 = vpop.permute.xlu0 %1009 }
 0x164   : > { %v6089_v33 = vpop.permute.xlu1 %1883  ;;  %9084 = vst [vmem:[#allocation24_spill] sm:$0xff] %v6109_v8 }
 0x165   : > { %v1900_v42 = vmul.f32 %v1897_v32, %v6089_v33 }
 0x167   : > { %1908 = vrot.lane.b32.xlu0 %v1900_v42, %s8883_s22  ;;  %v6113_v42 = vpop.permute.xlu0 %1071 }
 0x168   : > { %v6095_v46 = vpop.permute.xlu1 %1922  ;;  %9085 = vst [vmem:[#allocation25_spill] sm:$0xff] %v6113_v42  ;;  %v5501_v42 = vmov 839922192  }
 0x169   : > { %v1939_v52 = vmul.f32 %v1936_v36, %v6095_v46  ;;  %v694_v57 = vunpack.c.l.s4 %v5501_v42 }
 0x16b   : > { %1947 = vrot.lane.b32.xlu0 %v1939_v52, %s8883_s22  ;;  %v6117_v52 = vpop.permute.xlu0 %1111  ;;  %s9118_s22 = smov 113  }
 0x16c   : > { %v6099_v12 = vpop.permute.xlu1 %1957  ;;  %9086 = vst [vmem:[#allocation26_spill] sm:$0xff] %v6117_v52 }
 0x16f   : > { %1959 = vrot.lane.b32.xlu0 %v5725_v34, %s8875_s21  ;;  %v6123_v31 = vpop.permute.xlu0 %1150  ;;  %s9123_s21 = smov 96  }
 0x170   : > { %v6105_v3 = vpop.permute.xlu1 %1973  ;;  %9089 = vst [vmem:[#allocation29_spill] sm:$0xff] %v6123_v31 }
 0x173   : > { %v6127_v16 = vpop.permute.xlu0 %1189 }
 0x174   : > { %v6107_v28 = vpop.permute.xlu1 %2013  ;;  %9091 = vst [vmem:[#allocation31_spill] sm:$0xff] %v6127_v16 }
 0x177   : > { %v6131_v8 = vpop.permute.xlu0 %1239 }
 0x178   : > { %v6111_v32 = vpop.permute.xlu1 %2052  ;;  %9093 = vst [vmem:[#allocation33_spill] sm:$0xff] %v6131_v8 }
 0x17b   : > { %v6137_v52 = vpop.permute.xlu0 %1279 }
 0x17c   : > { %v6115_v36 = vpop.permute.xlu1 %2091  ;;  %9096 = vst [vmem:[#allocation36_spill] sm:$0xff] %v6137_v52 }
 0x180   : > { %v6119_v5 = vpop.permute.xlu1 %2130 }
 0x181   : > { %9087 = vst [vmem:[#allocation27_spill] sm:$0xff] %v6119_v5  ;;  %v695_v5 = vunpack.c.0.s8 %v694_v57 }
 0x183   : > { %v698_v31 = vsub.s32 %v695_v5, %v5643_v1 }
 0x184   : > { %v6121_v22 = vpop.permute.xlu1 %2340 }
 0x185   : > { %9088 = vst [vmem:[#allocation28_spill] sm:$0xff] %v6121_v22 }
 0x188   : > { %v6125_v34 = vpop.permute.xlu1 %2354 }
 0x189   : > { %9090 = vst [vmem:[#allocation30_spill] sm:$0xff] %v6125_v34  ;;  %v6142_v34 = vpop.permute.xlu0 %1318 }
 0x18a   : > { %9098 = vst [vmem:[#allocation38_spill] sm:$0xff] %v6142_v34 }
 0x18c   : > { %v6129_v15 = vpop.permute.xlu1 %2404 }
 0x18d   : > { %9092 = vst [vmem:[#allocation32_spill] sm:$0xff] %v6129_v15  ;;  %v6144_v54 = vpop.permute.xlu0 %1357 }
 0x18e   : > { %9099 = vst [vmem:[#allocation39_spill] sm:$0xff] %v6144_v54 }
 0x190   : > { %v6133_v60 = vpop.permute.xlu1 %2454 }
 0x191   : > { %9094 = vst [vmem:[#allocation34_spill] sm:$0xff] %v6133_v60  ;;  %v6147_v13 = vpop.permute.xlu0 %1503 }
 0x192   : > { %9100 = vst [vmem:[#allocation40_spill] sm:$0xff] %v6147_v13 }
 0x194   : > { %v6135_v55 = vpop.permute.xlu1 %2504 }
 0x195   : > { %9095 = vst [vmem:[#allocation35_spill] sm:$0xff] %v6135_v55  ;;  %v6149_v57 = vpop.permute.xlu0 %1543 }
 0x196   : > { %9101 = vst [vmem:[#allocation41_spill] sm:$0xff] %v6149_v57 }
 0x198   : > { %v6139_v22 = vpop.permute.xlu1 %2554 }
 0x199   : > { %9097 = vst [vmem:[#allocation37_spill] sm:$0xff] %v6139_v22  ;;  %v6151_v58 = vpop.permute.xlu0 %1582 }
 0x19a   : > { %9102 = vst [vmem:[#allocation42_spill] sm:$0xff] %v6151_v58 }
 0x19c   : > { %v692_v16 = vpop.permute.xlu1 %691 }
 0x19d   : > { %v699_v56 = vrot.slane %v692_v16, %v698_v31  ;;  %v6153_v16 = vpop.permute.xlu0 %1621 }
 0x19e   : > { %9103 = vst [vmem:[#allocation43_spill] sm:$0xff] %v6153_v16 }
 0x19f   : > { %v701_v60 = vmul.f32 %v699_v56, %v5671_v10 }
 0x1a0   : > { %v705_v15 = vpop.permute.xlu1 %704 }
 0x1a1   : > { %v712_v8 = vrot.slane %v705_v15, %v698_v31  ;;  %v6155_v1 = vpop.permute.xlu0 %1672 }
 0x1a2   : > { %9104 = vst [vmem:[#allocation44_spill] sm:$0xff] %v6155_v1 }
 0x1a3   : > { %v714_v42 = vadd.f32 %v712_v8, %v701_v60 }
 0x1a5   : > { %v715_v55 = vsub.f32 0.0, %v714_v42  ;;  %v6157_v10 = vpop.permute.xlu0 %1712 }
 0x1a6   : > { %9105 = vst [vmem:[#allocation45_spill] sm:$0xff] %v6157_v10 }
 0x1a7   : > { %v716_v52 = vmul.f32 1.442695, %v715_v55 }
 0x1a9   : > { %5401 = vpow2.f32 %v716_v52  ;;  %v6159_v55 = vpop.permute.xlu0 %1751 }
 0x1aa   : > { %9106 = vst [vmem:[#allocation46_spill] sm:$0xff] %v6159_v55  ;;  %v1039_v55 = vsel %vm1038_vm3, %v5854_v23, %v5910_v53 }
 0x1ad   : > { %v6165_v8 = vpop.permute.xlu0 %1790 }
 0x1ae   : > { %9107 = vst [vmem:[#allocation47_spill] sm:$0xff] %v6165_v8 }
 0x1b3   : > { %v5402_v5 = vpop.eup %5401 }
 0x1b4   : > { %v718_v34 = vadd.f32 1.0, %v5402_v5 }
 0x1b6   : > { %5403 = vrcp.f32 %v718_v34 }
 0x1c0   : > { %v5404_v54 = vpop.eup %5403 }
 0x1c1   : > { %v721_v56 = vmul.f32 %v5404_v54, %v714_v42 }
 0x1c3   : > { %v738_v60 = vcombine.high %v721_v56, %v721_v56  ;;  %740 = vst [vmem:[#allocation2 + $0x8] sm:$0xf] %v721_v56 }
 0x1c5   : > { %741 = vst [vmem:[#allocation2 + $0x10] sm:$0xf] %v738_v60 }
 0x1ca   : > { %v6161_v15 = vld [vmem:[#allocation2 + $0x8] sm:$0xf] }
 0x1cb   : > { %v920_v31 = vrot.slane %v6161_v15, %v5703_v27  ;;  %v6170_v34 = vrot.slane %v6161_v15, %v5829_v7  ;;  %v998_v5 = vrot.slane %v6161_v15, %v5832_v9  ;;  %v1044_v10 = vmul.f32 %v1039_v55, %v6161_v15 }
 0x1cd   : > { %v926_v52 = vmul.f32 %v920_v31, %v5871_v37  ;;  %v965_v42 = vmul.f32 %v6170_v34, %v5826_v4  ;;  %v1004_v60 = vmul.f32 %v998_v5, %v5838_v14  ;;  %v1100_v1 = vrot.slane %v1044_v10, %v5703_v27 }
 0x1cf   : > { %933 = vrot.lane.b32.xlu1 %v926_v52, %s9071_s23  ;;  %v1400_v52 = vmul.f32 %v5942_v0, %v920_v31 }
 0x1d1   : > { %v6173_v54 = vpop.permute.xlu0 %1829 }
 0x1d2   : > { %9108 = vst [vmem:[#allocation48_spill] sm:$0xff] %v6173_v54  ;;  %v6187_v54 = vld [vmem:[#allocation2 + $0x10] sm:$0xf] }
 0x1d3   : > { %972 = vrot.lane.b32.xlu1 %v965_v42, %s9071_s23 }
 0x1d5   : > { %v6180_v56 = vpop.permute.xlu0 %1869 }
 0x1d6   : > { %9109 = vst [vmem:[#allocation49_spill] sm:$0xff] %v6180_v56  ;;  %v1444_v56 = vmul.f32 %v5962_v30, %v998_v5 }
 0x1d7   : > { %1011 = vrot.lane.b32.xlu1 %v1004_v60, %s9071_s23  ;;  %v884_v60 = vrot.slane %v6187_v54, %v5657_v6 }
 0x1d9   : > { %v6184_v8 = vpop.permute.xlu0 %1908 }
 0x1da   : > { %9110 = vst [vmem:[#allocation50_spill] sm:$0xff] %v6184_v8  ;;  %v887_v8 = vmul.f32 %v884_v60, %v5812_v63 }
 0x1db   : > { %1404 = vrot.lane.b32.xlu1 %v1400_v52, %s9077_s30  ;;  %v1060_v52 = vrot.slane %v1044_v10, %v5657_v6 }
 0x1dd   : > { %v6193_v42 = vpop.permute.xlu0 %1947 }
 0x1de   : > { %9111 = vst [vmem:[#allocation51_spill] sm:$0xff] %v6193_v42  ;;  %v1066_v42 = vmul.f32 %v1060_v52, %v5874_v41 }
 0x1df   : > { %1448 = vrot.lane.b32.xlu1 %v1444_v56, %s9077_s30 }
 0x1e1   : > { %v6200_v31 = vpop.permute.xlu0 %1959 }
 0x1e2   : > { %v1968_v23 = vmul.f32 %v6200_v31, %v5976_v47  ;;  %v1106_v47 = vmul.f32 %v1100_v1, %v5885_v61 }
 0x1e3   : > { %895 = vrot.lane.b32.xlu1 %v887_v8, %s9071_s23  ;;  %v1139_v8 = vrot.slane %v1044_v10, %v5829_v7 }
 0x1e4   : > { %v1987_v5 = vrot.slane %v1968_v23, %v5657_v6  ;;  %v2027_v56 = vrot.slane %v1968_v23, %v5703_v27  ;;  %v2066_v52 = vrot.slane %v1968_v23, %v5829_v7 }
 0x1e6   : > { %v1990_v55 = vmul.f32 %v1987_v5, %v6105_v3  ;;  %v2030_v16 = vmul.f32 %v2027_v56, %v6107_v28  ;;  %v1207_v5 = vsel %vm897_vm4, %v5912_v62, %v5925_v59  ;;  %v2069_v58 = vmul.f32 %v2066_v52, %v6111_v32  ;;  %v5260_v52 = vld [vmem:[%s8832_s12 + $0x8] sm:$0xff] }
 0x1e7   : > { %1073 = vrot.lane.b32.xlu1 %v1066_v42, %s9112_s7  ;;  %v1145_v42 = vmul.f32 %v1139_v8, %v5895_v24  ;;  %v1212_v1 = vmul.f32 %v1207_v5, %v6161_v15  ;;  %v2105_v56 = vrot.slane %v1968_v23, %v5832_v9 }
 0x1e8   : > { %1998 = vrot.lane.b32.xlu0 %v1990_v55, %s8877_s20  ;;  %v1178_v55 = vrot.slane %v1044_v10, %v5832_v9  ;;  %v6237_v10 = vrot.slane %v5986_v51, %v5703_v27 }
 0x1e9   : > { %v1228_v62 = vrot.slane %v1212_v1, %v5657_v6  ;;  %v1268_v8 = vrot.slane %v1212_v1, %v5703_v27  ;;  %v1307_v5 = vrot.slane %v1212_v1, %v5829_v7 }
 0x1eb   : > { %1113 = vrot.lane.b32.xlu1 %v1106_v47, %s9112_s7  ;;  %v1184_v47 = vmul.f32 %v1178_v55, %v5903_v43  ;;  %v1234_v23 = vmul.f32 %v1228_v62, %v5921_v26  ;;  %v1313_v51 = vmul.f32 %v1307_v5, %v5944_v49  ;;  %v1346_v55 = vrot.slane %v1212_v1, %v5832_v9 }
 0x1ec   : > { %2038 = vrot.lane.b32.xlu0 %v2030_v16, %s8877_s20  ;;  %v2108_v16 = vmul.f32 %v2105_v56, %v6115_v36  ;;  %v1379_v62 = vmul.f32 %v5966_v39, %v884_v60  ;;  %v963_v1 = vrot.slane %v6187_v54, %v5829_v7 }
 0x1ed   : > { %v1352_v56 = vmul.f32 %v1346_v55, %v5952_v2  ;;  %v6280_v55 = vpop.permute.xlu1 %2593 }
 0x1ee   : > { %9115 = vst [vmem:[#allocation52_spill] sm:$0xff] %v6280_v55 }
 0x1ef   : > { %1152 = vrot.lane.b32.xlu1 %v1145_v42, %s9112_s7  ;;  %v5262_v42 = vld [vmem:[%s8832_s12 + $0x18] sm:$0xff] }
 0x1f0   : > { %2077 = vrot.lane.b32.xlu0 %v2069_v58, %s8877_s20  ;;  %v1274_v58 = vmul.f32 %v1268_v8, %v5930_v40  ;;  %v9114_v8 = vmov 0.0  }
 0x1f3   : > { %1191 = vrot.lane.b32.xlu1 %v1184_v47, %s9112_s7  ;;  %v5264_v47 = vld [vmem:[%s8832_s12 + $0x28] sm:$0xff] }
 0x1f4   : > { %2116 = vrot.lane.b32.xlu0 %v2108_v16, %s8877_s20  ;;  %v5266_v16 = vld [vmem:[%s8832_s12 + $0x38] sm:$0xff]  ;;  %s9120_s20 = smov 110  }
 0x1f7   : > { %1241 = vrot.lane.b32.xlu1 %v1234_v23, %s9113_s19  ;;  %v6267_v23 = vld [vmem:[#allocation2 + $0x10] sm:$0xf] }
 0x1f8   : > { %2342 = vrot.lane.b32.xlu0 %v6237_v10, %s9077_s30  ;;  %v1814_v60 = vrot.slane %v6267_v23, %v5657_v6 }
 0x1fb   : > { %1281 = vrot.lane.b32.xlu1 %v1274_v58, %s9113_s19  ;;  %v2560_v58 = vrot.slane %v9114_v8, %v5657_v6 }
 0x1fc   : > { %2379 = vperm.xlu0 %5397, %v5260_v52   ;;  %v1423_v52 = vmul.f32 %v5981_v50, %v963_v1 }
 0x1fd   : > { %v2569_v5 = vmul.f32 %v2560_v58, %v6139_v22  ;;  %v1893_v58 = vrot.slane %v6267_v23, %v5829_v7  ;;  %v9155_v22 = vld [vmem:[#allocation16_spill] sm:$0xff] }
 0x1ff   : > { %1320 = vrot.lane.b32.xlu1 %v1313_v51, %s9113_s19  ;;  %v6276_v51 = vld [vmem:[#allocation2] sm:$0xff] }
 0x200   : > { %2429 = vperm.xlu0 %5397, %v5262_v42   ;;  %v2599_v42 = vrot.slane %v6276_v51, %v5703_v27 }
 0x203   : > { %1359 = vrot.lane.b32.xlu1 %v1352_v56, %s9113_s19  ;;  %v1820_v56 = vmul.f32 %v1814_v60, %v6077_v21  ;;  %v1899_v60 = vmul.f32 %v1893_v58, %v6089_v33 }
 0x204   : > { %2479 = vperm.xlu0 %5397, %v5264_v47   ;;  %v1854_v47 = vrot.slane %v6267_v23, %v5703_v27 }
 0x206   : > { %v1860_v8 = vmul.f32 %v1854_v47, %v6083_v19 }
 0x207   : > { %1384 = vrot.lane.b32.xlu1 %v1379_v62, %s9077_s30  ;;  %v2608_v62 = vmul.f32 %v2599_v42, %v6280_v55 }
 0x208   : > { %2529 = vperm.xlu0 %5397, %v5266_v16   ;;  %v880_v16 = vrot.slane %v6161_v15, %v5657_v6 }
 0x20a   : > { %v1378_v42 = vmul.f32 %v5966_v39, %v880_v16  ;;  %v5270_v39 = vld [vmem:[%s8832_s12 + $0x58] sm:$0xff] }
 0x20b   : > { %1428 = vrot.lane.b32.xlu1 %v1423_v52, %s9077_s30  ;;  %v886_v52 = vmul.f32 %v880_v16, %v5812_v63  ;;  %v1422_v63 = vmul.f32 %v5981_v50, %v6170_v34  ;;  %v5271_v50 = vld [vmem:[%s8832_s12 + $0x60] sm:$0xff] }
 0x20c   : > { %2575 = vrot.lane.b32.xlu0 %v2569_v5, %s9071_s23  ;;  %v1932_v5 = vrot.slane %v6267_v23, %v5832_v9 }
 0x20e   : > { %v1938_v47 = vmul.f32 %v1932_v5, %v6095_v46 }
 0x20f   : > { %1827 = vrot.lane.b32.xlu1 %v1820_v56, %s9116_s29  ;;  %v6303_v56 = vld [vmem:[#allocation2 + $0x8] sm:$0xf] }
 0x210   : > { %2614 = vrot.lane.b32.xlu0 %v2608_v62, %s9071_s23  ;;  %v1810_v62 = vrot.slane %v6303_v56, %v5657_v6  ;;  %v1889_v58 = vrot.slane %v6303_v56, %v5829_v7 }
 0x212   : > { %v1819_v16 = vmul.f32 %v1810_v62, %v6077_v21  ;;  %v5272_v21 = vld [vmem:[%s8832_s12 + $0x68] sm:$0xff]  ;;  %v966_v62 = vmul.f32 %v963_v1, %v5826_v4  ;;  %v1467_v4 = vsel %vm1466_vm5, %v5994_v25, %v5978_v18  ;;  %v6380_v18 = vpop.permute.xlu1 %2632 }
 0x213   : > { %1867 = vrot.lane.b32.xlu1 %v1860_v8, %s9116_s29  ;;  %v1850_v8 = vrot.slane %v6303_v56, %v5703_v27  ;;  %v5277_v1 = vld [vmem:[%s8832_s12 + $0x88] sm:$0xff]  ;;  %9119 = vst [vmem:[#allocation54_spill] sm:$0xff] %v6380_v18 }
 0x214   : > { %893 = vrot.lane.b32.xlu0 %v886_v52, %s9071_s23  ;;  %v1898_v52 = vmul.f32 %v1889_v58, %v6089_v33  ;;  %v5274_v33 = vld [vmem:[%s8832_s12 + $0x78] sm:$0xff] }
 0x215   : > { %v1859_v34 = vmul.f32 %v1850_v8, %v6083_v19  ;;  %v5273_v19 = vld [vmem:[%s8832_s12 + $0x70] sm:$0xff]  ;;  %v1472_v8 = vmul.f32 %v1467_v4, %v6267_v23 }
 0x217   : > { %1906 = vrot.lane.b32.xlu1 %v1899_v60, %s9116_s29  ;;  %v1928_v60 = vrot.slane %v6303_v56, %v5832_v9  ;;  %v1488_v58 = vrot.slane %v1472_v8, %v5657_v6 }
 0x218   : > { %1382 = vrot.lane.b32.xlu0 %v1378_v42, %s9077_s30  ;;  %v924_v42 = vrot.slane %v6187_v54, %v5703_v27 }
 0x219   : > { %v1937_v5 = vmul.f32 %v1928_v60, %v6095_v46  ;;  %v1528_v60 = vrot.slane %v1472_v8, %v5703_v27 }
 0x21b   : > { %1945 = vrot.lane.b32.xlu1 %v1938_v47, %s9116_s29  ;;  %v6347_v47 = vld [vmem:[%s9061_s16 + $0x2] sm:$0x3]  ;;  %s5503_s16 = smov [#allocation3]  }
 0x21c   : > { %1426 = vrot.lane.b32.xlu0 %v1422_v63, %s9077_s30  ;;  %v927_v63 = vmul.f32 %v924_v42, %v5871_v37  ;;  %v6352_v46 = vrot.slane %v6347_v47, %v5657_v6  ;;  %v5276_v37 = vld [vmem:[%s8832_s12 + $0x80] sm:$0xff] }
 0x21e   : > { %9117 = vst [vmem:[#allocation53_spill] sm:$0xff] %v6352_v46 }
 0x21f   : > { %2671 = vperm.xlu1 %5396, %v5270_v39   ;;  %v1002_v39 = vrot.slane %v6187_v54, %v5832_v9 }
 0x220   : > { %1825 = vrot.lane.b32.xlu0 %v1819_v16, %s9116_s29 }
 0x221   : > { %v1005_v16 = vmul.f32 %v1002_v39, %v5838_v14  ;;  %v5278_v14 = vld [vmem:[%s8832_s12 + $0x90] sm:$0xff] }
 0x223   : > { %2710 = vperm.xlu1 %5396, %v5271_v50   ;;  %v1401_v50 = vmul.f32 %v5942_v0, %v924_v42  ;;  %v1534_v42 = vmul.f32 %v1528_v60, %v6007_v29 }
 0x224   : > { %1865 = vrot.lane.b32.xlu0 %v1859_v34, %s9116_s29  ;;  %v1471_v34 = vmul.f32 %v5994_v25, %v6303_v56  ;;  %v1494_v25 = vmul.f32 %v1488_v58, %v5999_v17 }
 0x227   : > { %2749 = vperm.xlu1 %5396, %v5272_v21   ;;  %v1445_v21 = vmul.f32 %v5962_v30, %v1002_v39 }
 0x228   : > { %1904 = vrot.lane.b32.xlu0 %v1898_v52, %s9116_s29  ;;  %v1484_v52 = vrot.slane %v1471_v34, %v5657_v6 }
 0x22b   : > { %2788 = vperm.xlu1 %5396, %v5273_v19   ;;  %v1493_v19 = vmul.f32 %v1484_v52, %v5999_v17  ;;  %v1636_v17 = vsel %vm1635_vm6, %v6037_v11, %v6022_v44 }
 0x22c   : > { %1943 = vrot.lane.b32.xlu0 %v1937_v5, %s9116_s29  ;;  %v1524_v5 = vrot.slane %v1471_v34, %v5703_v27  ;;  %v1641_v4 = vmul.f32 %v1636_v17, %v6267_v23 }
 0x22e   : > { %v1657_v58 = vrot.slane %v1641_v4, %v5657_v6  ;;  %v1775_v17 = vrot.slane %v1641_v4, %v5832_v9 }
 0x22f   : > { %2827 = vperm.xlu1 %5396, %v5274_v33   ;;  %v1567_v33 = vrot.slane %v1472_v8, %v5829_v7 }
 0x230   : > { %935 = vrot.lane.b32.xlu0 %v927_v63, %s9071_s23  ;;  %v1533_v63 = vmul.f32 %v1524_v5, %v6007_v29  ;;  %v1962_v5 = vsel %vm1961_vm7, %v6099_v12, %v6200_v31 }
 0x233   : > { %2872 = vrot.lane.b32.xlu1 %v6352_v46, %s9118_s22  ;;  %v9157_v46 = vld [vmem:[#allocation17_spill] sm:$0xff] }
 0x234   : > { %974 = vrot.lane.b32.xlu0 %v966_v62, %s9071_s23  ;;  %v1563_v62 = vrot.slane %v1471_v34, %v5829_v7 }
 0x236   : > { %v1572_v29 = vmul.f32 %v1563_v62, %v6015_v38 }
 0x237   : > { %2887 = vperm.xlu1 %5396, %v5276_v37   ;;  %v1573_v37 = vmul.f32 %v1567_v33, %v6015_v38  ;;  %v1967_v33 = vmul.f32 %v1962_v5, %v6267_v23  ;;  %v9124_v23 = vld [vmem:[#allocation20_spill] sm:$0xff] }
 0x238   : > { %1013 = vrot.lane.b32.xlu0 %v1005_v16, %s9071_s23  ;;  %v1606_v16 = vrot.slane %v1472_v8, %v5832_v9 }
 0x239   : > { %v2101_v5 = vrot.slane %v1967_v33, %v5832_v9 }
 0x23b   : > { %2926 = vperm.xlu1 %5396, %v5277_v1   ;;  %v1602_v1 = vrot.slane %v1471_v34, %v5832_v9  ;;  %v1697_v34 = vrot.slane %v1641_v4, %v5703_v27 }
 0x23c   : > { %1406 = vrot.lane.b32.xlu0 %v1401_v50, %s9077_s30  ;;  %v1640_v50 = vmul.f32 %v6037_v11, %v6303_v56  ;;  %v1663_v11 = vmul.f32 %v1657_v58, %v6043_v20 }
 0x23d   : > { %v1611_v8 = vmul.f32 %v1602_v1, %v6025_v45  ;;  %v1703_v60 = vmul.f32 %v1697_v34, %v6051_v35  ;;  %v1983_v1 = vrot.slane %v1967_v33, %v5657_v6 }
 0x23e   : > { %v1771_v31 = vrot.slane %v1640_v50, %v5832_v9 }
 0x23f   : > { %2965 = vperm.xlu1 %5396, %v5278_v14   ;;  %v1612_v14 = vmul.f32 %v1606_v16, %v6025_v45 }
 0x240   : > { %1450 = vrot.lane.b32.xlu0 %v1445_v21, %s9077_s30  ;;  %v1653_v21 = vrot.slane %v1640_v50, %v5657_v6 }
 0x241   : > { %v6386_v0 = vpop.permute.xlu1 %933 }
 0x242   : > { %v1662_v52 = vmul.f32 %v1653_v21, %v6043_v20  ;;  %v1732_v20 = vrot.slane %v1640_v50, %v5829_v7 }
 0x243   : > { %1501 = vrot.lane.b32.xlu1 %v1494_v25, %s9120_s20  ;;  %v1693_v25 = vrot.slane %v1640_v50, %v5703_v27  ;;  %v2023_v50 = vrot.slane %v1967_v33, %v5703_v27 }
 0x244   : > { %1499 = vrot.lane.b32.xlu0 %v1493_v19, %s9120_s20  ;;  %v1736_v19 = vrot.slane %v1641_v4, %v5829_v7 }
 0x245   : > { %v6394_v30 = vpop.permute.xlu1 %972  ;;  %v2029_v34 = vmul.f32 %v2023_v50, %v6107_v28 }
 0x246   : > { %v1742_v62 = vmul.f32 %v1736_v19, %v6056_v48 }
 0x247   : > { %1541 = vrot.lane.b32.xlu1 %v1534_v42, %s9120_s20  ;;  %v1702_v42 = vmul.f32 %v1693_v25, %v6051_v35  ;;  %v1966_v35 = vmul.f32 %v6099_v12, %v6303_v56  ;;  %v1989_v56 = vmul.f32 %v1983_v1, %v6105_v3 }
 0x248   : > { %1539 = vrot.lane.b32.xlu0 %v1533_v63, %s9120_s20 }
 0x249   : > { %v6405_v39 = vpop.permute.xlu1 %1011  ;;  %v1979_v4 = vrot.slane %v1966_v35, %v5657_v6 }
 0x24b   : > { %1580 = vrot.lane.b32.xlu1 %v1573_v37, %s9120_s20  ;;  %v1741_v37 = vmul.f32 %v1732_v20, %v6056_v48  ;;  %v1988_v58 = vmul.f32 %v1979_v4, %v6105_v3  ;;  %v2097_v20 = vrot.slane %v1966_v35, %v5832_v9 }
 0x24c   : > { %1578 = vrot.lane.b32.xlu0 %v1572_v29, %s9120_s20  ;;  %v1781_v29 = vmul.f32 %v1775_v17, %v9124_v23 }
 0x24d   : > { %v6416_v44 = vpop.permute.xlu1 %1404 }
 0x24e   : > { %9121 = vst [vmem:[#allocation55_spill] sm:$0xff] %v6416_v44 }
 0x24f   : > { %1619 = vrot.lane.b32.xlu1 %v1612_v14, %s9120_s20  ;;  %v1780_v14 = vmul.f32 %v1771_v31, %v9124_v23  ;;  %v2106_v31 = vmul.f32 %v2097_v20, %v6115_v36 }
 0x250   : > { %1617 = vrot.lane.b32.xlu0 %v1611_v8, %s9120_s20  ;;  %v2019_v8 = vrot.slane %v1966_v35, %v5703_v27 }
 0x251   : > { %v6424_v38 = vpop.permute.xlu1 %1448 }
 0x252   : > { %9122 = vst [vmem:[#allocation56_spill] sm:$0xff] %v6424_v38  ;;  %v2028_v25 = vmul.f32 %v2019_v8, %v6107_v28  ;;  %v1213_v8 = vmul.f32 %v5925_v59, %v6187_v54  ;;  %v5283_v59 = vld [vmem:[%s8832_s12 + $0xb8] sm:$0xff] }
 0x253   : > { %1670 = vrot.lane.b32.xlu1 %v1663_v11, %s9123_s21 }
 0x254   : > { %1668 = vrot.lane.b32.xlu0 %v1662_v52, %s9123_s21  ;;  %v2062_v52 = vrot.slane %v1967_v33, %v5829_v7 }
 0x255   : > { %v6432_v45 = vpop.permute.xlu1 %895 }
 0x256   : > { %v2068_v19 = vmul.f32 %v2062_v52, %v6111_v32  ;;  %v5282_v52 = vld [vmem:[%s8832_s12 + $0xb0] sm:$0xff] }
 0x257   : > { %1710 = vrot.lane.b32.xlu1 %v1703_v60, %s9123_s21  ;;  %v2058_v60 = vrot.slane %v1966_v35, %v5829_v7 }
 0x258   : > { %1708 = vrot.lane.b32.xlu0 %v1702_v42, %s9123_s21 }
 0x259   : > { %v6444_v63 = vpop.permute.xlu1 %1073  ;;  %v2067_v42 = vmul.f32 %v2058_v60, %v6111_v32 }
 0x25a   : > { %v6460_v48 = vpop.permute.xlu0 %1998 }
 0x25b   : > { %1749 = vrot.lane.b32.xlu1 %v1742_v62, %s9123_s21  ;;  %9125 = vst [vmem:[#allocation20_spill] sm:$0xff] %v6460_v48  ;;  %v1045_v62 = vmul.f32 %v5910_v53, %v6187_v54  ;;  %v5279_v53 = vld [vmem:[%s8832_s12 + $0x98] sm:$0xff] }
 0x25c   : > { %1747 = vrot.lane.b32.xlu0 %v1741_v37, %s9123_s21  ;;  %v2107_v37 = vmul.f32 %v2101_v5, %v6115_v36  ;;  %v5280_v36 = vld [vmem:[%s8832_s12 + $0xa0] sm:$0xff] }
 0x25d   : > { %v6454_v16 = vpop.permute.xlu1 %1113  ;;  %v1064_v33 = vrot.slane %v1045_v62, %v5657_v6  ;;  %v1143_v4 = vrot.slane %v1045_v62, %v5829_v7 }
 0x25e   : > { %v6472_v21 = vpop.permute.xlu0 %2038 }
 0x25f   : > { %1788 = vrot.lane.b32.xlu1 %v1781_v29, %s9123_s21  ;;  %9127 = vst [vmem:[#allocation57_spill] sm:$0xff] %v6472_v21  ;;  %v1067_v23 = vmul.f32 %v1064_v33, %v5874_v41  ;;  %v1104_v29 = vrot.slane %v1045_v62, %v5703_v27  ;;  %v5281_v41 = vld [vmem:[%s8832_s12 + $0xa8] sm:$0xff]  ;;  %v1146_v50 = vmul.f32 %v1143_v4, %v5895_v24 }
 0x260   : > { %1786 = vrot.lane.b32.xlu0 %v1780_v14, %s9123_s21  ;;  %v1232_v24 = vrot.slane %v1213_v8, %v5657_v6 }
 0x261   : > { %v6464_v12 = vpop.permute.xlu1 %1152  ;;  %v1107_v14 = vmul.f32 %v1104_v29, %v5885_v61  ;;  %v5285_v29 = vld [vmem:[%s8832_s12 + $0xc8] sm:$0xff] }
 0x262   : > { %v6490_v28 = vpop.permute.xlu0 %2077  ;;  %v1235_v5 = vmul.f32 %v1232_v24, %v5921_v26  ;;  %v5284_v26 = vld [vmem:[%s8832_s12 + $0xc0] sm:$0xff] }
 0x263   : > { %1996 = vrot.lane.b32.xlu1 %v1989_v56, %s9126_s18  ;;  %9128 = vst [vmem:[#allocation58_spill] sm:$0xff] %v6490_v28 }
 0x264   : > { %1994 = vrot.lane.b32.xlu0 %v1988_v58, %s9126_s18  ;;  %v1182_v58 = vrot.slane %v1045_v62, %v5832_v9  ;;  %v1311_v62 = vrot.slane %v1213_v8, %v5829_v7 }
 0x265   : > { %v6474_v11 = vpop.permute.xlu1 %1191 }
 0x266   : > { %v6504_v32 = vpop.permute.xlu0 %2116 }
 0x267   : > { %2036 = vrot.lane.b32.xlu1 %v2029_v34, %s9126_s18  ;;  %9129 = vst [vmem:[#allocation59_spill] sm:$0xff] %v6504_v32 }
 0x268   : > { %2034 = vrot.lane.b32.xlu0 %v2028_v25, %s9126_s18  ;;  %v1185_v25 = vmul.f32 %v1182_v58, %v5903_v43 }
 0x269   : > { %v6482_v3 = vpop.permute.xlu1 %1241 }
 0x26a   : > { %v6518_v56 = vpop.permute.xlu0 %2342 }
 0x26b   : > { %2075 = vrot.lane.b32.xlu1 %v2068_v19, %s9126_s18  ;;  %9130 = vst [vmem:[#allocation60_spill] sm:$0xff] %v6518_v56 }
 0x26c   : > { %2073 = vrot.lane.b32.xlu0 %v2067_v42, %s9126_s18  ;;  %v1272_v42 = vrot.slane %v1213_v8, %v5703_v27 }
 0x26d   : > { %v6494_v17 = vpop.permute.xlu1 %1281 }
 0x26e   : > { %v1275_v43 = vmul.f32 %v1272_v42, %v5930_v40  ;;  %v5289_v42 = vld [vmem:[%s8832_s12 + $0xe8] sm:$0xff] }
 0x26f   : > { %2114 = vrot.lane.b32.xlu1 %v2107_v37, %s9126_s18 }
 0x270   : > { %2112 = vrot.lane.b32.xlu0 %v2106_v31, %s9126_s18  ;;  %v9136_v31 = vld [vmem:[#allocation19_spill] sm:$0xff] }
 0x271   : > { %v6506_v35 = vpop.permute.xlu1 %1320 }
 0x273   : > { %3004 = vperm.xlu1 %5396, %v5279_v53   ;;  %v1314_v53 = vmul.f32 %v1311_v62, %v5944_v49  ;;  %v5286_v49 = vld [vmem:[%s8832_s12 + $0xd0] sm:$0xff] }
 0x274   : > { %1075 = vrot.lane.b32.xlu0 %v1067_v23, %s9112_s7  ;;  %v1350_v23 = vrot.slane %v1213_v8, %v5832_v9 }
 0x275   : > { %v6514_v1 = vpop.permute.xlu1 %1359 }
 0x276   : > { %v1353_v4 = vmul.f32 %v1350_v23, %v5952_v2  ;;  %v5287_v2 = vld [vmem:[%s8832_s12 + $0xd8] sm:$0xff] }
 0x277   : > { %3043 = vperm.xlu1 %5396, %v5280_v36   ;;  %v2638_v36 = vrot.slane %v6276_v51, %v5829_v7 }
 0x278   : > { %1115 = vrot.lane.b32.xlu0 %v1107_v14, %s9112_s7 }
 0x279   : > { %v6530_v61 = vpop.permute.xlu1 %1384 }
 0x27b   : > { %v6528_v34 = vpop.permute.xlu0 %2379  ;;  %3082 = vperm.xlu1 %5396, %v5281_v41  }
 0x27c   : > { %9131 = vst [vmem:[#allocation61_spill] sm:$0xff] %v6528_v34  ;;  %1154 = vrot.lane.b32.xlu0 %v1146_v50, %s9112_s7  ;;  %v2647_v50 = vmul.f32 %v2638_v36, %v6380_v18  ;;  %v5290_v36 = vld [vmem:[%s8832_s12 + $0xf0] sm:$0xff]  ;;  %v9152_v34 = vld [vmem:[#allocation15_spill] sm:$0xff] }
 0x27d   : > { %v6544_v19 = vpop.permute.xlu1 %1428 }
 0x27e   : > { %9133 = vst [vmem:[#allocation63_spill] sm:$0xff] %v6544_v19 }
 0x27f   : > { %v6538_v60 = vpop.permute.xlu0 %2429  ;;  %3121 = vperm.xlu1 %5396, %v5282_v52  }
 0x280   : > { %9132 = vst [vmem:[#allocation62_spill] sm:$0xff] %v6538_v60  ;;  %1193 = vrot.lane.b32.xlu0 %v1185_v25, %s9112_s7  ;;  %v5288_v25 = vld [vmem:[%s8832_s12 + $0xe0] sm:$0xff] }
 0x281   : > { %v6557_v33 = vpop.permute.xlu1 %1827 }
 0x282   : > { %9137 = vst [vmem:[#allocation66_spill] sm:$0xff] %v6557_v33 }
 0x283   : > { %v6548_v20 = vpop.permute.xlu0 %2479  ;;  %3160 = vperm.xlu1 %5396, %v5283_v59  }
 0x284   : > { %9134 = vst [vmem:[#allocation64_spill] sm:$0xff] %v6548_v20  ;;  %1243 = vrot.lane.b32.xlu0 %v1235_v5, %s9113_s19  ;;  %v6602_v5 = vrot.slane %v6276_v51, %v5832_v9 }
 0x285   : > { %v6573_v14 = vpop.permute.xlu1 %1867 }
 0x286   : > { %9139 = vst [vmem:[#allocation68_spill] sm:$0xff] %v6573_v14  ;;  %9145 = vst [vmem:[#allocation74_spill] sm:$0xff] %v6602_v5 }
 0x287   : > { %v6553_v37 = vpop.permute.xlu0 %2529  ;;  %3195 = vrot.lane.b32.xlu1 %v9136_v31, %s9071_s23 }
 0x288   : > { %9135 = vst [vmem:[#allocation65_spill] sm:$0xff] %v6553_v37  ;;  %1283 = vrot.lane.b32.xlu0 %v1275_v43, %s9113_s19  ;;  %v9146_v43 = vld [vmem:[#allocation12_spill] sm:$0xff] }
 0x289   : > { %v6585_v8 = vpop.permute.xlu1 %1906  ;;  %v6608_v62 = vsub.s32 4, %v9146_v43  ;;  %v6636_v37 = vsub.s32 6, %v9146_v43 }
 0x28a   : > { %9141 = vst [vmem:[#allocation70_spill] sm:$0xff] %v6585_v8 }
 0x28b   : > { %v6565_v40 = vpop.permute.xlu0 %2575  ;;  %3210 = vperm.xlu1 %5396, %v5284_v26  }
 0x28c   : > { %9138 = vst [vmem:[#allocation67_spill] sm:$0xff] %v6565_v40  ;;  %1322 = vrot.lane.b32.xlu0 %v1314_v53, %s9113_s19 }
 0x28d   : > { %v6596_v24 = vpop.permute.xlu1 %1945 }
 0x28e   : > { %9143 = vst [vmem:[#allocation72_spill] sm:$0xff] %v6596_v24 }
 0x28f   : > { %v6576_v41 = vpop.permute.xlu0 %2614  ;;  %3249 = vperm.xlu1 %5396, %v5285_v29   ;;  %v2716_v29 = vrot.slane %v6276_v51, %v6608_v62 }
 0x290   : > { %9140 = vst [vmem:[#allocation69_spill] sm:$0xff] %v6576_v41  ;;  %1361 = vrot.lane.b32.xlu0 %v1353_v4, %s9113_s19  ;;  %v6622_v4 = vsub.s32 5, %v9146_v43 }
 0x292   : > { %v6633_v40 = vrot.slane %v6276_v51, %v6622_v4 }
 0x293   : > { %v6583_v58 = vpop.permute.xlu0 %893  ;;  %3288 = vperm.xlu1 %5396, %v5286_v49  }
 0x294   : > { %2653 = vrot.lane.b32.xlu0 %v2647_v50, %s9071_s23  ;;  %v5420_v50 = vld [vmem:[#allocation2] sm:$0xf] }
 0x297   : > { %v6591_v52 = vpop.permute.xlu0 %1382  ;;  %3327 = vperm.xlu1 %5396, %v5287_v2   ;;  %v9149_v2 = vld [vmem:[#allocation13_spill] sm:$0xff] }
 0x298   : > { %9142 = vst [vmem:[#allocation71_spill] sm:$0xff] %v6591_v52  ;;  %9150 = vst [vmem:[#allocation13_spill] sm:$0xff] %v6633_v40 }
 0x29b   : > { %v6598_v59 = vpop.permute.xlu0 %1426  ;;  %3366 = vperm.xlu1 %5396, %v5288_v25   ;;  %v764_v25 = vmul.f32 %v5420_v50, %v9149_v2 }
 0x29c   : > { %9144 = vst [vmem:[#allocation73_spill] sm:$0xff] %v6598_v59 }
 0x29d   : > { %v801_v20 = vrot.slane %v764_v25, %v5703_v27  ;;  %v776_v60 = vrot.slane %v764_v25, %v5657_v6 }
 0x29e   : > { %v6610_v26 = vpop.permute.xlu1 %2671 }
 0x29f   : > { %9147 = vst [vmem:[#allocation12_spill] sm:$0xff] %v6610_v26  ;;  %v2686_v53 = vmul.f32 %v6602_v5, %v6610_v26  ;;  %v6614_v23 = vpop.permute.xlu0 %1825  ;;  %3405 = vperm.xlu1 %5396, %v5289_v42   ;;  %v810_v56 = vmul.f32 %v801_v20, %v9152_v34  ;;  %v851_v26 = vrot.slane %v764_v25, %v5832_v9 }
 0x2a1   : > { %2692 = vrot.lane.b32.xlu0 %v2686_v53, %s9071_s23  ;;  %v860_v32 = vmul.f32 %v851_v26, %v9157_v46 }
 0x2a2   : > { %v6625_v49 = vpop.permute.xlu1 %2710 }
 0x2a3   : > { %9148 = vst [vmem:[#allocation75_spill] sm:$0xff] %v6625_v49  ;;  %v2725_v41 = vmul.f32 %v2716_v29, %v6625_v49  ;;  %v6629_v42 = vpop.permute.xlu0 %1865  ;;  %3444 = vperm.xlu1 %5396, %v5290_v36   ;;  %v2794_v36 = vrot.slane %v6276_v51, %v6636_v37  ;;  %v826_v49 = vrot.slane %v764_v25, %v5829_v7 }
 0x2a5   : > { %2731 = vrot.lane.b32.xlu0 %v2725_v41, %s9071_s23  ;;  %v6652_v41 = vsub.s32 7, %v9146_v43 }
 0x2a6   : > { %v6639_v53 = vpop.permute.xlu1 %2749 }
 0x2a7   : > { %9151 = vst [vmem:[#allocation76_spill] sm:$0xff] %v6639_v53  ;;  %v2764_v50 = vmul.f32 %v6633_v40, %v6639_v53  ;;  %v6644_v29 = vpop.permute.xlu0 %1904  ;;  %v9154_v53 = vld [vmem:[#allocation14_spill] sm:$0xff]  ;;  %v835_v40 = vmul.f32 %v826_v49, %v9155_v22  ;;  %v6665_v20 = vrot.slane %v6276_v51, %v6652_v41 }
 0x2a8   : > { %v785_v55 = vmul.f32 %v776_v60, %v9154_v53 }
 0x2a9   : > { %2770 = vrot.lane.b32.xlu0 %v2764_v50, %s9071_s23  ;;  %9156 = vst [vmem:[#allocation14_spill] sm:$0xff] %v6665_v20 }
 0x2aa   : > { %v6656_v18 = vpop.permute.xlu1 %2788  ;;  %v813_v43 = vadd.f32 %v810_v56, %v785_v55  ;;  %v6681_v55 = vrot.slane %v6347_v47, %v5703_v27 }
 0x2ab   : > { %9153 = vst [vmem:[#allocation15_spill] sm:$0xff] %v6656_v18  ;;  %v2803_v5 = vmul.f32 %v2794_v36, %v6656_v18  ;;  %v6661_v31 = vpop.permute.xlu0 %1943  ;;  %v9159_v36 = vld [vmem:[#allocation21_spill] sm:$0xff] }
 0x2ac   : > { %v838_v50 = vadd.f32 %v835_v40, %v813_v43  ;;  %v898_v18 = vsel %vm897_vm4, %v9159_v36, %v6583_v58  ;;  %9160 = vst [vmem:[#allocation17_spill] sm:$0xff] %v6681_v55  ;;  %v9162_v43 = vld [vmem:[#allocation22_spill] sm:$0xff] }
 0x2ad   : > { %2809 = vrot.lane.b32.xlu0 %v2803_v5, %s9071_s23  ;;  %v937_v47 = vsel %vm897_vm4, %v9162_v43, %v6386_v0 }
 0x2ae   : > { %v6669_v25 = vpop.permute.xlu1 %2827  ;;  %v863_v28 = vadd.f32 %v860_v32, %v838_v50 }
 0x2af   : > { %9158 = vst [vmem:[#allocation16_spill] sm:$0xff] %v6669_v25  ;;  %v2842_v60 = vmul.f32 %v6665_v20, %v6669_v25  ;;  %v6673_v49 = vpop.permute.xlu0 %935 }
 0x2b0   : > { %v903_v5 = vadd.f32 %v898_v18, %v863_v28 }
 0x2b1   : > { %2848 = vrot.lane.b32.xlu0 %v2842_v60, %s9071_s23 }
 0x2b2   : > { %v6683_v56 = vpop.permute.xlu1 %2872  ;;  %v942_v60 = vadd.f32 %v937_v47, %v903_v5 }
 0x2b3   : > { %9161 = vst [vmem:[#allocation21_spill] sm:$0xff] %v6683_v56  ;;  %v6687_v40 = vmul.f32 %v6276_v51, %v6683_v56  ;;  %v6689_v26 = vpop.permute.xlu0 %974  ;;  %v9164_v56 = vld [vmem:[#allocation23_spill] sm:$0xff] }
 0x2b4   : > { %v976_v25 = vsel %vm897_vm4, %v9164_v56, %v6394_v30 }
 0x2b5   : > { %2874 = vrot.lane.b32.xlu0 %v6681_v55, %s9118_s22  ;;  %v2893_v32 = vrot.slane %v6687_v40, %v5657_v6  ;;  %v2932_v36 = vrot.slane %v6687_v40, %v5703_v27  ;;  %v981_v55 = vadd.f32 %v976_v25, %v942_v60  ;;  %v2971_v5 = vrot.slane %v6687_v40, %v5829_v7  ;;  %v9170_v60 = vld [vmem:[#allocation25_spill] sm:$0xff]  ;;  %s9229_s22 = smov 17  }
 0x2b6   : > { %v6698_v50 = vpop.permute.xlu1 %2887 }
 0x2b7   : > { %9163 = vst [vmem:[#allocation22_spill] sm:$0xff] %v6698_v50  ;;  %v2902_v18 = vmul.f32 %v2893_v32, %v6698_v50  ;;  %v6701_v28 = vpop.permute.xlu0 %1013  ;;  %v9167_v32 = vld [vmem:[#allocation24_spill] sm:$0xff] }
 0x2b8   : > { %v1015_v47 = vsel %vm897_vm4, %v9167_v32, %v6405_v39  ;;  %v9172_v32 = vld [vmem:[#allocation26_spill] sm:$0xff] }
 0x2b9   : > { %2908 = vrot.lane.b32.xlu0 %v2902_v18, %s9112_s7  ;;  %v1020_v56 = vadd.f32 %v1015_v47, %v981_v55  ;;  %v1117_v24 = vsel %vm1077_vm8, %v9172_v32, %v6454_v16 }
 0x2ba   : > { %v6709_v20 = vpop.permute.xlu1 %2926 }
 0x2bb   : > { %9165 = vst [vmem:[#allocation23_spill] sm:$0xff] %v6709_v20  ;;  %v2941_v43 = vmul.f32 %v2932_v36, %v6709_v20  ;;  %v6712_v21 = vpop.permute.xlu0 %1406  ;;  %v1078_v36 = vsel %vm1077_vm8, %v9170_v60, %v6444_v63 }
 0x2bc   : > { %9166 = vst [vmem:[#allocation77_spill] sm:$0xff] %v6712_v21 }
 0x2bd   : > { %2947 = vrot.lane.b32.xlu0 %v2941_v43, %s9112_s7  ;;  %v1083_v43 = vadd.f32 %v1078_v36, %v1020_v56  ;;  %v9176_v56 = vld [vmem:[#allocation31_spill] sm:$0xff] }
 0x2be   : > { %v6720_v18 = vpop.permute.xlu1 %2965  ;;  %v1195_v36 = vsel %vm1077_vm8, %v9176_v56, %v6474_v11 }
 0x2bf   : > { %9168 = vst [vmem:[#allocation24_spill] sm:$0xff] %v6720_v18  ;;  %v2980_v50 = vmul.f32 %v2971_v5, %v6720_v18  ;;  %v6723_v25 = vpop.permute.xlu0 %1450  ;;  %v1122_v5 = vadd.f32 %v1117_v24, %v1083_v43  ;;  %v9178_v43 = vld [vmem:[#allocation33_spill] sm:$0xff] }
 0x2c0   : > { %9169 = vst [vmem:[#allocation78_spill] sm:$0xff] %v6723_v25 }
 0x2c1   : > { %2986 = vrot.lane.b32.xlu0 %v2980_v50, %s9112_s7  ;;  %v9174_v50 = vld [vmem:[#allocation29_spill] sm:$0xff] }
 0x2c2   : > { %v6729_v20 = vpop.permute.xlu1 %1501  ;;  %v1156_v18 = vsel %vm1077_vm8, %v9174_v50, %v6464_v12 }
 0x2c3   : > { %9171 = vst [vmem:[#allocation25_spill] sm:$0xff] %v6729_v20  ;;  %v6731_v48 = vpop.permute.xlu0 %1499  ;;  %v1161_v60 = vadd.f32 %v1156_v18, %v1122_v5  ;;  %v9180_v5 = vld [vmem:[#allocation36_spill] sm:$0xff] }
 0x2c4   : > { %v1285_v57 = vsel %vm1245_vm9, %v9180_v5, %v6494_v17 }
 0x2c5   : > { %v1200_v32 = vadd.f32 %v1195_v36, %v1161_v60  ;;  %v9182_v60 = vld [vmem:[#allocation38_spill] sm:$0xff] }
 0x2c6   : > { %v6736_v55 = vpop.permute.xlu1 %1541  ;;  %v1324_v36 = vsel %vm1245_vm9, %v9182_v60, %v6506_v35 }
 0x2c7   : > { %9173 = vst [vmem:[#allocation26_spill] sm:$0xff] %v6736_v55  ;;  %v6738_v47 = vpop.permute.xlu0 %1539  ;;  %v1246_v55 = vsel %vm1245_vm9, %v9178_v43, %v6482_v3 }
 0x2ca   : > { %v6743_v8 = vpop.permute.xlu1 %1580 }
 0x2cb   : > { %9175 = vst [vmem:[#allocation29_spill] sm:$0xff] %v6743_v8  ;;  %v6745_v14 = vpop.permute.xlu0 %1578  ;;  %v1251_v8 = vadd.f32 %v1246_v55, %v1200_v32  ;;  %v9184_v55 = vld [vmem:[#allocation39_spill] sm:$0xff] }
 0x2cc   : > { %v1363_v32 = vsel %vm1245_vm9, %v9184_v55, %v6514_v1 }
 0x2ce   : > { %v6750_v33 = vpop.permute.xlu1 %1619 }
 0x2cf   : > { %9177 = vst [vmem:[#allocation31_spill] sm:$0xff] %v6750_v33  ;;  %v6752_v24 = vpop.permute.xlu0 %1617  ;;  %v1290_v33 = vadd.f32 %v1285_v57, %v1251_v8 }
 0x2d1   : > { %v1329_v43 = vadd.f32 %v1324_v36, %v1290_v33 }
 0x2d2   : > { %v6757_v50 = vpop.permute.xlu1 %1670 }
 0x2d3   : > { %9179 = vst [vmem:[#allocation33_spill] sm:$0xff] %v6757_v50  ;;  %v6759_v18 = vpop.permute.xlu0 %1668  ;;  %v1368_v5 = vadd.f32 %v1363_v32, %v1329_v43 }
 0x2d5   : > { %v1390_v8 = vadd.f32 %v6591_v52, %v1368_v5 }
 0x2d6   : > { %v6764_v56 = vpop.permute.xlu1 %1710 }
 0x2d7   : > { %9181 = vst [vmem:[#allocation36_spill] sm:$0xff] %v6764_v56  ;;  %v6766_v20 = vpop.permute.xlu0 %1708  ;;  %v1412_v43 = vadd.f32 %v6416_v44, %v1390_v8 }
 0x2da   : > { %v6771_v13 = vpop.permute.xlu1 %1749 }
 0x2db   : > { %9183 = vst [vmem:[#allocation38_spill] sm:$0xff] %v6771_v13  ;;  %v6773_v50 = vpop.permute.xlu0 %1747  ;;  %v9188_v13 = vld [vmem:[#allocation18_spill] sm:$0xff] }
 0x2dc   : > { %v760_v33 = vsel %vm759_vm10, %v9149_v2, %v9188_v13  ;;  %v766_v36 = vmul.f32 %v9188_v13, %v6187_v54  ;;  %v1434_v13 = vadd.f32 %v6598_v59, %v1412_v43  ;;  %v3010_v43 = vrot.slane %v6687_v40, %v5832_v9 }
 0x2dd   : > { %v765_v55 = vmul.f32 %v760_v33, %v6161_v15 }
 0x2de   : > { %v6778_v25 = vpop.permute.xlu1 %1788  ;;  %v809_v5 = vrot.slane %v766_v36, %v5703_v27 }
 0x2df   : > { %9185 = vst [vmem:[#allocation39_spill] sm:$0xff] %v6778_v25  ;;  %v6780_v56 = vpop.permute.xlu0 %1786  ;;  %v780_v19 = vrot.slane %v765_v55, %v5657_v6  ;;  %v805_v21 = vrot.slane %v765_v55, %v5703_v27 }
 0x2e0   : > { %v812_v8 = vmul.f32 %v809_v5, %v9152_v34 }
 0x2e1   : > { %v786_v33 = vmul.f32 %v780_v19, %v9154_v53 }
 0x2e2   : > { %v6782_v57 = vpop.permute.xlu1 %1996 }
 0x2e3   : > { %9186 = vst [vmem:[#allocation79_spill] sm:$0xff] %v6782_v57  ;;  %v6785_v60 = vpop.permute.xlu0 %1994  ;;  %v784_v57 = vrot.slane %v766_v36, %v5657_v6 }
 0x2e4   : > { %9187 = vst [vmem:[#allocation80_spill] sm:$0xff] %v6785_v60  ;;  %v830_v60 = vrot.slane %v765_v55, %v5829_v7 }
 0x2e5   : > { %v787_v15 = vmul.f32 %v784_v57, %v9154_v53 }
 0x2e6   : > { %v6793_v25 = vpop.permute.xlu1 %2036  ;;  %v836_v53 = vmul.f32 %v830_v60, %v9155_v22 }
 0x2e7   : > { %9189 = vst [vmem:[#allocation18_spill] sm:$0xff] %v6793_v25  ;;  %v6796_v32 = vpop.permute.xlu0 %2034  ;;  %v811_v25 = vmul.f32 %v805_v21, %v9152_v34  ;;  %v815_v57 = vadd.f32 %v812_v8, %v787_v15  ;;  %v859_v21 = vrot.slane %v766_v36, %v5832_v9 }
 0x2e8   : > { %9190 = vst [vmem:[#allocation81_spill] sm:$0xff] %v6796_v32  ;;  %v834_v32 = vrot.slane %v766_v36, %v5829_v7  ;;  %v3049_v36 = vrot.slane %v6687_v40, %v6608_v62 }
 0x2ea   : > { %v6802_v2 = vpop.permute.xlu1 %2075  ;;  %v837_v19 = vmul.f32 %v834_v32, %v9155_v22  ;;  %v862_v32 = vmul.f32 %v859_v21, %v9157_v46 }
 0x2eb   : > { %9191 = vst [vmem:[#allocation82_spill] sm:$0xff] %v6802_v2  ;;  %v6805_v54 = vpop.permute.xlu0 %2073  ;;  %v1456_v2 = vadd.f32 %v6424_v38, %v1434_v13 }
 0x2ec   : > { %9192 = vst [vmem:[#allocation83_spill] sm:$0xff] %v6805_v54  ;;  %v814_v54 = vadd.f32 %v811_v25, %v786_v33  ;;  %v840_v59 = vadd.f32 %v837_v19, %v815_v57  ;;  %v3088_v57 = vrot.slane %v6687_v40, %v6622_v4 }
 0x2ed   : > { %v1511_v5 = vadd.f32 %v6731_v48, %v1456_v2 }
 0x2ee   : > { %v6812_v44 = vpop.permute.xlu1 %2114  ;;  %v839_v15 = vadd.f32 %v836_v53, %v814_v54  ;;  %v865_v33 = vadd.f32 %v862_v32, %v840_v59  ;;  %v899_v54 = vsel %vm897_vm4, %v6583_v58, %v6432_v45 }
 0x2ef   : > { %9193 = vst [vmem:[#allocation84_spill] sm:$0xff] %v6812_v44  ;;  %v6816_v52 = vpop.permute.xlu0 %2112  ;;  %v855_v44 = vrot.slane %v765_v55, %v5832_v9  ;;  %v1550_v13 = vadd.f32 %v6738_v47, %v1511_v5 }
 0x2f0   : > { %9194 = vst [vmem:[#allocation85_spill] sm:$0xff] %v6816_v52 }
 0x2f1   : > { %v1589_v25 = vadd.f32 %v6745_v14, %v1550_v13  ;;  %v861_v22 = vmul.f32 %v855_v44, %v9157_v46  ;;  %v905_v46 = vadd.f32 %v6432_v45, %v865_v33  ;;  %v938_v44 = vsel %vm897_vm4, %v6386_v0, %v6673_v49 }
 0x2f2   : > { %v6823_v34 = vpop.permute.xlu1 %3004  ;;  %v977_v13 = vsel %vm897_vm4, %v6394_v30, %v6689_v26  ;;  %v3127_v0 = vrot.slane %v6687_v40, %v6636_v37 }
 0x2f3   : > { %v3019_v52 = vmul.f32 %v3010_v43, %v6823_v34  ;;  %v1076_v38 = vpop.permute.xlu0 %1075  ;;  %v1628_v60 = vadd.f32 %v6752_v24, %v1589_v25  ;;  %v944_v53 = vadd.f32 %v6673_v49, %v905_v46 }
 0x2f4   : > { %v1079_v33 = vsel %vm1077_vm8, %v6444_v63, %v1076_v38 }
 0x2f5   : > { %3025 = vrot.lane.b32.xlu0 %v3019_v52, %s9112_s7  ;;  %v864_v52 = vadd.f32 %v861_v22, %v839_v15  ;;  %v1680_v43 = vadd.f32 %v6759_v18, %v1628_v60  ;;  %v983_v25 = vadd.f32 %v6689_v26, %v944_v53  ;;  %v3166_v26 = vrot.slane %v6687_v40, %v6652_v41 }
 0x2f6   : > { %v6834_v2 = vpop.permute.xlu1 %3043 }
 0x2f7   : > { %v3058_v55 = vmul.f32 %v3049_v36, %v6834_v2  ;;  %v1116_v8 = vpop.permute.xlu0 %1115  ;;  %v904_v59 = vadd.f32 %v899_v54, %v864_v52  ;;  %v1719_v19 = vadd.f32 %v6766_v20, %v1680_v43  ;;  %v1016_v36 = vsel %vm897_vm4, %v6405_v39, %v6701_v28 }
 0x2f8   : > { %v1118_v52 = vsel %vm1077_vm8, %v6454_v16, %v1116_v8 }
 0x2f9   : > { %3064 = vrot.lane.b32.xlu0 %v3058_v55, %s9112_s7  ;;  %v943_v15 = vadd.f32 %v938_v44, %v904_v59  ;;  %v1758_v45 = vadd.f32 %v6773_v50, %v1719_v19  ;;  %v1022_v55 = vadd.f32 %v6701_v28, %v983_v25 }
 0x2fa   : > { %v6850_v5 = vpop.permute.xlu1 %3082 }
 0x2fb   : > { %v3097_v58 = vmul.f32 %v3088_v57, %v6850_v5  ;;  %v1155_v21 = vpop.permute.xlu0 %1154  ;;  %v982_v49 = vadd.f32 %v977_v13, %v943_v15  ;;  %v1797_v22 = vadd.f32 %v6780_v56, %v1758_v45  ;;  %v1085_v39 = vadd.f32 %v1076_v38, %v1022_v55 }
 0x2fc   : > { %v1157_v63 = vsel %vm1077_vm8, %v6464_v12, %v1155_v21 }
 0x2fd   : > { %3103 = vrot.lane.b32.xlu0 %v3097_v58, %s9112_s7  ;;  %v1021_v54 = vadd.f32 %v1016_v36, %v982_v49  ;;  %v1837_v57 = vadd.f32 %v6614_v23, %v1797_v22  ;;  %v1124_v59 = vadd.f32 %v1116_v8, %v1085_v39 }
 0x2fe   : > { %v6866_v32 = vpop.permute.xlu1 %3121 }
 0x2ff   : > { %9195 = vst [vmem:[#allocation86_spill] sm:$0xff] %v6866_v32  ;;  %v3136_v30 = vmul.f32 %v3127_v0, %v6866_v32  ;;  %v1194_v60 = vpop.permute.xlu0 %1193  ;;  %v1084_v46 = vadd.f32 %v1079_v33, %v1021_v54  ;;  %v1163_v40 = vadd.f32 %v1155_v21, %v1124_v59  ;;  %v1876_v58 = vadd.f32 %v6629_v42, %v1837_v57 }
 0x300   : > { %v1196_v38 = vsel %vm1077_vm8, %v6474_v11, %v1194_v60 }
 0x301   : > { %3142 = vrot.lane.b32.xlu0 %v3136_v30, %s9112_s7  ;;  %v1123_v19 = vadd.f32 %v1118_v52, %v1084_v46  ;;  %v1202_v15 = vadd.f32 %v1194_v60, %v1163_v40  ;;  %v9201_v40 = vld [vmem:[#allocation80_spill] sm:$0xff] }
 0x302   : > { %v6878_v43 = vpop.permute.xlu1 %3160 }
 0x303   : > { %9196 = vst [vmem:[#allocation87_spill] sm:$0xff] %v6878_v43  ;;  %v3175_v28 = vmul.f32 %v3166_v26, %v6878_v43  ;;  %v1244_v44 = vpop.permute.xlu0 %1243  ;;  %v1162_v53 = vadd.f32 %v1157_v63, %v1123_v19 }
 0x304   : > { %v1247_v12 = vsel %vm1245_vm9, %v6482_v3, %v1244_v44  ;;  %v1253_v21 = vadd.f32 %v1244_v44, %v1202_v15  ;;  %v9199_v44 = vld [vmem:[#allocation71_spill] sm:$0xff] }
 0x305   : > { %3181 = vrot.lane.b32.xlu0 %v3175_v28, %s9112_s7  ;;  %v1201_v45 = vadd.f32 %v1196_v38, %v1162_v53  ;;  %v1386_v59 = vsel %vm759_vm10, %v9199_v44, %v6530_v61  ;;  %v9203_v15 = vld [vmem:[#allocation55_spill] sm:$0xff]  ;;  %v9213_v44 = vld [vmem:[#allocation26_spill] sm:$0xff] }
 0x306   : > { %v6887_v16 = vpop.permute.xlu1 %3195 }
 0x307   : > { %v6892_v13 = vmul.f32 %v6276_v51, %v6887_v16  ;;  %v1284_v8 = vpop.permute.xlu0 %1283  ;;  %v1915_v51 = vadd.f32 %v6644_v29, %v1876_v58  ;;  %v1252_v36 = vadd.f32 %v1247_v12, %v1201_v45 }
 0x308   : > { %v1286_v0 = vsel %vm1245_vm9, %v6494_v17, %v1284_v8  ;;  %v1292_v30 = vadd.f32 %v1284_v8, %v1253_v21  ;;  %v9202_v8 = vld [vmem:[#allocation77_spill] sm:$0xff] }
 0x309   : > { %3197 = vrot.lane.b32.xlu0 %v6237_v10, %s9071_s23  ;;  %v3216_v11 = vrot.slane %v6892_v13, %v5657_v6  ;;  %v3255_v3 = vrot.slane %v6892_v13, %v5703_v27  ;;  %v1291_v55 = vadd.f32 %v1286_v0, %v1252_v36  ;;  %v1954_v54 = vadd.f32 %v6661_v31, %v1915_v51  ;;  %v9205_v21 = vld [vmem:[#allocation73_spill] sm:$0xff] }
 0x30a   : > { %v6902_v25 = vpop.permute.xlu1 %3210  ;;  %v3294_v57 = vrot.slane %v6892_v13, %v5829_v7  ;;  %v1408_v12 = vsel %vm759_vm10, %v9203_v15, %v9202_v8  ;;  %v3411_v15 = vrot.slane %v6892_v13, %v6622_v4 }
 0x30b   : > { %9197 = vst [vmem:[#allocation88_spill] sm:$0xff] %v6902_v25  ;;  %v3225_v49 = vmul.f32 %v3216_v11, %v6902_v25  ;;  %v1323_v22 = vpop.permute.xlu0 %1322  ;;  %v2006_v38 = vadd.f32 %v9201_v40, %v1954_v54 }
 0x30c   : > { %v1325_v60 = vsel %vm1245_vm9, %v6506_v35, %v1323_v22  ;;  %v1331_v33 = vadd.f32 %v1323_v22, %v1292_v30 }
 0x30d   : > { %3231 = vrot.lane.b32.xlu0 %v3225_v49, %s9113_s19  ;;  %v1330_v26 = vadd.f32 %v1325_v60, %v1291_v55  ;;  %v9207_v49 = vld [vmem:[#allocation81_spill] sm:$0xff]  ;;  %v3372_v60 = vrot.slane %v6892_v13, %v6608_v62  ;;  %v9208_v55 = vld [vmem:[#allocation78_spill] sm:$0xff] }
 0x30e   : > { %v6911_v17 = vpop.permute.xlu1 %3249  ;;  %v2045_v22 = vadd.f32 %v9207_v49, %v2006_v38 }
 0x30f   : > { %9198 = vst [vmem:[#allocation89_spill] sm:$0xff] %v6911_v17  ;;  %v3264_v39 = vmul.f32 %v3255_v3, %v6911_v17  ;;  %v1362_v52 = vpop.permute.xlu0 %1361 }
 0x310   : > { %v1364_v46 = vsel %vm1245_vm9, %v6514_v1, %v1362_v52  ;;  %v1370_v28 = vadd.f32 %v1362_v52, %v1331_v33  ;;  %v3333_v1 = vrot.slane %v6892_v13, %v5832_v9  ;;  %v9209_v33 = vld [vmem:[#allocation56_spill] sm:$0xff]  ;;  %v9211_v52 = vld [vmem:[#allocation25_spill] sm:$0xff] }
 0x311   : > { %v1369_v35 = vadd.f32 %v1364_v46, %v1330_v26  ;;  %3270 = vrot.lane.b32.xlu0 %v3264_v39, %s9113_s19  ;;  %v1452_v54 = vsel %vm759_vm10, %v9209_v33, %v9208_v55  ;;  %v9210_v39 = vld [vmem:[#allocation40_spill] sm:$0xff] }
 0x312   : > { %v1392_v63 = vadd.f32 %v6530_v61, %v1370_v28  ;;  %v6924_v19 = vpop.permute.xlu1 %3288  ;;  %v9204_v61 = vld [vmem:[#allocation63_spill] sm:$0xff]  ;;  %v1506_v28 = vsel %vm1505_vm11, %v6731_v48, %v9211_v52 }
 0x313   : > { %9200 = vst [vmem:[#allocation71_spill] sm:$0xff] %v6924_v19  ;;  %v1391_v58 = vadd.f32 %v1386_v59, %v1369_v35  ;;  %v3303_v53 = vmul.f32 %v3294_v57, %v6924_v19  ;;  %v1430_v0 = vsel %vm759_vm10, %v9205_v21, %v9204_v61  ;;  %v1507_v57 = vsel %vm1505_vm11, %v9211_v52, %v9210_v39  ;;  %v9212_v35 = vld [vmem:[#allocation41_spill] sm:$0xff]  ;;  %v9222_v52 = vld [vmem:[#allocation44_spill] sm:$0xff] }
 0x314   : > { %v1414_v45 = vadd.f32 %v9202_v8, %v1392_v63  ;;  %v1546_v59 = vsel %vm1505_vm11, %v9213_v44, %v9212_v35 }
 0x315   : > { %v1413_v11 = vadd.f32 %v1408_v12, %v1391_v58  ;;  %3309 = vrot.lane.b32.xlu0 %v3303_v53, %s9113_s19  ;;  %v9215_v58 = vld [vmem:[#allocation83_spill] sm:$0xff]  ;;  %v1545_v12 = vsel %vm1505_vm11, %v6738_v47, %v9213_v44  ;;  %v9224_v44 = vld [vmem:[#allocation45_spill] sm:$0xff] }
 0x316   : > { %v1436_v51 = vadd.f32 %v9204_v61, %v1414_v45  ;;  %v6939_v36 = vpop.permute.xlu1 %3327  ;;  %v2084_v53 = vadd.f32 %v9215_v58, %v2045_v22  ;;  %v9216_v45 = vld [vmem:[#allocation42_spill] sm:$0xff] }
 0x317   : > { %9206 = vst [vmem:[#allocation80_spill] sm:$0xff] %v6939_v36  ;;  %v1435_v3 = vadd.f32 %v1430_v0, %v1413_v11  ;;  %v3342_v30 = vmul.f32 %v3333_v1, %v6939_v36  ;;  %v9217_v11 = vld [vmem:[#allocation29_spill] sm:$0xff] }
 0x318   : > { %v1458_v26 = vadd.f32 %v9208_v55, %v1436_v51  ;;  %v1585_v61 = vsel %vm1505_vm11, %v9217_v11, %v9216_v45  ;;  %v1584_v0 = vsel %vm1505_vm11, %v6745_v14, %v9217_v11  ;;  %v9223_v14 = vld [vmem:[#allocation33_spill] sm:$0xff] }
 0x319   : > { %v1457_v46 = vadd.f32 %v1452_v54, %v1435_v3  ;;  %3348 = vrot.lane.b32.xlu0 %v3342_v30, %s9113_s19  ;;  %v9219_v3 = vld [vmem:[#allocation43_spill] sm:$0xff] }
 0x31a   : > { %v1513_v63 = vadd.f32 %v1507_v57, %v1458_v26  ;;  %v6959_v38 = vpop.permute.xlu1 %3366  ;;  %v9220_v30 = vld [vmem:[#allocation31_spill] sm:$0xff]  ;;  %v1676_v57 = vsel %vm1674_vm12, %v9223_v14, %v9222_v52  ;;  %v9235_v52 = vld [vmem:[#allocation68_spill] sm:$0xff] }
 0x31b   : > { %9214 = vst [vmem:[#allocation77_spill] sm:$0xff] %v6959_v38  ;;  %v1512_v1 = vadd.f32 %v1506_v28, %v1457_v46  ;;  %v3381_v8 = vmul.f32 %v3372_v60, %v6959_v38  ;;  %v1624_v47 = vsel %vm1505_vm11, %v9220_v30, %v9219_v3  ;;  %v9221_v60 = vld [vmem:[#allocation85_spill] sm:$0xff]  ;;  %v1623_v26 = vsel %vm1505_vm11, %v6752_v24, %v9220_v30 }
 0x31c   : > { %v1552_v48 = vadd.f32 %v1546_v59, %v1513_v63  ;;  %v2123_v55 = vadd.f32 %v9221_v60, %v2084_v53  ;;  %v1675_v28 = vsel %vm1674_vm12, %v6759_v18, %v9223_v14  ;;  %v9225_v59 = vld [vmem:[#allocation36_spill] sm:$0xff]  ;;  %v9226_v53 = vld [vmem:[#allocation27_spill] sm:$0xff] }
 0x31d   : > { %v1551_v21 = vadd.f32 %v1545_v12, %v1512_v1  ;;  %3387 = vrot.lane.b32.xlu0 %v3381_v8, %s9113_s19  ;;  %v1715_v63 = vsel %vm1674_vm12, %v9225_v59, %v9224_v44  ;;  %v1714_v8 = vsel %vm1674_vm12, %v6766_v20, %v9225_v59  ;;  %v9227_v12 = vld [vmem:[#allocation46_spill] sm:$0xff]  ;;  %v7030_v59 = vpop.permute.xlu0 %2653 }
 0x31e   : > { %v1591_v51 = vadd.f32 %v1585_v61, %v1552_v48  ;;  %v6975_v22 = vpop.permute.xlu1 %3405  ;;  %v6996_v1 = vadd.f32 %v9226_v53, %v2123_v55  ;;  %v9228_v48 = vld [vmem:[#allocation38_spill] sm:$0xff]  ;;  %9238 = vst [vmem:[#allocation63_spill] sm:$0xff] %v7030_v59 }
 0x31f   : > { %9218 = vst [vmem:[#allocation55_spill] sm:$0xff] %v6975_v22  ;;  %v1590_v33 = vadd.f32 %v1584_v0, %v1551_v21  ;;  %v3420_v54 = vmul.f32 %v3411_v15, %v6975_v22  ;;  %v1754_v45 = vsel %vm1674_vm12, %v9228_v48, %v9227_v12  ;;  %v1753_v18 = vsel %vm1674_vm12, %v6773_v50, %v9228_v48  ;;  %v9230_v21 = vld [vmem:[#allocation47_spill] sm:$0xff]  ;;  %v9233_v55 = vld [vmem:[#allocation66_spill] sm:$0xff] }
 0x320   : > { %v1630_v39 = vadd.f32 %v1624_v47, %v1591_v51  ;;  %v9231_v0 = vld [vmem:[#allocation39_spill] sm:$0xff]  ;;  %v9232_v47 = vld [vmem:[#allocation48_spill] sm:$0xff]  ;;  %v1832_v50 = vsel %vm1831_vm13, %v6614_v23, %v9233_v55 }
 0x321   : > { %v1629_v46 = vadd.f32 %v1623_v26, %v1590_v33  ;;  %3426 = vrot.lane.b32.xlu0 %v3420_v54, %s9113_s19  ;;  %v1793_v51 = vsel %vm1674_vm12, %v9231_v0, %v9230_v21  ;;  %v1792_v3 = vsel %vm1674_vm12, %v6780_v56, %v9231_v0  ;;  %v1833_v33 = vsel %vm1831_vm13, %v9233_v55, %v9232_v47 }
 0x322   : > { %v1682_v35 = vadd.f32 %v1676_v57, %v1630_v39  ;;  %v9234_v39 = vld [vmem:[#allocation49_spill] sm:$0xff]  ;;  %v1871_v56 = vsel %vm1831_vm13, %v6629_v42, %v9235_v52 }
 0x323   : > { %v1681_v24 = vadd.f32 %v1675_v28, %v1629_v46  ;;  %v1872_v14 = vsel %vm1831_vm13, %v9235_v52, %v9234_v39  ;;  %v9236_v28 = vld [vmem:[#allocation50_spill] sm:$0xff]  ;;  %v9248_v52 = vld [vmem:[#allocation59_spill] sm:$0xff] }
 0x324   : > { %v1721_v15 = vadd.f32 %v1715_v63, %v1682_v35  ;;  %v9237_v35 = vld [vmem:[#allocation70_spill] sm:$0xff] }
 0x325   : > { %v1720_v11 = vadd.f32 %v1714_v8, %v1681_v24  ;;  %2141 = vrot.lane.b32.xlu0 %v6996_v1, %s9229_s22  ;;  %v1911_v44 = vsel %vm1831_vm13, %v9237_v35, %v9236_v28  ;;  %v1910_v23 = vsel %vm1831_vm13, %v6644_v29, %v9237_v35  ;;  %v9239_v8 = vld [vmem:[#allocation51_spill] sm:$0xff] }
 0x326   : > { %v1760_v61 = vadd.f32 %v1754_v45, %v1721_v15  ;;  %v9240_v15 = vld [vmem:[#allocation72_spill] sm:$0xff] }
 0x327   : > { %v1759_v20 = vadd.f32 %v1753_v18, %v1720_v11  ;;  %v1950_v12 = vsel %vm1831_vm13, %v9240_v15, %v9239_v8  ;;  %v1949_v42 = vsel %vm1831_vm13, %v6661_v31, %v9240_v15  ;;  %v9241_v11 = vld [vmem:[#allocation20_spill] sm:$0xff]  ;;  %v9242_v18 = vld [vmem:[#allocation79_spill] sm:$0xff]  ;;  %v3450_v15 = vrot.slane %v6892_v13, %v6636_v37 }
 0x328   : > { %v1799_v30 = vadd.f32 %v1793_v51, %v1760_v61  ;;  %v2002_v61 = vsel %vm2000_vm14, %v9242_v18, %v9241_v11  ;;  %v2001_v29 = vsel %vm2000_vm14, %v9201_v40, %v9242_v18  ;;  %v9243_v51 = vld [vmem:[#allocation57_spill] sm:$0xff]  ;;  %v5296_v11 = vld [vmem:[%s8832_s12 + $0x120] sm:$0xff] }
 0x329   : > { %v1798_v54 = vadd.f32 %v1792_v3, %v1759_v20  ;;  %v9244_v20 = vld [vmem:[#allocation18_spill] sm:$0xff] }
 0x32a   : > { %v1839_v26 = vadd.f32 %v1833_v33, %v1799_v30  ;;  %v2041_v3 = vsel %vm2000_vm14, %v9244_v20, %v9243_v51  ;;  %v7050_v30 = vpop.permute.xlu0 %2692  ;;  %v2040_v31 = vsel %vm2000_vm14, %v9207_v49, %v9244_v20  ;;  %v9246_v33 = vld [vmem:[#allocation58_spill] sm:$0xff]  ;;  %v5301_v20 = vld [vmem:[%s8832_s12 + $0x148] sm:$0xff] }
 0x32b   : > { %v1838_v57 = vadd.f32 %v1832_v50, %v1798_v54  ;;  %9245 = vst [vmem:[#allocation73_spill] sm:$0xff] %v7050_v30  ;;  %v9247_v54 = vld [vmem:[#allocation82_spill] sm:$0xff] }
 0x32c   : > { %v1878_v46 = vadd.f32 %v1872_v14, %v1839_v26  ;;  %v2080_v50 = vsel %vm2000_vm14, %v9247_v54, %v9246_v33  ;;  %v2079_v40 = vsel %vm2000_vm14, %v9215_v58, %v9247_v54  ;;  %v9249_v14 = vld [vmem:[#allocation84_spill] sm:$0xff]  ;;  %v2154_v58 = vmul.f32 %v6996_v1, %v6996_v1 }
 0x32d   : > { %v1877_v63 = vadd.f32 %v1871_v56, %v1838_v57  ;;  %v2119_v57 = vsel %vm2000_vm14, %v9249_v14, %v9248_v52  ;;  %v2118_v49 = vsel %vm2000_vm14, %v9221_v60, %v9249_v14  ;;  %v5291_v60 = vld [vmem:[%s8832_s12 + $0xf8] sm:$0xff] }
 0x32e   : > { %v1917_v24 = vadd.f32 %v1911_v44, %v1878_v46  ;;  %v7067_v28 = vpop.permute.xlu0 %2731 }
 0x32f   : > { %v1916_v48 = vadd.f32 %v1910_v23, %v1877_v63  ;;  %9250 = vst [vmem:[#allocation81_spill] sm:$0xff] %v7067_v28 }
 0x330   : > { %v1956_v45 = vadd.f32 %v1950_v12, %v1917_v24  ;;  %v5292_v24 = vld [vmem:[%s8832_s12 + $0x100] sm:$0xff] }
 0x331   : > { %v1955_v21 = vadd.f32 %v1949_v42, %v1916_v48  ;;  %v5294_v48 = vld [vmem:[%s8832_s12 + $0x110] sm:$0xff]  ;;  %v7102_v42 = vpop.permute.xlu1 %3444 }
 0x332   : > { %v2008_v0 = vadd.f32 %v2002_v61, %v1956_v45  ;;  %v7084_v23 = vpop.permute.xlu0 %2770  ;;  %9253 = vst [vmem:[#allocation40_spill] sm:$0xff] %v7102_v42  ;;  %v3459_v45 = vmul.f32 %v3450_v15, %v7102_v42  ;;  %v5298_v61 = vld [vmem:[%s8832_s12 + $0x130] sm:$0xff]  ;;  %v3489_v15 = vrot.slane %v6892_v13, %v6652_v41  ;;  %v5295_v13 = vld [vmem:[%s8832_s12 + $0x118] sm:$0xff] }
 0x333   : > { %v2007_v47 = vadd.f32 %v2001_v29, %v1955_v21  ;;  %9251 = vst [vmem:[#allocation78_spill] sm:$0xff] %v7084_v23  ;;  %v9256_v29 = vld [vmem:[#allocation53_spill] sm:$0xff] }
 0x334   : > { %v2047_v55 = vadd.f32 %v2041_v3, %v2008_v0  ;;  %v5300_v0 = vld [vmem:[%s8832_s12 + $0x140] sm:$0xff] }
 0x335   : > { %v2046_v26 = vadd.f32 %v2040_v31, %v2007_v47  ;;  %v5302_v47 = vld [vmem:[%s8832_s12 + $0x150] sm:$0xff] }
 0x336   : > { %v2086_v39 = vadd.f32 %v2080_v50, %v2047_v55  ;;  %v7093_v8 = vpop.permute.xlu0 %2809 }
 0x337   : > { %v2085_v56 = vadd.f32 %v2079_v40, %v2046_v26  ;;  %9252 = vst [vmem:[#allocation56_spill] sm:$0xff] %v7093_v8  ;;  %v7347_v8 = vld [vmem:[%s8831_s11 + $0x10] sm:$0xff] }
 0x338   : > { %v2125_v46 = vadd.f32 %v2119_v57, %v2086_v39 }
 0x339   : > { %v2124_v35 = vadd.f32 %v2118_v49, %v2085_v56 }
 0x33a   : > { %v7070_v44 = vadd.f32 %v9226_v53, %v2125_v46  ;;  %v7109_v18 = vpop.permute.xlu0 %2848 }
 0x33b   : > { %v7073_v63 = vadd.f32 %v9226_v53, %v2124_v35  ;;  %9254 = vst [vmem:[#allocation25_spill] sm:$0xff] %v7109_v18 }
 0x33c   : > { %2145 = vrot.lane.b32.xlu0 %v7070_v44, %s9229_s22  ;;  %v2156_v53 = vmul.f32 %v7070_v44, %v7070_v44 }
 0x33d   : > { %2143 = vrot.lane.b32.xlu1 %v7073_v63, %s9229_s22  ;;  %v2155_v12 = vmul.f32 %v7073_v63, %v7073_v63 }
 0x33e   : > { %v7115_v21 = vpop.permute.xlu0 %2874 }
 0x340   : > { %2160 = vrot.lane.b32.xlu0 %v2154_v58, %s9229_s22 }
 0x341   : > { %3483 = vperm.xlu1 %5396, %v5291_v60  }
 0x342   : > { %v7122_v51 = vpop.permute.xlu0 %2908 }
 0x343   : > { %9257 = vst [vmem:[#allocation41_spill] sm:$0xff] %v7122_v51 }
 0x344   : > { %2164 = vrot.lane.b32.xlu0 %v2156_v53, %s9229_s22 }
 0x345   : > { %3522 = vperm.xlu1 %5396, %v5292_v24  }
 0x346   : > { %v7127_v3 = vpop.permute.xlu0 %2947 }
 0x347   : > { %9258 = vst [vmem:[#allocation26_spill] sm:$0xff] %v7127_v3 }
 0x348   : > { %2162 = vrot.lane.b32.xlu0 %v2155_v12, %s9229_s22 }
 0x349   : > { %3566 = vperm.xlu1 %5396, %v5294_v48  }
 0x34a   : > { %v7132_v31 = vpop.permute.xlu0 %2986 }
 0x34b   : > { %9259 = vst [vmem:[#allocation83_spill] sm:$0xff] %v7132_v31 }
 0x34c   : > { %3465 = vrot.lane.b32.xlu0 %v3459_v45, %s9113_s19  ;;  %v5303_v45 = vld [vmem:[%s8832_s12 + $0x158] sm:$0xff] }
 0x34d   : > { %3610 = vperm.xlu1 %5396, %v5296_v11   ;;  %v5293_v11 = vld [vmem:[%s8832_s12 + $0x108] sm:$0xff] }
 0x351   : > { %3654 = vperm.xlu1 %5396, %v5298_v61   ;;  %v5304_v61 = vld [vmem:[%s8832_s12 + $0x160] sm:$0xff] }
 0x355   : > { %3697 = vrot.lane.b32.xlu1 %v9256_v29, %s9255_s5 }
 0x359   : > { %3712 = vperm.xlu1 %5396, %v5300_v0   ;;  %v5305_v0 = vld [vmem:[%s8832_s12 + $0x168] sm:$0xff] }
 0x35d   : > { %3751 = vperm.xlu1 %5396, %v5301_v20   ;;  %v5297_v20 = vld [vmem:[%s8832_s12 + $0x128] sm:$0xff] }
 0x361   : > { %3790 = vperm.xlu1 %5396, %v5302_v47   ;;  %v5306_v47 = vld [vmem:[%s8832_s12 + $0x170] sm:$0xff] }
 0x367   : > { %v7134_v55 = vpop.permute.xlu0 %3025 }
 0x368   : > { %9260 = vst [vmem:[#allocation42_spill] sm:$0xff] %v7134_v55 }
 0x36b   : > { %v7136_v33 = vpop.permute.xlu0 %3064 }
 0x36c   : > { %9261 = vst [vmem:[#allocation29_spill] sm:$0xff] %v7136_v33 }
 0x36f   : > { %v7138_v54 = vpop.permute.xlu0 %3103 }
 0x370   : > { %9262 = vst [vmem:[#allocation43_spill] sm:$0xff] %v7138_v54 }
 0x373   : > { %v7140_v50 = vpop.permute.xlu0 %3142 }
 0x374   : > { %9263 = vst [vmem:[#allocation31_spill] sm:$0xff] %v7140_v50 }
 0x377   : > { %v7142_v26 = vpop.permute.xlu0 %3181 }
 0x378   : > { %9264 = vst [vmem:[#allocation85_spill] sm:$0xff] %v7142_v26 }
 0x37b   : > { %v7144_v40 = vpop.permute.xlu0 %3197 }
 0x37f   : > { %v7146_v39 = vpop.permute.xlu0 %3231 }
 0x380   : > { %9265 = vst [vmem:[#allocation44_spill] sm:$0xff] %v7146_v39 }
 0x383   : > { %v7148_v52 = vpop.permute.xlu0 %3270 }
 0x384   : > { %9266 = vst [vmem:[#allocation33_spill] sm:$0xff] %v7148_v52 }
 0x387   : > { %v7150_v14 = vpop.permute.xlu0 %3309 }
 0x388   : > { %9267 = vst [vmem:[#allocation45_spill] sm:$0xff] %v7150_v14 }
 0x38b   : > { %v7152_v57 = vpop.permute.xlu0 %3348 }
 0x38c   : > { %9268 = vst [vmem:[#allocation36_spill] sm:$0xff] %v7152_v57 }
 0x38f   : > { %v7154_v56 = vpop.permute.xlu0 %3387 }
 0x390   : > { %9269 = vst [vmem:[#allocation27_spill] sm:$0xff] %v7154_v56 }
 0x393   : > { %v7156_v49 = vpop.permute.xlu0 %3426 }
 0x394   : > { %9270 = vst [vmem:[#allocation46_spill] sm:$0xff] %v7156_v49 }
 0x397   : > { %v2142_v46 = vpop.permute.xlu0 %2141 }
 0x3ae   : > { %v2146_v35 = vpop.permute.xlu0 %2145 }
 0x3af   : > { %v2144_v58 = vpop.permute.xlu1 %2143 }
 0x3b0   : > { %v2147_v60 = vsel %vm1961_vm7, %v2142_v46, %v2144_v58  ;;  %v2148_v53 = vsel %vm1961_vm7, %v2144_v58, %v2146_v35  ;;  %v5299_v46 = vld [vmem:[%s8832_s12 + $0x138] sm:$0xff]  ;;  %v9272_v58 = vld [vmem:[#allocation17_spill] sm:$0xff] }
 0x3b1   : > { %v2151_v24 = vadd.f32 %v2148_v53, %v2147_v60  ;;  %v5307_v35 = vld [vmem:[%s8832_s12 + $0x178] sm:$0xff]  ;;  %v5308_v53 = vld [vmem:[%s8832_s12 + $0x180] sm:$0xff] }
 0x3b2   : > { %v9274_v60 = vld [vmem:[#allocation19_spill] sm:$0xff] }
 0x3b3   : > { %2152 = vadd.xlane.f32.xlu1 %v2151_v24  ;;  %v5309_v24 = vld [vmem:[%s8832_s12 + $0x188] sm:$0xff] }
 0x3c0   : > { %v7162_v12 = vpop.permute.xlu1 %3483 }
 0x3c1   : > { %9271 = vst [vmem:[#allocation38_spill] sm:$0xff] %v7162_v12  ;;  %v3498_v48 = vmul.f32 %v3489_v15, %v7162_v12  ;;  %v5310_v15 = vld [vmem:[%s8832_s12 + $0x190] sm:$0xff] }
 0x3c3   : > { %3504 = vrot.lane.b32.xlu0 %v3498_v48, %s9113_s19  ;;  %v5311_v48 = vld [vmem:[%s8832_s12 + $0x198] sm:$0xff] }
 0x3c4   : > { %3829 = vperm.xlu1 %5396, %v5303_v45   ;;  %v5312_v45 = vld [vmem:[%s8832_s12 + $0x1a0] sm:$0xff] }
 0x3c7   : > { %3544 = vperm.xlu0 %5397, %v5293_v11   ;;  %v5313_v11 = vld [vmem:[%s8832_s12 + $0x1a8] sm:$0xff] }
 0x3c8   : > { %3868 = vperm.xlu1 %5396, %v5304_v61   ;;  %v5315_v61 = vld [vmem:[%s8832_s12 + $0x1b8] sm:$0xff] }
 0x3cb   : > { %3588 = vperm.xlu0 %5397, %v5295_v13   ;;  %v5317_v13 = vld [vmem:[%s8832_s12 + $0x1c8] sm:$0xff] }
 0x3cc   : > { %3907 = vperm.xlu1 %5396, %v5305_v0   ;;  %v5319_v0 = vld [vmem:[%s8832_s12 + $0x1d8] sm:$0xff] }
 0x3cf   : > { %3632 = vperm.xlu0 %5397, %v5297_v20   ;;  %v5321_v20 = vld [vmem:[%s8832_s12 + $0x1e8] sm:$0xff] }
 0x3d0   : > { %3946 = vperm.xlu1 %5396, %v5306_v47   ;;  %v5323_v47 = vld [vmem:[%s8832_s12 + $0x1f8] sm:$0xff] }
 0x3d3   : > { %3676 = vperm.xlu0 %5397, %v5299_v46   ;;  %v5325_v46 = vld [vmem:[%s8832_s12 + $0x208] sm:$0xff] }
 0x3d4   : > { %3985 = vperm.xlu1 %5396, %v5307_v35   ;;  %v5327_v35 = vld [vmem:[%s8832_s12 + $0x218] sm:$0xff] }
 0x3d7   : > { %3699 = vrot.lane.b32.xlu0 %v9272_v58, %s9255_s5 }
 0x3d8   : > { %4020 = vrot.lane.b32.xlu1 %v9274_v60, %s9273_s17  ;;  %v5329_v60 = vld [vmem:[%s8832_s12 + $0x228] sm:$0xff] }
 0x3dc   : > { %4035 = vperm.xlu1 %5396, %v5308_v53   ;;  %v5331_v53 = vld [vmem:[%s8832_s12 + $0x238] sm:$0xff] }
 0x3e0   : > { %4074 = vperm.xlu1 %5396, %v5309_v24  }
 0x3e4   : > { %4113 = vperm.xlu1 %5396, %v5310_v15  }
 0x3e8   : > { %4152 = vperm.xlu1 %5396, %v5311_v48   ;;  %v7244_v48 = vpop.permute.xlu1 %3522 }
 0x3ec   : > { %4191 = vperm.xlu1 %5396, %v5312_v45  }
 0x3f0   : > { %4230 = vperm.xlu1 %5396, %v5313_v11   ;;  %v7248_v11 = vpop.permute.xlu1 %3566 }
 0x3f4   : > { %4308 = vperm.xlu1 %5396, %v5315_v61  }
 0x3f8   : > { %4386 = vperm.xlu1 %5396, %v5317_v13   ;;  %v7252_v13 = vpop.permute.xlu1 %3610 }
 0x3fc   : > { %4464 = vperm.xlu1 %5396, %v5319_v0  }
 0x400   : > { %4542 = vperm.xlu1 %5396, %v5321_v20  }
 0x404   : > { %4620 = vperm.xlu1 %5396, %v5323_v47   ;;  %v7258_v47 = vpop.permute.xlu1 %3654 }
 0x408   : > { %4655 = vrot.lane.b32.xlu1 %v9256_v29, %s9229_s22  ;;  %v2161_v29 = vpop.permute.xlu0 %2160 }
 0x40c   : > { %4709 = vperm.xlu1 %5396, %v5325_v46   ;;  %v2165_v24 = vpop.permute.xlu0 %2164 }
 0x410   : > { %4787 = vperm.xlu1 %5396, %v5327_v35   ;;  %v2163_v15 = vpop.permute.xlu0 %2162  ;;  %v7262_v35 = vpop.permute.xlu1 %3697 }
 0x411   : > { %9277 = vst [vmem:[#allocation48_spill] sm:$0xff] %v7262_v35  ;;  %v2166_v26 = vsel %vm1961_vm7, %v2161_v29, %v2163_v15  ;;  %v2167_v50 = vsel %vm1961_vm7, %v2163_v15, %v2165_v24 }
 0x412   : > { %v2170_v54 = vadd.f32 %v2167_v50, %v2166_v26 }
 0x414   : > { %4865 = vperm.xlu1 %5396, %v5329_v60   ;;  %v7246_v45 = vpop.permute.xlu0 %3465  ;;  %v7272_v49 = vpop.permute.xlu1 %3712 }
 0x415   : > { %9275 = vst [vmem:[#allocation47_spill] sm:$0xff] %v7246_v45  ;;  %v7268_v45 = vld [vmem:[#allocation2] sm:$0xff]  ;;  %9279 = vst [vmem:[#allocation49_spill] sm:$0xff] %v7272_v49 }
 0x418   : > { %4943 = vperm.xlu1 %5396, %v5331_v53   ;;  %v7278_v52 = vpop.permute.xlu1 %3751 }
 0x419   : > { %9280 = vst [vmem:[#allocation68_spill] sm:$0xff] %v7278_v52 }
 0x41c   : > { %v7284_v33 = vpop.permute.xlu1 %3790 }
 0x41d   : > { %9281 = vst [vmem:[#allocation50_spill] sm:$0xff] %v7284_v33 }
 0x435   : > { %v7250_v61 = vpop.permute.xlu0 %3504 }
 0x436   : > { %9276 = vst [vmem:[#allocation39_spill] sm:$0xff] %v7250_v61 }
 0x440   : > { %v2153_v55 = vpop.xlane.xlu1 %2152 }
 0x441   : > { %v2222_v59 = vmul.f32 %v7347_v8, %v2153_v55 }
 0x446   : > { %v7254_v0 = vpop.permute.xlu0 %3544 }
 0x44a   : > { %v7256_v20 = vpop.permute.xlu0 %3588 }
 0x44e   : > { %v7260_v46 = vpop.permute.xlu0 %3632 }
 0x452   : > { %v7264_v60 = vpop.permute.xlu0 %3676 }
 0x456   : > { %v7266_v53 = vpop.permute.xlu0 %3699 }
 0x457   : > { %9278 = vst [vmem:[#allocation66_spill] sm:$0xff] %v7266_v53  ;;  %v3707_v61 = vmul.f32 %v7268_v45, %v7266_v53 }
 0x459   : > { %v3726_v56 = vrot.slane %v3707_v61, %v5657_v6  ;;  %v3765_v14 = vrot.slane %v3707_v61, %v5703_v27  ;;  %v3804_v31 = vrot.slane %v3707_v61, %v5829_v7  ;;  %v3843_v3 = vrot.slane %v3707_v61, %v5832_v9 }
 0x45a   : > { %v3882_v50 = vrot.slane %v3707_v61, %v6608_v62  ;;  %v3921_v29 = vrot.slane %v3707_v61, %v6622_v4  ;;  %v3960_v24 = vrot.slane %v3707_v61, %v6636_v37 }
 0x45b   : > { %v3729_v57 = vmul.f32 %v3726_v56, %v7272_v49  ;;  %v3768_v39 = vmul.f32 %v3765_v14, %v7278_v52  ;;  %v7286_v56 = vpop.permute.xlu1 %3829 }
 0x45c   : > { %9282 = vst [vmem:[#allocation70_spill] sm:$0xff] %v7286_v56 }
 0x45d   : > { %3737 = vrot.lane.b32.xlu0 %v3729_v57, %s9120_s20  ;;  %v3807_v57 = vmul.f32 %v3804_v31, %v7284_v33  ;;  %v2223_v33 = vsel %vm1466_vm5, %v2222_v59, 0.0 }
 0x45e   : > { %v2224_v42 = vrot.slane %v2223_v33, 4 }
 0x45f   : > { %v7291_v14 = vpop.permute.xlu1 %3868 }
 0x460   : > { %9283 = vst [vmem:[#allocation51_spill] sm:$0xff] %v7291_v14  ;;  %v3885_v26 = vmul.f32 %v3882_v50, %v7291_v14 }
 0x461   : > { %3776 = vrot.lane.b32.xlu0 %v3768_v39, %s9120_s20  ;;  %v3846_v39 = vmul.f32 %v3843_v3, %v7286_v56 }
 0x480   : > { %2171 = vadd.xlane.f32.xlu0 %v2170_v54  ;;  %v7297_v54 = vpop.permute.xlu1 %3907 }
 0x481   : > { %9284 = vst [vmem:[#allocation72_spill] sm:$0xff] %v7297_v54  ;;  %v3924_v31 = vmul.f32 %v3921_v29, %v7297_v54 }
 0x484   : > { %v7304_v15 = vpop.permute.xlu1 %3946 }
 0x485   : > { %9285 = vst [vmem:[#allocation20_spill] sm:$0xff] %v7304_v15  ;;  %v3963_v3 = vmul.f32 %v3960_v24, %v7304_v15  ;;  %v7361_v15 = vld [vmem:[%s8831_s11 + $0x18] sm:$0xff] }
 0x496   : > { %3815 = vrot.lane.b32.xlu0 %v3807_v57, %s9120_s20  ;;  %v3999_v57 = vrot.slane %v3707_v61, %v6652_v41  ;;  %v7327_v61 = vld [vmem:[%s8831_s11] sm:$0xff] }
 0x49a   : > { %3854 = vrot.lane.b32.xlu0 %v3846_v39, %s9120_s20  ;;  %v7310_v39 = vpop.permute.xlu1 %3985 }
 0x49b   : > { %9286 = vst [vmem:[#allocation79_spill] sm:$0xff] %v7310_v39  ;;  %v4002_v50 = vmul.f32 %v3999_v57, %v7310_v39 }
 0x49e   : > { %3893 = vrot.lane.b32.xlu0 %v3885_v26, %s9120_s20  ;;  %v7320_v51 = vpop.permute.xlu1 %4020 }
 0x49f   : > { %9289 = vst [vmem:[#allocation58_spill] sm:$0xff] %v7320_v51 }
 0x4a2   : > { %3932 = vrot.lane.b32.xlu0 %v3924_v31, %s9120_s20 }
 0x4a6   : > { %3971 = vrot.lane.b32.xlu0 %v3963_v3, %s9120_s20  ;;  %v7332_v3 = vld [vmem:[%s8831_s11 + $0x8] sm:$0xff] }
 0x4aa   : > { %4010 = vrot.lane.b32.xlu0 %v4002_v50, %s9120_s20  ;;  %v2174_v50 = vmul.f32 %v7327_v61, %v2153_v55 }
 0x4ac   : > { %v2175_v28 = vsel %vm1466_vm5, %v2174_v50, 0.0 }
 0x4ad   : > { %v2176_v51 = vrot.slane %v2175_v28, 4 }
 0x4ae   : > { %4022 = vrot.lane.b32.xlu0 %v6237_v10, %s9273_s17  ;;  %v7334_v10 = vpop.permute.xlu1 %4035 }
 0x4af   : > { %9291 = vst [vmem:[#allocation59_spill] sm:$0xff] %v7334_v10 }
 0x4b2   : > { %v7349_v23 = vpop.permute.xlu1 %4074 }
 0x4b3   : > { %9294 = vst [vmem:[#allocation17_spill] sm:$0xff] %v7349_v23 }
 0x4b6   : > { %v7364_v50 = vpop.permute.xlu1 %4113 }
 0x4cf   : > { %v7316_v26 = vpop.permute.xlu0 %3737 }
 0x4d0   : > { %9287 = vst [vmem:[#allocation57_spill] sm:$0xff] %v7316_v26 }
 0x4d3   : > { %v7318_v29 = vpop.permute.xlu0 %3776 }
 0x4d4   : > { %9288 = vst [vmem:[#allocation18_spill] sm:$0xff] %v7318_v29  ;;  %v2198_v29 = vmul.f32 %v7332_v3, %v2153_v55 }
 0x50d   : > { %v2172_v31 = vpop.xlane.xlu0 %2171 }
 0x50e   : > { %v2206_v18 = vmul.f32 %v7332_v3, %v2172_v31  ;;  %v2230_v14 = vmul.f32 %v7347_v8, %v2172_v31  ;;  %v2254_v12 = vmul.f32 %v7361_v15, %v2172_v31 }
 0x510   : > { %v2207_v39 = vsel %vm1466_vm5, %v2206_v18, 0.0  ;;  %v2177_v18 = vadd.f32 %v2176_v51, %v2175_v28  ;;  %v2231_v49 = vsel %vm1466_vm5, %v2230_v14, 0.0  ;;  %v2225_v28 = vadd.f32 %v2224_v42, %v2223_v33 }
 0x511   : > { %v7322_v24 = vpop.permute.xlu0 %3815  ;;  %v2208_v56 = vrot.slane %v2207_v39, 4  ;;  %v2232_v59 = vrot.slane %v2231_v49, 4 }
 0x512   : > { %9290 = vst [vmem:[#allocation82_spill] sm:$0xff] %v7322_v24  ;;  %v2182_v24 = vmul.f32 %v7327_v61, %v2172_v31  ;;  %v2178_v36 = vrot.slane %v2177_v18, 2  ;;  %v2226_v42 = vrot.slane %v2225_v28, 2 }
 0x513   : > { %v2209_v53 = vadd.f32 %v2208_v56, %v2207_v39  ;;  %v2233_v31 = vadd.f32 %v2232_v59, %v2231_v49 }
 0x514   : > { %v2179_v39 = vadd.f32 %v2178_v36, %v2177_v18 }
 0x515   : > { %v7336_v57 = vpop.permute.xlu0 %3854  ;;  %v2210_v14 = vrot.slane %v2209_v53, 2  ;;  %v2234_v49 = vrot.slane %v2233_v31, 2 }
 0x516   : > { %9292 = vst [vmem:[#allocation84_spill] sm:$0xff] %v7336_v57  ;;  %v2199_v57 = vsel %vm1466_vm5, %v2198_v29, 0.0  ;;  %v2180_v36 = vrot.slane %v2179_v39, 1 }
 0x517   : > { %v2200_v54 = vrot.slane %v2199_v57, 4  ;;  %v2211_v25 = vadd.f32 %v2210_v14, %v2209_v53 }
 0x518   : > { %v2181_v14 = vadd.f32 %v2180_v36, %v2179_v39 }
 0x519   : > { %v7340_v26 = vpop.permute.xlu0 %3893  ;;  %v2201_v52 = vadd.f32 %v2200_v54, %v2199_v57 }
 0x51a   : > { %9293 = vst [vmem:[#allocation53_spill] sm:$0xff] %v7340_v26  ;;  %v2183_v26 = vsel %vm1466_vm5, %v2182_v24, 0.0  ;;  %v2246_v24 = vmul.f32 %v7361_v15, %v2153_v55  ;;  %v2255_v55 = vsel %vm1466_vm5, %v2254_v12, 0.0 }
 0x51b   : > { %v2184_v29 = vrot.slane %v2183_v26, 4  ;;  %v2202_v19 = vrot.slane %v2201_v52, 2 }
 0x51c   : > { %v2247_v38 = vsel %vm1466_vm5, %v2246_v24, 0.0 }
 0x51d   : > { %v7353_v30 = vpop.permute.xlu0 %3932  ;;  %v2185_v35 = vadd.f32 %v2184_v29, %v2183_v26  ;;  %v2248_v51 = vrot.slane %v2247_v38, 4  ;;  %v2203_v26 = vadd.f32 %v2202_v19, %v2201_v52  ;;  %v2256_v29 = vrot.slane %v2255_v55, 4 }
 0x51e   : > { %9295 = vst [vmem:[#allocation19_spill] sm:$0xff] %v7353_v30 }
 0x51f   : > { %v2186_v54 = vrot.slane %v2185_v35, 2  ;;  %v2249_v33 = vadd.f32 %v2248_v51, %v2247_v38  ;;  %v2204_v52 = vrot.slane %v2203_v26, 1  ;;  %v2257_v18 = vadd.f32 %v2256_v29, %v2255_v55 }
 0x520   : > { %v2227_v38 = vadd.f32 %v2226_v42, %v2225_v28  ;;  %v2190_v42 = vmul.f32 0.001953125, %v2181_v14 }
 0x521   : > { %v7366_v30 = vpop.permute.xlu0 %3971  ;;  %v2187_v17 = vadd.f32 %v2186_v54, %v2185_v35  ;;  %v2250_v59 = vrot.slane %v2249_v33, 2  ;;  %v2212_v35 = vrot.slane %v2211_v25, 1 }
 0x522   : > { %9296 = vst [vmem:[#allocation90_spill] sm:$0xff] %v7366_v30  ;;  %v7375_v30 = vpop.permute.xlu1 %4152  ;;  %v2228_v55 = vrot.slane %v2227_v38, 1 }
 0x523   : > { %v2188_v51 = vrot.slane %v2187_v17, 1  ;;  %v2251_v29 = vadd.f32 %v2250_v59, %v2249_v33 }
 0x524   : > { %v2229_v39 = vadd.f32 %v2228_v55, %v2227_v38  ;;  %v5318_v55 = vld [vmem:[%s8832_s12 + $0x1d0] sm:$0xff] }
 0x525   : > { %v7372_v22 = vpop.permute.xlu0 %4010 }
 0x526   : > { %9297 = vst [vmem:[#allocation91_spill] sm:$0xff] %v7372_v22  ;;  %v7388_v22 = vpop.permute.xlu1 %4191  ;;  %v2238_v59 = vmul.f32 0.001953125, %v2229_v39 }
 0x527   : > { %9299 = vst [vmem:[#allocation93_spill] sm:$0xff] %v7388_v22 }
 0x528   : > { %v2239_v14 = vmul.f32 %v7347_v8, %v2238_v59 }
 0x529   : > { %v7378_v57 = vpop.permute.xlu0 %4022 }
 0x52a   : > { %9298 = vst [vmem:[#allocation92_spill] sm:$0xff] %v7378_v57  ;;  %v7382_v56 = vmul.f32 %v7268_v45, %v7378_v57 }
 0x52c   : > { %v4049_v24 = vrot.slane %v7382_v56, %v5657_v6  ;;  %v4205_v12 = vrot.slane %v7382_v56, %v6608_v62  ;;  %v4088_v19 = vrot.slane %v7382_v56, %v5703_v27  ;;  %v4127_v54 = vrot.slane %v7382_v56, %v5829_v7 }
 0x52e   : > { %v4052_v43 = vmul.f32 %v4049_v24, %v7334_v10  ;;  %v4208_v57 = vmul.f32 %v4205_v12, %v7388_v22  ;;  %v4091_v53 = vmul.f32 %v4088_v19, %v7349_v23  ;;  %v2205_v24 = vadd.f32 %v2204_v52, %v2203_v26 }
 0x52f   : > { %v2235_v12 = vadd.f32 %v2234_v49, %v2233_v31  ;;  %v2258_v22 = vrot.slane %v2257_v18, 2  ;;  %v2213_v10 = vadd.f32 %v2212_v35, %v2211_v25  ;;  %v4130_v28 = vmul.f32 %v4127_v54, %v7364_v50 }
 0x530   : > { %4060 = vrot.lane.b32.xlu0 %v4052_v43, %s9123_s21  ;;  %4216 = vrot.lane.b32.xlu1 %v4208_v57, %s9123_s21  ;;  %v2189_v43 = vadd.f32 %v2188_v51, %v2187_v17  ;;  %v4166_v57 = vrot.slane %v7382_v56, %v5832_v9  ;;  %v2214_v19 = vmul.f32 0.001953125, %v2205_v24  ;;  %v2252_v26 = vrot.slane %v2251_v29, 1 }
 0x531   : > { %v2236_v23 = vrot.slane %v2235_v12, 1  ;;  %v2259_v32 = vadd.f32 %v2258_v22, %v2257_v18  ;;  %v2217_v36 = vmul.f32 0.001953125, %v2213_v10  ;;  %v2191_v17 = vmul.f32 %v2190_v42, %v7327_v61  ;;  %v5314_v10 = vld [vmem:[%s8832_s12 + $0x1b0] sm:$0xff] }
 0x532   : > { %v2193_v31 = vmul.f32 0.001953125, %v2189_v43  ;;  %v4169_v52 = vmul.f32 %v4166_v57, %v7375_v30  ;;  %v2215_v25 = vmul.f32 %v7332_v3, %v2214_v19  ;;  %v2253_v51 = vadd.f32 %v2252_v26, %v2251_v29  ;;  %v5320_v57 = vld [vmem:[%s8832_s12 + $0x1e0] sm:$0xff]  ;;  %v5322_v19 = vld [vmem:[%s8832_s12 + $0x1f0] sm:$0xff] }
 0x533   : > { %v2237_v33 = vadd.f32 %v2236_v23, %v2235_v12  ;;  %v2260_v49 = vrot.slane %v2259_v32, 1  ;;  %v2218_v18 = vmul.f32 %v7332_v3, %v2217_v36  ;;  %v5316_v23 = vld [vmem:[%s8832_s12 + $0x1c0] sm:$0xff]  ;;  %v7437_v36 = vpop.permute.xlu1 %4230 }
 0x534   : > { %4099 = vrot.lane.b32.xlu0 %v4091_v53, %s9123_s21  ;;  %v2194_v22 = vmul.f32 %v2193_v31, %v7327_v61  ;;  %v2216_v53 = vadd.f32 %v2215_v25, %v2191_v17  ;;  %v2262_v24 = vmul.f32 0.001953125, %v2253_v51  ;;  %v5324_v26 = vld [vmem:[%s8832_s12 + $0x200] sm:$0xff]  ;;  %v5326_v31 = vld [vmem:[%s8832_s12 + $0x210] sm:$0xff] }
 0x535   : > { %v2241_v38 = vmul.f32 0.001953125, %v2237_v33  ;;  %v2261_v35 = vadd.f32 %v2260_v49, %v2259_v32  ;;  %v2136_v25 = vld [vmem:[%s8829_s9] sm:$0xff]  ;;  %v4244_v33 = vrot.slane %v7382_v56, %v6622_v4 }
 0x536   : > { %v2219_v54 = vadd.f32 %v2218_v18, %v2194_v22  ;;  %v2240_v3 = vadd.f32 %v2239_v14, %v2216_v53  ;;  %v2263_v29 = vmul.f32 %v7361_v15, %v2262_v24  ;;  %v2137_v18 = vld [vmem:[%s8830_s10] sm:$0xff]  ;;  %v4400_v53 = vrot.slane %v7268_v45, %v5703_v27 }
 0x537   : > { %v2242_v61 = vmul.f32 %v7347_v8, %v2241_v38  ;;  %v2265_v12 = vmul.f32 0.001953125, %v2261_v35  ;;  %v7450_v59 = vpop.permute.xlu1 %4308  ;;  %v4247_v51 = vmul.f32 %v4244_v33, %v7437_v36  ;;  %v4322_v35 = vrot.slane %v7382_v56, %v6652_v41 }
 0x538   : > { %4138 = vrot.lane.b32.xlu0 %v4130_v28, %s9123_s21  ;;  %v2264_v28 = vadd.f32 %v2263_v29, %v2240_v3  ;;  %v9301_v3 = vld [vmem:[#allocation13_spill] sm:$0xff]  ;;  %v9302_v29 = vld [vmem:[#allocation14_spill] sm:$0xff]  ;;  %v4517_v33 = vrot.slane %v7268_v45, %v6608_v62 }
 0x539   : > { %v2243_v32 = vadd.f32 %v2242_v61, %v2219_v54  ;;  %v2266_v43 = vmul.f32 %v7361_v15, %v2265_v12  ;;  %v4325_v54 = vmul.f32 %v4322_v35, %v7450_v59  ;;  %v9300_v61 = vld [vmem:[#allocation74_spill] sm:$0xff] }
 0x53a   : > { %v2268_v8 = vmul.f32 %v2264_v28, %v2264_v28 }
 0x53b   : > { %v2267_v42 = vadd.f32 %v2266_v43, %v2243_v32 }
 0x53c   : > { %4177 = vrot.lane.b32.xlu0 %v4169_v52, %s9123_s21  ;;  %v5328_v52 = vld [vmem:[%s8832_s12 + $0x220] sm:$0xff] }
 0x53d   : > { %v2269_v39 = vsub.f32 %v2267_v42, %v2268_v8 }
 0x53f   : > { %v2270_v15 = vadd.f32 1e-05, %v2269_v39 }
 0x540   : > { %4269 = vperm.xlu0 %5397, %v5314_v10   ;;  %v7457_v10 = vpop.permute.xlu1 %4386 }
 0x541   : > { %5405 = vrsqrt.f32 %v2270_v15  ;;  %v4403_v14 = vmul.f32 %v4400_v53, %v7457_v10 }
 0x544   : > { %4347 = vperm.xlu0 %5397, %v5316_v23   ;;  %v7464_v23 = vpop.permute.xlu1 %4464 }
 0x545   : > { %v4481_v12 = vmul.f32 %v7464_v23, %v9300_v61 }
 0x548   : > { %4425 = vperm.xlu0 %5397, %v5318_v55   ;;  %v7469_v24 = vpop.permute.xlu1 %4542 }
 0x549   : > { %v4559_v55 = vmul.f32 %v7469_v24, %v9301_v3 }
 0x54b   : > { %v5406_v17 = vpop.eup %5405 }
 0x54c   : > { %4503 = vperm.xlu0 %5397, %v5320_v57   ;;  %v2272_v49 = vmul.f32 %v5406_v17, %v2136_v25  ;;  %v7476_v32 = vpop.permute.xlu1 %4620  ;;  %v4439_v25 = vrot.slane %v7268_v45, %v5829_v7 }
 0x54d   : > { %v4637_v43 = vmul.f32 %v7476_v32, %v9302_v29 }
 0x54e   : > { %v2273_v22 = vmul.f32 %v2272_v49, %v2264_v28 }
 0x550   : > { %4581 = vperm.xlu0 %5397, %v5322_v19   ;;  %v2274_v38 = vsub.f32 %v2137_v18, %v2273_v22  ;;  %v4283_v19 = vrot.slane %v7382_v56, %v6636_v37  ;;  %v4595_v22 = vrot.slane %v7268_v45, %v6636_v37  ;;  %v7517_v18 = vpop.permute.xlu1 %4655 }
 0x554   : > { %4670 = vperm.xlu0 %5397, %v5324_v26   ;;  %v7524_v53 = vpop.permute.xlu1 %4709 }
 0x558   : > { %4657 = vrot.lane.b32.xlu0 %v9272_v58, %s9229_s22  ;;  %v5330_v58 = vld [vmem:[%s8832_s12 + $0x230] sm:$0xff] }
 0x55c   : > { %4748 = vperm.xlu0 %5397, %v5326_v31   ;;  %v4361_v31 = vrot.slane %v7268_v45, %v5657_v6 }
 0x560   : > { %4826 = vperm.xlu0 %5397, %v5328_v52  }
 0x564   : > { %4904 = vperm.xlu0 %5397, %v5330_v58  }
 0x568   : > { %4255 = vrot.lane.b32.xlu0 %v4247_v51, %s9123_s21 }
 0x56c   : > { %2285 = vperm.xlu0 %5397, %v2274_v38  }
 0x570   : > { %4333 = vrot.lane.b32.xlu0 %v4325_v54, %s9123_s21 }
 0x574   : > { %4411 = vrot.lane.b32.xlu0 %v4403_v14, %s9116_s29 }
 0x578   : > { %4489 = vrot.lane.b32.xlu0 %v4481_v12, %s9116_s29 }
 0x57c   : > { %4567 = vrot.lane.b32.xlu0 %v4559_v55, %s9116_s29 }
 0x580   : > { %4645 = vrot.lane.b32.xlu0 %v4637_v43, %s9116_s29 }
 0x5a2   : > { %v7482_v28 = vpop.permute.xlu0 %4060 }
 0x5a3   : > { %9303 = vst [vmem:[#allocation74_spill] sm:$0xff] %v7482_v28 }
 0x5a6   : > { %v7484_v57 = vpop.permute.xlu0 %4099 }
 0x5a7   : > { %9304 = vst [vmem:[#allocation13_spill] sm:$0xff] %v7484_v57 }
 0x5aa   : > { %v7486_v42 = vpop.permute.xlu0 %4138 }
 0x5ab   : > { %9305 = vst [vmem:[#allocation14_spill] sm:$0xff] %v7486_v42 }
 0x5ae   : > { %v7488_v8 = vpop.permute.xlu0 %4177 }
 0x5af   : > { %9306 = vst [vmem:[#allocation94_spill] sm:$0xff] %v7488_v8 }
 0x5bf   : > { %v7492_v39 = vpop.permute.xlu0 %4269 }
 0x5c0   : > { %v4286_v26 = vmul.f32 %v4283_v19, %v7492_v39 }
 0x5c2   : > { %4294 = vrot.lane.b32.xlu1 %v4286_v26, %s9123_s21 }
 0x5c3   : > { %v7496_v15 = vpop.permute.xlu0 %4347 }
 0x5c4   : > { %v4364_v17 = vmul.f32 %v4361_v31, %v7496_v15 }
 0x5c6   : > { %2277 = vperm.xlu1 %5396, %v2272_v49  }
 0x5c7   : > { %v7500_v52 = vpop.permute.xlu0 %4425 }
 0x5c8   : > { %v4442_v58 = vmul.f32 %v4439_v25, %v7500_v52 }
 0x5ca   : > { %4372 = vrot.lane.b32.xlu1 %v4364_v17, %s9116_s29 }
 0x5cb   : > { %v7506_v56 = vpop.permute.xlu0 %4503 }
 0x5cc   : > { %v4520_v49 = vmul.f32 %v4517_v33, %v7506_v56 }
 0x5ce   : > { %4450 = vrot.lane.b32.xlu1 %v4442_v58, %s9116_s29 }
 0x5cf   : > { %v7512_v51 = vpop.permute.xlu0 %4581 }
 0x5d0   : > { %v4598_v35 = vmul.f32 %v4595_v22, %v7512_v51 }
 0x5d2   : > { %4528 = vrot.lane.b32.xlu1 %v4520_v49, %s9116_s29 }
 0x5d3   : > { %v7520_v38 = vpop.permute.xlu0 %4670 }
 0x5d6   : > { %4606 = vrot.lane.b32.xlu1 %v4598_v35, %s9116_s29 }
 0x5d7   : > { %v7526_v54 = vpop.permute.xlu0 %4657 }
 0x5d8   : > { %v7530_v14 = vmul.f32 %v7268_v45, %v7526_v54  ;;  %v7544_v45 = vpop.permute.xlu1 %4787 }
 0x5d9   : > { %9309 = vst [vmem:[#allocation97_spill] sm:$0xff] %v7544_v45 }
 0x5da   : > { %9307 = vst [vmem:[#allocation95_spill] sm:$0xff] %v7530_v14  ;;  %v4684_v61 = vrot.slane %v7530_v14, %v5657_v6  ;;  %v4723_v12 = vrot.slane %v7530_v14, %v5703_v27  ;;  %v4762_v55 = vrot.slane %v7530_v14, %v5829_v7  ;;  %v4801_v19 = vrot.slane %v7530_v14, %v5832_v9 }
 0x5db   : > { %v7536_v3 = vpop.permute.xlu0 %4748  ;;  %v4840_v17 = vrot.slane %v7530_v14, %v6608_v62  ;;  %v4879_v58 = vrot.slane %v7530_v14, %v6622_v4  ;;  %v4918_v22 = vrot.slane %v7530_v14, %v6636_v37 }
 0x5dc   : > { %9308 = vst [vmem:[#allocation96_spill] sm:$0xff] %v7536_v3  ;;  %v4687_v29 = vmul.f32 %v4684_v61, %v7520_v38  ;;  %v4726_v43 = vmul.f32 %v4723_v12, %v7524_v53  ;;  %v4765_v31 = vmul.f32 %v4762_v55, %v7536_v3  ;;  %v4804_v25 = vmul.f32 %v4801_v19, %v7544_v45  ;;  %v7558_v33 = vpop.permute.xlu1 %4865  ;;  %v4978_v12 = vld [vmem:[%s8833_s13] sm:$0xff] }
 0x5dd   : > { %9311 = vst [vmem:[#allocation99_spill] sm:$0xff] %v7558_v33  ;;  %v4882_v35 = vmul.f32 %v4879_v58, %v7558_v33 }
 0x5de   : > { %4695 = vrot.lane.b32.xlu1 %v4687_v29, %s9126_s18  ;;  %4734 = vrot.lane.b32.xlu0 %v4726_v43, %s9126_s18 }
 0x5df   : > { %v7548_v26 = vpop.permute.xlu0 %4826 }
 0x5e0   : > { %9310 = vst [vmem:[#allocation98_spill] sm:$0xff] %v7548_v26  ;;  %v4843_v49 = vmul.f32 %v4840_v17, %v7548_v26  ;;  %v7573_v29 = vpop.permute.xlu1 %4943 }
 0x5e1   : > { %9313 = vst [vmem:[#allocation101_spill] sm:$0xff] %v7573_v29 }
 0x5e2   : > { %4773 = vrot.lane.b32.xlu1 %v4765_v31, %s9126_s18  ;;  %4812 = vrot.lane.b32.xlu0 %v4804_v25, %s9126_s18 }
 0x5e3   : > { %v7564_v61 = vpop.permute.xlu0 %4904 }
 0x5e4   : > { %9312 = vst [vmem:[#allocation100_spill] sm:$0xff] %v7564_v61  ;;  %v4921_v55 = vmul.f32 %v4918_v22, %v7564_v61  ;;  %v7575_v43 = vpop.permute.xlu1 %4216 }
 0x5e5   : > { %9314 = vst [vmem:[#allocation102_spill] sm:$0xff] %v7575_v43 }
 0x5e6   : > { %4851 = vrot.lane.b32.xlu1 %v4843_v49, %s9126_s18  ;;  %4890 = vrot.lane.b32.xlu0 %v4882_v35, %s9126_s18 }
 0x5e7   : > { %v7577_v19 = vpop.permute.xlu0 %4255 }
 0x5e8   : > { %9315 = vst [vmem:[#allocation103_spill] sm:$0xff] %v7577_v19 }
 0x5ea   : > { %4981 = vperm.xlu1 %5396, %v4978_v12   ;;  %4929 = vrot.lane.b32.xlu0 %v4921_v55, %s9126_s18 }
 0x5eb   : > { %v2286_v35 = vpop.permute.xlu0 %2285 }
 0x634   : > { %v7579_v31 = vpop.permute.xlu1 %4294 }
 0x635   : > { %9316 = vst [vmem:[#allocation104_spill] sm:$0xff] %v7579_v31 }
 0x645   : > { %v2278_v17 = vpop.permute.xlu1 %2277 }
 0x646   : > { %v2280_v25 = vmul.f32 %v2278_v17, %v6996_v1  ;;  %v2281_v58 = vmul.f32 %v2278_v17, %v7073_v63  ;;  %v2282_v49 = vmul.f32 %v2278_v17, %v7070_v44 }
 0x648   : > { %v2288_v22 = vadd.f32 %v2286_v35, %v2280_v25  ;;  %v2289_v12 = vadd.f32 %v2286_v35, %v2281_v58  ;;  %v2290_v8 = vadd.f32 %v2286_v35, %v2282_v49 }
 0x64a   : > { %v2291_v55 = vsub.f32 0.0, %v2288_v22  ;;  %v2292_v42 = vsub.f32 0.0, %v2289_v12  ;;  %v2293_v57 = vsub.f32 0.0, %v2290_v8 }
 0x64c   : > { %v2294_v28 = vmul.f32 1.442695, %v2291_v55  ;;  %v2296_v43 = vmul.f32 1.442695, %v2292_v42  ;;  %v2298_v29 = vmul.f32 1.442695, %v2293_v57  ;;  %v7587_v57 = vpop.permute.xlu1 %4372 }
 0x64d   : > { %9317 = vst [vmem:[#allocation105_spill] sm:$0xff] %v7587_v57 }
 0x64e   : > { %5407 = vpow2.f32 %v2294_v28 }
 0x64f   : > { %5409 = vpow2.f32 %v2296_v43 }
 0x650   : > { %5411 = vpow2.f32 %v2298_v29  ;;  %v7589_v29 = vpop.permute.xlu1 %4450 }
 0x651   : > { %9318 = vst [vmem:[#allocation106_spill] sm:$0xff] %v7589_v29 }
 0x654   : > { %v7591_v43 = vpop.permute.xlu1 %4528 }
 0x655   : > { %9319 = vst [vmem:[#allocation107_spill] sm:$0xff] %v7591_v43 }
 0x658   : > { %v5408_v31 = vpop.eup %5407 }
 0x659   : > { %v5410_v19 = vpop.eup %5409  ;;  %v2300_v1 = vadd.f32 1.0, %v5408_v31 }
 0x65a   : > { %v5412_v14 = vpop.eup %5411  ;;  %v2301_v63 = vadd.f32 1.0, %v5410_v19 }
 0x65b   : > { %5413 = vrcp.f32 %v2300_v1  ;;  %v2302_v44 = vadd.f32 1.0, %v5412_v14  ;;  %v7593_v14 = vpop.permute.xlu1 %4606 }
 0x65c   : > { %5415 = vrcp.f32 %v2301_v63  ;;  %9320 = vst [vmem:[#allocation108_spill] sm:$0xff] %v7593_v14 }
 0x65d   : > { %5417 = vrcp.f32 %v2302_v44  ;;  %v9325_v44 = vld [vmem:[#allocation37_spill] sm:$0xff] }
 0x65f   : > { %v7595_v19 = vpop.permute.xlu1 %4695 }
 0x660   : > { %9321 = vst [vmem:[#allocation109_spill] sm:$0xff] %v7595_v19 }
 0x663   : > { %v7597_v31 = vpop.permute.xlu1 %4773 }
 0x664   : > { %9322 = vst [vmem:[#allocation110_spill] sm:$0xff] %v7597_v31 }
 0x665   : > { %v5414_v17 = vpop.eup %5413 }
 0x666   : > { %v2309_v25 = vmul.f32 %v5414_v17, %v2288_v22  ;;  %v5416_v58 = vpop.eup %5415 }
 0x667   : > { %v2310_v49 = vmul.f32 %v5416_v58, %v2289_v12  ;;  %v5418_v42 = vpop.eup %5417  ;;  %v7599_v35 = vpop.permute.xlu1 %4851 }
 0x668   : > { %2315 = vrot.lane.b32.xlu1 %v2309_v25, %s9229_s22  ;;  %v2311_v28 = vmul.f32 %v5418_v42, %v2290_v8  ;;  %9323 = vst [vmem:[#allocation111_spill] sm:$0xff] %v7599_v35  ;;  %v9326_v42 = vld [vmem:[#allocation52_spill] sm:$0xff] }
 0x66b   : > { %v7601_v22 = vpop.permute.xlu1 %4981 }
 0x66c   : > { %2317 = vrot.lane.b32.xlu1 %v2310_v49, %s9229_s22  ;;  %9324 = vst [vmem:[#allocation112_spill] sm:$0xff] %v7601_v22 }
 0x670   : > { %2319 = vrot.lane.b32.xlu1 %v2311_v28, %s9229_s22 }
 0x6da   : > { %v2316_v12 = vpop.permute.xlu1 %2315 }
 0x6de   : > { %v2318_v8 = vpop.permute.xlu1 %2317 }
 0x6df   : > { %v7604_v55 = vsel %vm1961_vm7, %v2316_v12, %v2318_v8 }
 0x6e0   : > { %2325 = vst [vmem:[#allocation2 + $0x8] sm:$0xff] %v7604_v55  ;;  %v7609_v1 = vrot.slane %v7604_v55, %v5657_v6  ;;  %v7615_v25 = vrot.slane %v7604_v55, %v5703_v27  ;;  %v7632_v22 = vrot.slane %v7604_v55, %v5829_v7 }
 0x6e2   : > { %v2320_v63 = vpop.permute.xlu1 %2319  ;;  %v2570_v17 = vmul.f32 %v7609_v1, %v9325_v44  ;;  %v2609_v28 = vmul.f32 %v7615_v25, %v9326_v42 }
 0x6e3   : > { %v7618_v58 = vsel %vm1961_vm7, %v2318_v8, %v2320_v63  ;;  %v9327_v63 = vld [vmem:[#allocation54_spill] sm:$0xff] }
 0x6e4   : > { %2326 = vst [vmem:[#allocation2 + $0x10] sm:$0xff] %v7618_v58  ;;  %2577 = vrot.lane.b32.xlu1 %v2570_v17, %s9071_s23  ;;  %v7624_v49 = vrot.slane %v7618_v58, %v5657_v6  ;;  %v7636_v8 = vrot.slane %v7618_v58, %v5703_v27  ;;  %v2648_v17 = vmul.f32 %v7632_v22, %v9327_v63 }
 0x6e5   : > { %v7650_v31 = vrot.slane %v7618_v58, %v5829_v7  ;;  %v7664_v14 = vrot.slane %v7618_v58, %v5832_v9  ;;  %v7678_v29 = vrot.slane %v7618_v58, %v6608_v62  ;;  %v7692_v61 = vrot.slane %v7618_v58, %v6622_v4 }
 0x6e6   : > { %v2571_v12 = vmul.f32 %v7624_v49, %v9325_v44  ;;  %v2610_v35 = vmul.f32 %v7636_v8, %v9326_v42  ;;  %v7646_v44 = vrot.slane %v7604_v55, %v5832_v9  ;;  %v7660_v42 = vrot.slane %v7604_v55, %v6608_v62 }
 0x6e7   : > { %v2649_v19 = vmul.f32 %v7650_v31, %v9327_v63  ;;  %v7674_v63 = vrot.slane %v7604_v55, %v6622_v4  ;;  %v7706_v26 = vrot.slane %v7618_v58, %v6636_v37  ;;  %v3526_v3 = vmul.f32 %v7244_v48, %v7624_v49 }
 0x6e8   : > { %2616 = vrot.lane.b32.xlu1 %v2609_v28, %s9071_s23  ;;  %2579 = vrot.lane.b32.xlu0 %v2571_v12, %s9071_s23  ;;  %v9328_v28 = vld [vmem:[#allocation12_spill] sm:$0xff] }
 0x6e9   : > { %v2687_v12 = vmul.f32 %v7646_v44, %v9328_v28  ;;  %v2688_v43 = vmul.f32 %v7664_v14, %v9328_v28  ;;  %v7688_v28 = vrot.slane %v7604_v55, %v6636_v37 }
 0x6ec   : > { %2655 = vrot.lane.b32.xlu1 %v2648_v17, %s9071_s23  ;;  %2618 = vrot.lane.b32.xlu0 %v2610_v35, %s9071_s23  ;;  %v9329_v17 = vld [vmem:[#allocation75_spill] sm:$0xff] }
 0x6ed   : > { %v2726_v35 = vmul.f32 %v7660_v42, %v9329_v17  ;;  %v2727_v57 = vmul.f32 %v7678_v29, %v9329_v17  ;;  %v7702_v17 = vrot.slane %v7604_v55, %v6652_v41 }
 0x6f0   : > { %2694 = vrot.lane.b32.xlu1 %v2687_v12, %s9071_s23  ;;  %2657 = vrot.lane.b32.xlu0 %v2649_v19, %s9071_s23  ;;  %v9330_v12 = vld [vmem:[#allocation76_spill] sm:$0xff] }
 0x6f1   : > { %v2765_v19 = vmul.f32 %v7674_v63, %v9330_v12  ;;  %v2766_v33 = vmul.f32 %v7692_v61, %v9330_v12  ;;  %v7716_v12 = vrot.slane %v7618_v58, %v6652_v41 }
 0x6f4   : > { %2733 = vrot.lane.b32.xlu1 %v2726_v35, %s9071_s23  ;;  %2696 = vrot.lane.b32.xlu0 %v2688_v43, %s9071_s23  ;;  %v9331_v35 = vld [vmem:[#allocation15_spill] sm:$0xff] }
 0x6f5   : > { %v2804_v43 = vmul.f32 %v7688_v28, %v9331_v35  ;;  %v2805_v45 = vmul.f32 %v7706_v26, %v9331_v35  ;;  %v3547_v35 = vmul.f32 %v7254_v0, %v7615_v25 }
 0x6f8   : > { %2772 = vrot.lane.b32.xlu1 %v2765_v19, %s9071_s23  ;;  %2735 = vrot.lane.b32.xlu0 %v2727_v57, %s9071_s23  ;;  %v9332_v19 = vld [vmem:[#allocation16_spill] sm:$0xff] }
 0x6f9   : > { %v2843_v57 = vmul.f32 %v7702_v17, %v9332_v19 }
 0x6fc   : > { %2811 = vrot.lane.b32.xlu1 %v2804_v43, %s9071_s23  ;;  %2774 = vrot.lane.b32.xlu0 %v2766_v33, %s9071_s23  ;;  %v2844_v33 = vmul.f32 %v7716_v12, %v9332_v19  ;;  %v3525_v43 = vmul.f32 %v7244_v48, %v7609_v1  ;;  %v3548_v19 = vmul.f32 %v7254_v0, %v7636_v8 }
 0x6fd   : > { %v3569_v48 = vmul.f32 %v7248_v11, %v7632_v22  ;;  %v3592_v0 = vmul.f32 %v7256_v20, %v7664_v14 }
 0x700   : > { %2850 = vrot.lane.b32.xlu1 %v2843_v57, %s9071_s23  ;;  %2813 = vrot.lane.b32.xlu0 %v2805_v45, %s9071_s23  ;;  %v3570_v45 = vmul.f32 %v7248_v11, %v7650_v31  ;;  %v3614_v57 = vmul.f32 %v7252_v13, %v7678_v29  ;;  %v3613_v11 = vmul.f32 %v7252_v13, %v7660_v42 }
 0x701   : > { %v3657_v13 = vmul.f32 %v7258_v47, %v7688_v28 }
 0x704   : > { %3531 = vrot.lane.b32.xlu1 %v3526_v3, %s9077_s30  ;;  %2852 = vrot.lane.b32.xlu0 %v2844_v33, %s9071_s23  ;;  %v3591_v3 = vmul.f32 %v7256_v20, %v7646_v44  ;;  %v3635_v33 = vmul.f32 %v7260_v46, %v7674_v63  ;;  %v3636_v20 = vmul.f32 %v7260_v46, %v7692_v61  ;;  %s5428_s23 = sshll.u32 %s5503_s16, 4  ;;  %s5429_s23 = int_to_ptr.vmem [resolvable:$false] %s5428_s23 }
 0x705   : > { %v3680_v46 = vmul.f32 %v7264_v60, %v7716_v12 }
 0x708   : > { %3551 = vrot.lane.b32.xlu1 %v3547_v35, %s9077_s30  ;;  %3529 = vrot.lane.b32.xlu0 %v3525_v43, %s9077_s30  ;;  %v3658_v35 = vmul.f32 %v7258_v47, %v7706_v26  ;;  %v3679_v43 = vmul.f32 %v7264_v60, %v7702_v17  ;;  %v4363_v47 = vmul.f32 %v7496_v15, %v7624_v49 }
 0x709   : > { %v4401_v60 = vmul.f32 %v7457_v10, %v7615_v25  ;;  %v4441_v49 = vmul.f32 %v7500_v52, %v7650_v31  ;;  %v9336_v31 = vld [vmem:[#allocation21_spill] sm:$0xff] }
 0x70c   : > { %3575 = vrot.lane.b32.xlu1 %v3570_v45, %s9077_s30  ;;  %3553 = vrot.lane.b32.xlu0 %v3548_v19, %s9077_s30  ;;  %v4362_v45 = vmul.f32 %v7496_v15, %v7609_v1  ;;  %v4402_v19 = vmul.f32 %v7457_v10, %v7636_v8  ;;  %v4440_v1 = vmul.f32 %v7500_v52, %v7632_v22 }
 0x70d   : > { %v4480_v15 = vmul.f32 %v7464_v23, %v7664_v14  ;;  %v4518_v22 = vmul.f32 %v7506_v56, %v7660_v42  ;;  %v4479_v10 = vmul.f32 %v7464_v23, %v7646_v44  ;;  %v4558_v14 = vmul.f32 %v7469_v24, %v7692_v61 }
 0x70e   : > { %v4519_v52 = vmul.f32 %v7506_v56, %v7678_v29  ;;  %v2876_v23 = vsel %vm1038_vm3, %v9336_v31, %v7115_v21  ;;  %v4596_v42 = vmul.f32 %v7512_v51, %v7688_v28  ;;  %v4636_v56 = vmul.f32 %v7476_v32, %v7716_v12 }
 0x70f   : > { %v2881_v61 = vmul.f32 %v2876_v23, %v7604_v55  ;;  %v4597_v29 = vmul.f32 %v7512_v51, %v7706_v26  ;;  %v7829_v28 = vmul.f32 %v7115_v21, %v7618_v58  ;;  %v4635_v12 = vmul.f32 %v7476_v32, %v7702_v17  ;;  %v9341_v21 = vld [vmem:[#allocation23_spill] sm:$0xff] }
 0x710   : > { %3595 = vrot.lane.b32.xlu1 %v3591_v3, %s9077_s30  ;;  %3573 = vrot.lane.b32.xlu0 %v3569_v48, %s9077_s30  ;;  %v7778_v3 = vpop.permute.xlu0 %4333  ;;  %v4557_v48 = vmul.f32 %v7469_v24, %v7674_v63  ;;  %v9339_v24 = vld [vmem:[#allocation22_spill] sm:$0xff] }
 0x711   : > { %9333 = vst [vmem:[#allocation37_spill] sm:$0xff] %v7778_v3  ;;  %v2901_v51 = vrot.slane %v7829_v28, %v5657_v6  ;;  %v2940_v32 = vrot.slane %v7829_v28, %v5703_v27 }
 0x714   : > { %3619 = vrot.lane.b32.xlu1 %v3614_v57, %s9077_s30  ;;  %3597 = vrot.lane.b32.xlu0 %v3592_v0, %s9077_s30  ;;  %v7788_v8 = vpop.permute.xlu0 %4411  ;;  %v2897_v57 = vrot.slane %v2881_v61, %v5657_v6 }
 0x715   : > { %9334 = vst [vmem:[#allocation52_spill] sm:$0xff] %v7788_v8  ;;  %v9380_v8 = vld [vmem:[#allocation72_spill] sm:$0xff] }
 0x716   : > { %v2903_v63 = vmul.f32 %v2897_v57, %v9339_v24  ;;  %v3170_v57 = vrot.slane %v2881_v61, %v6652_v41 }
 0x718   : > { %3639 = vrot.lane.b32.xlu1 %v3635_v33, %s9077_s30  ;;  %3617 = vrot.lane.b32.xlu0 %v3613_v11, %s9077_s30  ;;  %v7800_v25 = vpop.permute.xlu0 %4489  ;;  %v2936_v33 = vrot.slane %v2881_v61, %v5703_v27 }
 0x719   : > { %9335 = vst [vmem:[#allocation54_spill] sm:$0xff] %v7800_v25 }
 0x71a   : > { %v2942_v11 = vmul.f32 %v2936_v33, %v9341_v21 }
 0x71c   : > { %3663 = vrot.lane.b32.xlu1 %v3658_v35, %s9077_s30  ;;  %3641 = vrot.lane.b32.xlu0 %v3636_v20, %s9077_s30  ;;  %v7813_v44 = vpop.permute.xlu0 %4567  ;;  %v2904_v35 = vmul.f32 %v2901_v51, %v9339_v24  ;;  %v2975_v20 = vrot.slane %v2881_v61, %v5829_v7  ;;  %v3135_v51 = vrot.slane %v7829_v28, %v6636_v37 }
 0x71d   : > { %9337 = vst [vmem:[#allocation12_spill] sm:$0xff] %v7813_v44  ;;  %v9377_v44 = vld [vmem:[#allocation51_spill] sm:$0xff] }
 0x720   : > { %3683 = vrot.lane.b32.xlu1 %v3679_v43, %s9077_s30  ;;  %3661 = vrot.lane.b32.xlu0 %v3657_v13, %s9077_s30  ;;  %v7831_v0 = vpop.permute.xlu0 %4645  ;;  %v9343_v43 = vld [vmem:[#allocation24_spill] sm:$0xff] }
 0x721   : > { %9338 = vst [vmem:[#allocation75_spill] sm:$0xff] %v7831_v0  ;;  %v2981_v13 = vmul.f32 %v2975_v20, %v9343_v43 }
 0x724   : > { %4368 = vrot.lane.b32.xlu1 %v4362_v45, %s9116_s29  ;;  %3685 = vrot.lane.b32.xlu0 %v3680_v46, %s9077_s30  ;;  %v7841_v26 = vpop.permute.xlu0 %4734  ;;  %v2943_v45 = vmul.f32 %v2940_v32, %v9341_v21  ;;  %v3014_v46 = vrot.slane %v2881_v61, %v5832_v9  ;;  %v3174_v32 = vrot.slane %v7829_v28, %v6652_v41  ;;  %s5430_s30 = scalar_lea.vmem %s5429_s23, 512 }
 0x725   : > { %9340 = vst [vmem:[#allocation76_spill] sm:$0xff] %v7841_v26  ;;  %v9374_v26 = vld [vmem:[#allocation70_spill] sm:$0xff] }
 0x728   : > { %4409 = vrot.lane.b32.xlu1 %v4402_v19, %s9116_s29  ;;  %4370 = vrot.lane.b32.xlu0 %v4363_v47, %s9116_s29  ;;  %v7852_v17 = vpop.permute.xlu0 %4812  ;;  %v2979_v19 = vrot.slane %v7829_v28, %v5829_v7  ;;  %v3020_v47 = vmul.f32 %v3014_v46, %v6823_v34  ;;  %v9348_v46 = vld [vmem:[#allocation88_spill] sm:$0xff] }
 0x729   : > { %9342 = vst [vmem:[#allocation15_spill] sm:$0xff] %v7852_v17 }
 0x72c   : > { %4446 = vrot.lane.b32.xlu1 %v4440_v1, %s9116_s29  ;;  %4407 = vrot.lane.b32.xlu0 %v4401_v60, %s9116_s29  ;;  %v2982_v1 = vmul.f32 %v2979_v19, %v9343_v43  ;;  %v3053_v60 = vrot.slane %v2881_v61, %v6608_v62  ;;  %v7917_v43 = vmul.f32 %v7144_v40, %v7618_v58 }
 0x730   : > { %4487 = vrot.lane.b32.xlu1 %v4480_v15, %s9116_s29  ;;  %4448 = vrot.lane.b32.xlu0 %v4441_v49, %s9116_s29  ;;  %v3018_v15 = vrot.slane %v7829_v28, %v5832_v9  ;;  %v7866_v49 = vpop.permute.xlu0 %4890 }
 0x731   : > { %9344 = vst [vmem:[#allocation16_spill] sm:$0xff] %v7866_v49  ;;  %v9371_v49 = vld [vmem:[#allocation50_spill] sm:$0xff] }
 0x734   : > { %4524 = vrot.lane.b32.xlu1 %v4518_v22, %s9116_s29  ;;  %4485 = vrot.lane.b32.xlu0 %v4479_v10, %s9116_s29  ;;  %v3059_v22 = vmul.f32 %v3053_v60, %v6834_v2  ;;  %v3021_v10 = vmul.f32 %v3018_v15, %v6823_v34  ;;  %v7877_v31 = vpop.permute.xlu0 %4929  ;;  %v3096_v34 = vrot.slane %v7829_v28, %v6622_v4  ;;  %v9349_v15 = vld [vmem:[#allocation89_spill] sm:$0xff] }
 0x735   : > { %9345 = vst [vmem:[#allocation21_spill] sm:$0xff] %v7877_v31 }
 0x736   : > { %v3099_v33 = vmul.f32 %v3096_v34, %v6850_v5 }
 0x738   : > { %4565 = vrot.lane.b32.xlu1 %v4558_v14, %s9116_s29  ;;  %4526 = vrot.lane.b32.xlu0 %v4519_v52, %s9116_s29  ;;  %v3092_v14 = vrot.slane %v2881_v61, %v6622_v4  ;;  %v3057_v52 = vrot.slane %v7829_v28, %v6608_v62  ;;  %v3224_v28 = vrot.slane %v7917_v43, %v5657_v6 }
 0x73c   : > { %4602 = vrot.lane.b32.xlu1 %v4596_v42, %s9116_s29  ;;  %4563 = vrot.lane.b32.xlu0 %v4557_v48, %s9116_s29  ;;  %v3098_v42 = vmul.f32 %v3092_v14, %v6850_v5  ;;  %v3060_v48 = vmul.f32 %v3057_v52, %v6834_v2  ;;  %v9346_v2 = vld [vmem:[#allocation86_spill] sm:$0xff]  ;;  %v3263_v52 = vrot.slane %v7917_v43, %v5703_v27 }
 0x73d   : > { %v3138_v20 = vmul.f32 %v3135_v51, %v9346_v2  ;;  %v9351_v51 = vld [vmem:[#allocation80_spill] sm:$0xff] }
 0x740   : > { %4643 = vrot.lane.b32.xlu1 %v4636_v56, %s9116_s29  ;;  %4604 = vrot.lane.b32.xlu0 %v4597_v29, %s9116_s29  ;;  %v3131_v56 = vrot.slane %v2881_v61, %v6636_v37  ;;  %v3199_v29 = vsel %vm897_vm4, %v6887_v16, %v7144_v40  ;;  %v9347_v16 = vld [vmem:[#allocation87_spill] sm:$0xff] }
 0x741   : > { %v7901_v21 = vmul.f32 %v3199_v29, %v7604_v55  ;;  %v3176_v61 = vmul.f32 %v3170_v57, %v9347_v16  ;;  %v3266_v29 = vmul.f32 %v3263_v52, %v9349_v15 }
 0x743   : > { %v3220_v5 = vrot.slane %v7901_v21, %v5657_v6  ;;  %v3298_v14 = vrot.slane %v7901_v21, %v5829_v7  ;;  %v3337_v57 = vrot.slane %v7901_v21, %v5832_v9 }
 0x744   : > { %2910 = vrot.lane.b32.xlu1 %v2903_v63, %s9112_s7  ;;  %4641 = vrot.lane.b32.xlu0 %v4635_v12, %s9116_s29  ;;  %v3137_v12 = vmul.f32 %v3131_v56, %v9346_v2  ;;  %v9350_v56 = vld [vmem:[#allocation71_spill] sm:$0xff]  ;;  %v3302_v2 = vrot.slane %v7917_v43, %v5829_v7 }
 0x745   : > { %v3226_v19 = vmul.f32 %v3220_v5, %v9348_v46  ;;  %v3304_v34 = vmul.f32 %v3298_v14, %v9350_v56  ;;  %v3341_v5 = vrot.slane %v7917_v43, %v5832_v9  ;;  %v9354_v14 = vld [vmem:[#allocation55_spill] sm:$0xff] }
 0x748   : > { %2949 = vrot.lane.b32.xlu1 %v2942_v11, %s9112_s7  ;;  %2912 = vrot.lane.b32.xlu0 %v2904_v35, %s9112_s7 }
 0x74c   : > { %2988 = vrot.lane.b32.xlu1 %v2981_v13, %s9112_s7  ;;  %2951 = vrot.lane.b32.xlu0 %v2943_v45, %s9112_s7 }
 0x750   : > { %3027 = vrot.lane.b32.xlu1 %v3020_v47, %s9112_s7  ;;  %2990 = vrot.lane.b32.xlu0 %v2982_v1, %s9112_s7  ;;  %v3177_v47 = vmul.f32 %v3174_v32, %v9347_v16  ;;  %v3259_v1 = vrot.slane %v7901_v21, %v5703_v27  ;;  %v3343_v16 = vmul.f32 %v3337_v57, %v9351_v51  ;;  %v9355_v57 = vld [vmem:[#allocation66_spill] sm:$0xff] }
 0x754   : > { %3066 = vrot.lane.b32.xlu1 %v3059_v22, %s9112_s7  ;;  %3029 = vrot.lane.b32.xlu0 %v3021_v10, %s9112_s7  ;;  %v3265_v22 = vmul.f32 %v3259_v1, %v9349_v15  ;;  %v3227_v10 = vmul.f32 %v3224_v28, %v9348_v46  ;;  %v3344_v1 = vmul.f32 %v3341_v5, %v9351_v51  ;;  %v9359_v5 = vld [vmem:[#allocation40_spill] sm:$0xff] }
 0x755   : > { %v3415_v28 = vrot.slane %v7901_v21, %v6622_v4  ;;  %v3380_v15 = vrot.slane %v7917_v43, %v6608_v62 }
 0x756   : > { %v7879_v23 = vpop.permute.xlu1 %2577 }
 0x757   : > { %v3421_v52 = vmul.f32 %v3415_v28, %v9354_v14 }
 0x758   : > { %3105 = vrot.lane.b32.xlu1 %v3098_v42, %s9112_s7  ;;  %3068 = vrot.lane.b32.xlu0 %v3060_v48, %s9112_s7 }
 0x75a   : > { %v7892_v24 = vpop.permute.xlu0 %2579  ;;  %v7894_v63 = vpop.permute.xlu1 %2616 }
 0x75c   : > { %3144 = vrot.lane.b32.xlu1 %v3137_v12, %s9112_s7  ;;  %3107 = vrot.lane.b32.xlu0 %v3099_v33, %s9112_s7 }
 0x75e   : > { %v7906_v11 = vpop.permute.xlu0 %2618  ;;  %v7908_v35 = vpop.permute.xlu1 %2655 }
 0x760   : > { %3183 = vrot.lane.b32.xlu1 %v3176_v61, %s9112_s7  ;;  %3146 = vrot.lane.b32.xlu0 %v3138_v20, %s9112_s7  ;;  %v3305_v61 = vmul.f32 %v3302_v2, %v9350_v56  ;;  %v3376_v20 = vrot.slane %v7901_v21, %v6608_v62  ;;  %v9356_v2 = vld [vmem:[#allocation48_spill] sm:$0xff] }
 0x761   : > { %v3701_v51 = vsel %vm1466_vm5, %v9356_v2, %v9355_v57  ;;  %v8023_v57 = vmul.f32 %v9356_v2, %v7604_v55 }
 0x762   : > { %v7921_v13 = vpop.permute.xlu0 %2657  ;;  %v7923_v45 = vpop.permute.xlu1 %2694  ;;  %v8007_v28 = vmul.f32 %v3701_v51, %v7618_v58 }
 0x764   : > { %3233 = vrot.lane.b32.xlu1 %v3226_v19, %s9113_s19  ;;  %3185 = vrot.lane.b32.xlu0 %v3177_v47, %s9112_s7  ;;  %v9352_v19 = vld [vmem:[#allocation77_spill] sm:$0xff] }
 0x765   : > { %v3382_v47 = vmul.f32 %v3376_v20, %v9352_v19  ;;  %v3383_v56 = vmul.f32 %v3380_v15, %v9352_v19 }
 0x766   : > { %v7933_v40 = vpop.permute.xlu0 %2696  ;;  %v7935_v60 = vpop.permute.xlu1 %2733 }
 0x768   : > { %3272 = vrot.lane.b32.xlu1 %v3265_v22, %s9113_s19  ;;  %3235 = vrot.lane.b32.xlu0 %v3227_v10, %s9113_s19 }
 0x76a   : > { %v7945_v42 = vpop.permute.xlu0 %2735  ;;  %v7947_v48 = vpop.permute.xlu1 %2772 }
 0x76c   : > { %3311 = vrot.lane.b32.xlu1 %v3304_v34, %s9113_s19  ;;  %3274 = vrot.lane.b32.xlu0 %v3266_v29, %s9113_s19  ;;  %v3454_v34 = vrot.slane %v7901_v21, %v6636_v37  ;;  %v3419_v29 = vrot.slane %v7917_v43, %v6622_v4 }
 0x76e   : > { %v7957_v12 = vpop.permute.xlu0 %2774  ;;  %v7959_v33 = vpop.permute.xlu1 %2811  ;;  %v3460_v19 = vmul.f32 %v3454_v34, %v9359_v5 }
 0x770   : > { %3350 = vrot.lane.b32.xlu1 %v3343_v16, %s9113_s19  ;;  %3313 = vrot.lane.b32.xlu0 %v3305_v61, %s9113_s19  ;;  %v3493_v16 = vrot.slane %v7901_v21, %v6652_v41  ;;  %v3497_v21 = vrot.slane %v7917_v43, %v6652_v41 }
 0x772   : > { %v7969_v32 = vpop.permute.xlu0 %2813  ;;  %v7971_v46 = vpop.permute.xlu1 %2850 }
 0x774   : > { %3389 = vrot.lane.b32.xlu1 %v3382_v47, %s9113_s19  ;;  %3352 = vrot.lane.b32.xlu0 %v3344_v1, %s9113_s19  ;;  %v3422_v47 = vmul.f32 %v3419_v29, %v9354_v14  ;;  %v3458_v1 = vrot.slane %v7917_v43, %v6636_v37  ;;  %v3722_v29 = vrot.slane %v8007_v28, %v5657_v6 }
 0x776   : > { %v7981_v22 = vpop.permute.xlu0 %2852  ;;  %v7983_v10 = vpop.permute.xlu1 %3531  ;;  %v3461_v14 = vmul.f32 %v3458_v1, %v9359_v5  ;;  %v3761_v5 = vrot.slane %v8007_v28, %v5703_v27  ;;  %v3718_v1 = vrot.slane %v8023_v57, %v5657_v6 }
 0x777   : > { %9353 = vst [vmem:[#allocation22_spill] sm:$0xff] %v7983_v10 }
 0x778   : > { %3428 = vrot.lane.b32.xlu1 %v3421_v52, %s9113_s19  ;;  %3391 = vrot.lane.b32.xlu0 %v3383_v56, %s9113_s19  ;;  %v9362_v56 = vld [vmem:[#allocation38_spill] sm:$0xff] }
 0x779   : > { %v3499_v34 = vmul.f32 %v3493_v16, %v9362_v56  ;;  %v3500_v16 = vmul.f32 %v3497_v21, %v9362_v56  ;;  %v3800_v21 = vrot.slane %v8007_v28, %v5829_v7  ;;  %v3757_v56 = vrot.slane %v8023_v57, %v5703_v27 }
 0x77a   : > { %v7998_v61 = vpop.permute.xlu0 %3529  ;;  %v8000_v20 = vpop.permute.xlu1 %3551 }
 0x77b   : > { %9357 = vst [vmem:[#allocation23_spill] sm:$0xff] %v7998_v61  ;;  %9358 = vst [vmem:[#allocation24_spill] sm:$0xff] %v8000_v20  ;;  %v3806_v17 = vmul.f32 %v3800_v21, %v9371_v49 }
 0x77c   : > { %3467 = vrot.lane.b32.xlu1 %v3460_v19, %s9113_s19  ;;  %3430 = vrot.lane.b32.xlu0 %v3422_v47, %s9113_s19  ;;  %v9365_v19 = vld [vmem:[#allocation49_spill] sm:$0xff] }
 0x77d   : > { %v3728_v47 = vmul.f32 %v3722_v29, %v9365_v19  ;;  %v3727_v29 = vmul.f32 %v3718_v1, %v9365_v19  ;;  %v3839_v19 = vrot.slane %v8007_v28, %v5832_v9  ;;  %v3796_v1 = vrot.slane %v8023_v57, %v5829_v7 }
 0x77e   : > { %v8013_v15 = vpop.permute.xlu0 %3553  ;;  %v8015_v52 = vpop.permute.xlu1 %3575 }
 0x77f   : > { %9360 = vst [vmem:[#allocation86_spill] sm:$0xff] %v8013_v15  ;;  %9361 = vst [vmem:[#allocation87_spill] sm:$0xff] %v8015_v52  ;;  %v3845_v0 = vmul.f32 %v3839_v19, %v9374_v26  ;;  %v3805_v21 = vmul.f32 %v3796_v1, %v9371_v49  ;;  %v3917_v49 = vrot.slane %v8007_v28, %v6622_v4 }
 0x780   : > { %3506 = vrot.lane.b32.xlu1 %v3499_v34, %s9113_s19  ;;  %3469 = vrot.lane.b32.xlu0 %v3461_v14, %s9113_s19  ;;  %v9368_v14 = vld [vmem:[#allocation68_spill] sm:$0xff]  ;;  %v3874_v1 = vrot.slane %v8023_v57, %v6608_v62 }
 0x781   : > { %v3767_v31 = vmul.f32 %v3761_v5, %v9368_v14  ;;  %v3766_v5 = vmul.f32 %v3757_v56, %v9368_v14  ;;  %v3878_v14 = vrot.slane %v8007_v28, %v6608_v62  ;;  %v3835_v56 = vrot.slane %v8023_v57, %v5832_v9 }
 0x782   : > { %v8027_v43 = vpop.permute.xlu0 %3573  ;;  %v8029_v51 = vpop.permute.xlu1 %3595  ;;  %v3923_v3 = vmul.f32 %v3917_v49, %v9380_v8 }
 0x783   : > { %9363 = vst [vmem:[#allocation88_spill] sm:$0xff] %v8027_v43  ;;  %9364 = vst [vmem:[#allocation89_spill] sm:$0xff] %v8029_v51  ;;  %v3884_v25 = vmul.f32 %v3878_v14, %v9377_v44  ;;  %v3844_v19 = vmul.f32 %v3835_v56, %v9374_v26  ;;  %v3883_v14 = vmul.f32 %v3874_v1, %v9377_v44  ;;  %v9385_v1 = vld [vmem:[#allocation20_spill] sm:$0xff] }
 0x784   : > { %3735 = vrot.lane.b32.xlu1 %v3728_v47, %s9120_s20  ;;  %3508 = vrot.lane.b32.xlu0 %v3500_v16, %s9113_s19  ;;  %v3956_v26 = vrot.slane %v8007_v28, %v6636_v37  ;;  %v3913_v56 = vrot.slane %v8023_v57, %v6622_v4 }
 0x786   : > { %v8039_v2 = vpop.permute.xlu0 %3597  ;;  %v8041_v34 = vpop.permute.xlu1 %3619 }
 0x787   : > { %9366 = vst [vmem:[#allocation71_spill] sm:$0xff] %v8039_v2  ;;  %9367 = vst [vmem:[#allocation80_spill] sm:$0xff] %v8041_v34 }
 0x788   : > { %3774 = vrot.lane.b32.xlu1 %v3767_v31, %s9120_s20  ;;  %3733 = vrot.lane.b32.xlu0 %v3727_v29, %s9120_s20 }
 0x78a   : > { %v8051_v47 = vpop.permute.xlu0 %3617  ;;  %v8053_v16 = vpop.permute.xlu1 %3639 }
 0x78b   : > { %9369 = vst [vmem:[#allocation77_spill] sm:$0xff] %v8051_v47  ;;  %9370 = vst [vmem:[#allocation55_spill] sm:$0xff] %v8053_v16 }
 0x78c   : > { %3813 = vrot.lane.b32.xlu1 %v3806_v17, %s9120_s20  ;;  %3772 = vrot.lane.b32.xlu0 %v3766_v5, %s9120_s20 }
 0x78e   : > { %v8063_v31 = vpop.permute.xlu0 %3641  ;;  %v8065_v29 = vpop.permute.xlu1 %3663 }
 0x78f   : > { %9372 = vst [vmem:[#allocation66_spill] sm:$0xff] %v8063_v31  ;;  %9373 = vst [vmem:[#allocation48_spill] sm:$0xff] %v8065_v29  ;;  %v3995_v29 = vrot.slane %v8007_v28, %v6652_v41  ;;  %v3991_v28 = vrot.slane %v8023_v57, %v6652_v41 }
 0x790   : > { %3852 = vrot.lane.b32.xlu1 %v3845_v0, %s9120_s20  ;;  %3811 = vrot.lane.b32.xlu0 %v3805_v21, %s9120_s20 }
 0x792   : > { %v8075_v17 = vpop.permute.xlu0 %3661  ;;  %v8077_v5 = vpop.permute.xlu1 %3683 }
 0x793   : > { %9375 = vst [vmem:[#allocation40_spill] sm:$0xff] %v8075_v17  ;;  %9376 = vst [vmem:[#allocation38_spill] sm:$0xff] %v8077_v5  ;;  %v9381_v5 = vld [vmem:[#allocation92_spill] sm:$0xff]  ;;  %v9382_v17 = vld [vmem:[#allocation58_spill] sm:$0xff] }
 0x794   : > { %3891 = vrot.lane.b32.xlu1 %v3884_v25, %s9120_s20  ;;  %3850 = vrot.lane.b32.xlu0 %v3844_v19, %s9120_s20  ;;  %v4024_v25 = vsel %vm1635_vm6, %v9382_v17, %v9381_v5  ;;  %v3952_v5 = vrot.slane %v8023_v57, %v6636_v37 }
 0x795   : > { %v8103_v19 = vmul.f32 %v4024_v25, %v7618_v58 }
 0x796   : > { %v8087_v0 = vpop.permute.xlu0 %3685  ;;  %v8089_v21 = vpop.permute.xlu1 %4368 }
 0x797   : > { %9378 = vst [vmem:[#allocation49_spill] sm:$0xff] %v8087_v0  ;;  %9379 = vst [vmem:[#allocation68_spill] sm:$0xff] %v8089_v21  ;;  %v3962_v21 = vmul.f32 %v3956_v26, %v9385_v1  ;;  %v3922_v0 = vmul.f32 %v3913_v56, %v9380_v8  ;;  %v9388_v26 = vld [vmem:[#allocation79_spill] sm:$0xff]  ;;  %v3961_v8 = vmul.f32 %v3952_v5, %v9385_v1 }
 0x798   : > { %3930 = vrot.lane.b32.xlu1 %v3923_v3, %s9120_s20  ;;  %3889 = vrot.lane.b32.xlu0 %v3883_v14, %s9120_s20  ;;  %v4045_v3 = vrot.slane %v8103_v19, %v5657_v6  ;;  %v8129_v56 = vmul.f32 %v9382_v17, %v7604_v55  ;;  %v9392_v1 = vld [vmem:[#allocation59_spill] sm:$0xff]  ;;  %v4000_v57 = vmul.f32 %v3991_v28, %v9388_v26 }
 0x79a   : > { %v8105_v49 = vpop.permute.xlu0 %4370  ;;  %v8107_v44 = vpop.permute.xlu1 %4409  ;;  %v4051_v5 = vmul.f32 %v4045_v3, %v9392_v1  ;;  %v4041_v17 = vrot.slane %v8129_v56, %v5657_v6  ;;  %v4119_v15 = vrot.slane %v8129_v56, %v5829_v7 }
 0x79b   : > { %9383 = vst [vmem:[#allocation50_spill] sm:$0xff] %v8105_v49  ;;  %9384 = vst [vmem:[#allocation70_spill] sm:$0xff] %v8107_v44  ;;  %v4001_v44 = vmul.f32 %v3995_v29, %v9388_v26  ;;  %v9393_v49 = vld [vmem:[#allocation60_spill] sm:$0xff] }
 0x79c   : > { %3969 = vrot.lane.b32.xlu1 %v3962_v21, %s9120_s20  ;;  %3928 = vrot.lane.b32.xlu0 %v3922_v0, %s9120_s20  ;;  %v5422_v0 = vld [vmem:[#allocation2] sm:$0xff] }
 0x79d   : > { %v9389_v21 = vld [vmem:[#allocation28_spill] sm:$0xff] }
 0x79e   : > { %v8119_v14 = vpop.permute.xlu0 %4407  ;;  %v8121_v25 = vpop.permute.xlu1 %4446 }
 0x79f   : > { %9386 = vst [vmem:[#allocation51_spill] sm:$0xff] %v8119_v14  ;;  %9387 = vst [vmem:[#allocation72_spill] sm:$0xff] %v8121_v25  ;;  %v8134_v14 = vmul.f32 %v5422_v0, %v9389_v21  ;;  %v8151_v0 = vmul.f32 %v9393_v49, %v7618_v58 }
 0x7a0   : > { %4008 = vrot.lane.b32.xlu1 %v4001_v44, %s9120_s20  ;;  %3967 = vrot.lane.b32.xlu0 %v3961_v8, %s9120_s20  ;;  %v4084_v44 = vrot.slane %v8103_v19, %v5703_v27  ;;  %v2344_v8 = vsel %vm759_vm10, %v9389_v21, %v9393_v49  ;;  %v4050_v49 = vmul.f32 %v4041_v17, %v9392_v1 }
 0x7a1   : > { %v2360_v3 = vrot.slane %v8134_v14, %v5657_v6  ;;  %v2385_v26 = vrot.slane %v8134_v14, %v5703_v27  ;;  %v2368_v34 = vrot.slane %v8151_v0, %v5657_v6  ;;  %v2410_v17 = vrot.slane %v8134_v14, %v5829_v7 }
 0x7a2   : > { %v8136_v25 = vpop.permute.xlu0 %4448  ;;  %v8138_v29 = vpop.permute.xlu1 %4487  ;;  %v2460_v20 = vrot.slane %v8134_v14, %v6608_v62 }
 0x7a3   : > { %9390 = vst [vmem:[#allocation92_spill] sm:$0xff] %v8136_v25  ;;  %9391 = vst [vmem:[#allocation58_spill] sm:$0xff] %v8138_v29  ;;  %v8154_v29 = vmul.f32 %v2344_v8, %v7604_v55  ;;  %v9396_v25 = vld [vmem:[#allocation17_spill] sm:$0xff]  ;;  %v4080_v8 = vrot.slane %v8129_v56, %v5703_v27 }
 0x7a4   : > { %4058 = vrot.lane.b32.xlu1 %v4051_v5, %s9123_s21  ;;  %4006 = vrot.lane.b32.xlu0 %v4000_v57, %s9120_s20  ;;  %v4090_v16 = vmul.f32 %v4084_v44, %v9396_v25  ;;  %v4123_v5 = vrot.slane %v8103_v19, %v5829_v7  ;;  %v9397_v57 = vld [vmem:[#allocation61_spill] sm:$0xff]  ;;  %v9398_v44 = vld [vmem:[#allocation30_spill] sm:$0xff] }
 0x7a5   : > { %v2394_v31 = vmul.f32 %v2385_v26, %v9397_v57  ;;  %v2389_v1 = vrot.slane %v8154_v29, %v5703_v27  ;;  %v2369_v26 = vmul.f32 %v2360_v3, %v9398_v44  ;;  %v4089_v52 = vmul.f32 %v4080_v8, %v9396_v25  ;;  %v9401_v8 = vld [vmem:[#allocation32_spill] sm:$0xff] }
 0x7a6   : > { %v8162_v28 = vpop.permute.xlu0 %4485  ;;  %v8164_v21 = vpop.permute.xlu1 %4524  ;;  %v4129_v51 = vmul.f32 %v4123_v5, %v7364_v50  ;;  %v2371_v43 = vmul.f32 %v2368_v34, %v9398_v44  ;;  %v2435_v25 = vrot.slane %v8134_v14, %v5832_v9  ;;  %v2419_v5 = vmul.f32 %v2410_v17, %v9401_v8 }
 0x7a7   : > { %9394 = vst [vmem:[#allocation20_spill] sm:$0xff] %v8162_v28  ;;  %9395 = vst [vmem:[#allocation79_spill] sm:$0xff] %v8164_v21  ;;  %v2393_v28 = vrot.slane %v8151_v0, %v5703_v27  ;;  %v2364_v21 = vrot.slane %v8154_v29, %v5657_v6  ;;  %v2418_v34 = vrot.slane %v8151_v0, %v5829_v7 }
 0x7a8   : > { %4056 = vrot.lane.b32.xlu0 %v4050_v49, %s9123_s21  ;;  %4097 = vrot.lane.b32.xlu1 %v4090_v16, %s9123_s21  ;;  %v4162_v49 = vrot.slane %v8103_v19, %v5832_v9  ;;  %v2397_v16 = vadd.f32 %v2394_v31, %v2369_v26  ;;  %v2414_v31 = vrot.slane %v8154_v29, %v5829_v7 }
 0x7a9   : > { %v2396_v10 = vmul.f32 %v2393_v28, %v9397_v57  ;;  %v2370_v3 = vmul.f32 %v2364_v21, %v9398_v44  ;;  %v9404_v44 = vld [vmem:[#allocation62_spill] sm:$0xff] }
 0x7aa   : > { %v8186_v47 = vpop.permute.xlu0 %4526  ;;  %v8188_v2 = vpop.permute.xlu1 %4565  ;;  %v2422_v17 = vadd.f32 %v2419_v5, %v2397_v16  ;;  %v2444_v26 = vmul.f32 %v2435_v25, %v9404_v44  ;;  %v2443_v16 = vrot.slane %v8151_v0, %v5832_v9  ;;  %v4275_v5 = vrot.slane %v8129_v56, %v6636_v37 }
 0x7ab   : > { %9399 = vst [vmem:[#allocation28_spill] sm:$0xff] %v8186_v47  ;;  %9400 = vst [vmem:[#allocation59_spill] sm:$0xff] %v8188_v2  ;;  %v2395_v47 = vmul.f32 %v2389_v1, %v9397_v57  ;;  %v4128_v57 = vmul.f32 %v4119_v15, %v7364_v50  ;;  %v4240_v1 = vrot.slane %v8103_v19, %v6622_v4 }
 0x7ac   : > { %4095 = vrot.lane.b32.xlu0 %v4089_v52, %s9123_s21  ;;  %4136 = vrot.lane.b32.xlu1 %v4129_v51, %s9123_s21  ;;  %v4168_v52 = vmul.f32 %v4162_v49, %v7375_v30  ;;  %v4158_v51 = vrot.slane %v8129_v56, %v5832_v9  ;;  %v2399_v2 = vadd.f32 %v2396_v10, %v2371_v43 }
 0x7ad   : > { %v2420_v50 = vmul.f32 %v2414_v31, %v9401_v8  ;;  %v2439_v15 = vrot.slane %v8154_v29, %v5832_v9  ;;  %v2421_v49 = vmul.f32 %v2418_v34, %v9401_v8  ;;  %v2485_v8 = vrot.slane %v8134_v14, %v6622_v4 }
 0x7ae   : > { %v8209_v28 = vpop.permute.xlu0 %4563  ;;  %v8211_v21 = vpop.permute.xlu1 %4602  ;;  %v4167_v43 = vmul.f32 %v4158_v51, %v7375_v30  ;;  %v2447_v31 = vadd.f32 %v2444_v26, %v2422_v17  ;;  %v2446_v51 = vmul.f32 %v2443_v16, %v9404_v44 }
 0x7af   : > { %9402 = vst [vmem:[#allocation60_spill] sm:$0xff] %v8209_v28  ;;  %9403 = vst [vmem:[#allocation17_spill] sm:$0xff] %v8211_v21  ;;  %v2398_v28 = vadd.f32 %v2395_v47, %v2370_v3  ;;  %v4246_v47 = vmul.f32 %v4240_v1, %v7437_v36  ;;  %v4197_v3 = vrot.slane %v8129_v56, %v6608_v62 }
 0x7b0   : > { %4134 = vrot.lane.b32.xlu0 %v4128_v57, %s9123_s21  ;;  %4175 = vrot.lane.b32.xlu1 %v4168_v52, %s9123_s21  ;;  %v2424_v34 = vadd.f32 %v2421_v49, %v2399_v2  ;;  %v9407_v57 = vld [vmem:[#allocation34_spill] sm:$0xff]  ;;  %v2445_v30 = vmul.f32 %v2439_v15, %v9404_v44  ;;  %v2468_v1 = vrot.slane %v8151_v0, %v6608_v62 }
 0x7b1   : > { %v2469_v52 = vmul.f32 %v2460_v20, %v9407_v57  ;;  %v2423_v21 = vadd.f32 %v2420_v50, %v2398_v28  ;;  %v4201_v2 = vrot.slane %v8103_v19, %v6608_v62  ;;  %v9409_v28 = vld [vmem:[#allocation93_spill] sm:$0xff]  ;;  %v4284_v50 = vmul.f32 %v4275_v5, %v7492_v39 }
 0x7b2   : > { %v8230_v25 = vpop.permute.xlu0 %4604  ;;  %v8232_v10 = vpop.permute.xlu1 %4643  ;;  %v4206_v26 = vmul.f32 %v4197_v3, %v9409_v28  ;;  %v4318_v49 = vrot.slane %v8103_v19, %v6652_v41  ;;  %v8263_v44 = vmul.f32 %v7517_v18, %v7604_v55  ;;  %v2510_v15 = vrot.slane %v8134_v14, %v6636_v37 }
 0x7b3   : > { %9405 = vst [vmem:[#allocation61_spill] sm:$0xff] %v8230_v25  ;;  %9406 = vst [vmem:[#allocation30_spill] sm:$0xff] %v8232_v10  ;;  %v2464_v10 = vrot.slane %v8154_v29, %v6608_v62  ;;  %v2472_v16 = vadd.f32 %v2469_v52, %v2447_v31  ;;  %v4659_v3 = vsel %vm1961_vm7, %v7517_v18, %v7526_v54 }
 0x7b4   : > { %4173 = vrot.lane.b32.xlu0 %v4167_v43, %s9123_s21  ;;  %4253 = vrot.lane.b32.xlu1 %v4246_v47, %s9123_s21  ;;  %v9410_v43 = vld [vmem:[#allocation64_spill] sm:$0xff]  ;;  %v2448_v25 = vadd.f32 %v2445_v30, %v2423_v21  ;;  %v2489_v55 = vrot.slane %v8154_v29, %v6622_v4  ;;  %v2471_v61 = vmul.f32 %v2468_v1, %v9407_v57 }
 0x7b5   : > { %v2494_v47 = vmul.f32 %v2485_v8, %v9410_v43  ;;  %v2470_v5 = vmul.f32 %v2464_v10, %v9407_v57  ;;  %v2493_v8 = vrot.slane %v8151_v0, %v6622_v4  ;;  %v4207_v31 = vmul.f32 %v4201_v2, %v9409_v28 }
 0x7b6   : > { %v8253_v17 = vpop.permute.xlu0 %4641  ;;  %v8255_v20 = vpop.permute.xlu1 %2910  ;;  %v4324_v54 = vmul.f32 %v4318_v49, %v7450_v59  ;;  %v4236_v21 = vrot.slane %v8129_v56, %v6622_v4  ;;  %v4676_v10 = vrot.slane %v8263_v44, %v5657_v6  ;;  %v8290_v52 = vmul.f32 %v4659_v3, %v7618_v58 }
 0x7b7   : > { %9408 = vst [vmem:[#allocation32_spill] sm:$0xff] %v8253_v17  ;;  %v2449_v17 = vadd.f32 %v2446_v51, %v2424_v34  ;;  %v2535_v57 = vrot.slane %v8134_v14, %v6652_v41  ;;  %v9411_v51 = vld [vmem:[#allocation35_spill] sm:$0xff]  ;;  %v2497_v2 = vadd.f32 %v2494_v47, %v2472_v16  ;;  %v2473_v28 = vadd.f32 %v2470_v5, %v2448_v25 }
 0x7b8   : > { %4212 = vrot.lane.b32.xlu0 %v4206_v26, %s9123_s21  ;;  %4290 = vrot.lane.b32.xlu1 %v4284_v50, %s9123_s21  ;;  %v2519_v1 = vmul.f32 %v2510_v15, %v9411_v51  ;;  %v2495_v26 = vmul.f32 %v2489_v55, %v9410_v43  ;;  %v2514_v50 = vrot.slane %v8154_v29, %v6636_v37 }
 0x7b9   : > { %v2474_v30 = vadd.f32 %v2471_v61, %v2449_v17  ;;  %v2496_v58 = vmul.f32 %v2493_v8, %v9410_v43  ;;  %v2518_v49 = vrot.slane %v8151_v0, %v6636_v37  ;;  %v4245_v25 = vmul.f32 %v4236_v21, %v7437_v36  ;;  %v9412_v43 = vld [vmem:[#allocation65_spill] sm:$0xff] }
 0x7ba   : > { %v8280_v34 = vpop.permute.xlu0 %2912  ;;  %v8282_v18 = vpop.permute.xlu1 %2949  ;;  %v4685_v17 = vmul.f32 %v4676_v10, %v7520_v38  ;;  %v4279_v15 = vrot.slane %v8103_v19, %v6636_v37  ;;  %v4719_v16 = vrot.slane %v8290_v52, %v5703_v27  ;;  %v2522_v3 = vadd.f32 %v2519_v1, %v2497_v2 }
 0x7bb   : > { %v2499_v47 = vadd.f32 %v2496_v58, %v2474_v30  ;;  %v2544_v5 = vmul.f32 %v2535_v57, %v9412_v43  ;;  %v2498_v55 = vadd.f32 %v2495_v26, %v2473_v28  ;;  %v2520_v8 = vmul.f32 %v2514_v50, %v9411_v51 }
 0x7bc   : > { %4214 = vrot.lane.b32.xlu0 %v4207_v31, %s9123_s21  ;;  %4331 = vrot.lane.b32.xlu1 %v4324_v54, %s9123_s21  ;;  %v2539_v36 = vrot.slane %v8154_v29, %v6652_v41  ;;  %v2521_v31 = vmul.f32 %v2518_v49, %v9411_v51  ;;  %v2543_v19 = vrot.slane %v8151_v0, %v6652_v41  ;;  %v9413_v29 = vld [vmem:[#allocation67_spill] sm:$0xff] }
 0x7bd   : > { %v4285_v10 = vmul.f32 %v4279_v15, %v7492_v39  ;;  %v4725_v57 = vmul.f32 %v4719_v16, %v7524_v53  ;;  %v4314_v30 = vrot.slane %v8129_v56, %v6652_v41  ;;  %v4754_v1 = vrot.slane %v8263_v44, %v5829_v7  ;;  %v9414_v56 = vld [vmem:[#allocation69_spill] sm:$0xff]  ;;  %v9415_v16 = vld [vmem:[#allocation96_spill] sm:$0xff] }
 0x7be   : > { %v8303_v14 = vpop.permute.xlu0 %2951  ;;  %v8305_v61 = vpop.permute.xlu1 %2988  ;;  %v2581_v51 = vsel %vm897_vm4, %v9413_v29, %v7879_v23  ;;  %v2524_v2 = vadd.f32 %v2521_v31, %v2499_v47  ;;  %v2547_v0 = vadd.f32 %v2544_v5, %v2522_v3  ;;  %v2523_v28 = vadd.f32 %v2520_v8, %v2498_v55  ;;  %v9416_v55 = vld [vmem:[#allocation63_spill] sm:$0xff] }
 0x7bf   : > { %v2545_v39 = vmul.f32 %v2539_v36, %v9412_v43  ;;  %v2546_v26 = vmul.f32 %v2543_v19, %v9412_v43  ;;  %v2620_v50 = vsel %vm897_vm4, %v9414_v56, %v7894_v63  ;;  %v4680_v58 = vrot.slane %v8290_v52, %v5657_v6 }
 0x7c0   : > { %4251 = vrot.lane.b32.xlu0 %v4245_v25, %s9123_s21  ;;  %4691 = vrot.lane.b32.xlu1 %v4685_v17, %s9126_s18  ;;  %v2586_v49 = vadd.f32 %v2581_v51, %v2547_v0  ;;  %v4323_v15 = vmul.f32 %v4314_v30, %v7450_v59  ;;  %v4763_v47 = vmul.f32 %v4754_v1, %v9415_v16  ;;  %v9418_v0 = vld [vmem:[#allocation97_spill] sm:$0xff] }
 0x7c1   : > { %v4797_v3 = vrot.slane %v8290_v52, %v5832_v9  ;;  %v2549_v43 = vadd.f32 %v2546_v26, %v2524_v2  ;;  %v2582_v5 = vsel %vm897_vm4, %v7879_v23, %v7892_v24  ;;  %v2659_v8 = vsel %vm897_vm4, %v9416_v55, %v7908_v35  ;;  %v9417_v23 = vld [vmem:[#allocation73_spill] sm:$0xff] }
 0x7c2   : > { %v8322_v54 = vpop.permute.xlu0 %2990  ;;  %v8324_v21 = vpop.permute.xlu1 %3027  ;;  %v2548_v36 = vadd.f32 %v2545_v39, %v2523_v28  ;;  %v2625_v31 = vadd.f32 %v2620_v50, %v2586_v49  ;;  %v4715_v59 = vrot.slane %v8263_v44, %v5703_v27  ;;  %v4686_v30 = vmul.f32 %v4680_v58, %v7520_v38  ;;  %v9419_v26 = vld [vmem:[#allocation81_spill] sm:$0xff] }
 0x7c3   : > { %v2588_v19 = vadd.f32 %v7892_v24, %v2549_v43  ;;  %v4803_v28 = vmul.f32 %v4797_v3, %v9418_v0  ;;  %v4832_v24 = vrot.slane %v8263_v44, %v6608_v62  ;;  %v2737_v38 = vsel %vm897_vm4, %v9419_v26, %v7935_v60 }
 0x7c4   : > { %4292 = vrot.lane.b32.xlu0 %v4285_v10, %s9123_s21  ;;  %4732 = vrot.lane.b32.xlu1 %v4725_v57, %s9126_s18  ;;  %v2621_v10 = vsel %vm897_vm4, %v7894_v63, %v7906_v11  ;;  %v2698_v57 = vsel %vm897_vm4, %v9417_v23, %v7923_v45  ;;  %v2587_v1 = vadd.f32 %v2582_v5, %v2548_v36 }
 0x7c5   : > { %v2664_v29 = vadd.f32 %v2659_v8, %v2625_v31  ;;  %v2627_v39 = vadd.f32 %v7906_v11, %v2588_v19  ;;  %v2660_v63 = vsel %vm897_vm4, %v7908_v35, %v7921_v13  ;;  %v4724_v58 = vmul.f32 %v4715_v59, %v7524_v53  ;;  %v9420_v35 = vld [vmem:[#allocation78_spill] sm:$0xff]  ;;  %v9422_v31 = vld [vmem:[#allocation56_spill] sm:$0xff] }
 0x7c6   : > { %v8344_v25 = vpop.permute.xlu0 %3029  ;;  %v8346_v17 = vpop.permute.xlu1 %3066  ;;  %v2626_v56 = vadd.f32 %v2621_v10, %v2587_v1  ;;  %v2699_v11 = vsel %vm897_vm4, %v7923_v45, %v7933_v40  ;;  %v9421_v53 = vld [vmem:[#allocation98_spill] sm:$0xff]  ;;  %v2738_v36 = vsel %vm897_vm4, %v7935_v60, %v7945_v42  ;;  %v2815_v59 = vsel %vm897_vm4, %v9422_v31, %v7959_v33  ;;  %v9423_v60 = vld [vmem:[#allocation25_spill] sm:$0xff]  ;;  %v9428_v31 = vld [vmem:[#allocation83_spill] sm:$0xff] }
 0x7c7   : > { %v2703_v50 = vadd.f32 %v2698_v57, %v2664_v29  ;;  %v2666_v49 = vadd.f32 %v7921_v13, %v2627_v39  ;;  %v4841_v8 = vmul.f32 %v4832_v24, %v9421_v53  ;;  %v4875_v13 = vrot.slane %v8290_v52, %v6622_v4 }
 0x7c8   : > { %4329 = vrot.lane.b32.xlu0 %v4323_v15, %s9123_s21  ;;  %4769 = vrot.lane.b32.xlu1 %v4763_v47, %s9126_s18  ;;  %v2776_v15 = vsel %vm897_vm4, %v9420_v35, %v7947_v48  ;;  %v4758_v47 = vrot.slane %v8290_v52, %v5829_v7  ;;  %v2665_v3 = vadd.f32 %v2660_v63, %v2626_v56  ;;  %v9425_v56 = vld [vmem:[#allocation41_spill] sm:$0xff] }
 0x7c9   : > { %v2742_v43 = vadd.f32 %v2737_v38, %v2703_v50  ;;  %v2705_v45 = vadd.f32 %v7933_v40, %v2666_v49  ;;  %v4793_v23 = vrot.slane %v8263_v44, %v5832_v9  ;;  %v2777_v40 = vsel %vm897_vm4, %v7947_v48, %v7957_v12 }
 0x7ca   : > { %v8370_v51 = vpop.permute.xlu0 %3068  ;;  %v8372_v2 = vpop.permute.xlu1 %3105  ;;  %v2704_v19 = vadd.f32 %v2699_v11, %v2665_v3  ;;  %v4914_v1 = vrot.slane %v8290_v52, %v6636_v37  ;;  %v4764_v63 = vmul.f32 %v4758_v47, %v9415_v16  ;;  %v2816_v48 = vsel %vm897_vm4, %v7959_v33, %v7969_v32  ;;  %v9426_v33 = vld [vmem:[#allocation26_spill] sm:$0xff] }
 0x7cb   : > { %v2781_v10 = vadd.f32 %v2776_v15, %v2742_v43  ;;  %v2744_v57 = vadd.f32 %v7945_v42, %v2705_v45  ;;  %v9424_v42 = vld [vmem:[#allocation99_spill] sm:$0xff]  ;;  %v2914_v50 = vsel %vm1077_vm8, %v9425_v56, %v8255_v20  ;;  %v4836_v16 = vrot.slane %v8290_v52, %v6608_v62 }
 0x7cc   : > { %4693 = vrot.lane.b32.xlu0 %v4686_v30, %s9126_s18  ;;  %4810 = vrot.lane.b32.xlu1 %v4803_v28, %s9126_s18  ;;  %v2854_v30 = vsel %vm897_vm4, %v9423_v60, %v7971_v46  ;;  %v2743_v29 = vadd.f32 %v2738_v36, %v2704_v19  ;;  %v4881_v26 = vmul.f32 %v4875_v13, %v9424_v42 }
 0x7cd   : > { %v2820_v28 = vadd.f32 %v2815_v59, %v2781_v10  ;;  %v2783_v38 = vadd.f32 %v7957_v12, %v2744_v57  ;;  %v2855_v12 = vsel %vm897_vm4, %v7971_v46, %v7981_v22  ;;  %v2953_v35 = vsel %vm1077_vm8, %v9426_v33, %v8282_v18 }
 0x7ce   : > { %v8396_v5 = vpop.permute.xlu0 %3107  ;;  %v8398_v55 = vpop.permute.xlu1 %3144  ;;  %v4949_v15 = vrot.slane %v8263_v44, %v6652_v41  ;;  %v4802_v13 = vmul.f32 %v4793_v23, %v9418_v0  ;;  %v2915_v46 = vsel %vm1077_vm8, %v8255_v20, %v8280_v34  ;;  %v2992_v59 = vsel %vm1077_vm8, %v9428_v31, %v8305_v61  ;;  %v9429_v0 = vld [vmem:[#allocation95_spill] sm:$0xff]  ;;  %v9430_v20 = vld [vmem:[#allocation42_spill] sm:$0xff] }
 0x7cf   : > { %v2859_v49 = vadd.f32 %v2854_v30, %v2820_v28  ;;  %v2822_v11 = vadd.f32 %v7969_v32, %v2783_v38  ;;  %v9427_v32 = vld [vmem:[#allocation100_spill] sm:$0xff]  ;;  %v4957_v23 = vrot.slane %v9429_v0, %v6652_v41  ;;  %v4871_v60 = vrot.slane %v8263_v44, %v6622_v4 }
 0x7d0   : > { %4730 = vrot.lane.b32.xlu0 %v4724_v58, %s9126_s18  ;;  %4847 = vrot.lane.b32.xlu1 %v4841_v8, %s9126_s18  ;;  %v2782_v58 = vadd.f32 %v2777_v40, %v2743_v29  ;;  %v4920_v45 = vmul.f32 %v4914_v1, %v9427_v32  ;;  %v3031_v40 = vsel %vm1077_vm8, %v9430_v20, %v8324_v21 }
 0x7d1   : > { %v2919_v3 = vadd.f32 %v2914_v50, %v2859_v49  ;;  %v2861_v36 = vadd.f32 %v7981_v22, %v2822_v11  ;;  %v2954_v22 = vsel %vm1077_vm8, %v8282_v18, %v8303_v14  ;;  %v2993_v18 = vsel %vm1077_vm8, %v8305_v61, %v8322_v54  ;;  %v9433_v49 = vld [vmem:[#allocation43_spill] sm:$0xff] }
 0x7d2   : > { %v8423_v24 = vpop.permute.xlu0 %3146  ;;  %v8425_v39 = vpop.permute.xlu1 %3183  ;;  %v2821_v47 = vadd.f32 %v2816_v48, %v2782_v58  ;;  %v9432_v48 = vld [vmem:[#allocation29_spill] sm:$0xff]  ;;  %v3109_v61 = vsel %vm1077_vm8, %v9433_v49, %v8372_v2 }
 0x7d3   : > { %v2958_v10 = vadd.f32 %v2953_v35, %v2919_v3  ;;  %v2921_v57 = vadd.f32 %v8280_v34, %v2861_v36  ;;  %v3070_v56 = vsel %vm1077_vm8, %v9432_v48, %v8346_v17  ;;  %v9434_v3 = vld [vmem:[#allocation31_spill] sm:$0xff]  ;;  %v9438_v48 = vld [vmem:[#allocation45_spill] sm:$0xff] }
 0x7d4   : > { %4771 = vrot.lane.b32.xlu0 %v4764_v63, %s9126_s18  ;;  %4888 = vrot.lane.b32.xlu1 %v4881_v26, %s9126_s18  ;;  %v2860_v19 = vadd.f32 %v2855_v12, %v2821_v47  ;;  %v4842_v63 = vmul.f32 %v4836_v16, %v9421_v53  ;;  %v9431_v26 = vld [vmem:[#allocation101_spill] sm:$0xff]  ;;  %v4910_v47 = vrot.slane %v8263_v44, %v6636_v37 }
 0x7d5   : > { %v2997_v1 = vadd.f32 %v2992_v59, %v2958_v10  ;;  %v4958_v38 = vmul.f32 %v4949_v15, %v9431_v26  ;;  %v2960_v34 = vadd.f32 %v8303_v14, %v2921_v57  ;;  %v3032_v14 = vsel %vm1077_vm8, %v8324_v21, %v8344_v25  ;;  %v9436_v57 = vld [vmem:[#allocation44_spill] sm:$0xff] }
 0x7d6   : > { %v8449_v43 = vpop.permute.xlu0 %3185  ;;  %v8451_v8 = vpop.permute.xlu1 %3233  ;;  %v2920_v30 = vadd.f32 %v2915_v46, %v2860_v19  ;;  %v4960_v16 = vmul.f32 %v4957_v23, %v9431_v26  ;;  %v4880_v15 = vmul.f32 %v4871_v60, %v9424_v42  ;;  %v3071_v21 = vsel %vm1077_vm8, %v8346_v17, %v8370_v51  ;;  %v5332_v46 = vld [vmem:[%s8834_s14 + $0x8] sm:$0xff] }
 0x7d7   : > { %v3036_v58 = vadd.f32 %v3031_v40, %v2997_v1  ;;  %v2999_v53 = vadd.f32 %v8322_v54, %v2960_v34  ;;  %v3110_v44 = vsel %vm1077_vm8, %v8372_v2, %v8396_v5  ;;  %v4919_v0 = vmul.f32 %v4910_v47, %v9427_v32 }
 0x7d8   : > { %4808 = vrot.lane.b32.xlu0 %v4802_v13, %s9126_s18  ;;  %4927 = vrot.lane.b32.xlu1 %v4920_v45, %s9126_s18  ;;  %v2959_v50 = vadd.f32 %v2954_v22, %v2920_v30  ;;  %v3148_v13 = vsel %vm1077_vm8, %v9434_v3, %v8398_v55  ;;  %v3149_v2 = vsel %vm1077_vm8, %v8398_v55, %v8423_v24  ;;  %v5334_v55 = vld [vmem:[%s8834_s14 + $0x18] sm:$0xff]  ;;  %v9441_v3 = vld [vmem:[#allocation46_spill] sm:$0xff] }
 0x7d9   : > { %v3075_v12 = vadd.f32 %v3070_v56, %v3036_v58  ;;  %v3038_v54 = vadd.f32 %v8344_v25, %v2999_v53  ;;  %v9435_v25 = vld [vmem:[#allocation85_spill] sm:$0xff]  ;;  %v3237_v22 = vsel %vm1245_vm9, %v9436_v57, %v8451_v8 }
 0x7da   : > { %v3236_v29 = vpop.permute.xlu0 %3235  ;;  %v3273_v28 = vpop.permute.xlu1 %3272  ;;  %v2998_v11 = vadd.f32 %v2993_v18, %v2959_v50  ;;  %v3187_v17 = vsel %vm1077_vm8, %v9435_v25, %v8425_v39 }
 0x7db   : > { %v3114_v36 = vadd.f32 %v3109_v61, %v3075_v12  ;;  %v3077_v42 = vadd.f32 %v8370_v51, %v3038_v54  ;;  %v4953_v51 = vrot.slane %v8290_v52, %v6652_v41  ;;  %v3188_v52 = vsel %vm1077_vm8, %v8425_v39, %v8449_v43 }
 0x7dc   : > { %4849 = vrot.lane.b32.xlu0 %v4842_v63, %s9126_s18  ;;  %4964 = vrot.lane.b32.xlu1 %v4958_v38, %s9126_s18  ;;  %v3037_v45 = vadd.f32 %v3032_v14, %v2998_v11  ;;  %v9439_v14 = vld [vmem:[#allocation36_spill] sm:$0xff] }
 0x7dd   : > { %v3153_v59 = vadd.f32 %v3148_v13, %v3114_v36  ;;  %v3116_v23 = vadd.f32 %v8396_v5, %v3077_v42  ;;  %v9437_v5 = vld [vmem:[#allocation33_spill] sm:$0xff]  ;;  %v4959_v34 = vmul.f32 %v4953_v51, %v9431_v26 }
 0x7de   : > { %v3275_v33 = vpop.permute.xlu0 %3274  ;;  %v3312_v35 = vpop.permute.xlu1 %3311  ;;  %v3076_v31 = vadd.f32 %v3071_v21, %v3037_v45  ;;  %v3276_v60 = vsel %vm1245_vm9, %v9437_v5, %v3273_v28  ;;  %v5333_v45 = vld [vmem:[%s8834_s14 + $0x10] sm:$0xff] }
 0x7df   : > { %v3192_v40 = vadd.f32 %v3187_v17, %v3153_v59  ;;  %v3155_v32 = vadd.f32 %v8423_v24, %v3116_v23  ;;  %v3238_v24 = vsel %vm1245_vm9, %v8451_v8, %v3236_v29  ;;  %v3315_v39 = vsel %vm1245_vm9, %v9438_v48, %v3312_v35  ;;  %v9442_v17 = vld [vmem:[#allocation47_spill] sm:$0xff] }
 0x7e0   : > { %4886 = vrot.lane.b32.xlu0 %v4880_v15, %s9126_s18  ;;  %4968 = vrot.lane.b32.xlu1 %v4960_v16, %s9126_s18  ;;  %v3115_v20 = vadd.f32 %v3110_v44, %v3076_v31  ;;  %v3277_v53 = vsel %vm1245_vm9, %v3273_v28, %v3275_v33  ;;  %v9440_v15 = vld [vmem:[#allocation27_spill] sm:$0xff] }
 0x7e1   : > { %v3242_v1 = vadd.f32 %v3237_v22, %v3192_v40  ;;  %v3194_v18 = vadd.f32 %v8449_v43, %v3155_v32  ;;  %v4987_v43 = vld [vmem:[%s8834_s14] sm:$0xff]  ;;  %v9443_v40 = vld [vmem:[#allocation39_spill] sm:$0xff] }
 0x7e2   : > { %v3314_v19 = vpop.permute.xlu0 %3313  ;;  %v3351_v10 = vpop.permute.xlu1 %3350  ;;  %v3154_v30 = vadd.f32 %v3149_v2, %v3115_v20 }
 0x7e3   : > { %v3281_v50 = vadd.f32 %v3276_v60, %v3242_v1  ;;  %v3244_v58 = vadd.f32 %v3236_v29, %v3194_v18  ;;  %v3354_v49 = vsel %vm1245_vm9, %v9439_v14, %v3351_v10  ;;  %v3316_v12 = vsel %vm1245_vm9, %v3312_v35, %v3314_v19 }
 0x7e4   : > { %4925 = vrot.lane.b32.xlu0 %v4919_v0, %s9126_s18  ;;  %5019 = vperm.xlu1 %5396, %v5332_v46   ;;  %v3193_v56 = vadd.f32 %v3188_v52, %v3154_v30  ;;  %v5102_v0 = vld [vmem:[%s8835_s15] sm:$0xff]  ;;  %v9444_v30 = vld [vmem:[#allocation23_spill] sm:$0xff] }
 0x7e5   : > { %v3320_v8 = vadd.f32 %v3315_v39, %v3281_v50  ;;  %v3283_v11 = vadd.f32 %v3275_v33, %v3244_v58 }
 0x7e6   : > { %v3353_v63 = vpop.permute.xlu0 %3352  ;;  %v3390_v38 = vpop.permute.xlu1 %3389  ;;  %v3243_v26 = vadd.f32 %v3238_v24, %v3193_v56  ;;  %v9445_v24 = vld [vmem:[#allocation24_spill] sm:$0xff]  ;;  %v9446_v56 = vld [vmem:[#allocation22_spill] sm:$0xff] }
 0x7e7   : > { %v3393_v47 = vsel %vm1245_vm9, %v9440_v15, %v3390_v38  ;;  %v3359_v54 = vadd.f32 %v3354_v49, %v3320_v8  ;;  %v3322_v28 = vadd.f32 %v3314_v19, %v3283_v11  ;;  %v3355_v21 = vsel %vm1245_vm9, %v3351_v10, %v3353_v63  ;;  %v9448_v8 = vld [vmem:[#allocation86_spill] sm:$0xff]  ;;  %v9449_v11 = vld [vmem:[#allocation89_spill] sm:$0xff] }
 0x7e8   : > { %4966 = vrot.lane.b32.xlu0 %v4959_v34, %s9126_s18  ;;  %5077 = vperm.xlu1 %5396, %v5334_v55   ;;  %v3282_v29 = vadd.f32 %v3277_v53, %v3243_v26  ;;  %v3533_v50 = vsel %vm759_vm10, %v9444_v30, %v9446_v56  ;;  %v9447_v53 = vld [vmem:[#allocation88_spill] sm:$0xff] }
 0x7e9   : > { %v3398_v33 = vadd.f32 %v3393_v47, %v3359_v54  ;;  %v3361_v44 = vadd.f32 %v3353_v63, %v3322_v28  ;;  %v9450_v47 = vld [vmem:[#allocation87_spill] sm:$0xff] }
 0x7ea   : > { %v3392_v61 = vpop.permute.xlu0 %3391  ;;  %v3429_v16 = vpop.permute.xlu1 %3428  ;;  %v3321_v36 = vadd.f32 %v3316_v12, %v3282_v29  ;;  %v3577_v29 = vsel %vm759_vm10, %v9447_v53, %v9450_v47 }
 0x7eb   : > { %v3432_v13 = vsel %vm1245_vm9, %v9441_v3, %v3429_v16  ;;  %v3394_v25 = vsel %vm1245_vm9, %v3390_v38, %v3392_v61  ;;  %v3400_v19 = vadd.f32 %v3392_v61, %v3361_v44  ;;  %v3555_v61 = vsel %vm759_vm10, %v9445_v24, %v9448_v8  ;;  %v9453_v44 = vld [vmem:[#allocation80_spill] sm:$0xff] }
 0x7ec   : > { %4990 = vperm.xlu0 %5397, %v4987_v43   ;;  %v3360_v31 = vadd.f32 %v3355_v21, %v3321_v36  ;;  %v3437_v59 = vadd.f32 %v3432_v13, %v3398_v33  ;;  %v9451_v13 = vld [vmem:[#allocation71_spill] sm:$0xff]  ;;  %v9452_v33 = vld [vmem:[#allocation77_spill] sm:$0xff] }
 0x7ee   : > { %v3431_v42 = vpop.permute.xlu0 %3430  ;;  %v3468_v35 = vpop.permute.xlu1 %3467  ;;  %v3399_v51 = vadd.f32 %v3394_v25, %v3360_v31  ;;  %v3621_v25 = vsel %vm759_vm10, %v9452_v33, %v9453_v44 }
 0x7ef   : > { %v3471_v46 = vsel %vm1245_vm9, %v9442_v17, %v3468_v35  ;;  %v3433_v10 = vsel %vm1245_vm9, %v3429_v16, %v3431_v42  ;;  %v3439_v22 = vadd.f32 %v3431_v42, %v3400_v19  ;;  %v9454_v19 = vld [vmem:[#allocation66_spill] sm:$0xff] }
 0x7f0   : > { %5048 = vperm.xlu0 %5397, %v5333_v45   ;;  %v3476_v23 = vadd.f32 %v3471_v46, %v3437_v59  ;;  %v3438_v52 = vadd.f32 %v3433_v10, %v3399_v51  ;;  %v3599_v45 = vsel %vm759_vm10, %v9449_v11, %v9451_v13  ;;  %v9455_v10 = vld [vmem:[#allocation55_spill] sm:$0xff] }
 0x7f2   : > { %v3470_v2 = vpop.permute.xlu0 %3469  ;;  %v3507_v57 = vpop.permute.xlu1 %3506 }
 0x7f3   : > { %v3472_v20 = vsel %vm1245_vm9, %v3468_v35, %v3470_v2  ;;  %v3510_v32 = vsel %vm1245_vm9, %v9443_v40, %v3507_v57  ;;  %v3478_v60 = vadd.f32 %v3470_v2, %v3439_v22 }
 0x7f4   : > { %v3515_v5 = vadd.f32 %v3510_v32, %v3476_v23  ;;  %5105 = vperm.xlu0 %5397, %v5102_v0   ;;  %v3477_v55 = vadd.f32 %v3472_v20, %v3438_v52  ;;  %v3643_v0 = vsel %vm759_vm10, %v9455_v10, %v9454_v19  ;;  %v9457_v32 = vld [vmem:[#allocation40_spill] sm:$0xff] }
 0x7f6   : > { %v3537_v1 = vadd.f32 %v9444_v30, %v3515_v5  ;;  %v3509_v63 = vpop.permute.xlu0 %3508  ;;  %v3736_v38 = vpop.permute.xlu1 %3735  ;;  %v9458_v5 = vld [vmem:[#allocation49_spill] sm:$0xff] }
 0x7f7   : > { %v3511_v34 = vsel %vm1245_vm9, %v3507_v57, %v3509_v63  ;;  %v3517_v18 = vadd.f32 %v3509_v63, %v3478_v60  ;;  %v9456_v57 = vld [vmem:[#allocation48_spill] sm:$0xff]  ;;  %v9459_v30 = vld [vmem:[#allocation57_spill] sm:$0xff] }
 0x7f8   : > { %v3559_v48 = vadd.f32 %v9445_v24, %v3537_v1  ;;  %v3516_v39 = vadd.f32 %v3511_v34, %v3477_v55  ;;  %v3665_v52 = vsel %vm759_vm10, %v9457_v32, %v9456_v57  ;;  %v3740_v1 = vsel %vm1505_vm11, %v3736_v38, %v9459_v30 }
 0x7f9   : > { %v3539_v58 = vadd.f32 %v9446_v56, %v3517_v18 }
 0x7fa   : > { %v3581_v14 = vadd.f32 %v9447_v53, %v3559_v48  ;;  %v3538_v49 = vadd.f32 %v3533_v50, %v3516_v39  ;;  %v3734_v43 = vpop.permute.xlu0 %3733  ;;  %v3775_v26 = vpop.permute.xlu1 %3774  ;;  %v9460_v48 = vld [vmem:[#allocation38_spill] sm:$0xff] }
 0x7fb   : > { %v3561_v16 = vadd.f32 %v9448_v8, %v3539_v58  ;;  %v3687_v39 = vsel %vm759_vm10, %v9460_v48, %v9458_v5  ;;  %v9461_v50 = vld [vmem:[#allocation18_spill] sm:$0xff] }
 0x7fc   : > { %v3603_v12 = vadd.f32 %v9449_v11, %v3581_v14  ;;  %v3560_v15 = vadd.f32 %v3555_v61, %v3538_v49  ;;  %v3779_v58 = vsel %vm1505_vm11, %v3775_v26, %v9461_v50  ;;  %v3739_v61 = vsel %vm1505_vm11, %v3734_v43, %v3736_v38  ;;  %v9462_v11 = vld [vmem:[#allocation82_spill] sm:$0xff] }
 0x7fd   : > { %v3583_v54 = vadd.f32 %v9450_v47, %v3561_v16 }
 0x7fe   : > { %v3582_v28 = vadd.f32 %v3577_v29, %v3560_v15  ;;  %v3773_v21 = vpop.permute.xlu0 %3772  ;;  %v3814_v3 = vpop.permute.xlu1 %3813  ;;  %v3625_v42 = vadd.f32 %v9452_v33, %v3603_v12 }
 0x7ff   : > { %v3605_v36 = vadd.f32 %v9451_v13, %v3583_v54  ;;  %v3818_v12 = vsel %vm1505_vm11, %v3814_v3, %v9462_v11 }
 0x800   : > { %v3604_v35 = vadd.f32 %v3599_v45, %v3582_v28  ;;  %v3647_v23 = vadd.f32 %v9455_v10, %v3625_v42  ;;  %v3778_v28 = vsel %vm1505_vm11, %v3773_v21, %v3775_v26  ;;  %v9463_v45 = vld [vmem:[#allocation84_spill] sm:$0xff] }
 0x801   : > { %v3627_v17 = vadd.f32 %v9453_v44, %v3605_v36 }
 0x802   : > { %v3626_v46 = vadd.f32 %v3621_v25, %v3604_v35  ;;  %v3812_v31 = vpop.permute.xlu0 %3811  ;;  %v3853_v59 = vpop.permute.xlu1 %3852  ;;  %v3669_v55 = vadd.f32 %v9457_v32, %v3647_v23  ;;  %v9464_v25 = vld [vmem:[#allocation53_spill] sm:$0xff] }
 0x803   : > { %v3649_v51 = vadd.f32 %v9454_v19, %v3627_v17  ;;  %v3857_v36 = vsel %vm1505_vm11, %v3853_v59, %v9463_v45  ;;  %v3817_v38 = vsel %vm1505_vm11, %v3812_v31, %v3814_v3 }
 0x804   : > { %v3648_v2 = vadd.f32 %v3643_v0, %v3626_v46  ;;  %v3691_v56 = vadd.f32 %v9460_v48, %v3669_v55 }
 0x805   : > { %v3671_v22 = vadd.f32 %v9456_v57, %v3649_v51  ;;  %v9465_v51 = vld [vmem:[#allocation19_spill] sm:$0xff] }
 0x806   : > { %v3851_v20 = vpop.permute.xlu0 %3850  ;;  %v3892_v40 = vpop.permute.xlu1 %3891  ;;  %v3670_v63 = vadd.f32 %v3665_v52, %v3648_v2  ;;  %v3744_v16 = vadd.f32 %v3734_v43, %v3691_v56  ;;  %v9466_v52 = vld [vmem:[#allocation90_spill] sm:$0xff] }
 0x807   : > { %v3693_v60 = vadd.f32 %v9458_v5, %v3671_v22  ;;  %v3896_v17 = vsel %vm1505_vm11, %v3892_v40, %v9464_v25  ;;  %v3856_v26 = vsel %vm1505_vm11, %v3851_v20, %v3853_v59  ;;  %v9468_v56 = vld [vmem:[#allocation74_spill] sm:$0xff] }
 0x808   : > { %v3692_v53 = vadd.f32 %v3687_v39, %v3670_v63  ;;  %v3783_v13 = vadd.f32 %v3773_v21, %v3744_v16  ;;  %v9467_v63 = vld [vmem:[#allocation91_spill] sm:$0xff] }
 0x809   : > { %v3746_v34 = vadd.f32 %v3740_v1, %v3693_v60 }
 0x80a   : > { %v3890_v18 = vpop.permute.xlu0 %3889  ;;  %v3931_v24 = vpop.permute.xlu1 %3930  ;;  %v3745_v15 = vadd.f32 %v3739_v61, %v3692_v53  ;;  %v3822_v43 = vadd.f32 %v3812_v31, %v3783_v13  ;;  %v9470_v13 = vld [vmem:[#allocation14_spill] sm:$0xff] }
 0x80b   : > { %v3785_v14 = vadd.f32 %v3779_v58, %v3746_v34  ;;  %v3935_v23 = vsel %vm1505_vm11, %v3931_v24, %v9465_v51  ;;  %v3895_v3 = vsel %vm1505_vm11, %v3890_v18, %v3892_v40 }
 0x80c   : > { %v3784_v33 = vadd.f32 %v3778_v28, %v3745_v15  ;;  %v3861_v21 = vadd.f32 %v3851_v20, %v3822_v43 }
 0x80d   : > { %v3824_v47 = vadd.f32 %v3818_v12, %v3785_v14 }
 0x80e   : > { %v3929_v49 = vpop.permute.xlu0 %3928  ;;  %v3970_v8 = vpop.permute.xlu1 %3969  ;;  %v3823_v46 = vadd.f32 %v3817_v38, %v3784_v33  ;;  %v3900_v31 = vadd.f32 %v3890_v18, %v3861_v21 }
 0x80f   : > { %v3863_v42 = vadd.f32 %v3857_v36, %v3824_v47  ;;  %v3974_v5 = vsel %vm1505_vm11, %v3970_v8, %v9466_v52  ;;  %v3934_v59 = vsel %vm1505_vm11, %v3929_v49, %v3931_v24  ;;  %v9469_v24 = vld [vmem:[#allocation13_spill] sm:$0xff]  ;;  %v9473_v52 = vld [vmem:[#allocation103_spill] sm:$0xff] }
 0x810   : > { %v3862_v2 = vadd.f32 %v3856_v26, %v3823_v46  ;;  %v3939_v20 = vadd.f32 %v3929_v49, %v3900_v31 }
 0x811   : > { %v3902_v19 = vadd.f32 %v3896_v17, %v3863_v42  ;;  %v9471_v42 = vld [vmem:[#allocation94_spill] sm:$0xff] }
 0x812   : > { %v3968_v29 = vpop.permute.xlu0 %3967  ;;  %v4009_v54 = vpop.permute.xlu1 %4008  ;;  %v3901_v60 = vadd.f32 %v3895_v3, %v3862_v2 }
 0x813   : > { %v3941_v57 = vadd.f32 %v3935_v23, %v3902_v19  ;;  %v4013_v34 = vsel %vm1505_vm11, %v4009_v54, %v9467_v63  ;;  %v3973_v58 = vsel %vm1505_vm11, %v3968_v29, %v3970_v8  ;;  %v3978_v53 = vadd.f32 %v3968_v29, %v3939_v20  ;;  %v9474_v63 = vld [vmem:[#allocation104_spill] sm:$0xff] }
 0x814   : > { %v3940_v48 = vadd.f32 %v3934_v59, %v3901_v60 }
 0x815   : > { %v3980_v55 = vadd.f32 %v3974_v5, %v3941_v57 }
 0x816   : > { %v4007_v35 = vpop.permute.xlu0 %4006  ;;  %v4059_v44 = vpop.permute.xlu1 %4058  ;;  %v3979_v14 = vadd.f32 %v3973_v58, %v3940_v48 }
 0x817   : > { %v4019_v39 = vadd.f32 %v4013_v34, %v3980_v55  ;;  %v4063_v50 = vsel %vm1674_vm12, %v4059_v44, %v9468_v56  ;;  %v4012_v16 = vsel %vm1505_vm11, %v4007_v35, %v4009_v54  ;;  %v4017_v11 = vadd.f32 %v4007_v35, %v3978_v53  ;;  %v9475_v56 = vld [vmem:[#allocation37_spill] sm:$0xff] }
 0x818   : > { %v4018_v36 = vadd.f32 %v4012_v16, %v3979_v14  ;;  %v9477_v16 = vld [vmem:[#allocation50_spill] sm:$0xff] }
 0x819   : > { %v4069_v61 = vadd.f32 %v4063_v50, %v4019_v39 }
 0x81a   : > { %v4057_v10 = vpop.permute.xlu0 %4056  ;;  %v4098_v0 = vpop.permute.xlu1 %4097 }
 0x81b   : > { %v4102_v49 = vsel %vm1674_vm12, %v4098_v0, %v9469_v24  ;;  %v4062_v47 = vsel %vm1674_vm12, %v4057_v10, %v4059_v44  ;;  %v4067_v28 = vadd.f32 %v4057_v10, %v4017_v11  ;;  %v9472_v44 = vld [vmem:[#allocation102_spill] sm:$0xff] }
 0x81c   : > { %v4108_v33 = vadd.f32 %v4102_v49, %v4069_v61  ;;  %v4068_v35 = vadd.f32 %v4062_v47, %v4018_v36  ;;  %v9476_v61 = vld [vmem:[#allocation105_spill] sm:$0xff] }
 0x81d   : > { %v4375_v11 = vsel %vm1831_vm13, %v9477_v16, %v9476_v61 }
 0x81e   : > { %v4096_v22 = vpop.permute.xlu0 %4095  ;;  %v4137_v32 = vpop.permute.xlu1 %4136 }
 0x81f   : > { %v4141_v45 = vsel %vm1674_vm12, %v4137_v32, %v9470_v13  ;;  %v4101_v8 = vsel %vm1674_vm12, %v4096_v22, %v4098_v0  ;;  %v4106_v29 = vadd.f32 %v4096_v22, %v4067_v28  ;;  %v9478_v28 = vld [vmem:[#allocation68_spill] sm:$0xff] }
 0x820   : > { %v4147_v38 = vadd.f32 %v4141_v45, %v4108_v33  ;;  %v4107_v10 = vadd.f32 %v4101_v8, %v4068_v35  ;;  %v4374_v13 = vsel %vm1831_vm13, %v9478_v28, %v9477_v16  ;;  %v9479_v45 = vld [vmem:[#allocation52_spill] sm:$0xff]  ;;  %v9481_v35 = vld [vmem:[#allocation51_spill] sm:$0xff] }
 0x821   : > { %v9494_v16 = vld [vmem:[#allocation108_spill] sm:$0xff] }
 0x822   : > { %v4135_v30 = vpop.permute.xlu0 %4134  ;;  %v4176_v1 = vpop.permute.xlu1 %4175 }
 0x823   : > { %v4180_v54 = vsel %vm1674_vm12, %v4176_v1, %v9471_v42  ;;  %v4140_v17 = vsel %vm1674_vm12, %v4135_v30, %v4137_v32  ;;  %v4145_v46 = vadd.f32 %v4135_v30, %v4106_v29 }
 0x824   : > { %v4186_v26 = vadd.f32 %v4180_v54, %v4147_v38  ;;  %v4146_v0 = vadd.f32 %v4140_v17, %v4107_v10  ;;  %v9484_v10 = vld [vmem:[#allocation72_spill] sm:$0xff] }
 0x826   : > { %v4174_v40 = vpop.permute.xlu0 %4173  ;;  %v4254_v18 = vpop.permute.xlu1 %4253 }
 0x827   : > { %v4179_v21 = vsel %vm1674_vm12, %v4174_v40, %v4176_v1  ;;  %v4184_v51 = vadd.f32 %v4174_v40, %v4145_v46  ;;  %v4258_v32 = vsel %vm1674_vm12, %v4254_v18, %v9473_v52  ;;  %v9487_v52 = vld [vmem:[#allocation20_spill] sm:$0xff] }
 0x828   : > { %v4185_v31 = vadd.f32 %v4179_v21, %v4146_v0  ;;  %v9485_v21 = vld [vmem:[#allocation54_spill] sm:$0xff] }
 0x82a   : > { %v4213_v12 = vpop.permute.xlu0 %4212  ;;  %v4291_v15 = vpop.permute.xlu1 %4290 }
 0x82b   : > { %v4223_v22 = vadd.f32 %v4213_v12, %v4184_v51  ;;  %v9486_v51 = vld [vmem:[#allocation58_spill] sm:$0xff] }
 0x82c   : > { %v4492_v0 = vsel %vm1831_vm13, %v9486_v51, %v9485_v21 }
 0x82e   : > { %v4215_v43 = vpop.permute.xlu0 %4214  ;;  %v4332_v25 = vpop.permute.xlu1 %4331 }
 0x82f   : > { %v4219_v19 = vsel %vm1674_vm12, %v4215_v43, %v9472_v44  ;;  %v4218_v3 = vsel %vm1674_vm12, %v4213_v12, %v4215_v43  ;;  %v4336_v50 = vsel %vm1674_vm12, %v4332_v25, %v9475_v56  ;;  %v9482_v43 = vld [vmem:[#allocation106_spill] sm:$0xff] }
 0x830   : > { %v4225_v23 = vadd.f32 %v4219_v19, %v4186_v26  ;;  %v4224_v55 = vadd.f32 %v4218_v3, %v4185_v31 }
 0x832   : > { %v4252_v2 = vpop.permute.xlu0 %4251  ;;  %v8647_v57 = vpop.permute.xlu1 %4691  ;;  %v4264_v59 = vadd.f32 %v4258_v32, %v4225_v23  ;;  %v4491_v32 = vsel %vm1831_vm13, %v9487_v52, %v9486_v51 }
 0x833   : > { %v4257_v5 = vsel %vm1674_vm12, %v4252_v2, %v4254_v18  ;;  %v4262_v60 = vadd.f32 %v4252_v2, %v4223_v22 }
 0x834   : > { %v4263_v48 = vadd.f32 %v4257_v5, %v4224_v55  ;;  %v9488_v5 = vld [vmem:[#allocation107_spill] sm:$0xff] }
 0x835   : > { %v4301_v40 = vadd.f32 %v4291_v15, %v4262_v60  ;;  %v9489_v60 = vld [vmem:[#allocation28_spill] sm:$0xff] }
 0x836   : > { %v4293_v30 = vpop.permute.xlu0 %4292  ;;  %v8653_v1 = vpop.permute.xlu1 %4732  ;;  %v4531_v55 = vsel %vm1831_vm13, %v9489_v60, %v9488_v5 }
 0x837   : > { %v4296_v20 = vsel %vm1674_vm12, %v4291_v15, %v4293_v30  ;;  %v4297_v34 = vsel %vm1674_vm12, %v4293_v30, %v9474_v63  ;;  %v9480_v15 = vld [vmem:[#allocation70_spill] sm:$0xff]  ;;  %v9490_v63 = vld [vmem:[#allocation79_spill] sm:$0xff] }
 0x838   : > { %v4303_v39 = vadd.f32 %v4297_v34, %v4264_v59  ;;  %v4302_v58 = vadd.f32 %v4296_v20, %v4263_v48  ;;  %v4414_v36 = vsel %vm1831_vm13, %v9480_v15, %v9479_v45  ;;  %v4413_v38 = vsel %vm1831_vm13, %v9481_v35, %v9480_v15  ;;  %v9491_v48 = vld [vmem:[#allocation12_spill] sm:$0xff]  ;;  %v9497_v15 = vld [vmem:[#allocation75_spill] sm:$0xff] }
 0x839   : > { %v4530_v34 = vsel %vm1831_vm13, %v9490_v63, %v9489_v60  ;;  %v9502_v60 = vld [vmem:[#allocation110_spill] sm:$0xff] }
 0x83a   : > { %v4342_v53 = vadd.f32 %v4336_v50, %v4303_v39  ;;  %v4330_v18 = vpop.permute.xlu0 %4329  ;;  %v8660_v14 = vpop.permute.xlu1 %4769  ;;  %v9492_v39 = vld [vmem:[#allocation59_spill] sm:$0xff] }
 0x83b   : > { %v4335_v24 = vsel %vm1674_vm12, %v4330_v18, %v4332_v25  ;;  %v4340_v49 = vadd.f32 %v4330_v18, %v4301_v40  ;;  %v9483_v25 = vld [vmem:[#allocation92_spill] sm:$0xff]  ;;  %v4570_v56 = vsel %vm1831_vm13, %v9492_v39, %v9491_v48 }
 0x83c   : > { %v4381_v12 = vadd.f32 %v4375_v11, %v4342_v53  ;;  %v4341_v47 = vadd.f32 %v4335_v24, %v4302_v58  ;;  %v4453_v17 = vsel %vm1831_vm13, %v9483_v25, %v9482_v43  ;;  %v4452_v26 = vsel %vm1831_vm13, %v9484_v10, %v9483_v25  ;;  %v9493_v18 = vld [vmem:[#allocation60_spill] sm:$0xff]  ;;  %v9495_v11 = vld [vmem:[#allocation61_spill] sm:$0xff] }
 0x83d   : > { %v4379_v33 = vadd.f32 %v9478_v28, %v4340_v49  ;;  %v4569_v61 = vsel %vm1831_vm13, %v9493_v18, %v9492_v39  ;;  %v4609_v24 = vsel %vm1831_vm13, %v9495_v11, %v9494_v16  ;;  %v9499_v43 = vld [vmem:[#allocation32_spill] sm:$0xff] }
 0x83e   : > { %v4420_v8 = vadd.f32 %v4414_v36, %v4381_v12  ;;  %v4380_v29 = vadd.f32 %v4374_v13, %v4341_v47  ;;  %v4694_v42 = vpop.permute.xlu0 %4693  ;;  %v4811_v54 = vpop.permute.xlu1 %4810  ;;  %v9496_v13 = vld [vmem:[#allocation17_spill] sm:$0xff]  ;;  %v9498_v36 = vld [vmem:[#allocation30_spill] sm:$0xff] }
 0x83f   : > { %v4418_v46 = vadd.f32 %v9481_v35, %v4379_v33  ;;  %v4608_v45 = vsel %vm1831_vm13, %v9496_v13, %v9495_v11  ;;  %v4648_v33 = vsel %vm1831_vm13, %v9498_v36, %v9497_v15  ;;  %v4647_v25 = vsel %vm1831_vm13, %v9499_v43, %v9498_v36  ;;  %v9505_v11 = vld [vmem:[#allocation16_spill] sm:$0xff]  ;;  %v9506_v15 = vld [vmem:[#allocation21_spill] sm:$0xff] }
 0x840   : > { %v4459_v44 = vadd.f32 %v4453_v17, %v4420_v8  ;;  %v4419_v19 = vadd.f32 %v4413_v38, %v4380_v29  ;;  %v9500_v17 = vld [vmem:[#allocation109_spill] sm:$0xff]  ;;  %v4697_v51 = vsel %vm2000_vm14, %v8647_v57, %v4694_v42 }
 0x841   : > { %v4457_v23 = vadd.f32 %v9484_v10, %v4418_v46  ;;  %v4698_v46 = vsel %vm2000_vm14, %v4694_v42, %v9500_v17 }
 0x842   : > { %v4458_v2 = vadd.f32 %v4452_v26, %v4419_v19  ;;  %v4498_v22 = vadd.f32 %v4492_v0, %v4459_v44  ;;  %v4731_v3 = vpop.permute.xlu0 %4730  ;;  %v4848_v31 = vpop.permute.xlu1 %4847  ;;  %v9501_v26 = vld [vmem:[#allocation76_spill] sm:$0xff] }
 0x843   : > { %v4496_v30 = vadd.f32 %v9487_v52, %v4457_v23  ;;  %v4737_v21 = vsel %vm2000_vm14, %v8653_v1, %v9501_v26 }
 0x844   : > { %v4497_v59 = vadd.f32 %v4491_v32, %v4458_v2  ;;  %v4537_v20 = vadd.f32 %v4531_v55, %v4498_v22  ;;  %v4736_v32 = vsel %vm2000_vm14, %v4731_v3, %v8653_v1 }
 0x845   : > { %v4535_v50 = vadd.f32 %v9490_v63, %v4496_v30 }
 0x846   : > { %v4536_v40 = vadd.f32 %v4530_v34, %v4497_v59  ;;  %v4576_v58 = vadd.f32 %v4570_v56, %v4537_v20  ;;  %v4772_v53 = vpop.permute.xlu0 %4771  ;;  %v4889_v28 = vpop.permute.xlu1 %4888  ;;  %v9503_v20 = vld [vmem:[#allocation15_spill] sm:$0xff] }
 0x847   : > { %v4574_v49 = vadd.f32 %v9493_v18, %v4535_v50  ;;  %v4776_v55 = vsel %vm2000_vm14, %v4772_v53, %v9502_v60  ;;  %v4815_v63 = vsel %vm2000_vm14, %v4811_v54, %v9503_v20  ;;  %v4775_v42 = vsel %vm2000_vm14, %v8660_v14, %v4772_v53 }
 0x848   : > { %v4575_v12 = vadd.f32 %v4569_v61, %v4536_v40  ;;  %v4615_v47 = vadd.f32 %v4609_v24, %v4576_v58  ;;  %v4893_v53 = vsel %vm2000_vm14, %v4889_v28, %v9505_v11 }
 0x849   : > { %v4613_v8 = vadd.f32 %v9496_v13, %v4574_v49 }
 0x84a   : > { %v4614_v29 = vadd.f32 %v4608_v45, %v4575_v12  ;;  %v4654_v35 = vadd.f32 %v4648_v33, %v4615_v47  ;;  %v4809_v38 = vpop.permute.xlu0 %4808  ;;  %v4928_v22 = vpop.permute.xlu1 %4927 }
 0x84b   : > { %v4652_v44 = vadd.f32 %v9499_v43, %v4613_v8  ;;  %v4814_v56 = vsel %vm2000_vm14, %v4809_v38, %v4811_v54  ;;  %v4932_v36 = vsel %vm2000_vm14, %v4928_v22, %v9506_v15 }
 0x84c   : > { %v4653_v19 = vadd.f32 %v4647_v25, %v4614_v29  ;;  %v4704_v10 = vadd.f32 %v4698_v46, %v4654_v35 }
 0x84d   : > { %v4702_v0 = vadd.f32 %v8647_v57, %v4652_v44 }
 0x84e   : > { %v4703_v23 = vadd.f32 %v4697_v51, %v4653_v19  ;;  %v4743_v2 = vadd.f32 %v4737_v21, %v4704_v10  ;;  %v4850_v52 = vpop.permute.xlu0 %4849  ;;  %v4965_v18 = vpop.permute.xlu1 %4964  ;;  %v5423_v10 = vld [vmem:[%s5665_s0] sm:$0xff]  ;;  %s550_s0 = sand.u32 1, %s5478_s25  }
 0x84f   : > { %v4741_v5 = vadd.f32 %v4731_v3, %v4702_v0  ;;  %v9504_v3 = vld [vmem:[#allocation111_spill] sm:$0xff]  ;;  %v4853_v61 = vsel %vm2000_vm14, %v4848_v31, %v4850_v52  ;;  %v4996_v26 = vrot.slane %v5423_v10, %v5657_v6  ;;  %v5025_v51 = vrot.slane %v5423_v10, %v5703_v27  ;;  %s5128_s28 = scalar_lea.sflag [#allocation4], %s550_s0 }
 0x850   : > { %v4742_v30 = vadd.f32 %v4736_v32, %v4703_v23  ;;  %v4782_v59 = vadd.f32 %v4776_v55, %v4743_v2  ;;  %v4854_v50 = vsel %vm2000_vm14, %v4850_v52, %v9504_v3  ;;  %v5054_v0 = vrot.slane %v5423_v10, %v5829_v7 }
 0x851   : > { %v4780_v57 = vadd.f32 %v8660_v14, %v4741_v5  ;;  %v5000_v23 = vrot.slane %v5423_v10, %v6608_v62  ;;  %v5006_v2 = vrot.slane %v4996_v26, %v5657_v6  ;;  %v5058_v52 = vrot.slane %v5423_v10, %v6636_v37 }
 0x852   : > { %v4781_v34 = vadd.f32 %v4775_v42, %v4742_v30  ;;  %v4821_v48 = vadd.f32 %v4815_v63, %v4782_v59  ;;  %v4887_v39 = vpop.permute.xlu0 %4886  ;;  %v4969_v33 = vpop.permute.xlu1 %4968  ;;  %v5035_v32 = vrot.slane %v5025_v51, %v5703_v27  ;;  %v5064_v5 = vrot.slane %v5054_v0, %v5829_v7 }
 0x853   : > { %v4819_v1 = vadd.f32 %v4809_v38, %v4780_v57  ;;  %v4892_v12 = vsel %vm2000_vm14, %v4887_v39, %v4889_v28  ;;  %v9507_v28 = vld [vmem:[#allocation112_spill] sm:$0xff]  ;;  %v5010_v55 = vrot.slane %v5000_v23, %v5657_v6  ;;  %v5083_v59 = vrot.slane %v5423_v10, %v5832_v9 }
 0x854   : > { %v4820_v40 = vadd.f32 %v4814_v56, %v4781_v34  ;;  %v4860_v58 = vadd.f32 %v4854_v50, %v4821_v48  ;;  %v5068_v62 = vrot.slane %v5058_v52, %v5829_v7  ;;  %v5087_v37 = vrot.slane %v5423_v10, %v6652_v41 }
 0x855   : > { %v4858_v16 = vadd.f32 %v4848_v31, %v4819_v1  ;;  %v5093_v34 = vrot.slane %v5083_v59, %v5832_v9 }
 0x856   : > { %v4859_v24 = vadd.f32 %v4853_v61, %v4820_v40  ;;  %v4926_v14 = vpop.permute.xlu0 %4925  ;;  %v4899_v49 = vadd.f32 %v4893_v53, %v4860_v58  ;;  %v5097_v3 = vrot.slane %v5087_v37, %v5832_v9 }
 0x857   : > { %v4897_v47 = vadd.f32 %v4887_v39, %v4858_v16  ;;  %v4931_v13 = vsel %vm2000_vm14, %v4926_v14, %v4928_v22  ;;  %v5029_v22 = vrot.slane %v5423_v10, %v6622_v4 }
 0x858   : > { %v4898_v54 = vadd.f32 %v4892_v12, %v4859_v24  ;;  %v4938_v35 = vadd.f32 %v4932_v36, %v4899_v49 }
 0x859   : > { %v4936_v45 = vadd.f32 %v4926_v14, %v4897_v47  ;;  %v5039_v63 = vrot.slane %v5029_v22, %v5703_v27 }
 0x85a   : > { %v4937_v8 = vadd.f32 %v4931_v13, %v4898_v54  ;;  %v4967_v31 = vpop.permute.xlu0 %4966 }
 0x85b   : > { %v4975_v29 = vadd.f32 %v4965_v18, %v4936_v45  ;;  %v4970_v38 = vsel %vm2000_vm14, %v4965_v18, %v4967_v31  ;;  %v4971_v43 = vsel %vm2000_vm14, %v4967_v31, %v4969_v33 }
 0x85c   : > { %v4976_v25 = vadd.f32 %v4970_v38, %v4937_v8  ;;  %v4977_v46 = vadd.f32 %v4971_v43, %v4938_v35 }
 0x85d   : > { %v4984_v17 = vadd.f32 %v9507_v28, %v4975_v29 }
 0x85e   : > { %v4985_v44 = vadd.f32 %v9507_v28, %v4976_v25  ;;  %v4986_v19 = vadd.f32 %v9507_v28, %v4977_v46 }
 0x85f   : > { %5113 = vrot.lane.b32.xlu1 %v4984_v17, %s9229_s22 }
 0x860   : > { %5115 = vrot.lane.b32.xlu0 %v4985_v44, %s9229_s22 }
 0x863   : > { %5117 = vrot.lane.b32.xlu1 %v4986_v19, %s9229_s22  ;;  %v5020_v60 = vpop.permute.xlu1 %5019  ;;  %s5214_s22 = sshll.u32 %s550_s0, 4 }
 0x864   : > { %v5040_v42 = vmul.f32 %v5035_v32, %v5020_v60  ;;  %v5041_v39 = vmul.f32 %v5039_v63, %v5020_v60  ;;  %s552_s6 = scalar_lea.vmem [#allocation3], %s5214_s22 }
 0x865   : > { %s5142_s26 = sshll.u32 %s552_s6, 4  ;;  %s8780_s26 = int_to_ptr.vmem [resolvable:$true] %s5142_s26 }
 0x866   : > { %s5424_s5 = scalar_lea.vmem %s8780_s26, 256  ;;  %p5431_p0 = scmp.lt.s32.totalorder %s8780_s26, %s5429_s23 }
 0x867   : > { %v5078_v56 = vpop.permute.xlu1 %5077  ;;  %p5425_p11 = scmp.ne.s32.totalorder %s8780_s26, %s5424_s5  ;;  %p5432_p1 = scmp.lt.s32.totalorder %s5430_s30, %s5424_s5 }
 0x868   : > { %v5098_v27 = vmul.f32 %v5093_v34, %v5078_v56  ;;  %v5099_v18 = vmul.f32 %v5097_v3, %v5078_v56 }
 0x869   : > { %p5426_p12 = pnand %p5425_p11, %p5632_p5  ;;  %p5433_p2 = por %p5432_p1, %p5431_p0 }
 0x86b   : > { %v4991_v21 = vpop.permute.xlu0 %4990  ;;  %p5427_p13 = pneg %p5426_p12 }
 0x86c   : > { %v5011_v20 = vmul.f32 %v5006_v2, %v4991_v21  ;;  %v5012_v57 = vmul.f32 %v5010_v55, %v4991_v21 }
 0x86d   : > { %p5434_p3 = pnand %p5433_p2, %p5427_p13 }
 0x86e   : > { %v5042_v48 = vadd.f32 %v5040_v42, %v5011_v20  ;;  %v5043_v50 = vadd.f32 %v5041_v39, %v5012_v57 }
 0x86f   : > { %v5049_v30 = vpop.permute.xlu0 %5048 }
 0x870   : > { %v5069_v4 = vmul.f32 %v5064_v5, %v5049_v30  ;;  %v5070_v6 = vmul.f32 %v5068_v62, %v5049_v30 }
 0x872   : > { %v5071_v1 = vadd.f32 %v5069_v4, %v5042_v48  ;;  %v5072_v40 = vadd.f32 %v5070_v6, %v5043_v50 }
 0x873   : > { %v5106_v7 = vpop.permute.xlu0 %5105 }
 0x874   : > { %v5100_v58 = vadd.f32 %v5098_v27, %v5071_v1  ;;  %v5101_v41 = vadd.f32 %v5099_v18, %v5072_v40 }
 0x876   : > { %v5108_v16 = vadd.f32 %v5106_v7, %v5100_v58  ;;  %v5109_v9 = vadd.f32 %v5106_v7, %v5101_v41 }
 0x8d1   : > { %v5114_v61 = vpop.permute.xlu1 %5113 }
 0x8d2   : > { %v5116_v11 = vpop.permute.xlu0 %5115 }
 0x8d3   : > { %v5119_v53 = vsel %vm1961_vm7, %v5114_v61, %v5116_v11 }
 0x8d4   : > { %v5123_v24 = vadd.f32 %v5119_v53, %v5108_v16 }
 0x8d5   : > { %v5118_v14 = vpop.permute.xlu1 %5117 }
 0x8d6   : > { %5125 = vst [vmem:[%s552_s6] sm:$0xff] %v5123_v24  ;;  %v5120_v49 = vsel %vm1961_vm7, %v5116_v11, %v5118_v14 }
 0x8d7   : > { %v5124_v12 = vadd.f32 %v5120_v49, %v5109_v9 }
 0x8d9   : > { %5126 = vst [vmem:[%s552_s6 + $0x8] sm:$0xff] %v5124_v12 }
 0x8da   : > { %5437 = shalt.err (!%p5434_p3)
}
 0x8db   : > { %s5438_s7 = scalar_lea.hbm %s8778_s4, 256  ;;  %s5442_s20 = scalar_lea.hbm %s9508_s3, 512 }
 0x8dc   : > { %p5439_p4 = scmp.ne.s32.totalorder %s8778_s4, %s5438_s7  ;;  %p5443_p9 = scmp.lt.u32.totalorder %s8778_s4, %s9508_s3 }
 0x8dd   : > { %p5444_p10 = scmp.lt.u32.totalorder %s5442_s20, %s5438_s7  ;;  %p5446_p12 = scmp.lt.u32.totalorder %s5438_s7, %s8778_s4 }
 0x8de   : > { %p5440_p7 = pnand %p5439_p4, %p5632_p5 }
 0x8df   : > { %p5445_p11 = por %p5444_p10, %p5443_p9 }
 0x8e0   : > { %p5441_p8 = pneg %p5440_p7 }
 0x8e1   : > { %p5447_p13 = por %p5446_p12, %p5445_p11 }
 0x8e3   : > { %p5448_p0 = pnand %p5447_p13, %p5441_p8 }
 0x8e5   : > { %5451 = shalt.err (!%p5448_p0)
}
 0x8e6   : > { %5342 = dma.vmem_to_hbm [thread:$0]  (%p5632_p5), %s8780_s26, 256, %s8778_s4, %s5128_s28  }
 0x8e7 PF: > { %s9509_s24 = sld [smem:[#allocation8_spill]]  ;;  %s9510_s27 = sld [smem:[#allocation6_spill]] }
 0x8ed   : > { %p5348_p1 = scmp.ge.s32.totalorder %s9509_s24, 2  ;;  %s5154_s22 = sand.u32 1, %s9510_s27  }
 0x8ee   : > { %s5155_s8 = scalar_lea.sflag [#allocation4], %s5154_s22 }
 0x8ef   : > { %p5345_p2 = pnand %p5348_p1, %p5636_p6 }
 0x8f1   : > { %5469 = dma.done.wait (!%p5345_p2), %s5155_s8, 256  }
 0x8f2   : > { %5471 = vsyncadd (!%p5345_p2), %s5155_s8, 4294967040  ;;  %s9512_s27 = sld [smem:[#allocation9_spill]]  ;;  %s9513_s6 = sld [smem:[#allocation7_spill]] }
 0x8f3   : > { %s9514_s26 = sld [smem:[#allocation10_spill]]  ;;  %s9515_s24 = smov %s5478_s25 }
 0x8f8   : > { %p27_p3 = scmp.ge.s32.totalorder %s9512_s27, 4   ;;  %s9516_s25 = smov %s9513_s6 }
 0x8fa   :  { %29 = sbr.rel (!%p27_p3) target bundleno = 15 (0xf), region = 242 }
 0x901   :  { %5160 = vsyncpa [#allocation4], 1 }
 0x902   :  { %5162 = vsyncpa [#allocation4 + $0x1], 1 }

</bundles_post_ra>
